<compile_context>
chip_gen: v6e
topology: v6e:2x2x1
jax: 0.10.0
libtpu: 0.0.40
codegen_flags: <defaults>
</compile_context>

<pallas_src>
import functools

import jax
import jax.numpy as jnp
from jax import lax
from jax.experimental import pallas as pl
from jax.experimental.pallas import tpu as pltpu

KH, KW = 3, 5          # fixed by the paper / module
LEAKY_SLOPE = 0.01     # nn.LeakyReLU default
BN_EPS = 1e-5          # nn.BatchNorm2d default


def _round_up(x, m):
    return ((x + m - 1) // m) * m


# ----------------------------------------------------------------------------
# Fused kernel: one grid step per (batch, phase).
#   deconv (accumulated per-tap dots) -> gated pointwise path, all in VMEM.
# Layout: channels on sublanes, flattened spatial (row stride S) on lanes.
# ----------------------------------------------------------------------------
def _gated_block_kernel(offsets, n_out, c_out,
                        xp_ref, r_ref, wt_ref, b_ref, wc_ref,
                        scale_ref, shift_ref, o_ref):
    # xp_ref:    (1, Cin, n_in)       matmul dtype, flattened padded input (shared by phases)
    # r_ref:     (1, 1, Cout, n_out)  f32, phase plane of R_in
    # wt_ref:    (1, n_taps, Cout, Cin) matmul dtype, per-tap deconv weights (this phase)
    # b_ref:     (Cout, 1)            f32 deconv bias
    # wc_ref:    (Cout, 2*Cout)       matmul dtype, shared 1x1 conv weight
    # scale_ref: (Cout, 1)            f32 folded BN scale
    # shift_ref: (Cout, 1)            f32 folded BN shift
    # o_ref:     (1, 1, Cout, n_out)

    # --- transposed conv: accumulated (Cout,Cin)x(Cin,N) dot per tap (no im2col) ---
    d = jnp.zeros((c_out, n_out), jnp.float32)
    for t, off in enumerate(offsets):              # static unroll (9 or 15 taps)
        d = d + jnp.dot(wt_ref[0, t],
                        xp_ref[0, :, off:off + n_out],
                        preferred_element_type=jnp.float32)
    d = d + b_ref[...]                             # (Cout,1) broadcast over lanes

    # --- gated pointwise path (no channel concat; two accumulated dots) ---------
    r = r_ref[0, 0].astype(jnp.float32)
    scale = scale_ref[...]
    shift = shift_ref[...]
    mm_dtype = wc_ref.dtype

    if c_out == 1:
        # degenerate single-channel block: pure VPU, no MXU needed
        w_top = wc_ref[0:1, 0:1].astype(jnp.float32)
        w_bot = wc_ref[0:1, 1:2].astype(jnp.float32)

        def conv_bn_act(x_top, x_bot):
            y = w_top * x_top + w_bot * x_bot
            y = y * scale + shift
            return jnp.where(y > 0, y, LEAKY_SLOPE * y)

        d_mm, r_mm = d, r
        to_mm = lambda v: v
    else:
        w_top = wc_ref[:, :c_out]
        w_bot = wc_ref[:, c_out:]

        def conv_bn_act(x_top, x_bot):
            y = jnp.dot(w_top, x_top, preferred_element_type=jnp.float32)
            y = y + jnp.dot(w_bot, x_bot, preferred_element_type=jnp.float32)
            y = y * scale + shift
            return jnp.where(y > 0, y, LEAKY_SLOPE * y)

        d_mm = d.astype(mm_dtype)
        r_mm = r.astype(mm_dtype)
        to_mm = lambda v: v.astype(mm_dtype)

    y1 = conv_bn_act(d_mm, r_mm)        # Conv_lay(cat(out_Deconv, R_in))
    mask = r * y1                       # R_in * out1_conv      (f32)
    y2 = conv_bn_act(to_mm(mask), d_mm)  # Conv_lay(cat(mask, out_Deconv))
    o_ref[0, 0] = (y2 + d).astype(o_ref.dtype)


# ----------------------------------------------------------------------------
# Per-Gated_Block wrapper (NCHW in / NCHW out, no transposes)
# ----------------------------------------------------------------------------
def gated_block_forward(M_in, R_in, params, stride, padding,
                        mm_dtype=jnp.bfloat16):
    B, Cin, Hin, Win = M_in.shape
    Cout = params["w_conv"].shape[0]
    sh, sw = stride
    ph, pw = padding
    assert sh == 1 and sw in (1, 2), "Decoder_Block only uses strides (1,1)/(1,2)"
    assert 0 <= ph <= KH - 1
    Hout = (Hin - 1) * sh - 2 * ph + KH
    Wout = (Win - 1) * sw - 2 * pw + KW

    pt = KH - 1 - ph                      # top/bottom height pad
    if sw == 1:
        assert 0 <= pw <= KW - 1
        n_phases = 1
        n_wtaps = KW                      # 5 width taps
        w_pad_l = KW - 1 - pw
        Wq = Wout                         # phase-plane width (== Win here)
        S = Win + 2 * w_pad_l             # flat row stride
    else:                                 # sw == 2: even/odd phase decomposition
        assert pw == 2, "phase decomposition derived for padding=(1,2) width pad"
        n_phases = 2
        n_wtaps = (KW + 1) // 2           # 3 width taps (odd phase zero-padded)
        w_pad_l = 1
        Wq = (Wout + 1) // 2              # even-phase width; shared plane width
        S = Wq + 2                        # room for width offsets {0,1,2}
    w_pad_r = S - Win - w_pad_l
    assert w_pad_r >= 0

    # ---- pad + flatten the input (no zero dilation: phases index x directly) ----
    Hp = Hin + 2 * pt
    n_out = _round_up(Hout * S, 128)
    max_off = (KH - 1) * S + (n_wtaps - 1)
    n_in = _round_up(n_out + max_off, 128)          # lane-aligned input length
    xpad = jnp.pad(M_in, ((0, 0), (0, 0), (pt, pt), (w_pad_l, w_pad_r)))
    x_flat = xpad.reshape(B, Cin, Hp * S)
    x_flat = jnp.pad(x_flat, ((0, 0), (0, 0), (0, n_in - Hp * S)))
    x_flat = x_flat.astype(mm_dtype)

    # ---- phase-split R_in and flatten with the same row stride ------------------
    if sw == 2:
        We, Wo = (Wout + 1) // 2, Wout // 2
        r_e = R_in[:, :, :, 0::2]                                   # (B,Cout,Hout,We)
        r_o = jnp.pad(R_in[:, :, :, 1::2],
                      ((0, 0), (0, 0), (0, 0), (0, Wq - Wo)))       # (B,Cout,Hout,Wq)
        r_ph = jnp.stack([r_e, r_o], axis=1)                        # (B,2,Cout,Hout,Wq)
    else:
        r_ph = R_in[:, None]                                        # (B,1,Cout,Hout,Wq)
    r_ph = jnp.pad(r_ph, ((0, 0), (0, 0), (0, 0), (0, 0), (0, S - Wq)))
    r_flat = r_ph.reshape(B, n_phases, Cout, Hout * S)
    r_flat = jnp.pad(r_flat, ((0, 0), (0, 0), (0, 0), (0, n_out - Hout * S)))
    r_flat = r_flat.astype(jnp.float32)

    # ---- MXU operand weights (bf16 by default; epilogue params stay f32) --------
    w_taps = params["w_taps"].astype(mm_dtype)      # (n_phases, n_taps, Cout, Cin)
    w_conv = params["w_conv"].astype(mm_dtype)      # (Cout, 2*Cout)

    n_taps = KH * n_wtaps
    offsets = tuple(io * S + wo for io in range(KH) for wo in range(n_wtaps))
    kernel = functools.partial(_gated_block_kernel, offsets, n_out, Cout)

    # ---- explicit VMEM budget (double-buffered I/O + kernel temporaries) --------
    xb = jnp.dtype(mm_dtype).itemsize
    est = (2 * Cin * n_in * xb
           + 4 * Cout * n_out * 4                    # r + out, double buffered
           + 2 * n_phases * n_taps * Cout * Cin * xb
           + 8 * Cout * n_out * 4                    # f32 temporaries (d, y1, mask, ...)
           + 4 * Cin * n_out * xb                    # shifted tap operand staging
           + (2 << 20))
    vmem_limit = int(min(64 * 1024 * 1024, max(est, 8 * 1024 * 1024)))

    out = pl.pallas_call(
        kernel,
        out_shape=jax.ShapeDtypeStruct((B, n_phases, Cout, n_out), jnp.float32),
        grid_spec=pltpu.PrefetchScalarGridSpec(
            num_scalar_prefetch=0,
            grid=(B, n_phases),                      # both axes shard across TCs on v7x
            in_specs=[
                pl.BlockSpec((1, Cin, n_in), lambda b, p: (b, 0, 0)),
                pl.BlockSpec((1, 1, Cout, n_out), lambda b, p: (b, p, 0, 0)),
                pl.BlockSpec((1, n_taps, Cout, Cin), lambda b, p: (p, 0, 0, 0)),
                pl.BlockSpec((Cout, 1), lambda b, p: (0, 0)),
                pl.BlockSpec((Cout, 2 * Cout), lambda b, p: (0, 0)),
                pl.BlockSpec((Cout, 1), lambda b, p: (0, 0)),
                pl.BlockSpec((Cout, 1), lambda b, p: (0, 0)),
            ],
            out_specs=pl.BlockSpec((1, 1, Cout, n_out), lambda b, p: (b, p, 0, 0)),
        ),
        compiler_params=pltpu.CompilerParams(
            dimension_semantics=("parallel", "parallel"),
            vmem_limit_bytes=vmem_limit),
    )(x_flat, r_flat, w_taps, params["b2"], w_conv,
      params["bn_scale"], params["bn_shift"])

    # ---- drop lane padding / junk columns, interleave phases --------------------
    out = out[:, :, :, :Hout * S].reshape(B, n_phases, Cout, Hout, S)[..., :Wq]
    if sw == 2:
        res = jnp.zeros((B, Cout, Hout, Wout), jnp.float32)
        res = res.at[..., 0::2].set(out[:, 0][..., :We])
        res = res.at[..., 1::2].set(out[:, 1][..., :Wo])
    else:
        res = out[:, 0][..., :Wout]
    return res


def decoder_block_forward(f_ra, r2, r1, f_in, params, mm_dtype=jnp.bfloat16):
    """Decoder_Block.forward — three chained Gated_Blocks. All NCHW."""
    p1, p2, p3 = params
    out_1 = gated_block_forward(f_ra, r2, p1, stride=(1, 2), padding=(1, 2),
                                mm_dtype=mm_dtype)
    out_2 = gated_block_forward(out_1, r1, p2, stride=(1, 2), padding=(1, 2),
                                mm_dtype=mm_dtype)
    out_3 = gated_block_forward(out_2, f_in, p3, stride=(1, 1), padding=(1, 2),
                                mm_dtype=mm_dtype)
    return out_1, out_2, out_3


# ----------------------------------------------------------------------------
# Parameter preparation: per-tap (phase-split) deconv weights + folded BN
# ----------------------------------------------------------------------------
def prepare_gated_params(w_deconv, b_deconv, w_conv, gamma, beta, mean, var,
                         stride):
    Cin, Cout = w_deconv.shape[0], w_deconv.shape[1]
    sw = stride[1]
    scale = gamma / jnp.sqrt(var + BN_EPS)
    shift = beta - mean * scale

    wt = jnp.transpose(w_deconv, (2, 3, 1, 0))     # (KH, KW, Cout, Cin), [i, j]
    wt = wt[::-1]                                  # height flip: axis0 = i_off
    if sw == 1:
        # tap (i_off, w_off) <-> kernel (i = KH-1-i_off, j = KW-1-w_off)
        w_taps = wt[:, ::-1].reshape(1, KH * KW, Cout, Cin)
    else:
        # even output columns: j = 4 - 2*w_off ; odd: w_off=0 -> 0, else j = 5 - 2*w_off
        even = jnp.stack([wt[:, 4], wt[:, 2], wt[:, 0]], axis=1)        # (KH,3,Cout,Cin)
        odd = jnp.concatenate(
            [jnp.zeros_like(wt[:, 0:1]), wt[:, 3:4], wt[:, 1:2]], axis=1)
        w_taps = jnp.stack([even.reshape(KH * 3, Cout, Cin),
                            odd.reshape(KH * 3, Cout, Cin)], axis=0)    # (2,9,Cout,Cin)

    return dict(
        w_deconv=w_deconv, b_deconv=b_deconv, w_conv=w_conv,
        w_taps=w_taps, b2=b_deconv.reshape(Cout, 1),
        bn_scale=scale.reshape(Cout, 1), bn_shift=shift.reshape(Cout, 1))


# ----------------------------------------------------------------------------
# Pure-JAX reference (same math, no Pallas) for correctness checks
# ----------------------------------------------------------------------------
def reference_gated(M_in, R_in, p, stride, padding):
    sh, sw = stride
    ph, pw = padding
    Cout = p["w_conv"].shape[0]
    w_hwio = jnp.transpose(p["w_deconv"][:, :, ::-1, ::-1], (2, 3, 0, 1))
    x = jnp.transpose(M_in, (0, 2, 3, 1))
    out_d = lax.conv_general_dilated(
        x, w_hwio, window_strides=(1, 1),
        padding=[(KH - 1 - ph, KH - 1 - ph), (KW - 1 - pw, KW - 1 - pw)],
        lhs_dilation=(sh, sw),
        dimension_numbers=("NHWC", "HWIO", "NHWC"),
        precision=lax.Precision.HIGHEST) + p["b_deconv"]
    r = jnp.transpose(R_in, (0, 2, 3, 1))
    wc = p["w_conv"]
    scale = p["bn_scale"].reshape(-1)
    shift = p["bn_shift"].reshape(-1)

    def cba(x1, x2):
        y = (jnp.matmul(x1, wc[:, :Cout].T, precision=lax.Precision.HIGHEST) +
             jnp.matmul(x2, wc[:, Cout:].T, precision=lax.Precision.HIGHEST))
        y = y * scale + shift
        return jnp.where(y > 0, y, LEAKY_SLOPE * y)

    y1 = cba(out_d, r)
    mask = r * y1
    y2 = cba(mask, out_d)
    return jnp.transpose(y2 + out_d, (0, 3, 1, 2))


if __name__ == "__main__":
    key = jax.random.PRNGKey(0)
    kp1, kp2, kp3, kf, kr2, kr1, kfin = jax.random.split(key, 7)

    def init_gated(k, cin, cout, stride):
        ks = jax.random.split(k, 7)
        w_deconv = jax.random.normal(ks[0], (cin, cout, KH, KW), jnp.float32) \
            / ((cin * KH * KW) ** 0.5)
        b_deconv = 0.1 * jax.random.normal(ks[1], (cout,), jnp.float32)
        w_conv = jax.random.normal(ks[2], (cout, 2 * cout), jnp.float32) \
            / ((2 * cout) ** 0.5)
        gamma = 1.0 + 0.1 * jax.random.normal(ks[3], (cout,), jnp.float32)
        beta = 0.1 * jax.random.normal(ks[4], (cout,), jnp.float32)
        mean = 0.05 * jax.random.normal(ks[5], (cout,), jnp.float32)
        var = 0.5 + jnp.abs(0.5 * jax.random.normal(ks[6], (cout,), jnp.float32))
        return prepare_gated_params(w_deconv, b_deconv, w_conv,
                                    gamma, beta, mean, var, stride)

    # Decoder_Block channel configuration: 64->32, 32->16, 16->1
    p1 = init_gated(kp1, 64, 32, (1, 2))
    p2 = init_gated(kp2, 32, 16, (1, 2))
    p3 = init_gated(kp3, 16, 1, (1, 1))

    def out_hw(h, w, stride, padding):
        return ((h - 1) * stride[0] - 2 * padding[0] + KH,
                (w - 1) * stride[1] - 2 * padding[1] + KW)

    B, Hin, Win = 2, 8, 16
    h1, w1 = out_hw(Hin, Win, (1, 2), (1, 2))      # gated_1 output HW
    h2, w2 = out_hw(h1, w1, (1, 2), (1, 2))        # gated_2 output HW
    h3, w3 = out_hw(h2, w2, (1, 1), (1, 2))        # gated_3 output HW

    f_ra = jax.random.normal(kf, (B, 64, Hin, Win), jnp.float32)
    r2 = jax.random.normal(kr2, (B, 32, h1, w1), jnp.float32)
    r1 = jax.random.normal(kr1, (B, 16, h2, w2), jnp.float32)
    f_in = jax.random.normal(kfin, (B, 1, h3, w3), jnp.float32)

    fwd = jax.jit(decoder_block_forward, static_argnames=("mm_dtype",))

    # f32 MXU-operand run: tight correctness gate
    out_f = jax.block_until_ready(
        fwd(f_ra, r2, r1, f_in, (p1, p2, p3), mm_dtype=jnp.float32))
    # bf16 MXU-operand run: production path on v6e/v7x, looser numeric check
    out_b = jax.block_until_ready(
        fwd(f_ra, r2, r1, f_in, (p1, p2, p3), mm_dtype=jnp.bfloat16))

    # pure-JAX reference chain
    ref_1 = reference_gated(f_ra, r2, p1, (1, 2), (1, 2))
    ref_2 = reference_gated(ref_1, r1, p2, (1, 2), (1, 2))
    ref_3 = reference_gated(ref_2, f_in, p3, (1, 1), (1, 2))
    refs = (ref_1, ref_2, ref_3)

    expected_shapes = ((B, 32, h1, w1), (B, 16, h2, w2), (B, 1, h3, w3))
    for o, shp in zip(out_f, expected_shapes):
        assert o.shape == shp
    for o, shp in zip(out_b, expected_shapes):
        assert o.shape == shp

    # f32 path: tight tolerance (catches any layout / tap-offset / phase bug)
    for name, o, ref in zip(("out_1", "out_2", "out_3"), out_f, refs):
        assert jnp.allclose(o, ref, rtol=5e-3, atol=5e-3), f"f32 mismatch in {name}"

    # bf16 path: scale-normalized max error (bf16 MXU operands, chained blocks)
    for name, o, ref in zip(("out_1", "out_2", "out_3"), out_b, refs):
        err = jnp.max(jnp.abs(o - ref))
        scale = jnp.maximum(jnp.max(jnp.abs(ref)), 1e-6)
        assert err <= 5e-2 * scale, f"bf16 mismatch in {name}"

    print("KERNEL_OK")
</pallas_src>

<mosaic_0001>
module attributes {stable_mosaic.version = 11 : i64} {
  func.func @_gated_block_kernel(%arg0: i32, %arg1: i32, %arg2: memref<1x64x384xf32, #tpu.memory_space<vmem>>, %arg3: memref<1x1x32x256xf32, #tpu.memory_space<vmem>>, %arg4: memref<1x9x32x64xf32, #tpu.memory_space<vmem>>, %arg5: memref<32x1xf32, #tpu.memory_space<vmem>>, %arg6: memref<32x64xf32, #tpu.memory_space<vmem>>, %arg7: memref<32x1xf32, #tpu.memory_space<vmem>>, %arg8: memref<32x1xf32, #tpu.memory_space<vmem>>, %arg9: memref<1x1x32x256xf32, #tpu.memory_space<vmem>>) attributes {dimension_semantics = [#tpu.dimension_semantics<parallel>, #tpu.dimension_semantics<parallel>], iteration_bounds = array<i64: 2, 2>, scalar_prefetch = 0 : i64, scratch_operands = 0 : i64, tpu.core_type = #tpu.core_type<tc>, window_params = [{transform_indices = @transform_0, window_bounds = array<i64: 1, 64, 384>}, {transform_indices = @transform_1, window_bounds = array<i64: 1, 1, 32, 256>}, {transform_indices = @transform_2, window_bounds = array<i64: 1, 9, 32, 64>}, {pipeline_mode = #tpu.pipeline_mode<synchronous>, transform_indices = @transform_3, window_bounds = array<i64: 32, 1>}, {pipeline_mode = #tpu.pipeline_mode<synchronous>, transform_indices = @transform_4, window_bounds = array<i64: 32, 64>}, {pipeline_mode = #tpu.pipeline_mode<synchronous>, transform_indices = @transform_5, window_bounds = array<i64: 32, 1>}, {pipeline_mode = #tpu.pipeline_mode<synchronous>, transform_indices = @transform_6, window_bounds = array<i64: 32, 1>}, {transform_indices = @transform_7, window_bounds = array<i64: 1, 1, 32, 256>}]} {
    %cst = arith.constant 0.000000e+00 : f32
    %0 = vector.broadcast %cst : f32 to vector<32x256xf32>
    %c0 = arith.constant 0 : index
    %c0_0 = arith.constant 0 : index
    %c0_1 = arith.constant 0 : index
    %c0_2 = arith.constant 0 : index
    %1 = vector.load %arg4[%c0, %c0_0, %c0_1, %c0_2] : memref<1x9x32x64xf32, #tpu.memory_space<vmem>>, vector<1x1x32x64xf32>
    %2 = vector.shape_cast %1 : vector<1x1x32x64xf32> to vector<32x64xf32>
    %c0_3 = arith.constant 0 : index
    %c0_4 = arith.constant 0 : index
    %c0_5 = arith.constant 0 : index
    %3 = vector.load %arg2[%c0_3, %c0_4, %c0_5] : memref<1x64x384xf32, #tpu.memory_space<vmem>>, vector<1x64x256xf32>
    %4 = vector.shape_cast %3 : vector<1x64x256xf32> to vector<64x256xf32>
    %cst_6 = arith.constant dense<0.000000e+00> : vector<32x256xf32>
    %5 = tpu.matmul %2, %4, %cst_6 {dimension_numbers = #tpu.dot_dimension_numbers<[1], [0], [0], [1], [0, 0, 1, 1], [], []>} : vector<32x64xf32>, vector<64x256xf32>, vector<32x256xf32> -> vector<32x256xf32>
    %6 = arith.addf %0, %5 : vector<32x256xf32>
    %c0_7 = arith.constant 0 : index
    %c1 = arith.constant 1 : index
    %c0_8 = arith.constant 0 : index
    %c0_9 = arith.constant 0 : index
    %7 = vector.load %arg4[%c0_7, %c1, %c0_8, %c0_9] : memref<1x9x32x64xf32, #tpu.memory_space<vmem>>, vector<1x1x32x64xf32>
    %8 = vector.shape_cast %7 : vector<1x1x32x64xf32> to vector<32x64xf32>
    %c0_10 = arith.constant 0 : index
    %c0_11 = arith.constant 0 : index
    %c1_12 = arith.constant 1 : index
    %9 = vector.load %arg2[%c0_10, %c0_11, %c1_12] : memref<1x64x384xf32, #tpu.memory_space<vmem>>, vector<1x64x256xf32>
    %10 = vector.shape_cast %9 : vector<1x64x256xf32> to vector<64x256xf32>
    %cst_13 = arith.constant dense<0.000000e+00> : vector<32x256xf32>
    %11 = tpu.matmul %8, %10, %cst_13 {dimension_numbers = #tpu.dot_dimension_numbers<[1], [0], [0], [1], [0, 0, 1, 1], [], []>} : vector<32x64xf32>, vector<64x256xf32>, vector<32x256xf32> -> vector<32x256xf32>
    %12 = arith.addf %6, %11 : vector<32x256xf32>
    %c0_14 = arith.constant 0 : index
    %c2 = arith.constant 2 : index
    %c0_15 = arith.constant 0 : index
    %c0_16 = arith.constant 0 : index
    %13 = vector.load %arg4[%c0_14, %c2, %c0_15, %c0_16] : memref<1x9x32x64xf32, #tpu.memory_space<vmem>>, vector<1x1x32x64xf32>
    %14 = vector.shape_cast %13 : vector<1x1x32x64xf32> to vector<32x64xf32>
    %c0_17 = arith.constant 0 : index
    %c0_18 = arith.constant 0 : index
    %c2_19 = arith.constant 2 : index
    %15 = vector.load %arg2[%c0_17, %c0_18, %c2_19] : memref<1x64x384xf32, #tpu.memory_space<vmem>>, vector<1x64x256xf32>
    %16 = vector.shape_cast %15 : vector<1x64x256xf32> to vector<64x256xf32>
    %cst_20 = arith.constant dense<0.000000e+00> : vector<32x256xf32>
    %17 = tpu.matmul %14, %16, %cst_20 {dimension_numbers = #tpu.dot_dimension_numbers<[1], [0], [0], [1], [0, 0, 1, 1], [], []>} : vector<32x64xf32>, vector<64x256xf32>, vector<32x256xf32> -> vector<32x256xf32>
    %18 = arith.addf %12, %17 : vector<32x256xf32>
    %c0_21 = arith.constant 0 : index
    %c3 = arith.constant 3 : index
    %c0_22 = arith.constant 0 : index
    %c0_23 = arith.constant 0 : index
    %19 = vector.load %arg4[%c0_21, %c3, %c0_22, %c0_23] : memref<1x9x32x64xf32, #tpu.memory_space<vmem>>, vector<1x1x32x64xf32>
    %20 = vector.shape_cast %19 : vector<1x1x32x64xf32> to vector<32x64xf32>
    %c0_24 = arith.constant 0 : index
    %c0_25 = arith.constant 0 : index
    %c18 = arith.constant 18 : index
    %21 = vector.load %arg2[%c0_24, %c0_25, %c18] : memref<1x64x384xf32, #tpu.memory_space<vmem>>, vector<1x64x256xf32>
    %22 = vector.shape_cast %21 : vector<1x64x256xf32> to vector<64x256xf32>
    %cst_26 = arith.constant dense<0.000000e+00> : vector<32x256xf32>
    %23 = tpu.matmul %20, %22, %cst_26 {dimension_numbers = #tpu.dot_dimension_numbers<[1], [0], [0], [1], [0, 0, 1, 1], [], []>} : vector<32x64xf32>, vector<64x256xf32>, vector<32x256xf32> -> vector<32x256xf32>
    %24 = arith.addf %18, %23 : vector<32x256xf32>
    %c0_27 = arith.constant 0 : index
    %c4 = arith.constant 4 : index
    %c0_28 = arith.constant 0 : index
    %c0_29 = arith.constant 0 : index
    %25 = vector.load %arg4[%c0_27, %c4, %c0_28, %c0_29] : memref<1x9x32x64xf32, #tpu.memory_space<vmem>>, vector<1x1x32x64xf32>
    %26 = vector.shape_cast %25 : vector<1x1x32x64xf32> to vector<32x64xf32>
    %c0_30 = arith.constant 0 : index
    %c0_31 = arith.constant 0 : index
    %c19 = arith.constant 19 : index
    %27 = vector.load %arg2[%c0_30, %c0_31, %c19] : memref<1x64x384xf32, #tpu.memory_space<vmem>>, vector<1x64x256xf32>
    %28 = vector.shape_cast %27 : vector<1x64x256xf32> to vector<64x256xf32>
    %cst_32 = arith.constant dense<0.000000e+00> : vector<32x256xf32>
    %29 = tpu.matmul %26, %28, %cst_32 {dimension_numbers = #tpu.dot_dimension_numbers<[1], [0], [0], [1], [0, 0, 1, 1], [], []>} : vector<32x64xf32>, vector<64x256xf32>, vector<32x256xf32> -> vector<32x256xf32>
    %30 = arith.addf %24, %29 : vector<32x256xf32>
    %c0_33 = arith.constant 0 : index
    %c5 = arith.constant 5 : index
    %c0_34 = arith.constant 0 : index
    %c0_35 = arith.constant 0 : index
    %31 = vector.load %arg4[%c0_33, %c5, %c0_34, %c0_35] : memref<1x9x32x64xf32, #tpu.memory_space<vmem>>, vector<1x1x32x64xf32>
    %32 = vector.shape_cast %31 : vector<1x1x32x64xf32> to vector<32x64xf32>
    %c0_36 = arith.constant 0 : index
    %c0_37 = arith.constant 0 : index
    %c20 = arith.constant 20 : index
    %33 = vector.load %arg2[%c0_36, %c0_37, %c20] : memref<1x64x384xf32, #tpu.memory_space<vmem>>, vector<1x64x256xf32>
    %34 = vector.shape_cast %33 : vector<1x64x256xf32> to vector<64x256xf32>
    %cst_38 = arith.constant dense<0.000000e+00> : vector<32x256xf32>
    %35 = tpu.matmul %32, %34, %cst_38 {dimension_numbers = #tpu.dot_dimension_numbers<[1], [0], [0], [1], [0, 0, 1, 1], [], []>} : vector<32x64xf32>, vector<64x256xf32>, vector<32x256xf32> -> vector<32x256xf32>
    %36 = arith.addf %30, %35 : vector<32x256xf32>
    %c0_39 = arith.constant 0 : index
    %c6 = arith.constant 6 : index
    %c0_40 = arith.constant 0 : index
    %c0_41 = arith.constant 0 : index
    %37 = vector.load %arg4[%c0_39, %c6, %c0_40, %c0_41] : memref<1x9x32x64xf32, #tpu.memory_space<vmem>>, vector<1x1x32x64xf32>
    %38 = vector.shape_cast %37 : vector<1x1x32x64xf32> to vector<32x64xf32>
    %c0_42 = arith.constant 0 : index
    %c0_43 = arith.constant 0 : index
    %c36 = arith.constant 36 : index
    %39 = vector.load %arg2[%c0_42, %c0_43, %c36] : memref<1x64x384xf32, #tpu.memory_space<vmem>>, vector<1x64x256xf32>
    %40 = vector.shape_cast %39 : vector<1x64x256xf32> to vector<64x256xf32>
    %cst_44 = arith.constant dense<0.000000e+00> : vector<32x256xf32>
    %41 = tpu.matmul %38, %40, %cst_44 {dimension_numbers = #tpu.dot_dimension_numbers<[1], [0], [0], [1], [0, 0, 1, 1], [], []>} : vector<32x64xf32>, vector<64x256xf32>, vector<32x256xf32> -> vector<32x256xf32>
    %42 = arith.addf %36, %41 : vector<32x256xf32>
    %c0_45 = arith.constant 0 : index
    %c7 = arith.constant 7 : index
    %c0_46 = arith.constant 0 : index
    %c0_47 = arith.constant 0 : index
    %43 = vector.load %arg4[%c0_45, %c7, %c0_46, %c0_47] : memref<1x9x32x64xf32, #tpu.memory_space<vmem>>, vector<1x1x32x64xf32>
    %44 = vector.shape_cast %43 : vector<1x1x32x64xf32> to vector<32x64xf32>
    %c0_48 = arith.constant 0 : index
    %c0_49 = arith.constant 0 : index
    %c37 = arith.constant 37 : index
    %45 = vector.load %arg2[%c0_48, %c0_49, %c37] : memref<1x64x384xf32, #tpu.memory_space<vmem>>, vector<1x64x256xf32>
    %46 = vector.shape_cast %45 : vector<1x64x256xf32> to vector<64x256xf32>
    %cst_50 = arith.constant dense<0.000000e+00> : vector<32x256xf32>
    %47 = tpu.matmul %44, %46, %cst_50 {dimension_numbers = #tpu.dot_dimension_numbers<[1], [0], [0], [1], [0, 0, 1, 1], [], []>} : vector<32x64xf32>, vector<64x256xf32>, vector<32x256xf32> -> vector<32x256xf32>
    %48 = arith.addf %42, %47 : vector<32x256xf32>
    %c0_51 = arith.constant 0 : index
    %c8 = arith.constant 8 : index
    %c0_52 = arith.constant 0 : index
    %c0_53 = arith.constant 0 : index
    %49 = vector.load %arg4[%c0_51, %c8, %c0_52, %c0_53] : memref<1x9x32x64xf32, #tpu.memory_space<vmem>>, vector<1x1x32x64xf32>
    %50 = vector.shape_cast %49 : vector<1x1x32x64xf32> to vector<32x64xf32>
    %c0_54 = arith.constant 0 : index
    %c0_55 = arith.constant 0 : index
    %c38 = arith.constant 38 : index
    %51 = vector.load %arg2[%c0_54, %c0_55, %c38] : memref<1x64x384xf32, #tpu.memory_space<vmem>>, vector<1x64x256xf32>
    %52 = vector.shape_cast %51 : vector<1x64x256xf32> to vector<64x256xf32>
    %cst_56 = arith.constant dense<0.000000e+00> : vector<32x256xf32>
    %53 = tpu.matmul %50, %52, %cst_56 {dimension_numbers = #tpu.dot_dimension_numbers<[1], [0], [0], [1], [0, 0, 1, 1], [], []>} : vector<32x64xf32>, vector<64x256xf32>, vector<32x256xf32> -> vector<32x256xf32>
    %54 = arith.addf %48, %53 : vector<32x256xf32>
    %c0_57 = arith.constant 0 : index
    %c0_58 = arith.constant 0 : index
    %55 = vector.load %arg5[%c0_57, %c0_58] : memref<32x1xf32, #tpu.memory_space<vmem>>, vector<32x1xf32>
    %56 = vector.broadcast %55 : vector<32x1xf32> to vector<32x256xf32>
    %57 = arith.addf %54, %56 : vector<32x256xf32>
    %c0_59 = arith.constant 0 : index
    %c0_60 = arith.constant 0 : index
    %c0_61 = arith.constant 0 : index
    %c0_62 = arith.constant 0 : index
    %58 = vector.load %arg3[%c0_59, %c0_60, %c0_61, %c0_62] : memref<1x1x32x256xf32, #tpu.memory_space<vmem>>, vector<1x1x32x256xf32>
    %59 = vector.shape_cast %58 : vector<1x1x32x256xf32> to vector<32x256xf32>
    %c0_63 = arith.constant 0 : index
    %c0_64 = arith.constant 0 : index
    %60 = vector.load %arg7[%c0_63, %c0_64] : memref<32x1xf32, #tpu.memory_space<vmem>>, vector<32x1xf32>
    %c0_65 = arith.constant 0 : index
    %c0_66 = arith.constant 0 : index
    %61 = vector.load %arg8[%c0_65, %c0_66] : memref<32x1xf32, #tpu.memory_space<vmem>>, vector<32x1xf32>
    %c0_67 = arith.constant 0 : index
    %c0_68 = arith.constant 0 : index
    %62 = vector.load %arg6[%c0_67, %c0_68] : memref<32x64xf32, #tpu.memory_space<vmem>>, vector<32x32xf32>
    %c0_69 = arith.constant 0 : index
    %c32 = arith.constant 32 : index
    %63 = vector.load %arg6[%c0_69, %c32] : memref<32x64xf32, #tpu.memory_space<vmem>>, vector<32x32xf32>
    %cst_70 = arith.constant dense<0.000000e+00> : vector<32x256xf32>
    %64 = tpu.matmul %62, %57, %cst_70 {dimension_numbers = #tpu.dot_dimension_numbers<[1], [0], [0], [1], [0, 0, 1, 1], [], []>} : vector<32x32xf32>, vector<32x256xf32>, vector<32x256xf32> -> vector<32x256xf32>
    %cst_71 = arith.constant dense<0.000000e+00> : vector<32x256xf32>
    %65 = tpu.matmul %63, %59, %cst_71 {dimension_numbers = #tpu.dot_dimension_numbers<[1], [0], [0], [1], [0, 0, 1, 1], [], []>} : vector<32x32xf32>, vector<32x256xf32>, vector<32x256xf32> -> vector<32x256xf32>
    %66 = arith.addf %64, %65 : vector<32x256xf32>
    %67 = vector.broadcast %60 : vector<32x1xf32> to vector<32x256xf32>
    %68 = arith.mulf %66, %67 : vector<32x256xf32>
    %69 = vector.broadcast %61 : vector<32x1xf32> to vector<32x256xf32>
    %70 = arith.addf %68, %69 : vector<32x256xf32>
    %cst_72 = arith.constant 0.000000e+00 : f32
    %71 = vector.broadcast %cst_72 : f32 to vector<32x256xf32>
    %72 = arith.cmpf ogt, %70, %71 : vector<32x256xf32>
    %cst_73 = arith.constant 0.00999999977 : f32
    %73 = vector.broadcast %cst_73 : f32 to vector<32x256xf32>
    %74 = arith.mulf %73, %70 : vector<32x256xf32>
    %75 = arith.select %72, %70, %74 : vector<32x256xi1>, vector<32x256xf32>
    %76 = arith.mulf %59, %75 : vector<32x256xf32>
    %cst_74 = arith.constant dense<0.000000e+00> : vector<32x256xf32>
    %77 = tpu.matmul %62, %76, %cst_74 {dimension_numbers = #tpu.dot_dimension_numbers<[1], [0], [0], [1], [0, 0, 1, 1], [], []>} : vector<32x32xf32>, vector<32x256xf32>, vector<32x256xf32> -> vector<32x256xf32>
    %cst_75 = arith.constant dense<0.000000e+00> : vector<32x256xf32>
    %78 = tpu.matmul %63, %57, %cst_75 {dimension_numbers = #tpu.dot_dimension_numbers<[1], [0], [0], [1], [0, 0, 1, 1], [], []>} : vector<32x32xf32>, vector<32x256xf32>, vector<32x256xf32> -> vector<32x256xf32>
    %79 = arith.addf %77, %78 : vector<32x256xf32>
    %80 = vector.broadcast %60 : vector<32x1xf32> to vector<32x256xf32>
    %81 = arith.mulf %79, %80 : vector<32x256xf32>
    %82 = vector.broadcast %61 : vector<32x1xf32> to vector<32x256xf32>
    %83 = arith.addf %81, %82 : vector<32x256xf32>
    %cst_76 = arith.constant 0.000000e+00 : f32
    %84 = vector.broadcast %cst_76 : f32 to vector<32x256xf32>
    %85 = arith.cmpf ogt, %83, %84 : vector<32x256xf32>
    %cst_77 = arith.constant 0.00999999977 : f32
    %86 = vector.broadcast %cst_77 : f32 to vector<32x256xf32>
    %87 = arith.mulf %86, %83 : vector<32x256xf32>
    %88 = arith.select %85, %83, %87 : vector<32x256xi1>, vector<32x256xf32>
    %89 = arith.addf %88, %57 : vector<32x256xf32>
    %c0_78 = arith.constant 0 : index
    %c0_79 = arith.constant 0 : index
    %c0_80 = arith.constant 0 : index
    %c0_81 = arith.constant 0 : index
    %90 = vector.load %arg9[%c0_78, %c0_79, %c0_80, %c0_81] : memref<1x1x32x256xf32, #tpu.memory_space<vmem>>, vector<1x1x32x256xf32>
    %91 = vector.shape_cast %90 : vector<1x1x32x256xf32> to vector<32x256xf32>
    %92 = vector.shape_cast %89 : vector<32x256xf32> to vector<1x1x32x256xf32>
    tpu.vector_store %arg9[%c0_78, %c0_79, %c0_80, %c0_81], %92 {strides = array<i32>} : memref<1x1x32x256xf32, #tpu.memory_space<vmem>>, vector<1x1x32x256xf32>,
    return
  }
  func.func @transform_0(%arg0: i32, %arg1: i32) -> (i32, i32, i32) {
    %c0_i32 = arith.constant 0 : i32
    %c0_i32_0 = arith.constant 0 : i32
    %c0_i32_1 = arith.constant 0 : i32
    return %arg0, %c0_i32, %c0_i32_0 : i32, i32, i32
  }
  func.func @transform_1(%arg0: i32, %arg1: i32) -> (i32, i32, i32, i32) {
    %c0_i32 = arith.constant 0 : i32
    %c0_i32_0 = arith.constant 0 : i32
    %c0_i32_1 = arith.constant 0 : i32
    return %arg0, %arg1, %c0_i32, %c0_i32_0 : i32, i32, i32, i32
  }
  func.func @transform_2(%arg0: i32, %arg1: i32) -> (i32, i32, i32, i32) {
    %c0_i32 = arith.constant 0 : i32
    %c0_i32_0 = arith.constant 0 : i32
    %c0_i32_1 = arith.constant 0 : i32
    %c0_i32_2 = arith.constant 0 : i32
    return %arg1, %c0_i32, %c0_i32_0, %c0_i32_1 : i32, i32, i32, i32
  }
  func.func @transform_3(%arg0: i32, %arg1: i32) -> (i32, i32) {
    %c0_i32 = arith.constant 0 : i32
    %c0_i32_0 = arith.constant 0 : i32
    %c0_i32_1 = arith.constant 0 : i32
    return %c0_i32, %c0_i32_0 : i32, i32
  }
  func.func @transform_4(%arg0: i32, %arg1: i32) -> (i32, i32) {
    %c0_i32 = arith.constant 0 : i32
    %c0_i32_0 = arith.constant 0 : i32
    %c0_i32_1 = arith.constant 0 : i32
    return %c0_i32, %c0_i32_0 : i32, i32
  }
  func.func @transform_5(%arg0: i32, %arg1: i32) -> (i32, i32) {
    %c0_i32 = arith.constant 0 : i32
    %c0_i32_0 = arith.constant 0 : i32
    %c0_i32_1 = arith.constant 0 : i32
    return %c0_i32, %c0_i32_0 : i32, i32
  }
  func.func @transform_6(%arg0: i32, %arg1: i32) -> (i32, i32) {
    %c0_i32 = arith.constant 0 : i32
    %c0_i32_0 = arith.constant 0 : i32
    %c0_i32_1 = arith.constant 0 : i32
    return %c0_i32, %c0_i32_0 : i32, i32
  }
  func.func @transform_7(%arg0: i32, %arg1: i32) -> (i32, i32, i32, i32) {
    %c0_i32 = arith.constant 0 : i32
    %c0_i32_0 = arith.constant 0 : i32
    %c0_i32_1 = arith.constant 0 : i32
    return %arg0, %arg1, %c0_i32, %c0_i32_0 : i32, i32, i32, i32
  }
}

module attributes {stable_mosaic.version = 11 : i64} {
  func.func @_gated_block_kernel(%arg0: i32, %arg1: i32, %arg2: memref<1x32x512xf32, #tpu.memory_space<vmem>>, %arg3: memref<1x1x16x384xf32, #tpu.memory_space<vmem>>, %arg4: memref<1x9x16x32xf32, #tpu.memory_space<vmem>>, %arg5: memref<16x1xf32, #tpu.memory_space<vmem>>, %arg6: memref<16x32xf32, #tpu.memory_space<vmem>>, %arg7: memref<16x1xf32, #tpu.memory_space<vmem>>, %arg8: memref<16x1xf32, #tpu.memory_space<vmem>>, %arg9: memref<1x1x16x384xf32, #tpu.memory_space<vmem>>) attributes {dimension_semantics = [#tpu.dimension_semantics<parallel>, #tpu.dimension_semantics<parallel>], iteration_bounds = array<i64: 2, 2>, scalar_prefetch = 0 : i64, scratch_operands = 0 : i64, tpu.core_type = #tpu.core_type<tc>, window_params = [{transform_indices = @transform_0, window_bounds = array<i64: 1, 32, 512>}, {transform_indices = @transform_1, window_bounds = array<i64: 1, 1, 16, 384>}, {transform_indices = @transform_2, window_bounds = array<i64: 1, 9, 16, 32>}, {pipeline_mode = #tpu.pipeline_mode<synchronous>, transform_indices = @transform_3, window_bounds = array<i64: 16, 1>}, {pipeline_mode = #tpu.pipeline_mode<synchronous>, transform_indices = @transform_4, window_bounds = array<i64: 16, 32>}, {pipeline_mode = #tpu.pipeline_mode<synchronous>, transform_indices = @transform_5, window_bounds = array<i64: 16, 1>}, {pipeline_mode = #tpu.pipeline_mode<synchronous>, transform_indices = @transform_6, window_bounds = array<i64: 16, 1>}, {transform_indices = @transform_7, window_bounds = array<i64: 1, 1, 16, 384>}]} {
    %cst = arith.constant 0.000000e+00 : f32
    %0 = vector.broadcast %cst : f32 to vector<16x384xf32>
    %c0 = arith.constant 0 : index
    %c0_0 = arith.constant 0 : index
    %c0_1 = arith.constant 0 : index
    %c0_2 = arith.constant 0 : index
    %1 = vector.load %arg4[%c0, %c0_0, %c0_1, %c0_2] : memref<1x9x16x32xf32, #tpu.memory_space<vmem>>, vector<1x1x16x32xf32>
    %2 = vector.shape_cast %1 : vector<1x1x16x32xf32> to vector<16x32xf32>
    %c0_3 = arith.constant 0 : index
    %c0_4 = arith.constant 0 : index
    %c0_5 = arith.constant 0 : index
    %3 = vector.load %arg2[%c0_3, %c0_4, %c0_5] : memref<1x32x512xf32, #tpu.memory_space<vmem>>, vector<1x32x384xf32>
    %4 = vector.shape_cast %3 : vector<1x32x384xf32> to vector<32x384xf32>
    %cst_6 = arith.constant dense<0.000000e+00> : vector<16x384xf32>
    %5 = tpu.matmul %2, %4, %cst_6 {dimension_numbers = #tpu.dot_dimension_numbers<[1], [0], [0], [1], [0, 0, 1, 1], [], []>} : vector<16x32xf32>, vector<32x384xf32>, vector<16x384xf32> -> vector<16x384xf32>
    %6 = arith.addf %0, %5 : vector<16x384xf32>
    %c0_7 = arith.constant 0 : index
    %c1 = arith.constant 1 : index
    %c0_8 = arith.constant 0 : index
    %c0_9 = arith.constant 0 : index
    %7 = vector.load %arg4[%c0_7, %c1, %c0_8, %c0_9] : memref<1x9x16x32xf32, #tpu.memory_space<vmem>>, vector<1x1x16x32xf32>
    %8 = vector.shape_cast %7 : vector<1x1x16x32xf32> to vector<16x32xf32>
    %c0_10 = arith.constant 0 : index
    %c0_11 = arith.constant 0 : index
    %c1_12 = arith.constant 1 : index
    %9 = vector.load %arg2[%c0_10, %c0_11, %c1_12] : memref<1x32x512xf32, #tpu.memory_space<vmem>>, vector<1x32x384xf32>
    %10 = vector.shape_cast %9 : vector<1x32x384xf32> to vector<32x384xf32>
    %cst_13 = arith.constant dense<0.000000e+00> : vector<16x384xf32>
    %11 = tpu.matmul %8, %10, %cst_13 {dimension_numbers = #tpu.dot_dimension_numbers<[1], [0], [0], [1], [0, 0, 1, 1], [], []>} : vector<16x32xf32>, vector<32x384xf32>, vector<16x384xf32> -> vector<16x384xf32>
    %12 = arith.addf %6, %11 : vector<16x384xf32>
    %c0_14 = arith.constant 0 : index
    %c2 = arith.constant 2 : index
    %c0_15 = arith.constant 0 : index
    %c0_16 = arith.constant 0 : index
    %13 = vector.load %arg4[%c0_14, %c2, %c0_15, %c0_16] : memref<1x9x16x32xf32, #tpu.memory_space<vmem>>, vector<1x1x16x32xf32>
    %14 = vector.shape_cast %13 : vector<1x1x16x32xf32> to vector<16x32xf32>
    %c0_17 = arith.constant 0 : index
    %c0_18 = arith.constant 0 : index
    %c2_19 = arith.constant 2 : index
    %15 = vector.load %arg2[%c0_17, %c0_18, %c2_19] : memref<1x32x512xf32, #tpu.memory_space<vmem>>, vector<1x32x384xf32>
    %16 = vector.shape_cast %15 : vector<1x32x384xf32> to vector<32x384xf32>
    %cst_20 = arith.constant dense<0.000000e+00> : vector<16x384xf32>
    %17 = tpu.matmul %14, %16, %cst_20 {dimension_numbers = #tpu.dot_dimension_numbers<[1], [0], [0], [1], [0, 0, 1, 1], [], []>} : vector<16x32xf32>, vector<32x384xf32>, vector<16x384xf32> -> vector<16x384xf32>
    %18 = arith.addf %12, %17 : vector<16x384xf32>
    %c0_21 = arith.constant 0 : index
    %c3 = arith.constant 3 : index
    %c0_22 = arith.constant 0 : index
    %c0_23 = arith.constant 0 : index
    %19 = vector.load %arg4[%c0_21, %c3, %c0_22, %c0_23] : memref<1x9x16x32xf32, #tpu.memory_space<vmem>>, vector<1x1x16x32xf32>
    %20 = vector.shape_cast %19 : vector<1x1x16x32xf32> to vector<16x32xf32>
    %c0_24 = arith.constant 0 : index
    %c0_25 = arith.constant 0 : index
    %c33 = arith.constant 33 : index
    %21 = vector.load %arg2[%c0_24, %c0_25, %c33] : memref<1x32x512xf32, #tpu.memory_space<vmem>>, vector<1x32x384xf32>
    %22 = vector.shape_cast %21 : vector<1x32x384xf32> to vector<32x384xf32>
    %cst_26 = arith.constant dense<0.000000e+00> : vector<16x384xf32>
    %23 = tpu.matmul %20, %22, %cst_26 {dimension_numbers = #tpu.dot_dimension_numbers<[1], [0], [0], [1], [0, 0, 1, 1], [], []>} : vector<16x32xf32>, vector<32x384xf32>, vector<16x384xf32> -> vector<16x384xf32>
    %24 = arith.addf %18, %23 : vector<16x384xf32>
    %c0_27 = arith.constant 0 : index
    %c4 = arith.constant 4 : index
    %c0_28 = arith.constant 0 : index
    %c0_29 = arith.constant 0 : index
    %25 = vector.load %arg4[%c0_27, %c4, %c0_28, %c0_29] : memref<1x9x16x32xf32, #tpu.memory_space<vmem>>, vector<1x1x16x32xf32>
    %26 = vector.shape_cast %25 : vector<1x1x16x32xf32> to vector<16x32xf32>
    %c0_30 = arith.constant 0 : index
    %c0_31 = arith.constant 0 : index
    %c34 = arith.constant 34 : index
    %27 = vector.load %arg2[%c0_30, %c0_31, %c34] : memref<1x32x512xf32, #tpu.memory_space<vmem>>, vector<1x32x384xf32>
    %28 = vector.shape_cast %27 : vector<1x32x384xf32> to vector<32x384xf32>
    %cst_32 = arith.constant dense<0.000000e+00> : vector<16x384xf32>
    %29 = tpu.matmul %26, %28, %cst_32 {dimension_numbers = #tpu.dot_dimension_numbers<[1], [0], [0], [1], [0, 0, 1, 1], [], []>} : vector<16x32xf32>, vector<32x384xf32>, vector<16x384xf32> -> vector<16x384xf32>
    %30 = arith.addf %24, %29 : vector<16x384xf32>
    %c0_33 = arith.constant 0 : index
    %c5 = arith.constant 5 : index
    %c0_34 = arith.constant 0 : index
    %c0_35 = arith.constant 0 : index
    %31 = vector.load %arg4[%c0_33, %c5, %c0_34, %c0_35] : memref<1x9x16x32xf32, #tpu.memory_space<vmem>>, vector<1x1x16x32xf32>
    %32 = vector.shape_cast %31 : vector<1x1x16x32xf32> to vector<16x32xf32>
    %c0_36 = arith.constant 0 : index
    %c0_37 = arith.constant 0 : index
    %c35 = arith.constant 35 : index
    %33 = vector.load %arg2[%c0_36, %c0_37, %c35] : memref<1x32x512xf32, #tpu.memory_space<vmem>>, vector<1x32x384xf32>
    %34 = vector.shape_cast %33 : vector<1x32x384xf32> to vector<32x384xf32>
    %cst_38 = arith.constant dense<0.000000e+00> : vector<16x384xf32>
    %35 = tpu.matmul %32, %34, %cst_38 {dimension_numbers = #tpu.dot_dimension_numbers<[1], [0], [0], [1], [0, 0, 1, 1], [], []>} : vector<16x32xf32>, vector<32x384xf32>, vector<16x384xf32> -> vector<16x384xf32>
    %36 = arith.addf %30, %35 : vector<16x384xf32>
    %c0_39 = arith.constant 0 : index
    %c6 = arith.constant 6 : index
    %c0_40 = arith.constant 0 : index
    %c0_41 = arith.constant 0 : index
    %37 = vector.load %arg4[%c0_39, %c6, %c0_40, %c0_41] : memref<1x9x16x32xf32, #tpu.memory_space<vmem>>, vector<1x1x16x32xf32>
    %38 = vector.shape_cast %37 : vector<1x1x16x32xf32> to vector<16x32xf32>
    %c0_42 = arith.constant 0 : index
    %c0_43 = arith.constant 0 : index
    %c66 = arith.constant 66 : index
    %39 = vector.load %arg2[%c0_42, %c0_43, %c66] : memref<1x32x512xf32, #tpu.memory_space<vmem>>, vector<1x32x384xf32>
    %40 = vector.shape_cast %39 : vector<1x32x384xf32> to vector<32x384xf32>
    %cst_44 = arith.constant dense<0.000000e+00> : vector<16x384xf32>
    %41 = tpu.matmul %38, %40, %cst_44 {dimension_numbers = #tpu.dot_dimension_numbers<[1], [0], [0], [1], [0, 0, 1, 1], [], []>} : vector<16x32xf32>, vector<32x384xf32>, vector<16x384xf32> -> vector<16x384xf32>
    %42 = arith.addf %36, %41 : vector<16x384xf32>
    %c0_45 = arith.constant 0 : index
    %c7 = arith.constant 7 : index
    %c0_46 = arith.constant 0 : index
    %c0_47 = arith.constant 0 : index
    %43 = vector.load %arg4[%c0_45, %c7, %c0_46, %c0_47] : memref<1x9x16x32xf32, #tpu.memory_space<vmem>>, vector<1x1x16x32xf32>
    %44 = vector.shape_cast %43 : vector<1x1x16x32xf32> to vector<16x32xf32>
    %c0_48 = arith.constant 0 : index
    %c0_49 = arith.constant 0 : index
    %c67 = arith.constant 67 : index
    %45 = vector.load %arg2[%c0_48, %c0_49, %c67] : memref<1x32x512xf32, #tpu.memory_space<vmem>>, vector<1x32x384xf32>
    %46 = vector.shape_cast %45 : vector<1x32x384xf32> to vector<32x384xf32>
    %cst_50 = arith.constant dense<0.000000e+00> : vector<16x384xf32>
    %47 = tpu.matmul %44, %46, %cst_50 {dimension_numbers = #tpu.dot_dimension_numbers<[1], [0], [0], [1], [0, 0, 1, 1], [], []>} : vector<16x32xf32>, vector<32x384xf32>, vector<16x384xf32> -> vector<16x384xf32>
    %48 = arith.addf %42, %47 : vector<16x384xf32>
    %c0_51 = arith.constant 0 : index
    %c8 = arith.constant 8 : index
    %c0_52 = arith.constant 0 : index
    %c0_53 = arith.constant 0 : index
    %49 = vector.load %arg4[%c0_51, %c8, %c0_52, %c0_53] : memref<1x9x16x32xf32, #tpu.memory_space<vmem>>, vector<1x1x16x32xf32>
    %50 = vector.shape_cast %49 : vector<1x1x16x32xf32> to vector<16x32xf32>
    %c0_54 = arith.constant 0 : index
    %c0_55 = arith.constant 0 : index
    %c68 = arith.constant 68 : index
    %51 = vector.load %arg2[%c0_54, %c0_55, %c68] : memref<1x32x512xf32, #tpu.memory_space<vmem>>, vector<1x32x384xf32>
    %52 = vector.shape_cast %51 : vector<1x32x384xf32> to vector<32x384xf32>
    %cst_56 = arith.constant dense<0.000000e+00> : vector<16x384xf32>
    %53 = tpu.matmul %50, %52, %cst_56 {dimension_numbers = #tpu.dot_dimension_numbers<[1], [0], [0], [1], [0, 0, 1, 1], [], []>} : vector<16x32xf32>, vector<32x384xf32>, vector<16x384xf32> -> vector<16x384xf32>
    %54 = arith.addf %48, %53 : vector<16x384xf32>
    %c0_57 = arith.constant 0 : index
    %c0_58 = arith.constant 0 : index
    %55 = vector.load %arg5[%c0_57, %c0_58] : memref<16x1xf32, #tpu.memory_space<vmem>>, vector<16x1xf32>
    %56 = vector.broadcast %55 : vector<16x1xf32> to vector<16x384xf32>
    %57 = arith.addf %54, %56 : vector<16x384xf32>
    %c0_59 = arith.constant 0 : index
    %c0_60 = arith.constant 0 : index
    %c0_61 = arith.constant 0 : index
    %c0_62 = arith.constant 0 : index
    %58 = vector.load %arg3[%c0_59, %c0_60, %c0_61, %c0_62] : memref<1x1x16x384xf32, #tpu.memory_space<vmem>>, vector<1x1x16x384xf32>
    %59 = vector.shape_cast %58 : vector<1x1x16x384xf32> to vector<16x384xf32>
    %c0_63 = arith.constant 0 : index
    %c0_64 = arith.constant 0 : index
    %60 = vector.load %arg7[%c0_63, %c0_64] : memref<16x1xf32, #tpu.memory_space<vmem>>, vector<16x1xf32>
    %c0_65 = arith.constant 0 : index
    %c0_66 = arith.constant 0 : index
    %61 = vector.load %arg8[%c0_65, %c0_66] : memref<16x1xf32, #tpu.memory_space<vmem>>, vector<16x1xf32>
    %c0_67 = arith.constant 0 : index
    %c0_68 = arith.constant 0 : index
    %62 = vector.load %arg6[%c0_67, %c0_68] : memref<16x32xf32, #tpu.memory_space<vmem>>, vector<16x16xf32>
    %c0_69 = arith.constant 0 : index
    %c16 = arith.constant 16 : index
    %63 = vector.load %arg6[%c0_69, %c16] : memref<16x32xf32, #tpu.memory_space<vmem>>, vector<16x16xf32>
    %cst_70 = arith.constant dense<0.000000e+00> : vector<16x384xf32>
    %64 = tpu.matmul %62, %57, %cst_70 {dimension_numbers = #tpu.dot_dimension_numbers<[1], [0], [0], [1], [0, 0, 1, 1], [], []>} : vector<16x16xf32>, vector<16x384xf32>, vector<16x384xf32> -> vector<16x384xf32>
    %cst_71 = arith.constant dense<0.000000e+00> : vector<16x384xf32>
    %65 = tpu.matmul %63, %59, %cst_71 {dimension_numbers = #tpu.dot_dimension_numbers<[1], [0], [0], [1], [0, 0, 1, 1], [], []>} : vector<16x16xf32>, vector<16x384xf32>, vector<16x384xf32> -> vector<16x384xf32>
    %66 = arith.addf %64, %65 : vector<16x384xf32>
    %67 = vector.broadcast %60 : vector<16x1xf32> to vector<16x384xf32>
    %68 = arith.mulf %66, %67 : vector<16x384xf32>
    %69 = vector.broadcast %61 : vector<16x1xf32> to vector<16x384xf32>
    %70 = arith.addf %68, %69 : vector<16x384xf32>
    %cst_72 = arith.constant 0.000000e+00 : f32
    %71 = vector.broadcast %cst_72 : f32 to vector<16x384xf32>
    %72 = arith.cmpf ogt, %70, %71 : vector<16x384xf32>
    %cst_73 = arith.constant 0.00999999977 : f32
    %73 = vector.broadcast %cst_73 : f32 to vector<16x384xf32>
    %74 = arith.mulf %73, %70 : vector<16x384xf32>
    %75 = arith.select %72, %70, %74 : vector<16x384xi1>, vector<16x384xf32>
    %76 = arith.mulf %59, %75 : vector<16x384xf32>
    %cst_74 = arith.constant dense<0.000000e+00> : vector<16x384xf32>
    %77 = tpu.matmul %62, %76, %cst_74 {dimension_numbers = #tpu.dot_dimension_numbers<[1], [0], [0], [1], [0, 0, 1, 1], [], []>} : vector<16x16xf32>, vector<16x384xf32>, vector<16x384xf32> -> vector<16x384xf32>
    %cst_75 = arith.constant dense<0.000000e+00> : vector<16x384xf32>
    %78 = tpu.matmul %63, %57, %cst_75 {dimension_numbers = #tpu.dot_dimension_numbers<[1], [0], [0], [1], [0, 0, 1, 1], [], []>} : vector<16x16xf32>, vector<16x384xf32>, vector<16x384xf32> -> vector<16x384xf32>
    %79 = arith.addf %77, %78 : vector<16x384xf32>
    %80 = vector.broadcast %60 : vector<16x1xf32> to vector<16x384xf32>
    %81 = arith.mulf %79, %80 : vector<16x384xf32>
    %82 = vector.broadcast %61 : vector<16x1xf32> to vector<16x384xf32>
    %83 = arith.addf %81, %82 : vector<16x384xf32>
    %cst_76 = arith.constant 0.000000e+00 : f32
    %84 = vector.broadcast %cst_76 : f32 to vector<16x384xf32>
    %85 = arith.cmpf ogt, %83, %84 : vector<16x384xf32>
    %cst_77 = arith.constant 0.00999999977 : f32
    %86 = vector.broadcast %cst_77 : f32 to vector<16x384xf32>
    %87 = arith.mulf %86, %83 : vector<16x384xf32>
    %88 = arith.select %85, %83, %87 : vector<16x384xi1>, vector<16x384xf32>
    %89 = arith.addf %88, %57 : vector<16x384xf32>
    %c0_78 = arith.constant 0 : index
    %c0_79 = arith.constant 0 : index
    %c0_80 = arith.constant 0 : index
    %c0_81 = arith.constant 0 : index
    %90 = vector.load %arg9[%c0_78, %c0_79, %c0_80, %c0_81] : memref<1x1x16x384xf32, #tpu.memory_space<vmem>>, vector<1x1x16x384xf32>
    %91 = vector.shape_cast %90 : vector<1x1x16x384xf32> to vector<16x384xf32>
    %92 = vector.shape_cast %89 : vector<16x384xf32> to vector<1x1x16x384xf32>
    tpu.vector_store %arg9[%c0_78, %c0_79, %c0_80, %c0_81], %92 {strides = array<i32>} : memref<1x1x16x384xf32, #tpu.memory_space<vmem>>, vector<1x1x16x384xf32>,
    return
  }
  func.func @transform_0(%arg0: i32, %arg1: i32) -> (i32, i32, i32) {
    %c0_i32 = arith.constant 0 : i32
    %c0_i32_0 = arith.constant 0 : i32
    %c0_i32_1 = arith.constant 0 : i32
    return %arg0, %c0_i32, %c0_i32_0 : i32, i32, i32
  }
  func.func @transform_1(%arg0: i32, %arg1: i32) -> (i32, i32, i32, i32) {
    %c0_i32 = arith.constant 0 : i32
    %c0_i32_0 = arith.constant 0 : i32
    %c0_i32_1 = arith.constant 0 : i32
    return %arg0, %arg1, %c0_i32, %c0_i32_0 : i32, i32, i32, i32
  }
  func.func @transform_2(%arg0: i32, %arg1: i32) -> (i32, i32, i32, i32) {
    %c0_i32 = arith.constant 0 : i32
    %c0_i32_0 = arith.constant 0 : i32
    %c0_i32_1 = arith.constant 0 : i32
    %c0_i32_2 = arith.constant 0 : i32
    return %arg1, %c0_i32, %c0_i32_0, %c0_i32_1 : i32, i32, i32, i32
  }
  func.func @transform_3(%arg0: i32, %arg1: i32) -> (i32, i32) {
    %c0_i32 = arith.constant 0 : i32
    %c0_i32_0 = arith.constant 0 : i32
    %c0_i32_1 = arith.constant 0 : i32
    return %c0_i32, %c0_i32_0 : i32, i32
  }
  func.func @transform_4(%arg0: i32, %arg1: i32) -> (i32, i32) {
    %c0_i32 = arith.constant 0 : i32
    %c0_i32_0 = arith.constant 0 : i32
    %c0_i32_1 = arith.constant 0 : i32
    return %c0_i32, %c0_i32_0 : i32, i32
  }
  func.func @transform_5(%arg0: i32, %arg1: i32) -> (i32, i32) {
    %c0_i32 = arith.constant 0 : i32
    %c0_i32_0 = arith.constant 0 : i32
    %c0_i32_1 = arith.constant 0 : i32
    return %c0_i32, %c0_i32_0 : i32, i32
  }
  func.func @transform_6(%arg0: i32, %arg1: i32) -> (i32, i32) {
    %c0_i32 = arith.constant 0 : i32
    %c0_i32_0 = arith.constant 0 : i32
    %c0_i32_1 = arith.constant 0 : i32
    return %c0_i32, %c0_i32_0 : i32, i32
  }
  func.func @transform_7(%arg0: i32, %arg1: i32) -> (i32, i32, i32, i32) {
    %c0_i32 = arith.constant 0 : i32
    %c0_i32_0 = arith.constant 0 : i32
    %c0_i32_1 = arith.constant 0 : i32
    return %arg0, %arg1, %c0_i32, %c0_i32_0 : i32, i32, i32, i32
  }
}

module attributes {stable_mosaic.version = 11 : i64} {
  func.func @_gated_block_kernel(%arg0: i32, %arg1: i32, %arg2: memref<1x16x896xf32, #tpu.memory_space<vmem>>, %arg3: memref<1x1x1x640xf32, #tpu.memory_space<vmem>>, %arg4: memref<1x15x1x16xf32, #tpu.memory_space<vmem>>, %arg5: memref<1x1xf32, #tpu.memory_space<vmem>>, %arg6: memref<1x2xf32, #tpu.memory_space<vmem>>, %arg7: memref<1x1xf32, #tpu.memory_space<vmem>>, %arg8: memref<1x1xf32, #tpu.memory_space<vmem>>, %arg9: memref<1x1x1x640xf32, #tpu.memory_space<vmem>>) attributes {dimension_semantics = [#tpu.dimension_semantics<parallel>, #tpu.dimension_semantics<parallel>], iteration_bounds = array<i64: 2, 1>, scalar_prefetch = 0 : i64, scratch_operands = 0 : i64, tpu.core_type = #tpu.core_type<tc>, window_params = [{transform_indices = @transform_0, window_bounds = array<i64: 1, 16, 896>}, {transform_indices = @transform_1, window_bounds = array<i64: 1, 1, 1, 640>}, {transform_indices = @transform_2, window_bounds = array<i64: 1, 15, 1, 16>}, {pipeline_mode = #tpu.pipeline_mode<synchronous>, transform_indices = @transform_3, window_bounds = array<i64: 1, 1>}, {pipeline_mode = #tpu.pipeline_mode<synchronous>, transform_indices = @transform_4, window_bounds = array<i64: 1, 2>}, {pipeline_mode = #tpu.pipeline_mode<synchronous>, transform_indices = @transform_5, window_bounds = array<i64: 1, 1>}, {pipeline_mode = #tpu.pipeline_mode<synchronous>, transform_indices = @transform_6, window_bounds = array<i64: 1, 1>}, {transform_indices = @transform_7, window_bounds = array<i64: 1, 1, 1, 640>}]} {
    %cst = arith.constant 0.000000e+00 : f32
    %0 = vector.broadcast %cst : f32 to vector<1x640xf32>
    %c0 = arith.constant 0 : index
    %c0_0 = arith.constant 0 : index
    %c0_1 = arith.constant 0 : index
    %c0_2 = arith.constant 0 : index
    %1 = vector.load %arg4[%c0, %c0_0, %c0_1, %c0_2] : memref<1x15x1x16xf32, #tpu.memory_space<vmem>>, vector<1x1x1x16xf32>
    %2 = vector.shape_cast %1 : vector<1x1x1x16xf32> to vector<1x16xf32>
    %c0_3 = arith.constant 0 : index
    %c0_4 = arith.constant 0 : index
    %c0_5 = arith.constant 0 : index
    %3 = vector.load %arg2[%c0_3, %c0_4, %c0_5] : memref<1x16x896xf32, #tpu.memory_space<vmem>>, vector<1x16x640xf32>
    %4 = vector.shape_cast %3 : vector<1x16x640xf32> to vector<16x640xf32>
    %cst_6 = arith.constant dense<0.000000e+00> : vector<1x640xf32>
    %5 = tpu.matmul %2, %4, %cst_6 {dimension_numbers = #tpu.dot_dimension_numbers<[1], [0], [0], [1], [0, 0, 1, 1], [], []>} : vector<1x16xf32>, vector<16x640xf32>, vector<1x640xf32> -> vector<1x640xf32>
    %6 = arith.addf %0, %5 : vector<1x640xf32>
    %c0_7 = arith.constant 0 : index
    %c1 = arith.constant 1 : index
    %c0_8 = arith.constant 0 : index
    %c0_9 = arith.constant 0 : index
    %7 = vector.load %arg4[%c0_7, %c1, %c0_8, %c0_9] : memref<1x15x1x16xf32, #tpu.memory_space<vmem>>, vector<1x1x1x16xf32>
    %8 = vector.shape_cast %7 : vector<1x1x1x16xf32> to vector<1x16xf32>
    %c0_10 = arith.constant 0 : index
    %c0_11 = arith.constant 0 : index
    %c1_12 = arith.constant 1 : index
    %9 = vector.load %arg2[%c0_10, %c0_11, %c1_12] : memref<1x16x896xf32, #tpu.memory_space<vmem>>, vector<1x16x640xf32>
    %10 = vector.shape_cast %9 : vector<1x16x640xf32> to vector<16x640xf32>
    %cst_13 = arith.constant dense<0.000000e+00> : vector<1x640xf32>
    %11 = tpu.matmul %8, %10, %cst_13 {dimension_numbers = #tpu.dot_dimension_numbers<[1], [0], [0], [1], [0, 0, 1, 1], [], []>} : vector<1x16xf32>, vector<16x640xf32>, vector<1x640xf32> -> vector<1x640xf32>
    %12 = arith.addf %6, %11 : vector<1x640xf32>
    %c0_14 = arith.constant 0 : index
    %c2 = arith.constant 2 : index
    %c0_15 = arith.constant 0 : index
    %c0_16 = arith.constant 0 : index
    %13 = vector.load %arg4[%c0_14, %c2, %c0_15, %c0_16] : memref<1x15x1x16xf32, #tpu.memory_space<vmem>>, vector<1x1x1x16xf32>
    %14 = vector.shape_cast %13 : vector<1x1x1x16xf32> to vector<1x16xf32>
    %c0_17 = arith.constant 0 : index
    %c0_18 = arith.constant 0 : index
    %c2_19 = arith.constant 2 : index
    %15 = vector.load %arg2[%c0_17, %c0_18, %c2_19] : memref<1x16x896xf32, #tpu.memory_space<vmem>>, vector<1x16x640xf32>
    %16 = vector.shape_cast %15 : vector<1x16x640xf32> to vector<16x640xf32>
    %cst_20 = arith.constant dense<0.000000e+00> : vector<1x640xf32>
    %17 = tpu.matmul %14, %16, %cst_20 {dimension_numbers = #tpu.dot_dimension_numbers<[1], [0], [0], [1], [0, 0, 1, 1], [], []>} : vector<1x16xf32>, vector<16x640xf32>, vector<1x640xf32> -> vector<1x640xf32>
    %18 = arith.addf %12, %17 : vector<1x640xf32>
    %c0_21 = arith.constant 0 : index
    %c3 = arith.constant 3 : index
    %c0_22 = arith.constant 0 : index
    %c0_23 = arith.constant 0 : index
    %19 = vector.load %arg4[%c0_21, %c3, %c0_22, %c0_23] : memref<1x15x1x16xf32, #tpu.memory_space<vmem>>, vector<1x1x1x16xf32>
    %20 = vector.shape_cast %19 : vector<1x1x1x16xf32> to vector<1x16xf32>
    %c0_24 = arith.constant 0 : index
    %c0_25 = arith.constant 0 : index
    %c3_26 = arith.constant 3 : index
    %21 = vector.load %arg2[%c0_24, %c0_25, %c3_26] : memref<1x16x896xf32, #tpu.memory_space<vmem>>, vector<1x16x640xf32>
    %22 = vector.shape_cast %21 : vector<1x16x640xf32> to vector<16x640xf32>
    %cst_27 = arith.constant dense<0.000000e+00> : vector<1x640xf32>
    %23 = tpu.matmul %20, %22, %cst_27 {dimension_numbers = #tpu.dot_dimension_numbers<[1], [0], [0], [1], [0, 0, 1, 1], [], []>} : vector<1x16xf32>, vector<16x640xf32>, vector<1x640xf32> -> vector<1x640xf32>
    %24 = arith.addf %18, %23 : vector<1x640xf32>
    %c0_28 = arith.constant 0 : index
    %c4 = arith.constant 4 : index
    %c0_29 = arith.constant 0 : index
    %c0_30 = arith.constant 0 : index
    %25 = vector.load %arg4[%c0_28, %c4, %c0_29, %c0_30] : memref<1x15x1x16xf32, #tpu.memory_space<vmem>>, vector<1x1x1x16xf32>
    %26 = vector.shape_cast %25 : vector<1x1x1x16xf32> to vector<1x16xf32>
    %c0_31 = arith.constant 0 : index
    %c0_32 = arith.constant 0 : index
    %c4_33 = arith.constant 4 : index
    %27 = vector.load %arg2[%c0_31, %c0_32, %c4_33] : memref<1x16x896xf32, #tpu.memory_space<vmem>>, vector<1x16x640xf32>
    %28 = vector.shape_cast %27 : vector<1x16x640xf32> to vector<16x640xf32>
    %cst_34 = arith.constant dense<0.000000e+00> : vector<1x640xf32>
    %29 = tpu.matmul %26, %28, %cst_34 {dimension_numbers = #tpu.dot_dimension_numbers<[1], [0], [0], [1], [0, 0, 1, 1], [], []>} : vector<1x16xf32>, vector<16x640xf32>, vector<1x640xf32> -> vector<1x640xf32>
    %30 = arith.addf %24, %29 : vector<1x640xf32>
    %c0_35 = arith.constant 0 : index
    %c5 = arith.constant 5 : index
    %c0_36 = arith.constant 0 : index
    %c0_37 = arith.constant 0 : index
    %31 = vector.load %arg4[%c0_35, %c5, %c0_36, %c0_37] : memref<1x15x1x16xf32, #tpu.memory_space<vmem>>, vector<1x1x1x16xf32>
    %32 = vector.shape_cast %31 : vector<1x1x1x16xf32> to vector<1x16xf32>
    %c0_38 = arith.constant 0 : index
    %c0_39 = arith.constant 0 : index
    %c65 = arith.constant 65 : index
    %33 = vector.load %arg2[%c0_38, %c0_39, %c65] : memref<1x16x896xf32, #tpu.memory_space<vmem>>, vector<1x16x640xf32>
    %34 = vector.shape_cast %33 : vector<1x16x640xf32> to vector<16x640xf32>
    %cst_40 = arith.constant dense<0.000000e+00> : vector<1x640xf32>
    %35 = tpu.matmul %32, %34, %cst_40 {dimension_numbers = #tpu.dot_dimension_numbers<[1], [0], [0], [1], [0, 0, 1, 1], [], []>} : vector<1x16xf32>, vector<16x640xf32>, vector<1x640xf32> -> vector<1x640xf32>
    %36 = arith.addf %30, %35 : vector<1x640xf32>
    %c0_41 = arith.constant 0 : index
    %c6 = arith.constant 6 : index
    %c0_42 = arith.constant 0 : index
    %c0_43 = arith.constant 0 : index
    %37 = vector.load %arg4[%c0_41, %c6, %c0_42, %c0_43] : memref<1x15x1x16xf32, #tpu.memory_space<vmem>>, vector<1x1x1x16xf32>
    %38 = vector.shape_cast %37 : vector<1x1x1x16xf32> to vector<1x16xf32>
    %c0_44 = arith.constant 0 : index
    %c0_45 = arith.constant 0 : index
    %c66 = arith.constant 66 : index
    %39 = vector.load %arg2[%c0_44, %c0_45, %c66] : memref<1x16x896xf32, #tpu.memory_space<vmem>>, vector<1x16x640xf32>
    %40 = vector.shape_cast %39 : vector<1x16x640xf32> to vector<16x640xf32>
    %cst_46 = arith.constant dense<0.000000e+00> : vector<1x640xf32>
    %41 = tpu.matmul %38, %40, %cst_46 {dimension_numbers = #tpu.dot_dimension_numbers<[1], [0], [0], [1], [0, 0, 1, 1], [], []>} : vector<1x16xf32>, vector<16x640xf32>, vector<1x640xf32> -> vector<1x640xf32>
    %42 = arith.addf %36, %41 : vector<1x640xf32>
    %c0_47 = arith.constant 0 : index
    %c7 = arith.constant 7 : index
    %c0_48 = arith.constant 0 : index
    %c0_49 = arith.constant 0 : index
    %43 = vector.load %arg4[%c0_47, %c7, %c0_48, %c0_49] : memref<1x15x1x16xf32, #tpu.memory_space<vmem>>, vector<1x1x1x16xf32>
    %44 = vector.shape_cast %43 : vector<1x1x1x16xf32> to vector<1x16xf32>
    %c0_50 = arith.constant 0 : index
    %c0_51 = arith.constant 0 : index
    %c67 = arith.constant 67 : index
    %45 = vector.load %arg2[%c0_50, %c0_51, %c67] : memref<1x16x896xf32, #tpu.memory_space<vmem>>, vector<1x16x640xf32>
    %46 = vector.shape_cast %45 : vector<1x16x640xf32> to vector<16x640xf32>
    %cst_52 = arith.constant dense<0.000000e+00> : vector<1x640xf32>
    %47 = tpu.matmul %44, %46, %cst_52 {dimension_numbers = #tpu.dot_dimension_numbers<[1], [0], [0], [1], [0, 0, 1, 1], [], []>} : vector<1x16xf32>, vector<16x640xf32>, vector<1x640xf32> -> vector<1x640xf32>
    %48 = arith.addf %42, %47 : vector<1x640xf32>
    %c0_53 = arith.constant 0 : index
    %c8 = arith.constant 8 : index
    %c0_54 = arith.constant 0 : index
    %c0_55 = arith.constant 0 : index
    %49 = vector.load %arg4[%c0_53, %c8, %c0_54, %c0_55] : memref<1x15x1x16xf32, #tpu.memory_space<vmem>>, vector<1x1x1x16xf32>
    %50 = vector.shape_cast %49 : vector<1x1x1x16xf32> to vector<1x16xf32>
    %c0_56 = arith.constant 0 : index
    %c0_57 = arith.constant 0 : index
    %c68 = arith.constant 68 : index
    %51 = vector.load %arg2[%c0_56, %c0_57, %c68] : memref<1x16x896xf32, #tpu.memory_space<vmem>>, vector<1x16x640xf32>
    %52 = vector.shape_cast %51 : vector<1x16x640xf32> to vector<16x640xf32>
    %cst_58 = arith.constant dense<0.000000e+00> : vector<1x640xf32>
    %53 = tpu.matmul %50, %52, %cst_58 {dimension_numbers = #tpu.dot_dimension_numbers<[1], [0], [0], [1], [0, 0, 1, 1], [], []>} : vector<1x16xf32>, vector<16x640xf32>, vector<1x640xf32> -> vector<1x640xf32>
    %54 = arith.addf %48, %53 : vector<1x640xf32>
    %c0_59 = arith.constant 0 : index
    %c9 = arith.constant 9 : index
    %c0_60 = arith.constant 0 : index
    %c0_61 = arith.constant 0 : index
    %55 = vector.load %arg4[%c0_59, %c9, %c0_60, %c0_61] : memref<1x15x1x16xf32, #tpu.memory_space<vmem>>, vector<1x1x1x16xf32>
    %56 = vector.shape_cast %55 : vector<1x1x1x16xf32> to vector<1x16xf32>
    %c0_62 = arith.constant 0 : index
    %c0_63 = arith.constant 0 : index
    %c69 = arith.constant 69 : index
    %57 = vector.load %arg2[%c0_62, %c0_63, %c69] : memref<1x16x896xf32, #tpu.memory_space<vmem>>, vector<1x16x640xf32>
    %58 = vector.shape_cast %57 : vector<1x16x640xf32> to vector<16x640xf32>
    %cst_64 = arith.constant dense<0.000000e+00> : vector<1x640xf32>
    %59 = tpu.matmul %56, %58, %cst_64 {dimension_numbers = #tpu.dot_dimension_numbers<[1], [0], [0], [1], [0, 0, 1, 1], [], []>} : vector<1x16xf32>, vector<16x640xf32>, vector<1x640xf32> -> vector<1x640xf32>
    %60 = arith.addf %54, %59 : vector<1x640xf32>
    %c0_65 = arith.constant 0 : index
    %c10 = arith.constant 10 : index
    %c0_66 = arith.constant 0 : index
    %c0_67 = arith.constant 0 : index
    %61 = vector.load %arg4[%c0_65, %c10, %c0_66, %c0_67] : memref<1x15x1x16xf32, #tpu.memory_space<vmem>>, vector<1x1x1x16xf32>
    %62 = vector.shape_cast %61 : vector<1x1x1x16xf32> to vector<1x16xf32>
    %c0_68 = arith.constant 0 : index
    %c0_69 = arith.constant 0 : index
    %c130 = arith.constant 130 : index
    %63 = vector.load %arg2[%c0_68, %c0_69, %c130] : memref<1x16x896xf32, #tpu.memory_space<vmem>>, vector<1x16x640xf32>
    %64 = vector.shape_cast %63 : vector<1x16x640xf32> to vector<16x640xf32>
    %cst_70 = arith.constant dense<0.000000e+00> : vector<1x640xf32>
    %65 = tpu.matmul %62, %64, %cst_70 {dimension_numbers = #tpu.dot_dimension_numbers<[1], [0], [0], [1], [0, 0, 1, 1], [], []>} : vector<1x16xf32>, vector<16x640xf32>, vector<1x640xf32> -> vector<1x640xf32>
    %66 = arith.addf %60, %65 : vector<1x640xf32>
    %c0_71 = arith.constant 0 : index
    %c11 = arith.constant 11 : index
    %c0_72 = arith.constant 0 : index
    %c0_73 = arith.constant 0 : index
    %67 = vector.load %arg4[%c0_71, %c11, %c0_72, %c0_73] : memref<1x15x1x16xf32, #tpu.memory_space<vmem>>, vector<1x1x1x16xf32>
    %68 = vector.shape_cast %67 : vector<1x1x1x16xf32> to vector<1x16xf32>
    %c0_74 = arith.constant 0 : index
    %c0_75 = arith.constant 0 : index
    %c131 = arith.constant 131 : index
    %69 = vector.load %arg2[%c0_74, %c0_75, %c131] : memref<1x16x896xf32, #tpu.memory_space<vmem>>, vector<1x16x640xf32>
    %70 = vector.shape_cast %69 : vector<1x16x640xf32> to vector<16x640xf32>
    %cst_76 = arith.constant dense<0.000000e+00> : vector<1x640xf32>
    %71 = tpu.matmul %68, %70, %cst_76 {dimension_numbers = #tpu.dot_dimension_numbers<[1], [0], [0], [1], [0, 0, 1, 1], [], []>} : vector<1x16xf32>, vector<16x640xf32>, vector<1x640xf32> -> vector<1x640xf32>
    %72 = arith.addf %66, %71 : vector<1x640xf32>
    %c0_77 = arith.constant 0 : index
    %c12 = arith.constant 12 : index
    %c0_78 = arith.constant 0 : index
    %c0_79 = arith.constant 0 : index
    %73 = vector.load %arg4[%c0_77, %c12, %c0_78, %c0_79] : memref<1x15x1x16xf32, #tpu.memory_space<vmem>>, vector<1x1x1x16xf32>
    %74 = vector.shape_cast %73 : vector<1x1x1x16xf32> to vector<1x16xf32>
    %c0_80 = arith.constant 0 : index
    %c0_81 = arith.constant 0 : index
    %c132 = arith.constant 132 : index
    %75 = vector.load %arg2[%c0_80, %c0_81, %c132] : memref<1x16x896xf32, #tpu.memory_space<vmem>>, vector<1x16x640xf32>
    %76 = vector.shape_cast %75 : vector<1x16x640xf32> to vector<16x640xf32>
    %cst_82 = arith.constant dense<0.000000e+00> : vector<1x640xf32>
    %77 = tpu.matmul %74, %76, %cst_82 {dimension_numbers = #tpu.dot_dimension_numbers<[1], [0], [0], [1], [0, 0, 1, 1], [], []>} : vector<1x16xf32>, vector<16x640xf32>, vector<1x640xf32> -> vector<1x640xf32>
    %78 = arith.addf %72, %77 : vector<1x640xf32>
    %c0_83 = arith.constant 0 : index
    %c13 = arith.constant 13 : index
    %c0_84 = arith.constant 0 : index
    %c0_85 = arith.constant 0 : index
    %79 = vector.load %arg4[%c0_83, %c13, %c0_84, %c0_85] : memref<1x15x1x16xf32, #tpu.memory_space<vmem>>, vector<1x1x1x16xf32>
    %80 = vector.shape_cast %79 : vector<1x1x1x16xf32> to vector<1x16xf32>
    %c0_86 = arith.constant 0 : index
    %c0_87 = arith.constant 0 : index
    %c133 = arith.constant 133 : index
    %81 = vector.load %arg2[%c0_86, %c0_87, %c133] : memref<1x16x896xf32, #tpu.memory_space<vmem>>, vector<1x16x640xf32>
    %82 = vector.shape_cast %81 : vector<1x16x640xf32> to vector<16x640xf32>
    %cst_88 = arith.constant dense<0.000000e+00> : vector<1x640xf32>
    %83 = tpu.matmul %80, %82, %cst_88 {dimension_numbers = #tpu.dot_dimension_numbers<[1], [0], [0], [1], [0, 0, 1, 1], [], []>} : vector<1x16xf32>, vector<16x640xf32>, vector<1x640xf32> -> vector<1x640xf32>
    %84 = arith.addf %78, %83 : vector<1x640xf32>
    %c0_89 = arith.constant 0 : index
    %c14 = arith.constant 14 : index
    %c0_90 = arith.constant 0 : index
    %c0_91 = arith.constant 0 : index
    %85 = vector.load %arg4[%c0_89, %c14, %c0_90, %c0_91] : memref<1x15x1x16xf32, #tpu.memory_space<vmem>>, vector<1x1x1x16xf32>
    %86 = vector.shape_cast %85 : vector<1x1x1x16xf32> to vector<1x16xf32>
    %c0_92 = arith.constant 0 : index
    %c0_93 = arith.constant 0 : index
    %c134 = arith.constant 134 : index
    %87 = vector.load %arg2[%c0_92, %c0_93, %c134] : memref<1x16x896xf32, #tpu.memory_space<vmem>>, vector<1x16x640xf32>
    %88 = vector.shape_cast %87 : vector<1x16x640xf32> to vector<16x640xf32>
    %cst_94 = arith.constant dense<0.000000e+00> : vector<1x640xf32>
    %89 = tpu.matmul %86, %88, %cst_94 {dimension_numbers = #tpu.dot_dimension_numbers<[1], [0], [0], [1], [0, 0, 1, 1], [], []>} : vector<1x16xf32>, vector<16x640xf32>, vector<1x640xf32> -> vector<1x640xf32>
    %90 = arith.addf %84, %89 : vector<1x640xf32>
    %c0_95 = arith.constant 0 : index
    %c0_96 = arith.constant 0 : index
    %91 = vector.load %arg5[%c0_95, %c0_96] : memref<1x1xf32, #tpu.memory_space<vmem>>, vector<1x1xf32>
    %92 = vector.broadcast %91 : vector<1x1xf32> to vector<1x640xf32>
    %93 = arith.addf %90, %92 : vector<1x640xf32>
    %c0_97 = arith.constant 0 : index
    %c0_98 = arith.constant 0 : index
    %c0_99 = arith.constant 0 : index
    %c0_100 = arith.constant 0 : index
    %94 = vector.load %arg3[%c0_97, %c0_98, %c0_99, %c0_100] : memref<1x1x1x640xf32, #tpu.memory_space<vmem>>, vector<1x1x1x640xf32>
    %95 = vector.shape_cast %94 : vector<1x1x1x640xf32> to vector<1x640xf32>
    %c0_101 = arith.constant 0 : index
    %c0_102 = arith.constant 0 : index
    %96 = vector.load %arg7[%c0_101, %c0_102] : memref<1x1xf32, #tpu.memory_space<vmem>>, vector<1x1xf32>
    %c0_103 = arith.constant 0 : index
    %c0_104 = arith.constant 0 : index
    %97 = vector.load %arg8[%c0_103, %c0_104] : memref<1x1xf32, #tpu.memory_space<vmem>>, vector<1x1xf32>
    %c0_105 = arith.constant 0 : index
    %c0_106 = arith.constant 0 : index
    %98 = vector.load %arg6[%c0_105, %c0_106] : memref<1x2xf32, #tpu.memory_space<vmem>>, vector<1x1xf32>
    %c0_107 = arith.constant 0 : index
    %c1_108 = arith.constant 1 : index
    %99 = vector.load %arg6[%c0_107, %c1_108] : memref<1x2xf32, #tpu.memory_space<vmem>>, vector<1x1xf32>
    %100 = vector.broadcast %98 : vector<1x1xf32> to vector<1x640xf32>
    %101 = arith.mulf %100, %93 : vector<1x640xf32>
    %102 = vector.broadcast %99 : vector<1x1xf32> to vector<1x640xf32>
    %103 = arith.mulf %102, %95 : vector<1x640xf32>
    %104 = arith.addf %101, %103 : vector<1x640xf32>
    %105 = vector.broadcast %96 : vector<1x1xf32> to vector<1x640xf32>
    %106 = arith.mulf %104, %105 : vector<1x640xf32>
    %107 = vector.broadcast %97 : vector<1x1xf32> to vector<1x640xf32>
    %108 = arith.addf %106, %107 : vector<1x640xf32>
    %cst_109 = arith.constant 0.000000e+00 : f32
    %109 = vector.broadcast %cst_109 : f32 to vector<1x640xf32>
    %110 = arith.cmpf ogt, %108, %109 : vector<1x640xf32>
    %cst_110 = arith.constant 0.00999999977 : f32
    %111 = vector.broadcast %cst_110 : f32 to vector<1x640xf32>
    %112 = arith.mulf %111, %108 : vector<1x640xf32>
    %113 = arith.select %110, %108, %112 : vector<1x640xi1>, vector<1x640xf32>
    %114 = arith.mulf %95, %113 : vector<1x640xf32>
    %115 = vector.broadcast %98 : vector<1x1xf32> to vector<1x640xf32>
    %116 = arith.mulf %115, %114 : vector<1x640xf32>
    %117 = vector.broadcast %99 : vector<1x1xf32> to vector<1x640xf32>
    %118 = arith.mulf %117, %93 : vector<1x640xf32>
    %119 = arith.addf %116, %118 : vector<1x640xf32>
    %120 = vector.broadcast %96 : vector<1x1xf32> to vector<1x640xf32>
    %121 = arith.mulf %119, %120 : vector<1x640xf32>
    %122 = vector.broadcast %97 : vector<1x1xf32> to vector<1x640xf32>
    %123 = arith.addf %121, %122 : vector<1x640xf32>
    %cst_111 = arith.constant 0.000000e+00 : f32
    %124 = vector.broadcast %cst_111 : f32 to vector<1x640xf32>
    %125 = arith.cmpf ogt, %123, %124 : vector<1x640xf32>
    %cst_112 = arith.constant 0.00999999977 : f32
    %126 = vector.broadcast %cst_112 : f32 to vector<1x640xf32>
    %127 = arith.mulf %126, %123 : vector<1x640xf32>
    %128 = arith.select %125, %123, %127 : vector<1x640xi1>, vector<1x640xf32>
    %129 = arith.addf %128, %93 : vector<1x640xf32>
    %c0_113 = arith.constant 0 : index
    %c0_114 = arith.constant 0 : index
    %c0_115 = arith.constant 0 : index
    %c0_116 = arith.constant 0 : index
    %130 = vector.load %arg9[%c0_113, %c0_114, %c0_115, %c0_116] : memref<1x1x1x640xf32, #tpu.memory_space<vmem>>, vector<1x1x1x640xf32>
    %131 = vector.shape_cast %130 : vector<1x1x1x640xf32> to vector<1x640xf32>
    %132 = vector.shape_cast %129 : vector<1x640xf32> to vector<1x1x1x640xf32>
    tpu.vector_store %arg9[%c0_113, %c0_114, %c0_115, %c0_116], %132 {strides = array<i32>} : memref<1x1x1x640xf32, #tpu.memory_space<vmem>>, vector<1x1x1x640xf32>,
    return
  }
  func.func @transform_0(%arg0: i32, %arg1: i32) -> (i32, i32, i32) {
    %c0_i32 = arith.constant 0 : i32
    %c0_i32_0 = arith.constant 0 : i32
    %c0_i32_1 = arith.constant 0 : i32
    return %arg0, %c0_i32, %c0_i32_0 : i32, i32, i32
  }
  func.func @transform_1(%arg0: i32, %arg1: i32) -> (i32, i32, i32, i32) {
    %c0_i32 = arith.constant 0 : i32
    %c0_i32_0 = arith.constant 0 : i32
    %c0_i32_1 = arith.constant 0 : i32
    return %arg0, %arg1, %c0_i32, %c0_i32_0 : i32, i32, i32, i32
  }
  func.func @transform_2(%arg0: i32, %arg1: i32) -> (i32, i32, i32, i32) {
    %c0_i32 = arith.constant 0 : i32
    %c0_i32_0 = arith.constant 0 : i32
    %c0_i32_1 = arith.constant 0 : i32
    %c0_i32_2 = arith.constant 0 : i32
    return %arg1, %c0_i32, %c0_i32_0, %c0_i32_1 : i32, i32, i32, i32
  }
  func.func @transform_3(%arg0: i32, %arg1: i32) -> (i32, i32) {
    %c0_i32 = arith.constant 0 : i32
    %c0_i32_0 = arith.constant 0 : i32
    %c0_i32_1 = arith.constant 0 : i32
    return %c0_i32, %c0_i32_0 : i32, i32
  }
  func.func @transform_4(%arg0: i32, %arg1: i32) -> (i32, i32) {
    %c0_i32 = arith.constant 0 : i32
    %c0_i32_0 = arith.constant 0 : i32
    %c0_i32_1 = arith.constant 0 : i32
    return %c0_i32, %c0_i32_0 : i32, i32
  }
  func.func @transform_5(%arg0: i32, %arg1: i32) -> (i32, i32) {
    %c0_i32 = arith.constant 0 : i32
    %c0_i32_0 = arith.constant 0 : i32
    %c0_i32_1 = arith.constant 0 : i32
    return %c0_i32, %c0_i32_0 : i32, i32
  }
  func.func @transform_6(%arg0: i32, %arg1: i32) -> (i32, i32) {
    %c0_i32 = arith.constant 0 : i32
    %c0_i32_0 = arith.constant 0 : i32
    %c0_i32_1 = arith.constant 0 : i32
    return %c0_i32, %c0_i32_0 : i32, i32
  }
  func.func @transform_7(%arg0: i32, %arg1: i32) -> (i32, i32, i32, i32) {
    %c0_i32 = arith.constant 0 : i32
    %c0_i32_0 = arith.constant 0 : i32
    %c0_i32_1 = arith.constant 0 : i32
    return %arg0, %arg1, %c0_i32, %c0_i32_0 : i32, i32, i32, i32
  }
}

</mosaic_0001>

<bundles_post_ra>
// kernel: decoder_block_forward.3
= control target key start
LH: loop header
LB: loop body
LE: loop exit
PB: predicated region body
PF: predicated region fallthrough
CT: control target
= control target key end

     0   :  { %s3062_s24 = smov 0   ;;  %s3064_s25 = smov 0   ;;  %s4163_s0 = inlined_call_operand.vmem [shape: f32[2,64,384], index: 0, kind: input, shape index: {}]   ;;  %s4164_s1 = inlined_call_operand.vmem [shape: f32[2,2,32,256], index: 1, kind: input, shape index: {}]   ;;  %s4165_s2 = inlined_call_operand.vmem [shape: f32[2,9,32,64], index: 2, kind: input, shape index: {}]   ;;  %s4166_s3 = inlined_call_operand.vmem [shape: f32[32,1], index: 3, kind: input, shape index: {}]   ;;  %s4167_s4 = inlined_call_operand.vmem [shape: f32[32,64], index: 4, kind: input, shape index: {}]   ;;  %s4168_s5 = inlined_call_operand.vmem [shape: f32[32,1], index: 5, kind: input, shape index: {}]   ;;  %s4169_s6 = inlined_call_operand.vmem [shape: f32[32,1], index: 6, kind: input, shape index: {}]   ;;  %s4170_s7 = inlined_call_operand.vmem [shape: f32[2,2,32,256], index: 7, kind: output, shape index: {}]  }
   0x1   :  { %s3066_s26 = smov 0   ;;  %s3068_s27 = smov 0  }
   0x2   :  { %s3070_s28 = smov 0  }
   0x3 LB: > { %s26_s29 = sadd.s32 1, %s3001_s26  ;;  %s29_s30 = sadd.s32 1, %s3005_s27  ;;  %s3009_s28 = sphi %s3070_s28, %s17_s28   ;;  %s3005_s27 = sphi %s3068_s27, %s4255_s27   ;;  %s3001_s26 = sphi %s3066_s26, %s4254_s26   ;;  %s2997_s25 = sphi %s3064_s25, %s4253_s25   ;;  %s2993_s24 = sphi %s3062_s24, %s4252_s24  }
   0x4   : > { %p27_p0 = scmp.ge.s32.totalorder %s26_s29, 2  ;;  %p2781_p1 = scmp.ge.s32.totalorder %s3009_s28, 1 }
   0x5   : > { %p277_p2 = scmp.lt.s32.totalorder %s3009_s28, 5 }
   0x6   : > { %s4257_s29 = smov (%p27_p0, %s26_s29), 0  ;;  %s4259_s30 = smov (!%p27_p0, %s29_s30), %s3005_s27 }
   0x7   : > { %p278_p3 = pnand %p2781_p1, %p277_p2  ;;  %p31_p4 = scmp.ge.s32.totalorder %s4259_s30, 2 }
   0x9   : > { %s4261_s30 = smov (%p31_p4, %s4259_s30), 0  ;;  %281 = sbr.rel (%p278_p3) target bundleno = 1177 (0x499), region = 48 }
   0xe   : > { %p327_p5 = scmp.lt.s32.totalorder %s2997_s25, 1  ;;  %s3011_s12 = smov 127   ;;  %vm509_vm0 = vcmask 523264   ;;  %v4171_v24 = vmov 0.0   ;;  %vm476_vm1 = vcmask 1039360   ;;  %vm960_vm2 = vcmask 900096  }
   0xf   : > { %p334_p6 = scmp.lt.s32.totalorder %s2993_s24, 1  ;;  %687 = vmatprep.mubr.f32.mxu1 %v4171_v24  ;;  %586 = vmatprep.mubr.f32.mxu0 %v4171_v24  ;;  %s3013_s17 = smov 110   ;;  %vm765_vm3 = vcmask 1031168   ;;  %vm1350_vm4 = vcmask 883712   ;;  %vm1155_vm5 = vcmask 891904   ;;  %vm1740_vm6 = vcmask 744448  }
  0x10   : > { %s4263_s25 = smov (!%p327_p5, %s2997_s25), 1  ;;  %s3014_s18 = smov 126   ;;  %vm1545_vm7 = vcmask 752640   ;;  %vm1935_vm8 = vcmask 736256   ;;  %vm2141_vm9 = vcmask 261120  }
  0x11   : > { %s2892_s8 = smul.u32 192, %s4263_s25  ;;  %s4265_s24 = smov (!%p334_p6, %s2993_s24), 1 }
  0x12   : > { %s2893_s13 = smul.u32 288, %s4265_s24  ;;  %s3015_s19 = smov 108  }
  0x13   : > { %s3100_s11 = scalar_lea.vmem %s4163_s0, %s2892_s8  ;;  %s3016_s20 = smov 109  }
  0x14   : > { %v3103_v0 = vld [vmem:[%s3100_s11 + $0xb0] sm:$0xff]  ;;  %v3106_v1 = vld [vmem:[%s3100_s11 + $0xa8] sm:$0xff]  ;;  %v3113_v2 = vld [vmem:[%s3100_s11 + $0xb8] sm:$0xff]  ;;  %s3224_s16 = scalar_lea.vmem %s4165_s2, %s2893_s13  ;;  %s3017_s21 = smov 91  }
  0x15   : > { %472 = vrot.lane.b32.xlu0 %v3103_v0, %s3011_s12  ;;  %470 = vrot.lane.b32.xlu1 %v3106_v1, %s3011_s12  ;;  %v3116_v3 = vld [vmem:[%s3100_s11 + $0x98] sm:$0xff]  ;;  %v3126_v4 = vld [vmem:[%s3100_s11 + $0x90] sm:$0xff]  ;;  %s3018_s22 = smov 92   ;;  %s3019_s23 = smov 90  }
  0x16   : > { %639 = vmatprep.subr.mxu1 %v3103_v0  ;;  %v3129_v5 = vld [vmem:[%s3100_s11 + $0xa0] sm:$0xff]  ;;  %v3136_v7 = vld [vmem:[%s3100_s11 + $0x78] sm:$0xff]  ;;  %v3145_v8 = vld [vmem:[%s3100_s11 + $0x68] sm:$0xff]  ;;  %s2784_s13 = sshll.u32 %s4263_s25, 4 }
  0x17   : > { %640 = vmatpush1.msra.mxu1 %v3106_v1  ;;  %v3132_v6 = vld [vmem:[%s3100_s11 + $0x80] sm:$0xff]  ;;  %v3148_v9 = vld [vmem:[%s3100_s11 + $0x88] sm:$0xff]  ;;  %v3155_v11 = vld [vmem:[%s3100_s11 + $0x50] sm:$0xff] }
  0x18   : > { %641 = vmatprep.subr.mxu1 %v3116_v3  ;;  %v3151_v10 = vld [vmem:[%s3100_s11 + $0x60] sm:$0xff]  ;;  %v3164_v12 = vld [vmem:[%s3100_s11 + $0x48] sm:$0xff]  ;;  %v3167_v13 = vld [vmem:[%s3100_s11 + $0x38] sm:$0xff] }
  0x19   : > { %474 = vrot.lane.b32.xlu0 %v3113_v2, %s3011_s12  ;;  %466 = vrot.lane.b32.xlu1 %v3116_v3, %s3011_s12  ;;  %v3171_v14 = vld [vmem:[%s3100_s11 + $0x30] sm:$0xff]  ;;  %v3180_v15 = vld [vmem:[%s3100_s11 + $0x20] sm:$0xff] }
  0x1a   : > { %642 = vmatpush1.msra.mxu1 %v3126_v4  ;;  %v3183_v16 = vld [vmem:[%s3100_s11 + $0x70] sm:$0xff]  ;;  %v3186_v17 = vld [vmem:[%s3100_s11 + $0x18] sm:$0xff]  ;;  %v3190_v18 = vld [vmem:[%s3100_s11 + $0x8] sm:$0xff] }
  0x1b   : > { %643 = vmatprep.subr.mxu1 %v3132_v6  ;;  %v3199_v19 = vld [vmem:[%s3100_s11] sm:$0xff]  ;;  %v3202_v20 = vld [vmem:[%s3100_s11 + $0x58] sm:$0xff]  ;;  %v3232_v23 = vld [vmem:[%s3100_s11 + $0x28] sm:$0xff] }
  0x1c   : > { %644 = vmatpush1.msra.mxu1 %v3136_v7  ;;  %v3218_v21 = vld [vmem:[%s3100_s11 + $0x40] sm:$0xff]  ;;  %v3251_v25 = vld [vmem:[%s3100_s11 + $0x10] sm:$0xff]  ;;  %v356_v28 = vld [vmem:[%s3224_s16 + $0x8] sm:$0xff] }
  0x1d   : > { %468 = vrot.lane.b32.xlu0 %v3129_v5, %s3011_s12  ;;  %464 = vrot.lane.b32.xlu1 %v3126_v4, %s3011_s12  ;;  %v355_v22 = vld [vmem:[%s3224_s16] sm:$0xff]  ;;  %v357_v33 = vld [vmem:[%s3224_s16 + $0x10] sm:$0xff] }
  0x1e   : > { %645 = vmatprep.subr.mxu1 %v3145_v8  ;;  %v358_v38 = vld [vmem:[%s3224_s16 + $0x18] sm:$0xff] }
  0x1f   : > { %646 = vmatpush1.msra.mxu1 %v3151_v10 }
  0x20   : > { %647 = vmatprep.subr.mxu1 %v3155_v11 }
  0x21   : > { %462 = vrot.lane.b32.xlu1 %v3148_v9, %s3011_s12  ;;  %460 = vrot.lane.b32.xlu0 %v3132_v6, %s3011_s12 }
  0x22   : > { %648 = vmatpush1.msra.mxu1 %v3164_v12 }
  0x23   : > { %649 = vmatprep.subr.mxu1 %v3167_v13 }
  0x24   : > { %650 = vmatpush1.msra.mxu1 %v3171_v14 }
  0x25   : > { %458 = vrot.lane.b32.xlu0 %v3136_v7, %s3011_s12  ;;  %454 = vrot.lane.b32.xlu1 %v3145_v8, %s3011_s12 }
  0x26   : > { %651 = vmatprep.subr.mxu1 %v3180_v15 }
  0x27   : > { %652 = vmatpush1.msra.mxu1 %v3186_v17 }
  0x28   : > { %653 = vmatprep.subr.mxu1 %v3190_v18 }
  0x29   : > { %456 = vrot.lane.b32.xlu0 %v3183_v16, %s3011_s12  ;;  %452 = vrot.lane.b32.xlu1 %v3151_v10, %s3011_s12 }
  0x2a   : > { %654 = vmatpush1.msra.mxu1 %v3199_v19 }
  0x2b   : > { %2798 = vmatmul.mubr.msk.f32.vlgmr.msra.gmra.mxu1 %vm509_vm0, %v355_v22 }
  0x2c   : > { %693 = vmatprep.mubr.f32.mxu1 %v4171_v24 }
  0x2d   : > { %450 = vrot.lane.b32.xlu1 %v3202_v20, %s3011_s12  ;;  %448 = vrot.lane.b32.xlu0 %v3155_v11, %s3011_s12 }
  0x2f   : > { %2799 = vmatmul.mubr.msk.f32.gmra.mxu1 %vm509_vm0, %v356_v28 }
  0x30   : > { %699 = vmatprep.mubr.f32.mxu1 %v4171_v24 }
  0x31   : > { %446 = vrot.lane.b32.xlu0 %v3164_v12, %s3011_s12  ;;  %442 = vrot.lane.b32.xlu1 %v3167_v13, %s3011_s12 }
  0x33   : > { %2800 = vmatmul.mubr.msk.f32.gmra.mxu1 %vm509_vm0, %v357_v33 }
  0x34   : > { %705 = vmatprep.mubr.f32.mxu1 %v4171_v24 }
  0x35   : > { %444 = vrot.lane.b32.xlu0 %v3218_v21, %s3011_s12  ;;  %440 = vrot.lane.b32.xlu1 %v3171_v14, %s3011_s12 }
  0x37   : > { %2801 = vmatmul.mubr.msk.f32.gmra.mxu1 %vm509_vm0, %v358_v38 }
  0x38   : > { %1069 = vmatprep.mubr.f32.mxu1 %v4171_v24 }
  0x39   : > { %438 = vrot.lane.b32.xlu1 %v3232_v23, %s3011_s12  ;;  %436 = vrot.lane.b32.xlu0 %v3180_v15, %s3011_s12 }
  0x3d   : > { %958 = vrot.lane.b32.xlu1 %v3113_v2, %s3013_s17  ;;  %956 = vrot.lane.b32.xlu0 %v3103_v0, %s3013_s17 }
  0x41   : > { %954 = vrot.lane.b32.xlu1 %v3106_v1, %s3013_s17  ;;  %434 = vrot.lane.b32.xlu0 %v3186_v17, %s3011_s12 }
  0x45   : > { %432 = vrot.lane.b32.xlu1 %v3251_v25, %s3011_s12  ;;  %430 = vrot.lane.b32.xlu0 %v3190_v18, %s3011_s12 }
  0x49   : > { %952 = vrot.lane.b32.xlu1 %v3129_v5, %s3013_s17  ;;  %950 = vrot.lane.b32.xlu0 %v3116_v3, %s3013_s17 }
  0x4d   : > { %948 = vrot.lane.b32.xlu1 %v3126_v4, %s3013_s17  ;;  %428 = vrot.lane.b32.xlu0 %v3199_v19, %s3011_s12  ;;  %s2783_s12 = sshll.u32 %s4265_s24, 3 }
  0x51   : > { %763 = vrot.lane.b32.xlu1 %v3113_v2, %s3014_s18  ;;  %761 = vrot.lane.b32.xlu0 %v3103_v0, %s3014_s18 }
  0x55   : > { %946 = vrot.lane.b32.xlu1 %v3148_v9, %s3013_s17  ;;  %944 = vrot.lane.b32.xlu0 %v3132_v6, %s3013_s17 }
  0x59   : > { %942 = vrot.lane.b32.xlu1 %v3136_v7, %s3013_s17  ;;  %759 = vrot.lane.b32.xlu0 %v3106_v1, %s3014_s18 }
  0x5d   : > { %757 = vrot.lane.b32.xlu1 %v3129_v5, %s3014_s18  ;;  %755 = vrot.lane.b32.xlu0 %v3116_v3, %s3014_s18 }
  0x61   : > { %940 = vrot.lane.b32.xlu1 %v3183_v16, %s3013_s17  ;;  %938 = vrot.lane.b32.xlu0 %v3145_v8, %s3013_s17 }
  0x65   : > { %936 = vrot.lane.b32.xlu1 %v3151_v10, %s3013_s17  ;;  %753 = vrot.lane.b32.xlu0 %v3126_v4, %s3014_s18 }
  0x69   : > { %751 = vrot.lane.b32.xlu1 %v3148_v9, %s3014_s18  ;;  %749 = vrot.lane.b32.xlu0 %v3132_v6, %s3014_s18 }
  0x6d   : > { %934 = vrot.lane.b32.xlu1 %v3202_v20, %s3013_s17  ;;  %932 = vrot.lane.b32.xlu0 %v3155_v11, %s3013_s17 }
  0x71   : > { %930 = vrot.lane.b32.xlu1 %v3164_v12, %s3013_s17  ;;  %747 = vrot.lane.b32.xlu0 %v3136_v7, %s3014_s18 }
  0x75   : > { %745 = vrot.lane.b32.xlu1 %v3183_v16, %s3014_s18  ;;  %743 = vrot.lane.b32.xlu0 %v3145_v8, %s3014_s18 }
  0x79   : > { %928 = vrot.lane.b32.xlu1 %v3218_v21, %s3013_s17  ;;  %926 = vrot.lane.b32.xlu0 %v3167_v13, %s3013_s17 }
  0x7d   : > { %924 = vrot.lane.b32.xlu1 %v3171_v14, %s3013_s17  ;;  %741 = vrot.lane.b32.xlu0 %v3151_v10, %s3014_s18 }
  0x81   : > { %739 = vrot.lane.b32.xlu1 %v3202_v20, %s3014_s18  ;;  %737 = vrot.lane.b32.xlu0 %v3155_v11, %s3014_s18 }
  0x85   : > { %922 = vrot.lane.b32.xlu1 %v3232_v23, %s3013_s17  ;;  %920 = vrot.lane.b32.xlu0 %v3180_v15, %s3013_s17 }
  0x87   : > { %v473_v26 = vpop.permute.xlu0 %472  ;;  %v471_v27 = vpop.permute.xlu1 %470 }
  0x88   : > { %v491_v32 = vsel %vm476_vm1, %v471_v27, %v473_v26 }
  0x89   : > { %918 = vrot.lane.b32.xlu1 %v3186_v17, %s3013_s17  ;;  %735 = vrot.lane.b32.xlu0 %v3164_v12, %s3014_s18 }
  0x8b   : > { %v475_v29 = vpop.permute.xlu0 %474  ;;  %v467_v30 = vpop.permute.xlu1 %466 }
  0x8c   : > { %v492_v31 = vsel %vm476_vm1, %v473_v26, %v475_v29 }
  0x8d   : > { %538 = vmatprep.subr.mxu0 %v492_v31  ;;  %733 = vrot.lane.b32.xlu1 %v3218_v21, %s3014_s18 }
  0x8e   : > { %731 = vrot.lane.b32.xlu0 %v3167_v13, %s3014_s18  ;;  %539 = vmatpush1.msra.mxu0 %v491_v32 }
  0x8f   : > { %v469_v34 = vpop.permute.xlu0 %468  ;;  %v465_v35 = vpop.permute.xlu1 %464 }
  0x90   : > { %v490_v36 = vsel %vm476_vm1, %v467_v30, %v469_v34  ;;  %v489_v37 = vsel %vm476_vm1, %v465_v35, %v467_v30 }
  0x91   : > { %540 = vmatprep.subr.mxu0 %v490_v36  ;;  %916 = vrot.lane.b32.xlu1 %v3251_v25, %s3013_s17 }
  0x92   : > { %914 = vrot.lane.b32.xlu0 %v3190_v18, %s3013_s17  ;;  %541 = vmatpush1.msra.mxu0 %v489_v37 }
  0x93   : > { %v463_v39 = vpop.permute.xlu1 %462  ;;  %v461_v40 = vpop.permute.xlu0 %460 }
  0x94   : > { %v488_v41 = vsel %vm476_vm1, %v461_v40, %v463_v39 }
  0x95   : > { %542 = vmatprep.subr.mxu0 %v488_v41  ;;  %912 = vrot.lane.b32.xlu1 %v3199_v19, %s3013_s17 }
  0x96   : > { %729 = vrot.lane.b32.xlu0 %v3171_v14, %s3014_s18 }
  0x97   : > { %v459_v42 = vpop.permute.xlu0 %458  ;;  %v455_v43 = vpop.permute.xlu1 %454 }
  0x98   : > { %v487_v44 = vsel %vm476_vm1, %v459_v42, %v461_v40  ;;  %v2790_v40 = vld [vmem:[%s3224_s16 + $0x20] sm:$0xff] }
  0x99   : > { %543 = vmatpush1.msra.mxu0 %v487_v44  ;;  %727 = vrot.lane.b32.xlu1 %v3232_v23, %s3014_s18  ;;  %v2791_v44 = vld [vmem:[%s3224_s16 + $0x28] sm:$0xff] }
  0x9a   : > { %725 = vrot.lane.b32.xlu0 %v3180_v15, %s3014_s18 }
  0x9b   : > { %v457_v45 = vpop.permute.xlu0 %456  ;;  %v453_v46 = vpop.permute.xlu1 %452 }
  0x9c   : > { %v486_v47 = vsel %vm476_vm1, %v455_v43, %v457_v45  ;;  %v485_v48 = vsel %vm476_vm1, %v453_v46, %v455_v43 }
  0x9d   : > { %544 = vmatprep.subr.mxu0 %v486_v47  ;;  %1348 = vrot.lane.b32.xlu1 %v3113_v2, %s3015_s19 }
  0x9e   : > { %1346 = vrot.lane.b32.xlu0 %v3103_v0, %s3015_s19  ;;  %545 = vmatpush1.msra.mxu0 %v485_v48  ;;  %v2792_v48 = vld [vmem:[%s3224_s16 + $0x30] sm:$0xff] }
  0x9f   : > { %v451_v49 = vpop.permute.xlu1 %450  ;;  %v449_v50 = vpop.permute.xlu0 %448 }
  0xa0   : > { %v484_v51 = vsel %vm476_vm1, %v449_v50, %v451_v49 }
  0xa1   : > { %546 = vmatprep.subr.mxu0 %v484_v51  ;;  %1344 = vrot.lane.b32.xlu1 %v3106_v1, %s3015_s19 }
  0xa2   : > { %723 = vrot.lane.b32.xlu0 %v3186_v17, %s3014_s18 }
  0xa3   : > { %v447_v52 = vpop.permute.xlu0 %446  ;;  %v443_v53 = vpop.permute.xlu1 %442 }
  0xa4   : > { %v483_v54 = vsel %vm476_vm1, %v447_v52, %v449_v50 }
  0xa5   : > { %547 = vmatpush1.msra.mxu0 %v483_v54  ;;  %721 = vrot.lane.b32.xlu1 %v3251_v25, %s3014_s18 }
  0xa6   : > { %719 = vrot.lane.b32.xlu0 %v3190_v18, %s3014_s18 }
  0xa7   : > { %v445_v55 = vpop.permute.xlu0 %444  ;;  %v441_v56 = vpop.permute.xlu1 %440 }
  0xa8   : > { %v482_v57 = vsel %vm476_vm1, %v443_v53, %v445_v55  ;;  %v481_v58 = vsel %vm476_vm1, %v441_v56, %v443_v53  ;;  %v2793_v53 = vld [vmem:[%s3224_s16 + $0x38] sm:$0xff] }
  0xa9   : > { %548 = vmatprep.subr.mxu0 %v482_v57  ;;  %1342 = vrot.lane.b32.xlu1 %v3129_v5, %s3015_s19 }
  0xaa   : > { %1340 = vrot.lane.b32.xlu0 %v3116_v3, %s3015_s19  ;;  %549 = vmatpush1.msra.mxu0 %v481_v58 }
  0xab   : > { %v439_v59 = vpop.permute.xlu1 %438  ;;  %v437_v60 = vpop.permute.xlu0 %436 }
  0xac   : > { %v480_v61 = vsel %vm476_vm1, %v437_v60, %v439_v59 }
  0xad   : > { %550 = vmatprep.subr.mxu0 %v480_v61  ;;  %1338 = vrot.lane.b32.xlu1 %v3126_v4, %s3015_s19 }
  0xae   : > { %717 = vrot.lane.b32.xlu0 %v3199_v19, %s3014_s18 }
  0xaf   : > { %v959_v62 = vpop.permute.xlu1 %958  ;;  %v957_v63 = vpop.permute.xlu0 %956 }
  0xb0   : > { %v976_v22 = vsel %vm960_vm2, %v957_v63, %v959_v62 }
  0xb1   : > { %1153 = vrot.lane.b32.xlu1 %v3113_v2, %s3016_s20  ;;  %1021 = vmatprep.subr.mxu1 %v976_v22 }
  0xb2   : > { %1151 = vrot.lane.b32.xlu0 %v3103_v0, %s3016_s20 }
  0xb3   : > { %v955_v26 = vpop.permute.xlu1 %954  ;;  %v435_v27 = vpop.permute.xlu0 %434 }
  0xb4   : > { %v975_v28 = vsel %vm960_vm2, %v955_v26, %v957_v63  ;;  %v479_v29 = vsel %vm476_vm1, %v435_v27, %v437_v60 }
  0xb5   : > { %551 = vmatpush1.msra.mxu0 %v479_v29  ;;  %1336 = vrot.lane.b32.xlu1 %v3148_v9, %s3015_s19 }
  0xb6   : > { %1334 = vrot.lane.b32.xlu0 %v3132_v6, %s3015_s19  ;;  %1022 = vmatpush1.msra.mxu1 %v975_v28 }
  0xb7   : > { %v433_v30 = vpop.permute.xlu1 %432  ;;  %v431_v31 = vpop.permute.xlu0 %430 }
  0xb8   : > { %v478_v32 = vsel %vm476_vm1, %v431_v31, %v433_v30 }
  0xb9   : > { %552 = vmatprep.subr.mxu0 %v478_v32  ;;  %1332 = vrot.lane.b32.xlu1 %v3136_v7, %s3015_s19 }
  0xba   : > { %1149 = vrot.lane.b32.xlu0 %v3106_v1, %s3016_s20 }
  0xbb   : > { %v953_v33 = vpop.permute.xlu1 %952  ;;  %v951_v34 = vpop.permute.xlu0 %950 }
  0xbc   : > { %v974_v35 = vsel %vm960_vm2, %v951_v34, %v953_v33 }
  0xbd   : > { %1147 = vrot.lane.b32.xlu1 %v3129_v5, %s3016_s20  ;;  %1023 = vmatprep.subr.mxu1 %v974_v35 }
  0xbe   : > { %1145 = vrot.lane.b32.xlu0 %v3116_v3, %s3016_s20 }
  0xbf   : > { %v949_v36 = vpop.permute.xlu1 %948  ;;  %v429_v37 = vpop.permute.xlu0 %428 }
  0xc0   : > { %v973_v38 = vsel %vm960_vm2, %v949_v36, %v951_v34  ;;  %v477_v39 = vsel %vm476_vm1, %v429_v37, %v431_v31 }
  0xc1   : > { %1330 = vrot.lane.b32.xlu1 %v3183_v16, %s3015_s19  ;;  %553 = vmatpush1.msra.mxu0 %v477_v39 }
  0xc2   : > { %1328 = vrot.lane.b32.xlu0 %v3145_v8, %s3015_s19  ;;  %1024 = vmatpush1.msra.mxu1 %v973_v38 }
  0xc3   : > { %v764_v41 = vpop.permute.xlu1 %763  ;;  %v762_v42 = vpop.permute.xlu0 %761  ;;  %2794 = vmatmul.mubr.msk.f32.vlgmr.msra.gmra.mxu0 %vm509_vm0, %v2790_v40 }
  0xc4   : > { %v781_v43 = vsel %vm765_vm3, %v762_v42, %v764_v41  ;;  %592 = vmatprep.mubr.f32.mxu0 %v4171_v24 }
  0xc5   : > { %1326 = vrot.lane.b32.xlu1 %v3151_v10, %s3015_s19  ;;  %826 = vmatprep.subr.mxu0 %v781_v43 }
  0xc6   : > { %1143 = vrot.lane.b32.xlu0 %v3126_v4, %s3016_s20 }
  0xc7   : > { %v947_v45 = vpop.permute.xlu1 %946  ;;  %v945_v46 = vpop.permute.xlu0 %944  ;;  %2795 = vmatmul.mubr.msk.f32.gmra.mxu0 %vm509_vm0, %v2791_v44 }
  0xc8   : > { %v972_v47 = vsel %vm960_vm2, %v945_v46, %v947_v45  ;;  %598 = vmatprep.mubr.f32.mxu0 %v4171_v24 }
  0xc9   : > { %1141 = vrot.lane.b32.xlu1 %v3148_v9, %s3016_s20  ;;  %1025 = vmatprep.subr.mxu1 %v972_v47 }
  0xca   : > { %1139 = vrot.lane.b32.xlu0 %v3132_v6, %s3016_s20 }
  0xcb   : > { %v943_v49 = vpop.permute.xlu1 %942  ;;  %v760_v50 = vpop.permute.xlu0 %759  ;;  %2796 = vmatmul.mubr.msk.f32.gmra.mxu0 %vm509_vm0, %v2792_v48 }
  0xcc   : > { %v971_v51 = vsel %vm960_vm2, %v943_v49, %v945_v46  ;;  %v780_v52 = vsel %vm765_vm3, %v760_v50, %v762_v42  ;;  %604 = vmatprep.mubr.f32.mxu0 %v4171_v24 }
  0xcd   : > { %1324 = vrot.lane.b32.xlu1 %v3202_v20, %s3015_s19  ;;  %827 = vmatpush1.msra.mxu0 %v780_v52 }
  0xce   : > { %1322 = vrot.lane.b32.xlu0 %v3155_v11, %s3015_s19  ;;  %1026 = vmatpush1.msra.mxu1 %v971_v51 }
  0xcf   : > { %v758_v54 = vpop.permute.xlu1 %757  ;;  %v756_v55 = vpop.permute.xlu0 %755  ;;  %2797 = vmatmul.mubr.msk.f32.gmra.mxu0 %vm509_vm0, %v2793_v53 }
  0xd0   : > { %v779_v56 = vsel %vm765_vm3, %v756_v55, %v758_v54  ;;  %874 = vmatprep.mubr.f32.mxu0 %v4171_v24 }
  0xd1   : > { %1320 = vrot.lane.b32.xlu1 %v3164_v12, %s3015_s19  ;;  %828 = vmatprep.subr.mxu0 %v779_v56 }
  0xd2   : > { %1137 = vrot.lane.b32.xlu0 %v3136_v7, %s3016_s20 }
  0xd3   : > { %v941_v57 = vpop.permute.xlu1 %940  ;;  %v939_v58 = vpop.permute.xlu0 %938 }
  0xd4   : > { %v970_v59 = vsel %vm960_vm2, %v939_v58, %v941_v57 }
  0xd5   : > { %1135 = vrot.lane.b32.xlu1 %v3183_v16, %s3016_s20  ;;  %1027 = vmatprep.subr.mxu1 %v970_v59 }
  0xd6   : > { %1133 = vrot.lane.b32.xlu0 %v3145_v8, %s3016_s20 }
  0xd7   : > { %v937_v60 = vpop.permute.xlu1 %936  ;;  %v754_v61 = vpop.permute.xlu0 %753 }
  0xd8   : > { %v969_v62 = vsel %vm960_vm2, %v937_v60, %v939_v58  ;;  %v778_v63 = vsel %vm765_vm3, %v754_v61, %v756_v55 }
  0xd9   : > { %1318 = vrot.lane.b32.xlu1 %v3218_v21, %s3015_s19  ;;  %829 = vmatpush1.msra.mxu0 %v778_v63 }
  0xda   : > { %1316 = vrot.lane.b32.xlu0 %v3167_v13, %s3015_s19  ;;  %1028 = vmatpush1.msra.mxu1 %v969_v62 }
  0xdb   : > { %v752_v22 = vpop.permute.xlu1 %751  ;;  %v750_v26 = vpop.permute.xlu0 %749 }
  0xdc   : > { %v777_v27 = vsel %vm765_vm3, %v750_v26, %v752_v22  ;;  %v2810_v22 = vld [vmem:[%s3224_s16 + $0x60] sm:$0xff] }
  0xdd   : > { %1314 = vrot.lane.b32.xlu1 %v3171_v14, %s3015_s19  ;;  %830 = vmatprep.subr.mxu0 %v777_v27 }
  0xde   : > { %1131 = vrot.lane.b32.xlu0 %v3151_v10, %s3016_s20 }
  0xdf   : > { %v935_v28 = vpop.permute.xlu1 %934  ;;  %v933_v29 = vpop.permute.xlu0 %932 }
  0xe0   : > { %v968_v30 = vsel %vm960_vm2, %v933_v29, %v935_v28 }
  0xe1   : > { %1129 = vrot.lane.b32.xlu1 %v3202_v20, %s3016_s20  ;;  %1029 = vmatprep.subr.mxu1 %v968_v30 }
  0xe2   : > { %1127 = vrot.lane.b32.xlu0 %v3155_v11, %s3016_s20 }
  0xe3   : > { %v931_v31 = vpop.permute.xlu1 %930  ;;  %v748_v32 = vpop.permute.xlu0 %747 }
  0xe4   : > { %v967_v33 = vsel %vm960_vm2, %v931_v31, %v933_v29  ;;  %v776_v34 = vsel %vm765_vm3, %v748_v32, %v750_v26  ;;  %v2811_v29 = vld [vmem:[%s3224_s16 + $0x68] sm:$0xff] }
  0xe5   : > { %1312 = vrot.lane.b32.xlu1 %v3232_v23, %s3015_s19  ;;  %831 = vmatpush1.msra.mxu0 %v776_v34 }
  0xe6   : > { %1310 = vrot.lane.b32.xlu0 %v3180_v15, %s3015_s19  ;;  %1030 = vmatpush1.msra.mxu1 %v967_v33  ;;  %v2812_v33 = vld [vmem:[%s3224_s16 + $0x70] sm:$0xff] }
  0xe7   : > { %v746_v35 = vpop.permute.xlu1 %745  ;;  %v744_v36 = vpop.permute.xlu0 %743 }
  0xe8   : > { %v775_v37 = vsel %vm765_vm3, %v744_v36, %v746_v35 }
  0xe9   : > { %1308 = vrot.lane.b32.xlu1 %v3186_v17, %s3015_s19  ;;  %832 = vmatprep.subr.mxu0 %v775_v37 }
  0xea   : > { %1125 = vrot.lane.b32.xlu0 %v3164_v12, %s3016_s20 }
  0xeb   : > { %v929_v38 = vpop.permute.xlu1 %928  ;;  %v927_v39 = vpop.permute.xlu0 %926 }
  0xec   : > { %v966_v40 = vsel %vm960_vm2, %v927_v39, %v929_v38  ;;  %v2813_v38 = vld [vmem:[%s3224_s16 + $0x78] sm:$0xff] }
  0xed   : > { %1123 = vrot.lane.b32.xlu1 %v3218_v21, %s3016_s20  ;;  %1031 = vmatprep.subr.mxu1 %v966_v40 }
  0xee   : > { %1121 = vrot.lane.b32.xlu0 %v3167_v13, %s3016_s20 }
  0xef   : > { %v925_v41 = vpop.permute.xlu1 %924  ;;  %v742_v42 = vpop.permute.xlu0 %741 }
  0xf0   : > { %v965_v43 = vsel %vm960_vm2, %v925_v41, %v927_v39  ;;  %v774_v44 = vsel %vm765_vm3, %v742_v42, %v744_v36 }
  0xf1   : > { %1306 = vrot.lane.b32.xlu1 %v3251_v25, %s3015_s19  ;;  %833 = vmatpush1.msra.mxu0 %v774_v44 }
  0xf2   : > { %1304 = vrot.lane.b32.xlu0 %v3190_v18, %s3015_s19  ;;  %1032 = vmatpush1.msra.mxu1 %v965_v43 }
  0xf3   : > { %v740_v45 = vpop.permute.xlu1 %739  ;;  %v738_v46 = vpop.permute.xlu0 %737 }
  0xf4   : > { %v773_v47 = vsel %vm765_vm3, %v738_v46, %v740_v45 }
  0xf5   : > { %1302 = vrot.lane.b32.xlu1 %v3199_v19, %s3015_s19  ;;  %834 = vmatprep.subr.mxu0 %v773_v47  ;;  %v2802_v47 = vld [vmem:[%s3224_s16 + $0x40] sm:$0xff] }
  0xf6   : > { %1119 = vrot.lane.b32.xlu0 %v3171_v14, %s3016_s20 }
  0xf7   : > { %v923_v48 = vpop.permute.xlu1 %922  ;;  %v921_v49 = vpop.permute.xlu0 %920 }
  0xf8   : > { %v964_v50 = vsel %vm960_vm2, %v921_v49, %v923_v48  ;;  %v2803_v48 = vld [vmem:[%s3224_s16 + $0x48] sm:$0xff] }
  0xf9   : > { %1117 = vrot.lane.b32.xlu1 %v3232_v23, %s3016_s20  ;;  %1033 = vmatprep.subr.mxu1 %v964_v50 }
  0xfa   : > { %1115 = vrot.lane.b32.xlu0 %v3180_v15, %s3016_s20 }
  0xfb   : > { %v919_v51 = vpop.permute.xlu1 %918  ;;  %v736_v52 = vpop.permute.xlu0 %735 }
  0xfc   : > { %v963_v53 = vsel %vm960_vm2, %v919_v51, %v921_v49  ;;  %v772_v54 = vsel %vm765_vm3, %v736_v52, %v738_v46  ;;  %v2804_v52 = vld [vmem:[%s3224_s16 + $0x50] sm:$0xff] }
  0xfd   : > { %1738 = vrot.lane.b32.xlu1 %v3113_v2, %s3017_s21  ;;  %835 = vmatpush1.msra.mxu0 %v772_v54 }
  0xfe   : > { %1736 = vrot.lane.b32.xlu0 %v3103_v0, %s3017_s21  ;;  %1034 = vmatpush1.msra.mxu1 %v963_v53 }
  0xff   : > { %v734_v55 = vpop.permute.xlu1 %733 }
 0x100   : > { %v732_v56 = vpop.permute.xlu0 %731 }
 0x101   : > { %1734 = vrot.lane.b32.xlu1 %v3106_v1, %s3017_s21  ;;  %v771_v57 = vsel %vm765_vm3, %v732_v56, %v734_v55 }
 0x102   : > { %1113 = vrot.lane.b32.xlu0 %v3186_v17, %s3016_s20  ;;  %836 = vmatprep.subr.mxu0 %v771_v57 }
 0x103   : > { %v917_v58 = vpop.permute.xlu1 %916 }
 0x104   : > { %v915_v59 = vpop.permute.xlu0 %914 }
 0x105   : > { %1111 = vrot.lane.b32.xlu1 %v3251_v25, %s3016_s20  ;;  %v962_v60 = vsel %vm960_vm2, %v915_v59, %v917_v58 }
 0x106   : > { %1109 = vrot.lane.b32.xlu0 %v3190_v18, %s3016_s20  ;;  %1035 = vmatprep.subr.mxu1 %v962_v60 }
 0x107   : > { %v913_v61 = vpop.permute.xlu1 %912 }
 0x108   : > { %v961_v62 = vsel %vm960_vm2, %v913_v61, %v915_v59  ;;  %v730_v63 = vpop.permute.xlu0 %729 }
 0x109   : > { %v770_v26 = vsel %vm765_vm3, %v730_v63, %v732_v56  ;;  %1732 = vrot.lane.b32.xlu1 %v3129_v5, %s3017_s21  ;;  %1036 = vmatpush1.msra.mxu1 %v961_v62  ;;  %v2805_v56 = vld [vmem:[%s3224_s16 + $0x58] sm:$0xff] }
 0x10a   : > { %1730 = vrot.lane.b32.xlu0 %v3116_v3, %s3017_s21  ;;  %837 = vmatpush1.msra.mxu0 %v770_v26 }
 0x10b   : > { %v728_v27 = vpop.permute.xlu1 %727  ;;  %2814 = vmatmul.mubr.msk.f32.vlgmr.msra.gmra.mxu1 %vm509_vm0, %v2810_v22 }
 0x10c   : > { %v726_v28 = vpop.permute.xlu0 %725  ;;  %1075 = vmatprep.mubr.f32.mxu1 %v4171_v24 }
 0x10d   : > { %1728 = vrot.lane.b32.xlu1 %v3126_v4, %s3017_s21  ;;  %v769_v30 = vsel %vm765_vm3, %v726_v28, %v728_v27 }
 0x10e   : > { %1107 = vrot.lane.b32.xlu0 %v3199_v19, %s3016_s20  ;;  %838 = vmatprep.subr.mxu0 %v769_v30 }
 0x10f   : > { %v1349_v31 = vpop.permute.xlu1 %1348  ;;  %2815 = vmatmul.mubr.msk.f32.gmra.mxu1 %vm509_vm0, %v2811_v29 }
 0x110   : > { %v1347_v32 = vpop.permute.xlu0 %1346  ;;  %1081 = vmatprep.mubr.f32.mxu1 %v4171_v24 }
 0x111   : > { %1543 = vrot.lane.b32.xlu1 %v3113_v2, %s3018_s22  ;;  %v1366_v34 = vsel %vm1350_vm4, %v1347_v32, %v1349_v31 }
 0x112   : > { %1541 = vrot.lane.b32.xlu0 %v3103_v0, %s3018_s22  ;;  %1411 = vmatprep.subr.mxu1 %v1366_v34 }
 0x113   : > { %v1345_v35 = vpop.permute.xlu1 %1344  ;;  %2816 = vmatmul.mubr.msk.f32.gmra.mxu1 %vm509_vm0, %v2812_v33 }
 0x114   : > { %v1365_v36 = vsel %vm1350_vm4, %v1345_v35, %v1347_v32  ;;  %v724_v37 = vpop.permute.xlu0 %723  ;;  %1087 = vmatprep.mubr.f32.mxu1 %v4171_v24 }
 0x115   : > { %v768_v39 = vsel %vm765_vm3, %v724_v37, %v726_v28  ;;  %1726 = vrot.lane.b32.xlu1 %v3148_v9, %s3017_s21  ;;  %1412 = vmatpush1.msra.mxu1 %v1365_v36 }
 0x116   : > { %1724 = vrot.lane.b32.xlu0 %v3132_v6, %s3017_s21  ;;  %839 = vmatpush1.msra.mxu0 %v768_v39 }
 0x117   : > { %v722_v0 = vpop.permute.xlu1 %721  ;;  %2817 = vmatmul.mubr.msk.f32.gmra.mxu1 %vm509_vm0, %v2813_v38 }
 0x118   : > { %v720_v2 = vpop.permute.xlu0 %719  ;;  %1459 = vmatprep.mubr.f32.mxu1 %v4171_v24 }
 0x119   : > { %1722 = vrot.lane.b32.xlu1 %v3136_v7, %s3017_s21  ;;  %v767_v40 = vsel %vm765_vm3, %v720_v2, %v722_v0 }
 0x11a   : > { %1539 = vrot.lane.b32.xlu0 %v3106_v1, %s3018_s22  ;;  %840 = vmatprep.subr.mxu0 %v767_v40 }
 0x11b   : > { %v1343_v41 = vpop.permute.xlu1 %1342 }
 0x11c   : > { %v1341_v42 = vpop.permute.xlu0 %1340 }
 0x11d   : > { %1537 = vrot.lane.b32.xlu1 %v3129_v5, %s3018_s22  ;;  %v1364_v43 = vsel %vm1350_vm4, %v1341_v42, %v1343_v41 }
 0x11e   : > { %1535 = vrot.lane.b32.xlu0 %v3116_v3, %s3018_s22  ;;  %1413 = vmatprep.subr.mxu1 %v1364_v43 }
 0x11f   : > { %v1339_v44 = vpop.permute.xlu1 %1338 }
 0x120   : > { %v1363_v45 = vsel %vm1350_vm4, %v1339_v44, %v1341_v42  ;;  %v718_v46 = vpop.permute.xlu0 %717 }
 0x121   : > { %v766_v1 = vsel %vm765_vm3, %v718_v46, %v720_v2  ;;  %1720 = vrot.lane.b32.xlu1 %v3183_v16, %s3017_s21  ;;  %1414 = vmatpush1.msra.mxu1 %v1363_v45  ;;  %v2947_v45 = vld [vmem:[%s3100_s11 + $0xb8] sm:$0xff]  ;;  %v2948_v46 = vld [vmem:[%s3100_s11 + $0xb0] sm:$0xff] }
 0x122   : > { %1718 = vrot.lane.b32.xlu0 %v3145_v8, %s3017_s21  ;;  %841 = vmatpush1.msra.mxu0 %v766_v1 }
 0x123   : > { %v1154_v3 = vpop.permute.xlu1 %1153  ;;  %2806 = vmatmul.mubr.msk.f32.vlgmr.msra.gmra.mxu0 %vm509_vm0, %v2802_v47 }
 0x124   : > { %v1152_v5 = vpop.permute.xlu0 %1151  ;;  %880 = vmatprep.mubr.f32.mxu0 %v4171_v24 }
 0x125   : > { %1716 = vrot.lane.b32.xlu1 %v3151_v10, %s3017_s21  ;;  %v1171_v49 = vsel %vm1155_vm5, %v1152_v5, %v1154_v3 }
 0x126   : > { %1533 = vrot.lane.b32.xlu0 %v3126_v4, %s3018_s22  ;;  %1216 = vmatprep.subr.mxu0 %v1171_v49 }
 0x127   : > { %v1337_v50 = vpop.permute.xlu1 %1336  ;;  %2807 = vmatmul.mubr.msk.f32.gmra.mxu0 %vm509_vm0, %v2803_v48 }
 0x128   : > { %v1335_v51 = vpop.permute.xlu0 %1334  ;;  %886 = vmatprep.mubr.f32.mxu0 %v4171_v24 }
 0x129   : > { %1531 = vrot.lane.b32.xlu1 %v3148_v9, %s3018_s22  ;;  %v1362_v53 = vsel %vm1350_vm4, %v1335_v51, %v1337_v50 }
 0x12a   : > { %1529 = vrot.lane.b32.xlu0 %v3132_v6, %s3018_s22  ;;  %1415 = vmatprep.subr.mxu1 %v1362_v53  ;;  %v2950_v53 = vld [vmem:[%s3100_s11 + $0xa0] sm:$0xff] }
 0x12b   : > { %v1333_v54 = vpop.permute.xlu1 %1332  ;;  %2808 = vmatmul.mubr.msk.f32.gmra.mxu0 %vm509_vm0, %v2804_v52 }
 0x12c   : > { %v1361_v4 = vsel %vm1350_vm4, %v1333_v54, %v1335_v51  ;;  %v1150_v55 = vpop.permute.xlu0 %1149  ;;  %892 = vmatprep.mubr.f32.mxu0 %v4171_v24 }
 0x12d   : > { %v1170_v57 = vsel %vm1155_vm5, %v1150_v55, %v1152_v5  ;;  %1714 = vrot.lane.b32.xlu1 %v3202_v20, %s3017_s21  ;;  %1416 = vmatpush1.msra.mxu1 %v1361_v4  ;;  %v2827_v4 = vld [vmem:[%s3224_s16 + $0xa8] sm:$0xff]  ;;  %v2952_v55 = vld [vmem:[%s3100_s11 + $0x90] sm:$0xff] }
 0x12e   : > { %1712 = vrot.lane.b32.xlu0 %v3155_v11, %s3017_s21  ;;  %1217 = vmatpush1.msra.mxu0 %v1170_v57 }
 0x12f   : > { %v1148_v6 = vpop.permute.xlu1 %1147  ;;  %2809 = vmatmul.mubr.msk.f32.gmra.mxu0 %vm509_vm0, %v2805_v56 }
 0x130   : > { %v1146_v9 = vpop.permute.xlu0 %1145  ;;  %1264 = vmatprep.mubr.f32.mxu0 %v4171_v24 }
 0x131   : > { %1710 = vrot.lane.b32.xlu1 %v3164_v12, %s3017_s21  ;;  %v1169_v58 = vsel %vm1155_vm5, %v1146_v9, %v1148_v6 }
 0x132   : > { %1527 = vrot.lane.b32.xlu0 %v3136_v7, %s3018_s22  ;;  %1218 = vmatprep.subr.mxu0 %v1169_v58  ;;  %v2953_v58 = vld [vmem:[%s3100_s11 + $0x88] sm:$0xff] }
 0x133   : > { %v1331_v59 = vpop.permute.xlu1 %1330 }
 0x134   : > { %v1329_v60 = vpop.permute.xlu0 %1328 }
 0x135   : > { %1525 = vrot.lane.b32.xlu1 %v3183_v16, %s3018_s22  ;;  %v1360_v61 = vsel %vm1350_vm4, %v1329_v60, %v1331_v59 }
 0x136   : > { %1523 = vrot.lane.b32.xlu0 %v3145_v8, %s3018_s22  ;;  %1417 = vmatprep.subr.mxu1 %v1360_v61 }
 0x137   : > { %v1327_v62 = vpop.permute.xlu1 %1326 }
 0x138   : > { %v1359_v63 = vsel %vm1350_vm4, %v1327_v62, %v1329_v60  ;;  %v1144_v22 = vpop.permute.xlu0 %1143  ;;  %v2954_v60 = vld [vmem:[%s3100_s11 + $0x80] sm:$0xff] }
 0x139   : > { %v1168_v26 = vsel %vm1155_vm5, %v1144_v22, %v1146_v9  ;;  %1708 = vrot.lane.b32.xlu1 %v3218_v21, %s3017_s21  ;;  %1418 = vmatpush1.msra.mxu1 %v1359_v63  ;;  %v2828_v9 = vld [vmem:[%s3224_s16 + $0xb0] sm:$0xff]  ;;  %v2829_v63 = vld [vmem:[%s3224_s16 + $0xb8] sm:$0xff] }
 0x13a   : > { %1706 = vrot.lane.b32.xlu0 %v3167_v13, %s3017_s21  ;;  %1219 = vmatpush1.msra.mxu0 %v1168_v26  ;;  %v2955_v26 = vld [vmem:[%s3100_s11 + $0x68] sm:$0xff] }
 0x13b   : > { %v1142_v7 = vpop.permute.xlu1 %1141 }
 0x13c   : > { %v1140_v16 = vpop.permute.xlu0 %1139 }
 0x13d   : > { %1704 = vrot.lane.b32.xlu1 %v3171_v14, %s3017_s21  ;;  %v1167_v8 = vsel %vm1155_vm5, %v1140_v16, %v1142_v7  ;;  %v2956_v7 = vld [vmem:[%s3100_s11 + $0x78] sm:$0xff] }
 0x13e   : > { %1521 = vrot.lane.b32.xlu0 %v3151_v10, %s3018_s22  ;;  %1220 = vmatprep.subr.mxu0 %v1167_v8 }
 0x13f   : > { %v1325_v27 = vpop.permute.xlu1 %1324 }
 0x140   : > { %v1323_v28 = vpop.permute.xlu0 %1322 }
 0x141   : > { %1519 = vrot.lane.b32.xlu1 %v3202_v20, %s3018_s22  ;;  %v1358_v29 = vsel %vm1350_vm4, %v1323_v28, %v1325_v27  ;;  %v2957_v27 = vld [vmem:[%s3100_s11 + $0x60] sm:$0xff] }
 0x142   : > { %1517 = vrot.lane.b32.xlu0 %v3155_v11, %s3018_s22  ;;  %1419 = vmatprep.subr.mxu1 %v1358_v29  ;;  %v2958_v29 = vld [vmem:[%s3100_s11 + $0x70] sm:$0xff] }
 0x143   : > { %v1321_v30 = vpop.permute.xlu1 %1320 }
 0x144   : > { %v1357_v31 = vsel %vm1350_vm4, %v1321_v30, %v1323_v28  ;;  %v1138_v32 = vpop.permute.xlu0 %1137 }
 0x145   : > { %v1166_v33 = vsel %vm1155_vm5, %v1138_v32, %v1140_v16  ;;  %1702 = vrot.lane.b32.xlu1 %v3232_v23, %s3017_s21  ;;  %1420 = vmatpush1.msra.mxu1 %v1357_v31  ;;  %v2959_v32 = vld [vmem:[%s3100_s11 + $0x58] sm:$0xff] }
 0x146   : > { %1700 = vrot.lane.b32.xlu0 %v3180_v15, %s3017_s21  ;;  %1221 = vmatpush1.msra.mxu0 %v1166_v33 }
 0x147   : > { %v1136_v10 = vpop.permute.xlu1 %1135 }
 0x148   : > { %v1134_v20 = vpop.permute.xlu0 %1133 }
 0x149   : > { %1698 = vrot.lane.b32.xlu1 %v3186_v17, %s3017_s21  ;;  %v1165_v11 = vsel %vm1155_vm5, %v1134_v20, %v1136_v10  ;;  %v2960_v10 = vld [vmem:[%s3100_s11 + $0x50] sm:$0xff] }
 0x14a   : > { %1515 = vrot.lane.b32.xlu0 %v3164_v12, %s3018_s22  ;;  %1222 = vmatprep.subr.mxu0 %v1165_v11 }
 0x14b   : > { %v1319_v34 = vpop.permute.xlu1 %1318 }
 0x14c   : > { %v1317_v35 = vpop.permute.xlu0 %1316 }
 0x14d   : > { %1513 = vrot.lane.b32.xlu1 %v3218_v21, %s3018_s22  ;;  %v1356_v36 = vsel %vm1350_vm4, %v1317_v35, %v1319_v34 }
 0x14e   : > { %1511 = vrot.lane.b32.xlu0 %v3167_v13, %s3018_s22  ;;  %1421 = vmatprep.subr.mxu1 %v1356_v36 }
 0x14f   : > { %v1315_v37 = vpop.permute.xlu1 %1314 }
 0x150   : > { %v1355_v38 = vsel %vm1350_vm4, %v1315_v37, %v1317_v35  ;;  %v1132_v39 = vpop.permute.xlu0 %1131  ;;  %v2818_v35 = vld [vmem:[%s3224_s16 + $0x80] sm:$0xff]  ;;  %v2961_v37 = vld [vmem:[%s3100_s11 + $0x38] sm:$0xff] }
 0x151   : > { %v1164_v0 = vsel %vm1155_vm5, %v1132_v39, %v1134_v20  ;;  %1696 = vrot.lane.b32.xlu1 %v3251_v25, %s3017_s21  ;;  %1422 = vmatpush1.msra.mxu1 %v1355_v38  ;;  %v2962_v38 = vld [vmem:[%s3100_s11 + $0x48] sm:$0xff] }
 0x152   : > { %1694 = vrot.lane.b32.xlu0 %v3190_v18, %s3017_s21  ;;  %1223 = vmatpush1.msra.mxu0 %v1164_v0 }
 0x153   : > { %v1130_v12 = vpop.permute.xlu1 %1129 }
 0x154   : > { %v1128_v21 = vpop.permute.xlu0 %1127 }
 0x155   : > { %1692 = vrot.lane.b32.xlu1 %v3199_v19, %s3017_s21  ;;  %v1163_v13 = vsel %vm1155_vm5, %v1128_v21, %v1130_v12  ;;  %v2819_v12 = vld [vmem:[%s3224_s16 + $0x88] sm:$0xff]  ;;  %s3021_s21 = smov 96  }
 0x156   : > { %1509 = vrot.lane.b32.xlu0 %v3171_v14, %s3018_s22  ;;  %1224 = vmatprep.subr.mxu0 %v1163_v13 }
 0x157   : > { %v1313_v2 = vpop.permute.xlu1 %1312 }
 0x158   : > { %v1311_v40 = vpop.permute.xlu0 %1310 }
 0x159   : > { %1507 = vrot.lane.b32.xlu1 %v3232_v23, %s3018_s22  ;;  %v1354_v41 = vsel %vm1350_vm4, %v1311_v40, %v1313_v2  ;;  %v2964_v2 = vld [vmem:[%s3100_s11 + $0x40] sm:$0xff] }
 0x15a   : > { %1505 = vrot.lane.b32.xlu0 %v3180_v15, %s3018_s22  ;;  %1423 = vmatprep.subr.mxu1 %v1354_v41  ;;  %v2949_v15 = vld [vmem:[%s3100_s11 + $0xa8] sm:$0xff] }
 0x15b   : > { %v1309_v42 = vpop.permute.xlu1 %1308 }
 0x15c   : > { %v1353_v43 = vsel %vm1350_vm4, %v1309_v42, %v1311_v40  ;;  %v1126_v44 = vpop.permute.xlu0 %1125  ;;  %v2820_v42 = vld [vmem:[%s3224_s16 + $0x90] sm:$0xff] }
 0x15d   : > { %v1162_v14 = vsel %vm1155_vm5, %v1126_v44, %v1128_v21  ;;  %1933 = vrot.lane.b32.xlu1 %v2947_v45, %s3019_s23  ;;  %1424 = vmatpush1.msra.mxu1 %v1353_v43  ;;  %v2963_v21 = vld [vmem:[%s3100_s11 + $0x30] sm:$0xff]  ;;  %v2965_v43 = vld [vmem:[%s3100_s11 + $0x28] sm:$0xff] }
 0x15e   : > { %1931 = vrot.lane.b32.xlu0 %v2948_v46, %s3019_s23  ;;  %1225 = vmatpush1.msra.mxu0 %v1162_v14  ;;  %v2966_v14 = vld [vmem:[%s3100_s11 + $0x20] sm:$0xff] }
 0x15f   : > { %v1124_v23 = vpop.permute.xlu1 %1123 }
 0x160   : > { %v1122_v47 = vpop.permute.xlu0 %1121 }
 0x161   : > { %1929 = vrot.lane.b32.xlu1 %v2949_v15, %s3019_s23  ;;  %v1161_v1 = vsel %vm1155_vm5, %v1122_v47, %v1124_v23 }
 0x162   : > { %1503 = vrot.lane.b32.xlu0 %v3186_v17, %s3018_s22  ;;  %1226 = vmatprep.subr.mxu0 %v1161_v1  ;;  %v2826_v17 = vld [vmem:[%s3224_s16 + $0xa0] sm:$0xff]  ;;  %v2967_v1 = vld [vmem:[%s3100_s11 + $0x8] sm:$0xff] }
 0x163   : > { %v1307_v3 = vpop.permute.xlu1 %1306 }
 0x164   : > { %v1305_v5 = vpop.permute.xlu0 %1304 }
 0x165   : > { %1501 = vrot.lane.b32.xlu1 %v3251_v25, %s3018_s22  ;;  %v1352_v48 = vsel %vm1350_vm4, %v1305_v5, %v1307_v3  ;;  %v2951_v25 = vld [vmem:[%s3100_s11 + $0x98] sm:$0xff] }
 0x166   : > { %1499 = vrot.lane.b32.xlu0 %v3190_v18, %s3018_s22  ;;  %1425 = vmatprep.subr.mxu1 %v1352_v48  ;;  %v2968_v3 = vld [vmem:[%s3100_s11 + $0x18] sm:$0xff]  ;;  %v3020_v48 = vmov 0  }
 0x167   : > { %v1303_v49 = vpop.permute.xlu1 %1302  ;;  %2946 = vset.pattern.permute.xlu1 %v3020_v48  ;;  %2945 = vset.pattern.permute.xlu0 %v3020_v48 }
 0x168   : > { %v1351_v50 = vsel %vm1350_vm4, %v1303_v49, %v1305_v5  ;;  %v1120_v51 = vpop.permute.xlu0 %1119 }
 0x169   : > { %v1160_v52 = vsel %vm1155_vm5, %v1120_v51, %v1122_v47  ;;  %1927 = vrot.lane.b32.xlu1 %v2950_v53, %s3019_s23  ;;  %1426 = vmatpush1.msra.mxu1 %v1351_v50  ;;  %v2821_v47 = vld [vmem:[%s3224_s16 + $0x98] sm:$0xff]  ;;  %v2969_v50 = vld [vmem:[%s3100_s11] sm:$0xff] }
 0x16a   : > { %1925 = vrot.lane.b32.xlu0 %v2951_v25, %s3019_s23  ;;  %1227 = vmatpush1.msra.mxu0 %v1160_v52  ;;  %v2079_v52 = vld [vmem:[%s4166_s3 + $0x10] sm:$0xff]  ;;  %v2080_v25 = vld [vmem:[%s4166_s3 + $0x18] sm:$0xff] }
 0x16b   : > { %v1118_v18 = vpop.permute.xlu1 %1117  ;;  %2830 = vmatmul.mubr.msk.f32.vlgmr.msra.gmra.mxu1 %vm509_vm0, %v2826_v17  ;;  %v2970_v17 = vld [vmem:[%s3100_s11 + $0x10] sm:$0xff]  ;;  %s3884_s11 = sadd.s32 %s2784_s13, %s2783_s12 }
 0x16c   : > { %v1116_v54 = vpop.permute.xlu0 %1115  ;;  %1465 = vmatprep.mubr.f32.mxu1 %v4171_v24  ;;  %s2785_s14 = sshll.u32 %s3884_s11, 3 }
 0x16d   : > { %1923 = vrot.lane.b32.xlu1 %v2952_v55, %s3019_s23  ;;  %v1159_v56 = vsel %vm1155_vm5, %v1116_v54, %v1118_v18  ;;  %s4119_s18 = scalar_lea.vmem %s4170_s7, %s2785_s14 }
 0x16e   : > { %1497 = vrot.lane.b32.xlu0 %v3199_v19, %s3018_s22  ;;  %1228 = vmatprep.subr.mxu0 %v1159_v56  ;;  %v2077_v56 = vld [vmem:[%s4166_s3] sm:$0xff] }
 0x16f   : > { %v1739_v57 = vpop.permute.xlu1 %1738  ;;  %2831 = vmatmul.mubr.msk.f32.gmra.mxu1 %vm509_vm0, %v2827_v4  ;;  %v2078_v4 = vld [vmem:[%s4166_s3 + $0x8] sm:$0xff] }
 0x170   : > { %v1737_v6 = vpop.permute.xlu0 %1736  ;;  %1471 = vmatprep.mubr.f32.mxu1 %v4171_v24 }
 0x171   : > { %1921 = vrot.lane.b32.xlu1 %v2953_v58, %s3019_s23  ;;  %v1756_v59 = vsel %vm1740_vm6, %v1737_v6, %v1739_v57  ;;  %v3765_v58 = vld [vmem:[%s4167_s4] sm:$0xff] }
 0x172   : > { %1919 = vrot.lane.b32.xlu0 %v2954_v60, %s3019_s23  ;;  %1801 = vmatprep.subr.mxu1 %v1756_v59  ;;  %4197 = vst [vmem:[#allocation2_spill] sm:$0xff] %v3765_v58  ;;  %v3770_v60 = vld [vmem:[%s4167_s4 + $0x8] sm:$0xff] }
 0x173   : > { %v1735_v19 = vpop.permute.xlu1 %1734  ;;  %2832 = vmatmul.mubr.msk.f32.gmra.mxu1 %vm509_vm0, %v2828_v9  ;;  %4198 = vst [vmem:[#allocation3_spill] sm:$0xff] %v3770_v60 }
 0x174   : > { %v1755_v61 = vsel %vm1740_vm6, %v1735_v19, %v1737_v6  ;;  %v1114_v62 = vpop.permute.xlu0 %1113  ;;  %1477 = vmatprep.mubr.f32.mxu1 %v4171_v24 }
 0x175   : > { %v1158_v22 = vsel %vm1155_vm5, %v1114_v62, %v1116_v54  ;;  %1913 = vrot.lane.b32.xlu1 %v2955_v26, %s3019_s23  ;;  %1802 = vmatpush1.msra.mxu1 %v1755_v61  ;;  %v3778_v62 = vld [vmem:[%s4167_s4 + $0x10] sm:$0xff] }
 0x176   : > { %1917 = vrot.lane.b32.xlu0 %v2956_v7, %s3019_s23  ;;  %1229 = vmatpush1.msra.mxu0 %v1158_v22  ;;  %4199 = vst [vmem:[#allocation4_spill] sm:$0xff] %v3778_v62  ;;  %v3783_v22 = vld [vmem:[%s4167_s4 + $0x18] sm:$0xff] }
 0x177   : > { %v1112_v16 = vpop.permute.xlu1 %1111  ;;  %2833 = vmatmul.mubr.msk.f32.gmra.mxu1 %vm509_vm0, %v2829_v63  ;;  %4200 = vst [vmem:[#allocation5_spill] sm:$0xff] %v3783_v22 }
 0x178   : > { %v1110_v8 = vpop.permute.xlu0 %1109  ;;  %1849 = vmatprep.mubr.f32.mxu1 %v4171_v24 }
 0x179   : > { %1911 = vrot.lane.b32.xlu1 %v2957_v27, %s3019_s23  ;;  %v1157_v28 = vsel %vm1155_vm5, %v1110_v8, %v1112_v16  ;;  %v2120_v16 = vld [vmem:[%s4168_s5 + $0x18] sm:$0xff]  ;;  %v2119_v27 = vld [vmem:[%s4168_s5 + $0x10] sm:$0xff] }
 0x17a   : > { %1915 = vrot.lane.b32.xlu0 %v2958_v29, %s3019_s23  ;;  %1230 = vmatprep.subr.mxu0 %v1157_v28 }
 0x17b   : > { %v1733_v30 = vpop.permute.xlu1 %1732 }
 0x17c   : > { %v1731_v31 = vpop.permute.xlu0 %1730 }
 0x17d   : > { %1909 = vrot.lane.b32.xlu1 %v2959_v32, %s3019_s23  ;;  %v1754_v33 = vsel %vm1740_vm6, %v1731_v31, %v1733_v30 }
 0x17e   : > { %1907 = vrot.lane.b32.xlu0 %v2960_v10, %s3019_s23  ;;  %1803 = vmatprep.subr.mxu1 %v1754_v33  ;;  %v2118_v33 = vld [vmem:[%s4168_s5 + $0x8] sm:$0xff] }
 0x17f   : > { %v1729_v20 = vpop.permute.xlu1 %1728 }
 0x180   : > { %v1753_v11 = vsel %vm1740_vm6, %v1729_v20, %v1731_v31  ;;  %v1108_v34 = vpop.permute.xlu0 %1107  ;;  %v2124_v31 = vld [vmem:[%s4169_s6 + $0x18] sm:$0xff] }
 0x181   : > { %v1156_v36 = vsel %vm1155_vm5, %v1108_v34, %v1110_v8  ;;  %1901 = vrot.lane.b32.xlu1 %v2961_v37, %s3019_s23  ;;  %1804 = vmatpush1.msra.mxu1 %v1753_v11  ;;  %v2123_v11 = vld [vmem:[%s4169_s6 + $0x10] sm:$0xff] }
 0x182   : > { %1905 = vrot.lane.b32.xlu0 %v2962_v38, %s3019_s23  ;;  %1231 = vmatpush1.msra.mxu0 %v1156_v36  ;;  %v2122_v38 = vld [vmem:[%s4169_s6 + $0x8] sm:$0xff] }
 0x183   : > { %v1544_v39 = vpop.permute.xlu1 %1543  ;;  %2822 = vmatmul.mubr.msk.f32.vlgmr.msra.gmra.mxu0 %vm509_vm0, %v2818_v35  ;;  %v2117_v35 = vld [vmem:[%s4168_s5] sm:$0xff] }
 0x184   : > { %v1542_v0 = vpop.permute.xlu0 %1541  ;;  %1270 = vmatprep.mubr.f32.mxu0 %v4171_v24 }
 0x185   : > { %1899 = vrot.lane.b32.xlu1 %v2963_v21, %s3019_s23  ;;  %v1561_v13 = vsel %vm1545_vm7, %v1542_v0, %v1544_v39 }
 0x186   : > { %1903 = vrot.lane.b32.xlu0 %v2964_v2, %s3019_s23  ;;  %1606 = vmatprep.subr.mxu0 %v1561_v13 }
 0x187   : > { %v1727_v40 = vpop.permute.xlu1 %1726  ;;  %2823 = vmatmul.mubr.msk.f32.gmra.mxu0 %vm509_vm0, %v2819_v12 }
 0x188   : > { %v1725_v41 = vpop.permute.xlu0 %1724  ;;  %1276 = vmatprep.mubr.f32.mxu0 %v4171_v24 }
 0x189   : > { %1897 = vrot.lane.b32.xlu1 %v2965_v43, %s3019_s23  ;;  %v1752_v44 = vsel %vm1740_vm6, %v1725_v41, %v1727_v40 }
 0x18a   : > { %1895 = vrot.lane.b32.xlu0 %v2966_v14, %s3019_s23  ;;  %1805 = vmatprep.subr.mxu1 %v1752_v44 }
 0x18b   : > { %v1723_v45 = vpop.permute.xlu1 %1722  ;;  %2824 = vmatmul.mubr.msk.f32.gmra.mxu0 %vm509_vm0, %v2820_v42 }
 0x18c   : > { %v1751_v46 = vsel %vm1740_vm6, %v1723_v45, %v1725_v41  ;;  %v1540_v23 = vpop.permute.xlu0 %1539  ;;  %1282 = vmatprep.mubr.f32.mxu0 %v4171_v24 }
 0x18d   : > { %v1560_v15 = vsel %vm1545_vm7, %v1540_v23, %v1542_v0  ;;  %1889 = vrot.lane.b32.xlu1 %v2967_v1, %s3019_s23  ;;  %1806 = vmatpush1.msra.mxu1 %v1751_v46  ;;  %v2121_v0 = vld [vmem:[%s4169_s6] sm:$0xff] }
 0x18e   : > { %1893 = vrot.lane.b32.xlu0 %v2968_v3, %s3019_s23  ;;  %1607 = vmatpush1.msra.mxu0 %v1560_v15 }
 0x18f   : > { %v1538_v5 = vpop.permute.xlu1 %1537  ;;  %2825 = vmatmul.mubr.msk.f32.gmra.mxu0 %vm509_vm0, %v2821_v47 }
 0x190   : > { %v1536_v49 = vpop.permute.xlu0 %1535  ;;  %1654 = vmatprep.mubr.f32.mxu0 %v4171_v24 }
 0x191   : > { %1887 = vrot.lane.b32.xlu1 %v2969_v50, %s3019_s23  ;;  %v1559_v51 = vsel %vm1545_vm7, %v1536_v49, %v1538_v5  ;;  %v2842_v50 = vld [vmem:[%s3224_s16 + $0xe0] sm:$0xff] }
 0x192   : > { %1891 = vrot.lane.b32.xlu0 %v2970_v17, %s3019_s23  ;;  %1608 = vmatprep.subr.mxu0 %v1559_v51 }
 0x193   : > { %v1721_v53 = vpop.permute.xlu1 %1720 }
 0x194   : > { %v1719_v18 = vpop.permute.xlu0 %1718 }
 0x195   : > { %v1750_v54 = vsel %vm1740_vm6, %v1719_v18, %v1721_v53  ;;  %2093 = vperm.xlu1 %2946, %v2079_v52  }
 0x196   : > { %1807 = vmatprep.subr.mxu1 %v1750_v54  ;;  %2098 = vperm.xlu0 %2945, %v2080_v25   ;;  %v2843_v25 = vld [vmem:[%s3224_s16 + $0xe8] sm:$0xff] }
 0x197   : > { %v1717_v55 = vpop.permute.xlu1 %1716 }
 0x198   : > { %v1749_v57 = vsel %vm1740_vm6, %v1717_v55, %v1719_v18  ;;  %v1534_v6 = vpop.permute.xlu0 %1533  ;;  %v2844_v55 = vld [vmem:[%s3224_s16 + $0xf0] sm:$0xff] }
 0x199   : > { %v1558_v9 = vsel %vm1545_vm7, %v1534_v6, %v1536_v49  ;;  %1808 = vmatpush1.msra.mxu1 %v1749_v57  ;;  %2088 = vperm.xlu1 %2946, %v2078_v4  }
 0x19a   : > { %1609 = vmatpush1.msra.mxu0 %v1558_v9  ;;  %2083 = vperm.xlu0 %2945, %v2077_v56   ;;  %v2845_v9 = vld [vmem:[%s3224_s16 + $0xf8] sm:$0xff] }
 0x19b   : > { %v1532_v59 = vpop.permute.xlu1 %1531 }
 0x19c   : > { %v1530_v19 = vpop.permute.xlu0 %1529 }
 0x19d   : > { %v1557_v61 = vsel %vm1545_vm7, %v1530_v19, %v1532_v59  ;;  %2133 = vrot.lane.b32.xlu1 %v3765_v58, %s3021_s21 }
 0x19e   : > { %1610 = vmatprep.subr.mxu0 %v1557_v61  ;;  %2135 = vrot.lane.b32.xlu0 %v3770_v60, %s3021_s21 }
 0x19f   : > { %v1715_v63 = vpop.permute.xlu1 %1714 }
 0x1a0   : > { %v1713_v26 = vpop.permute.xlu0 %1712 }
 0x1a1   : > { %v1748_v7 = vsel %vm1740_vm6, %v1713_v26, %v1715_v63  ;;  %2137 = vrot.lane.b32.xlu1 %v3778_v62, %s3021_s21 }
 0x1a2   : > { %1809 = vmatprep.subr.mxu1 %v1748_v7  ;;  %2139 = vrot.lane.b32.xlu0 %v3783_v22, %s3021_s21 }
 0x1a3   : > { %v1711_v8 = vpop.permute.xlu1 %1710 }
 0x1a4   : > { %v1747_v28 = vsel %vm1740_vm6, %v1711_v8, %v1713_v26  ;;  %v1528_v29 = vpop.permute.xlu0 %1527 }
 0x1a5   : > { %v1556_v30 = vsel %vm1545_vm7, %v1528_v29, %v1530_v19  ;;  %1810 = vmatpush1.msra.mxu1 %v1747_v28  ;;  %2353 = vperm.xlu1 %2946, %v2120_v16  }
 0x1a6   : > { %1611 = vmatpush1.msra.mxu0 %v1556_v30  ;;  %2348 = vperm.xlu0 %2945, %v2119_v27  }
 0x1a7   : > { %v1526_v32 = vpop.permute.xlu1 %1525 }
 0x1a8   : > { %v1524_v10 = vpop.permute.xlu0 %1523 }
 0x1a9   : > { %v1555_v20 = vsel %vm1545_vm7, %v1524_v10, %v1526_v32  ;;  %2381 = vperm.xlu1 %2946, %v2124_v31   ;;  %v2834_v31 = vld [vmem:[%s3224_s16 + $0xc0] sm:$0xff] }
 0x1aa   : > { %1612 = vmatprep.subr.mxu0 %v1555_v20  ;;  %2343 = vperm.xlu0 %2945, %v2118_v33   ;;  %v2835_v20 = vld [vmem:[%s3224_s16 + $0xc8] sm:$0xff] }
 0x1ab   : > { %v1709_v34 = vpop.permute.xlu1 %1708 }
 0x1ac   : > { %v1707_v36 = vpop.permute.xlu0 %1706 }
 0x1ad   : > { %v1746_v37 = vsel %vm1740_vm6, %v1707_v36, %v1709_v34  ;;  %2376 = vperm.xlu1 %2946, %v2123_v11  }
 0x1ae   : > { %1811 = vmatprep.subr.mxu1 %v1746_v37  ;;  %2338 = vperm.xlu0 %2945, %v2117_v35  }
 0x1af   : > { %v1705_v39 = vpop.permute.xlu1 %1704 }
 0x1b0   : > { %v1745_v12 = vsel %vm1740_vm6, %v1705_v39, %v1707_v36  ;;  %v1522_v21 = vpop.permute.xlu0 %1521  ;;  %v2836_v36 = vld [vmem:[%s3224_s16 + $0xd0] sm:$0xff] }
 0x1b1   : > { %v1554_v13 = vsel %vm1545_vm7, %v1522_v21, %v1524_v10  ;;  %1812 = vmatpush1.msra.mxu1 %v1745_v12  ;;  %2371 = vperm.xlu1 %2946, %v2122_v38   ;;  %v2837_v12 = vld [vmem:[%s3224_s16 + $0xd8] sm:$0xff] }
 0x1b2   : > { %1613 = vmatpush1.msra.mxu0 %v1554_v13  ;;  %2366 = vperm.xlu0 %2945, %v2121_v0  }
 0x1b3   : > { %v1520_v2 = vpop.permute.xlu1 %1519 }
 0x1b4   : > { %v1518_v40 = vpop.permute.xlu0 %1517 }
 0x1b5   : > { %v1553_v41 = vsel %vm1545_vm7, %v1518_v40, %v1520_v2 }
 0x1b6   : > { %1614 = vmatprep.subr.mxu0 %v1553_v41 }
 0x1b7   : > { %v1703_v42 = vpop.permute.xlu1 %1702 }
 0x1b8   : > { %v1701_v43 = vpop.permute.xlu0 %1700 }
 0x1b9   : > { %v1744_v44 = vsel %vm1740_vm6, %v1701_v43, %v1703_v42 }
 0x1ba   : > { %1813 = vmatprep.subr.mxu1 %v1744_v44 }
 0x1bb   : > { %v1699_v14 = vpop.permute.xlu1 %1698 }
 0x1bc   : > { %v1743_v45 = vsel %vm1740_vm6, %v1699_v14, %v1701_v43  ;;  %v1516_v46 = vpop.permute.xlu0 %1515 }
 0x1bd   : > { %v1552_v23 = vsel %vm1545_vm7, %v1516_v46, %v1518_v40  ;;  %1814 = vmatpush1.msra.mxu1 %v1743_v45 }
 0x1be   : > { %1615 = vmatpush1.msra.mxu0 %v1552_v23 }
 0x1bf   : > { %v1514_v47 = vpop.permute.xlu1 %1513 }
 0x1c0   : > { %v1512_v15 = vpop.permute.xlu0 %1511 }
 0x1c1   : > { %v1551_v1 = vsel %vm1545_vm7, %v1512_v15, %v1514_v47 }
 0x1c2   : > { %1616 = vmatprep.subr.mxu0 %v1551_v1 }
 0x1c3   : > { %v1697_v3 = vpop.permute.xlu1 %1696 }
 0x1c4   : > { %v1695_v5 = vpop.permute.xlu0 %1694 }
 0x1c5   : > { %v1742_v48 = vsel %vm1740_vm6, %v1695_v5, %v1697_v3 }
 0x1c6   : > { %1815 = vmatprep.subr.mxu1 %v1742_v48 }
 0x1c7   : > { %v1693_v49 = vpop.permute.xlu1 %1692 }
 0x1c8   : > { %v1741_v51 = vsel %vm1740_vm6, %v1693_v49, %v1695_v5  ;;  %v1510_v17 = vpop.permute.xlu0 %1509 }
 0x1c9   : > { %v1550_v52 = vsel %vm1545_vm7, %v1510_v17, %v1512_v15  ;;  %1816 = vmatpush1.msra.mxu1 %v1741_v51  ;;  %v2850_v17 = vld [vmem:[%s3224_s16 + $0x100] sm:$0xff] }
 0x1ca   : > { %1617 = vmatpush1.msra.mxu0 %v1550_v52  ;;  %2846 = vmatmul.mubr.msk.f32.vlgmr.msra.gmra.mxu1 %vm509_vm0, %v2842_v50  ;;  %v2852_v52 = vld [vmem:[%s3224_s16 + $0x110] sm:$0xff] }
 0x1cb   : > { %v1508_v53 = vpop.permute.xlu1 %1507  ;;  %1855 = vmatprep.mubr.f32.mxu1 %v4171_v24 }
 0x1cc   : > { %v1506_v18 = vpop.permute.xlu0 %1505 }
 0x1cd   : > { %v1549_v54 = vsel %vm1545_vm7, %v1506_v18, %v1508_v53  ;;  %v2851_v53 = vld [vmem:[%s3224_s16 + $0x108] sm:$0xff] }
 0x1ce   : > { %1618 = vmatprep.subr.mxu0 %v1549_v54  ;;  %2847 = vmatmul.mubr.msk.f32.gmra.mxu1 %vm509_vm0, %v2843_v25  ;;  %v2853_v25 = vld [vmem:[%s3224_s16 + $0x118] sm:$0xff]  ;;  %s340_s16 = scalar_lea.vmem %s4164_s1, %s2785_s14 }
 0x1cf   : > { %v1934_v4 = vpop.permute.xlu1 %1933  ;;  %1861 = vmatprep.mubr.f32.mxu1 %v4171_v24  ;;  %v3894_v54 = vld [vmem:[%s340_s16 + $0x30] sm:$0xff] }
 0x1d0   : > { %v1932_v56 = vpop.permute.xlu0 %1931  ;;  %4202 = vst [vmem:[#allocation7_spill] sm:$0xff] %v3894_v54 }
 0x1d1   : > { %v1951_v57 = vsel %vm1935_vm8, %v1932_v56, %v1934_v4  ;;  %v3896_v4 = vld [vmem:[%s340_s16 + $0x28] sm:$0xff] }
 0x1d2   : > { %2876 = vmatprep.subr.mxu1 %v1951_v57  ;;  %2848 = vmatmul.mubr.msk.f32.gmra.mxu1 %vm509_vm0, %v2844_v55  ;;  %4203 = vst [vmem:[#allocation8_spill] sm:$0xff] %v3896_v4  ;;  %v3899_v55 = vld [vmem:[%s340_s16 + $0x20] sm:$0xff] }
 0x1d3   : > { %v1930_v6 = vpop.permute.xlu1 %1929  ;;  %1867 = vmatprep.mubr.f32.mxu1 %v4171_v24  ;;  %4204 = vst [vmem:[#allocation9_spill] sm:$0xff] %v3899_v55 }
 0x1d4   : > { %v1950_v59 = vsel %vm1935_vm8, %v1930_v6, %v1932_v56  ;;  %v1504_v19 = vpop.permute.xlu0 %1503  ;;  %v3902_v56 = vld [vmem:[%s340_s16 + $0x18] sm:$0xff] }
 0x1d5   : > { %v1548_v61 = vsel %vm1545_vm7, %v1504_v19, %v1506_v18  ;;  %2884 = vmatpush1.msra.mxu1 %v1950_v59  ;;  %v3892_v18 = vld [vmem:[%s340_s16 + $0x38] sm:$0xff]  ;;  %4205 = vst [vmem:[#allocation10_spill] sm:$0xff] %v3902_v56 }
 0x1d6   : > { %1619 = vmatpush1.msra.mxu0 %v1548_v61  ;;  %2849 = vmatmul.mubr.msk.f32.gmra.mxu1 %vm509_vm0, %v2845_v9  ;;  %4201 = vst [vmem:[#allocation6_spill] sm:$0xff] %v3892_v18  ;;  %v3918_v61 = vld [vmem:[%s340_s16 + $0x8] sm:$0xff] }
 0x1d7   : > { %v1502_v63 = vpop.permute.xlu1 %1501  ;;  %2056 = vmatprep.mubr.f32.mxu1 %v4171_v24  ;;  %4211 = vst [vmem:[#allocation16_spill] sm:$0xff] %v3918_v61 }
 0x1d8   : > { %v1500_v26 = vpop.permute.xlu0 %1499 }
 0x1d9   : > { %v1547_v7 = vsel %vm1545_vm7, %v1500_v26, %v1502_v63  ;;  %v3921_v63 = vld [vmem:[%s340_s16] sm:$0xff] }
 0x1da   : > { %1620 = vmatprep.subr.mxu0 %v1547_v7  ;;  %4212 = vst [vmem:[#allocation17_spill] sm:$0xff] %v3921_v63  ;;  %v3926_v7 = vpop.f32.mrf.mxu0 }
 0x1db   : > { %v1928_v16 = vpop.permute.xlu1 %1927 }
 0x1dc   : > { %v1926_v8 = vpop.permute.xlu0 %1925 }
 0x1dd   : > { %v1949_v27 = vsel %vm1935_vm8, %v1926_v8, %v1928_v16  ;;  %v3928_v16 = vpop.f32.mrf.mxu1 }
 0x1de   : > { %2877 = vmatprep.subr.mxu1 %v1949_v27 }
 0x1df   : > { %v1924_v28 = vpop.permute.xlu1 %1923 }
 0x1e0   : > { %v1948_v29 = vsel %vm1935_vm8, %v1924_v28, %v1926_v8  ;;  %v1498_v30 = vpop.permute.xlu0 %1497  ;;  %v3937_v28 = vpop.f32.mrf.mxu1 }
 0x1e1   : > { %v1546_v32 = vsel %vm1545_vm7, %v1498_v30, %v1500_v26  ;;  %2885 = vmatpush1.msra.mxu1 %v1948_v29 }
 0x1e2   : > { %1621 = vmatpush1.msra.mxu0 %v1546_v32 }
 0x1e3   : > { %2838 = vmatmul.mubr.msk.f32.vlgmr.msra.gmra.mxu0 %vm509_vm0, %v2834_v31  ;;  %1996 = vmatprep.subr.mxu0 %v1951_v57  ;;  %v1922_v33 = vpop.permute.xlu1 %1921  ;;  %v695_v31 = vpop.f32.mrf.mxu1 }
 0x1e4   : > { %1997 = vmatpush1.msra.mxu0 %v1950_v59  ;;  %v1920_v10 = vpop.permute.xlu0 %1919  ;;  %1660 = vmatprep.mubr.f32.mxu0 %v4171_v24  ;;  %v3913_v59 = vld [vmem:[%s340_s16 + $0x10] sm:$0xff] }
 0x1e5   : > { %1998 = vmatprep.subr.mxu0 %v1949_v27  ;;  %v1947_v11 = vsel %vm1935_vm8, %v1920_v10, %v1922_v33  ;;  %4209 = vst [vmem:[#allocation14_spill] sm:$0xff] %v3913_v59  ;;  %v3935_v27 = vpop.f32.mrf.mxu0 }
 0x1e6   : > { %1999 = vmatpush1.msra.mxu0 %v1948_v29  ;;  %2878 = vmatprep.subr.mxu1 %v1947_v11 }
 0x1e7   : > { %2839 = vmatmul.mubr.msk.f32.gmra.mxu0 %vm509_vm0, %v2835_v20  ;;  %2000 = vmatprep.subr.mxu0 %v1947_v11  ;;  %v1914_v34 = vpop.permute.xlu1 %1913  ;;  %v594_v30 = vpop.f32.mrf.mxu0 }
 0x1e8   : > { %v1918_v35 = vpop.permute.xlu0 %1917  ;;  %1666 = vmatprep.mubr.f32.mxu0 %v4171_v24 }
 0x1e9   : > { %v1946_v37 = vsel %vm1935_vm8, %v1918_v35, %v1920_v10  ;;  %v596_v33 = vpop.f32.mrf.mxu0  ;;  %v697_v10 = vpop.f32.mrf.mxu1 }
 0x1ea   : > { %2001 = vmatpush1.msra.mxu0 %v1946_v37  ;;  %2886 = vmatpush1.msra.mxu1 %v1946_v37 }
 0x1eb   : > { %2840 = vmatmul.mubr.msk.f32.gmra.mxu0 %vm509_vm0, %v2836_v36  ;;  %v1912_v38 = vpop.permute.xlu1 %1911  ;;  %v600_v20 = vpop.f32.mrf.mxu0 }
 0x1ec   : > { %v1944_v39 = vsel %vm1935_vm8, %v1912_v38, %v1914_v34  ;;  %v1916_v0 = vpop.permute.xlu0 %1915  ;;  %1672 = vmatprep.mubr.f32.mxu0 %v4171_v24  ;;  %v701_v11 = vpop.f32.mrf.mxu1 }
 0x1ed   : > { %v1945_v21 = vsel %vm1935_vm8, %v1914_v34, %v1916_v0  ;;  %v602_v34 = vpop.f32.mrf.mxu0  ;;  %v702_v58 = vadd.f32 %v701_v11, %v600_v20 }
 0x1ee   : > { %2002 = vmatprep.subr.mxu0 %v1945_v21  ;;  %2879 = vmatprep.subr.mxu1 %v1945_v21  ;;  %v703_v35 = vpop.f32.mrf.mxu1 }
 0x1ef   : > { %2841 = vmatmul.mubr.msk.f32.gmra.mxu0 %vm509_vm0, %v2837_v12  ;;  %2887 = vmatpush1.msra.mxu1 %v1944_v39  ;;  %v1910_v13 = vpop.permute.xlu1 %1909  ;;  %v606_v36 = vpop.f32.mrf.mxu0  ;;  %v704_v60 = vadd.f32 %v703_v35, %v602_v34 }
 0x1f0   : > { %2003 = vmatpush1.msra.mxu0 %v1944_v39  ;;  %v1908_v2 = vpop.permute.xlu0 %1907  ;;  %2044 = vmatprep.mubr.f32.mxu0 %v4171_v24  ;;  %v707_v37 = vpop.f32.mrf.mxu1 }
 0x1f1   : > { %v1943_v40 = vsel %vm1935_vm8, %v1908_v2, %v1910_v13  ;;  %v608_v38 = vpop.f32.mrf.mxu0 }
 0x1f2   : > { %2004 = vmatprep.subr.mxu0 %v1943_v40  ;;  %2880 = vmatprep.subr.mxu1 %v1943_v40  ;;  %v709_v39 = vpop.f32.mrf.mxu1 }
 0x1f3   : > { %v1902_v41 = vpop.permute.xlu1 %1901  ;;  %v876_v0 = vpop.f32.mrf.mxu0 }
 0x1f4   : > { %v1906_v42 = vpop.permute.xlu0 %1905  ;;  %v3952_v12 = vpop.f32.mrf.mxu1 }
 0x1f5   : > { %v1942_v43 = vsel %vm1935_vm8, %v1906_v42, %v1908_v2  ;;  %v878_v21 = vpop.f32.mrf.mxu0 }
 0x1f6   : > { %2005 = vmatpush1.msra.mxu0 %v1942_v43  ;;  %2888 = vmatpush1.msra.mxu1 %v1942_v43  ;;  %v3954_v13 = vpop.f32.mrf.mxu1 }
 0x1f7   : > { %v1900_v44 = vpop.permute.xlu1 %1899  ;;  %v882_v2 = vpop.f32.mrf.mxu0 }
 0x1f8   : > { %v1940_v14 = vsel %vm1935_vm8, %v1900_v44, %v1902_v41  ;;  %v1904_v45 = vpop.permute.xlu0 %1903  ;;  %v1077_v40 = vpop.f32.mrf.mxu1 }
 0x1f9   : > { %v1941_v46 = vsel %vm1935_vm8, %v1902_v41, %v1904_v45  ;;  %v884_v41 = vpop.f32.mrf.mxu0 }
 0x1fa   : > { %2006 = vmatprep.subr.mxu0 %v1941_v46  ;;  %2881 = vmatprep.subr.mxu1 %v1941_v46  ;;  %v1079_v42 = vpop.f32.mrf.mxu1 }
 0x1fb   : > { %2007 = vmatpush1.msra.mxu0 %v1940_v14  ;;  %2889 = vmatpush1.msra.mxu1 %v1940_v14  ;;  %v1898_v23 = vpop.permute.xlu1 %1897  ;;  %v888_v43 = vpop.f32.mrf.mxu0 }
 0x1fc   : > { %v1896_v47 = vpop.permute.xlu0 %1895  ;;  %v1083_v44 = vpop.f32.mrf.mxu1 }
 0x1fd   : > { %v1939_v15 = vsel %vm1935_vm8, %v1896_v47, %v1898_v23  ;;  %v890_v14 = vpop.f32.mrf.mxu0 }
 0x1fe   : > { %2008 = vmatprep.subr.mxu0 %v1939_v15  ;;  %2882 = vmatprep.subr.mxu1 %v1939_v15  ;;  %v1085_v45 = vpop.f32.mrf.mxu1 }
 0x1ff   : > { %v1890_v1 = vpop.permute.xlu1 %1889  ;;  %v894_v46 = vpop.f32.mrf.mxu0 }
 0x200   : > { %v1894_v3 = vpop.permute.xlu0 %1893  ;;  %v1089_v23 = vpop.f32.mrf.mxu1 }
 0x201   : > { %v1938_v5 = vsel %vm1935_vm8, %v1894_v3, %v1896_v47  ;;  %v896_v47 = vpop.f32.mrf.mxu0 }
 0x202   : > { %2009 = vmatpush1.msra.mxu0 %v1938_v5  ;;  %2890 = vmatpush1.msra.mxu1 %v1938_v5  ;;  %v1091_v15 = vpop.f32.mrf.mxu1 }
 0x203   : > { %v1888_v48 = vpop.permute.xlu1 %1887 }
 0x204   : > { %v1936_v49 = vsel %vm1935_vm8, %v1888_v48, %v1890_v1  ;;  %v1892_v50 = vpop.permute.xlu0 %1891 }
 0x205   : > { %v1937_v51 = vsel %vm1935_vm8, %v1890_v1, %v1892_v50 }
 0x206   : > { %2010 = vmatprep.subr.mxu0 %v1937_v51  ;;  %2883 = vmatprep.subr.mxu1 %v1937_v51 }
 0x207   : > { %2011 = vmatpush1.msra.mxu0 %v1936_v49  ;;  %2891 = vmatpush1.msra.mxu1 %v1936_v49 }
 0x208   : > { %2854 = vmatmul.mubr.msk.f32.vlgmr.msra.gmra.mxu0 %vm509_vm0, %v2850_v17  ;;  %2856 = vmatmul.mubr.msk.f32.vlgmr.msra.gmra.mxu1 %vm509_vm0, %v2852_v52 }
 0x209   : > { %2050 = vmatprep.mubr.f32.mxu0 %v4171_v24  ;;  %2062 = vmatprep.mubr.f32.mxu1 %v4171_v24 }
 0x20a   : > { %2174 = vmatprep.subr.mxu1 %v3892_v18 }
 0x20b   : > { %2175 = vmatpush1.msra.mxu1 %v3894_v54 }
 0x20c   : > { %2855 = vmatmul.mubr.msk.f32.gmra.mxu0 %vm509_vm0, %v2851_v53  ;;  %2857 = vmatmul.mubr.msk.f32.gmra.mxu1 %vm509_vm0, %v2853_v25 }
 0x20d   : > { %2214 = vmatprep.mubr.f32.mxu1 %v4171_v24  ;;  %2311 = vmatprep.mubr.f32.mxu0 %v4171_v24 }
 0x20e   : > { %2176 = vmatprep.subr.mxu1 %v3896_v4 }
 0x20f   : > { %2177 = vmatpush1.msra.mxu1 %v3899_v55 }
 0x210   : > { %2178 = vmatprep.subr.mxu1 %v3902_v56  ;;  %v3907_v57 = vpop.permute.xlu1 %2093 }
 0x211   : > { %4206 = vst [vmem:[#allocation11_spill] sm:$0xff] %v3907_v57  ;;  %v3909_v6 = vpop.permute.xlu0 %2098  ;;  %2179 = vmatpush1.msra.mxu1 %v3913_v59 }
 0x212   : > { %4207 = vst [vmem:[#allocation12_spill] sm:$0xff] %v3909_v6  ;;  %2180 = vmatprep.subr.mxu1 %v3918_v61 }
 0x213   : > { %2181 = vmatpush1.msra.mxu1 %v3921_v63 }
 0x214   : > { %v3911_v9 = vpop.permute.xlu1 %2088 }
 0x215   : > { %4208 = vst [vmem:[#allocation13_spill] sm:$0xff] %v3911_v9  ;;  %v3915_v19 = vpop.permute.xlu0 %2083  ;;  %v696_v9 = vadd.f32 %v695_v31, %v594_v30 }
 0x216   : > { %4210 = vst [vmem:[#allocation15_spill] sm:$0xff] %v3915_v19  ;;  %v698_v19 = vadd.f32 %v697_v10, %v596_v33 }
 0x218   : > { %v3923_v26 = vpop.permute.xlu1 %2133 }
 0x219   : > { %4213 = vst [vmem:[#allocation18_spill] sm:$0xff] %v3923_v26  ;;  %2858 = vmatmul.mubr.msk.f32.vlgmr.msra.gmra.mxu1 %vm2141_vm9, %v3923_v26  ;;  %v3933_v8 = vpop.permute.xlu0 %2135  ;;  %v710_v26 = vadd.f32 %v709_v39, %v608_v38 }
 0x21a   : > { %2220 = vmatprep.mubr.f32.mxu1 %v4171_v24  ;;  %4214 = vst [vmem:[#allocation19_spill] sm:$0xff] %v3933_v8 }
 0x21c   : > { %v3942_v29 = vpop.permute.xlu1 %2137 }
 0x21d   : > { %2859 = vmatmul.mubr.msk.f32.gmra.mxu1 %vm2141_vm9, %v3933_v8  ;;  %4215 = vst [vmem:[#allocation20_spill] sm:$0xff] %v3942_v29  ;;  %v3947_v32 = vpop.permute.xlu0 %2139 }
 0x21e   : > { %2226 = vmatprep.mubr.f32.mxu1 %v4171_v24  ;;  %4216 = vst [vmem:[#allocation21_spill] sm:$0xff] %v3947_v32 }
 0x221   : > { %2860 = vmatmul.mubr.msk.f32.gmra.mxu1 %vm2141_vm9, %v3942_v29  ;;  %v708_v29 = vadd.f32 %v707_v37, %v606_v36  ;;  %v903_v36 = vadd.f32 %v888_v43, %v702_v58  ;;  %v902_v37 = vadd.f32 %v884_v41, %v698_v19 }
 0x222   : > { %2232 = vmatprep.mubr.f32.mxu1 %v4171_v24 }
 0x223   : > { %v905_v57 = vadd.f32 %v894_v46, %v708_v29  ;;  %v1098_v31 = vadd.f32 %v1083_v44, %v903_v36  ;;  %v1097_v10 = vadd.f32 %v1079_v42, %v902_v37 }
 0x225   : > { %2861 = vmatmul.mubr.msk.f32.gmra.mxu1 %vm2141_vm9, %v3947_v32 }
 0x226   : > { %2488 = vmatprep.mubr.f32.mxu1 %v4171_v24 }
 0x22b   : > { %v3958_v3 = vpop.f32.mrf.mxu1 }
 0x22c   : > { %4217 = vst [vmem:[#allocation22_spill] sm:$0xff] %v3958_v3  ;;  %v901_v3 = vadd.f32 %v882_v2, %v696_v9 }
 0x22d   : > { %v3960_v48 = vpop.f32.mrf.mxu1 }
 0x22e   : > { %v1096_v11 = vadd.f32 %v1077_v40, %v901_v3 }
 0x22f   : > { %v3962_v50 = vpop.f32.mrf.mxu1 }
 0x231   : > { %v3964_v17 = vpop.f32.mrf.mxu1 }
 0x233   : > { %v1473_v53 = vpop.f32.mrf.mxu1 }
 0x235   : > { %v1475_v24 = vpop.f32.mrf.mxu1 }
 0x237   : > { %v1479_v61 = vpop.f32.mrf.mxu1 }
 0x239   : > { %v1481_v56 = vpop.f32.mrf.mxu1 }
 0x243   : > { %v3956_v1 = vpop.f32.mrf.mxu0 }
 0x245   : > { %v1268_v5 = vpop.f32.mrf.mxu0 }
 0x247   : > { %v1272_v49 = vpop.f32.mrf.mxu0 }
 0x248   : > { %v1291_v19 = vadd.f32 %v1272_v49, %v1096_v11  ;;  %v4232_v11 = vld [vmem:[#allocation11_spill] sm:$0xff] }
 0x249   : > { %v1274_v51 = vpop.f32.mrf.mxu0 }
 0x24b   : > { %v1278_v52 = vpop.f32.mrf.mxu0 }
 0x24c   : > { %v1293_v9 = vadd.f32 %v1278_v52, %v1098_v31 }
 0x24d   : > { %v1280_v25 = vpop.f32.mrf.mxu0 }
 0x24f   : > { %v1284_v63 = vpop.f32.mrf.mxu0 }
 0x251   : > { %v1286_v59 = vpop.f32.mrf.mxu0 }
 0x28a   : > { %v3968_v4 = vpop.f32.mrf.mxu1 }
 0x28b   : > { %4219 = vst [vmem:[#allocation24_spill] sm:$0xff] %v3968_v4  ;;  %v692_v4 = vadd.f32 %v3937_v28, %v3935_v27 }
 0x28c   : > { %v3972_v18 = vpop.f32.mrf.mxu1 }
 0x28d   : > { %4221 = vst [vmem:[#allocation26_spill] sm:$0xff] %v3972_v18  ;;  %v906_v18 = vadd.f32 %v896_v47, %v710_v26  ;;  %v900_v20 = vadd.f32 %v878_v21, %v692_v4 }
 0x28e   : > { %v3974_v22 = vpop.f32.mrf.mxu1 }
 0x28f   : > { %4222 = vst [vmem:[#allocation27_spill] sm:$0xff] %v3974_v22  ;;  %v690_v22 = vadd.f32 %v3928_v16, %v3926_v7  ;;  %v1101_v30 = vadd.f32 %v1091_v15, %v906_v18  ;;  %v1095_v26 = vadd.f32 %v3954_v13, %v900_v20 }
 0x290   : > { %v3976_v8 = vpop.f32.mrf.mxu1 }
 0x291   : > { %4223 = vst [vmem:[#allocation28_spill] sm:$0xff] %v3976_v8  ;;  %v1100_v8 = vadd.f32 %v1089_v23, %v905_v57  ;;  %v899_v29 = vadd.f32 %v876_v0, %v690_v22  ;;  %v1296_v7 = vadd.f32 %v1286_v59, %v1101_v30  ;;  %v1292_v57 = vadd.f32 %v1274_v51, %v1097_v10 }
 0x292   : > { %v1290_v18 = vadd.f32 %v1268_v5, %v1095_v26  ;;  %v4233_v26 = vld [vmem:[#allocation13_spill] sm:$0xff] }
 0x293   : > { %v1295_v38 = vadd.f32 %v1284_v63, %v1100_v8  ;;  %v1094_v58 = vadd.f32 %v3952_v12, %v899_v29  ;;  %v1491_v39 = vadd.f32 %v1481_v56, %v1296_v7  ;;  %v1488_v63 = vadd.f32 %v1473_v53, %v1293_v9 }
 0x294   : > { %v1487_v13 = vadd.f32 %v3964_v17, %v1292_v57  ;;  %v1486_v12 = vadd.f32 %v3962_v50, %v1291_v19  ;;  %v1485_v43 = vadd.f32 %v3960_v48, %v1290_v18  ;;  %v4229_v37 = vld [vmem:[#allocation26_spill] sm:$0xff]  ;;  %v4239_v18 = vld [vmem:[#allocation19_spill] sm:$0xff] }
 0x295   : > { %v1490_v16 = vadd.f32 %v1479_v61, %v1295_v38  ;;  %v1289_v0 = vadd.f32 %v3956_v1, %v1094_v58  ;;  %v4234_v58 = vld [vmem:[#allocation15_spill] sm:$0xff]  ;;  %v4235_v19 = vld [vmem:[#allocation2_spill] sm:$0xff] }
 0x298   : > { %v4227_v52 = vld [vmem:[#allocation28_spill] sm:$0xff] }
 0x2a3   : > { %v3966_v55 = vpop.f32.mrf.mxu0 }
 0x2a4   : > { %4218 = vst [vmem:[#allocation23_spill] sm:$0xff] %v3966_v55  ;;  %v1863_v55 = vpop.f32.mrf.mxu1 }
 0x2a5   : > { %v3970_v54 = vpop.f32.mrf.mxu0 }
 0x2a6   : > { %4220 = vst [vmem:[#allocation25_spill] sm:$0xff] %v3970_v54  ;;  %v904_v54 = vadd.f32 %v890_v14, %v704_v60  ;;  %v1865_v35 = vpop.f32.mrf.mxu1 }
 0x2a7   : > { %v1662_v32 = vpop.f32.mrf.mxu0 }
 0x2a8   : > { %v1099_v33 = vadd.f32 %v1085_v45, %v904_v54  ;;  %v1869_v60 = vpop.f32.mrf.mxu1  ;;  %v1681_v14 = vadd.f32 %v1662_v32, %v1486_v12  ;;  %v4060_v12 = vpop.permute.xlu0 %2348 }
 0x2a9   : > { %v1664_v62 = vpop.f32.mrf.mxu0 }
 0x2aa   : > { %v1294_v28 = vadd.f32 %v1280_v25, %v1099_v33  ;;  %v1871_v54 = vpop.f32.mrf.mxu1  ;;  %v1682_v44 = vadd.f32 %v1664_v62, %v1487_v13  ;;  %v4228_v25 = vld [vmem:[#allocation27_spill] sm:$0xff]  ;;  %v4230_v33 = vld [vmem:[#allocation12_spill] sm:$0xff]  ;;  %v4058_v13 = vpop.permute.xlu1 %2353 }
 0x2ab   : > { %v1668_v6 = vpop.f32.mrf.mxu0  ;;  %v4226_v5 = vld [vmem:[#allocation23_spill] sm:$0xff]  ;;  %v1876_v36 = vadd.f32 %v4228_v25, %v1681_v14 }
 0x2ac   : > { %v1489_v22 = vadd.f32 %v1475_v24, %v1294_v28  ;;  %v1683_v41 = vadd.f32 %v1668_v6, %v1488_v63  ;;  %v4224_v24 = vld [vmem:[#allocation22_spill] sm:$0xff]  ;;  %v1877_v53 = vadd.f32 %v4227_v52, %v1682_v44  ;;  %v4243_v63 = vld [vmem:[#allocation21_spill] sm:$0xff] }
 0x2ad   : > { %v1670_v34 = vpop.f32.mrf.mxu0  ;;  %v1484_v56 = vadd.f32 %v4224_v24, %v1289_v0  ;;  %v4225_v47 = vld [vmem:[#allocation25_spill] sm:$0xff]  ;;  %v4064_v24 = vpop.permute.xlu0 %2343 }
 0x2ae   : > { %v1684_v59 = vadd.f32 %v1670_v34, %v1489_v22  ;;  %v1680_v15 = vadd.f32 %v4225_v47, %v1485_v43  ;;  %v1878_v51 = vadd.f32 %v1863_v55, %v1683_v41  ;;  %v4240_v22 = vld [vmem:[#allocation4_spill] sm:$0xff]  ;;  %v4242_v0 = vld [vmem:[#allocation5_spill] sm:$0xff]  ;;  %v4062_v43 = vpop.permute.xlu1 %2381 }
 0x2af   : > { %v1674_v27 = vpop.f32.mrf.mxu0  ;;  %v1679_v49 = vadd.f32 %v4226_v5, %v1484_v56 }
 0x2b0   : > { %v1685_v8 = vadd.f32 %v1674_v27, %v1490_v16  ;;  %v1879_v1 = vadd.f32 %v1865_v35, %v1684_v59  ;;  %v1875_v34 = vadd.f32 %v4229_v37, %v1680_v15  ;;  %v4231_v35 = vld [vmem:[#allocation24_spill] sm:$0xff]  ;;  %v4236_v16 = vld [vmem:[#allocation18_spill] sm:$0xff] }
 0x2b1   : > { %v1676_v4 = vpop.f32.mrf.mxu0  ;;  %v1874_v29 = vadd.f32 %v4231_v35, %v1679_v49 }
 0x2b2   : > { %v1686_v40 = vadd.f32 %v1676_v4, %v1491_v39  ;;  %v1880_v45 = vadd.f32 %v1869_v60, %v1685_v8  ;;  %v4237_v4 = vmov 0.0   ;;  %v4241_v39 = vld [vmem:[#allocation20_spill] sm:$0xff]  ;;  %v4066_v47 = vpop.permute.xlu1 %2376 }
 0x2b4   : > { %v1881_v3 = vadd.f32 %v1871_v54, %v1686_v40  ;;  %v4238_v54 = vld [vmem:[#allocation3_spill] sm:$0xff] }
 0x2c8   : > { %v2046_v21 = vpop.f32.mrf.mxu0  ;;  %v2058_v2 = vpop.f32.mrf.mxu1 }
 0x2c9   : > { %v2073_v32 = vadd.f32 %v2058_v2, %v1878_v51  ;;  %v2069_v27 = vadd.f32 %v2046_v21, %v1874_v29  ;;  %v4068_v51 = vpop.permute.xlu0 %2338 }
 0x2ca   : > { %v2048_v42 = vpop.f32.mrf.mxu0  ;;  %v2060_v61 = vpop.f32.mrf.mxu1 }
 0x2cb   : > { %v2074_v48 = vadd.f32 %v2060_v61, %v1879_v1  ;;  %v2070_v10 = vadd.f32 %v2048_v42, %v1875_v34  ;;  %v4007_v60 = vadd.f32 %v4232_v11, %v2073_v32  ;;  %v4027_v57 = vadd.f32 %v4234_v58, %v2069_v27 }
 0x2cc   : > { %v2052_v46 = vpop.f32.mrf.mxu0  ;;  %v2064_v23 = vpop.f32.mrf.mxu1 }
 0x2cd   : > { %v2075_v50 = vadd.f32 %v2064_v23, %v1880_v45  ;;  %v2071_v31 = vadd.f32 %v2052_v46, %v1876_v36  ;;  %v4002_v38 = vadd.f32 %v4232_v11, %v2074_v48  ;;  %v4022_v9 = vadd.f32 %v4234_v58, %v2070_v10  ;;  %v4084_v11 = vpop.permute.xlu0 %2366 }
 0x2ce   : > { %v2054_v6 = vpop.f32.mrf.mxu0  ;;  %v2066_v17 = vpop.f32.mrf.mxu1 }
 0x2cf   : > { %v2076_v62 = vadd.f32 %v2066_v17, %v1881_v3  ;;  %v2072_v20 = vadd.f32 %v2054_v6, %v1877_v53  ;;  %v3999_v55 = vadd.f32 %v4230_v33, %v2075_v50  ;;  %v4017_v7 = vadd.f32 %v4233_v26, %v2071_v31 }
 0x2d1   : > { %v3995_v30 = vadd.f32 %v4230_v33, %v2076_v62  ;;  %v4012_v28 = vadd.f32 %v4233_v26, %v2072_v20  ;;  %v4077_v20 = vpop.permute.xlu1 %2371 }
 0x2d3   : > { %2271 = vmatprep.subr.mxu0 %v3995_v30  ;;  %2448 = vmatprep.subr.mxu1 %v3995_v30 }
 0x2d4   : > { %2272 = vmatpush1.msra.mxu0 %v3999_v55  ;;  %2449 = vmatpush1.msra.mxu1 %v3999_v55 }
 0x2d5   : > { %2273 = vmatprep.subr.mxu0 %v4002_v38  ;;  %2450 = vmatprep.subr.mxu1 %v4002_v38 }
 0x2d6   : > { %2274 = vmatpush1.msra.mxu0 %v4007_v60  ;;  %2451 = vmatpush1.msra.mxu1 %v4007_v60 }
 0x2d7   : > { %2275 = vmatprep.subr.mxu0 %v4012_v28  ;;  %2452 = vmatprep.subr.mxu1 %v4012_v28 }
 0x2d8   : > { %2276 = vmatpush1.msra.mxu0 %v4017_v7  ;;  %2453 = vmatpush1.msra.mxu1 %v4017_v7 }
 0x2d9   : > { %2277 = vmatprep.subr.mxu0 %v4022_v9  ;;  %2454 = vmatprep.subr.mxu1 %v4022_v9  ;;  %v2216_v8 = vpop.f32.mrf.mxu1 }
 0x2da   : > { %2278 = vmatpush1.msra.mxu0 %v4027_v57  ;;  %2455 = vmatpush1.msra.mxu1 %v4027_v57 }
 0x2db   : > { %2862 = vmatmul.mubr.msk.f32.vlgmr.msra.gmra.mxu0 %vm2141_vm9, %v4235_v19  ;;  %2866 = vmatmul.mubr.msk.f32.vlgmr.msra.gmra.mxu1 %vm2141_vm9, %v4236_v16  ;;  %v2218_v21 = vpop.f32.mrf.mxu1 }
 0x2dc   : > { %2317 = vmatprep.mubr.f32.mxu0 %v4237_v4  ;;  %2494 = vmatprep.mubr.f32.mxu1 %v4237_v4 }
 0x2dd   : > { %v2222_v2 = vpop.f32.mrf.mxu1 }
 0x2df   : > { %2863 = vmatmul.mubr.msk.f32.gmra.mxu0 %vm2141_vm9, %v4238_v54  ;;  %2867 = vmatmul.mubr.msk.f32.gmra.mxu1 %vm2141_vm9, %v4239_v18  ;;  %v2224_v59 = vpop.f32.mrf.mxu1 }
 0x2e0   : > { %2323 = vmatprep.mubr.f32.mxu0 %v4237_v4  ;;  %2500 = vmatprep.mubr.f32.mxu1 %v4237_v4 }
 0x2e1   : > { %v2228_v42 = vpop.f32.mrf.mxu1 }
 0x2e3   : > { %2864 = vmatmul.mubr.msk.f32.gmra.mxu0 %vm2141_vm9, %v4240_v22  ;;  %2868 = vmatmul.mubr.msk.f32.gmra.mxu1 %vm2141_vm9, %v4241_v39  ;;  %v2230_v56 = vpop.f32.mrf.mxu1 }
 0x2e4   : > { %2329 = vmatprep.mubr.f32.mxu0 %v4237_v4  ;;  %2506 = vmatprep.mubr.f32.mxu1 %v4237_v4 }
 0x2e5   : > { %v2234_v15 = vpop.f32.mrf.mxu1 }
 0x2e7   : > { %2865 = vmatmul.mubr.msk.f32.gmra.mxu0 %vm2141_vm9, %v4242_v0  ;;  %2869 = vmatmul.mubr.msk.f32.gmra.mxu1 %vm2141_vm9, %v4243_v63  ;;  %v2236_v62 = vpop.f32.mrf.mxu1 }
 0x2e8   : > { %2577 = vmatprep.mubr.f32.mxu0 %v4237_v4 }
 0x39b   : > { %v2313_v40 = vpop.f32.mrf.mxu0 }
 0x39c   : > { %v2314_v50 = vadd.f32 %v2313_v40, %v2216_v8 }
 0x39d   : > { %v2315_v41 = vpop.f32.mrf.mxu0 }
 0x39e   : > { %v2316_v5 = vadd.f32 %v2315_v41, %v2218_v21  ;;  %v2356_v33 = vmul.f32 %v4068_v51, %v2314_v50 }
 0x39f   : > { %v2319_v61 = vpop.f32.mrf.mxu0 }
 0x3a0   : > { %v2320_v1 = vadd.f32 %v2319_v61, %v2222_v2  ;;  %v2357_v32 = vmul.f32 %v4068_v51, %v2316_v5  ;;  %v2384_v39 = vadd.f32 %v4084_v11, %v2356_v33  ;;  %v4247_v5 = vld [vmem:[#allocation9_spill] sm:$0xff] }
 0x3a1   : > { %v2321_v44 = vpop.f32.mrf.mxu0 }
 0x3a2   : > { %v2322_v46 = vadd.f32 %v2321_v44, %v2224_v59  ;;  %v2358_v25 = vmul.f32 %v4064_v24, %v2320_v1  ;;  %v2385_v58 = vadd.f32 %v4084_v11, %v2357_v32  ;;  %v2400_v61 = vmul.f32 0.01, %v2384_v39  ;;  %v4244_v44 = vld [vmem:[#allocation6_spill] sm:$0xff] }
 0x3a3   : > { %v2325_v14 = vpop.f32.mrf.mxu0  ;;  %vm2392_vm1 = vcmp.gt.f32.partialorder %v2384_v39, 0.0 }
 0x3a4   : > { %v2326_v45 = vadd.f32 %v2325_v14, %v2228_v42  ;;  %v2359_v53 = vmul.f32 %v4064_v24, %v2322_v46  ;;  %v2386_v27 = vadd.f32 %v4077_v20, %v2358_v25  ;;  %v2401_v40 = vmul.f32 0.01, %v2385_v58 }
 0x3a5   : > { %v2327_v23 = vpop.f32.mrf.mxu0  ;;  %vm2393_vm0 = vcmp.gt.f32.partialorder %v2385_v58, 0.0 }
 0x3a6   : > { %v2328_v3 = vadd.f32 %v2327_v23, %v2230_v56  ;;  %v2360_v6 = vmul.f32 %v4060_v12, %v2326_v45  ;;  %v2387_v31 = vadd.f32 %v4077_v20, %v2359_v53  ;;  %v2402_v2 = vmul.f32 0.01, %v2386_v27  ;;  %v4245_v45 = vld [vmem:[#allocation7_spill] sm:$0xff]  ;;  %v4249_v53 = vld [vmem:[#allocation14_spill] sm:$0xff] }
 0x3a7   : > { %v2331_v49 = vpop.f32.mrf.mxu0  ;;  %vm2394_vm15 = vcmp.gt.f32.partialorder %v2386_v27, 0.0  ;;  %v2409_v50 = vsel %vm2393_vm0, %v2385_v58, %v2401_v40 }
 0x3a8   : > { %v2361_v17 = vmul.f32 %v4060_v12, %v2328_v3  ;;  %v2332_v52 = vadd.f32 %v2331_v49, %v2234_v15  ;;  %v2388_v35 = vadd.f32 %v4066_v47, %v2360_v6  ;;  %v2403_v8 = vmul.f32 0.01, %v2387_v31  ;;  %v4246_v15 = vld [vmem:[#allocation8_spill] sm:$0xff]  ;;  %v4248_v6 = vld [vmem:[#allocation10_spill] sm:$0xff] }
 0x3a9   : > { %v2333_v48 = vpop.f32.mrf.mxu0  ;;  %vm2395_vm14 = vcmp.gt.f32.partialorder %v2387_v31, 0.0  ;;  %v2410_v3 = vsel %vm2394_vm15, %v2386_v27, %v2402_v2 }
 0x3aa   : > { %v2362_v36 = vmul.f32 %v4058_v13, %v2332_v52  ;;  %v2389_v37 = vadd.f32 %v4066_v47, %v2361_v17  ;;  %v2334_v34 = vadd.f32 %v2333_v48, %v2236_v62  ;;  %v2404_v63 = vmul.f32 0.01, %v2388_v35  ;;  %v4250_v62 = vld [vmem:[#allocation16_spill] sm:$0xff] }
 0x3ab   : > { %vm2396_vm12 = vcmp.gt.f32.partialorder %v2388_v35, 0.0  ;;  %v2411_v23 = vsel %vm2395_vm14, %v2387_v31, %v2403_v8  ;;  %v2408_v52 = vsel %vm2392_vm1, %v2384_v39, %v2400_v61  ;;  %v2418_v48 = vmul.f32 %v2410_v3, %v4249_v53 }
 0x3ac   : > { %v2390_v29 = vadd.f32 %v4062_v43, %v2362_v36  ;;  %v2363_v10 = vmul.f32 %v4058_v13, %v2334_v34  ;;  %v2405_v16 = vmul.f32 0.01, %v2389_v37  ;;  %vm2397_vm11 = vcmp.gt.f32.partialorder %v2389_v37, 0.0  ;;  %v4251_v36 = vld [vmem:[#allocation17_spill] sm:$0xff] }
 0x3ad   : > { %v2412_v14 = vsel %vm2396_vm12, %v2388_v35, %v2404_v63  ;;  %v2419_v17 = vmul.f32 %v2411_v23, %v4248_v6  ;;  %v2417_v25 = vmul.f32 %v2409_v50, %v4250_v62  ;;  %v2416_v32 = vmul.f32 %v2408_v52, %v4251_v36 }
 0x3ae   : > { %v2406_v26 = vmul.f32 0.01, %v2390_v29  ;;  %vm2398_vm10 = vcmp.gt.f32.partialorder %v2390_v29, 0.0  ;;  %v2391_v18 = vadd.f32 %v4062_v43, %v2363_v10  ;;  %v2413_v42 = vsel %vm2397_vm11, %v2389_v37, %v2405_v16  ;;  %v2490_v37 = vpop.f32.mrf.mxu1 }
 0x3af   : > { %v2421_v1 = vmul.f32 %v2413_v42, %v4246_v15  ;;  %v2420_v49 = vmul.f32 %v2412_v14, %v4247_v5 }
 0x3b0   : > { %v2407_v21 = vmul.f32 0.01, %v2391_v18  ;;  %vm2399_vm13 = vcmp.gt.f32.partialorder %v2391_v18, 0.0  ;;  %v2414_v59 = vsel %vm2398_vm10, %v2390_v29, %v2406_v26  ;;  %v2492_v34 = vpop.f32.mrf.mxu1 }
 0x3b1   : > { %v2422_v46 = vmul.f32 %v2414_v59, %v4245_v45 }
 0x3b2   : > { %v2415_v41 = vsel %vm2399_vm13, %v2391_v18, %v2407_v21  ;;  %v2496_v33 = vpop.f32.mrf.mxu1 }
 0x3b3   : > { %v2423_v56 = vmul.f32 %v2415_v41, %v4244_v44 }
 0x3b4   : > { %v2498_v35 = vpop.f32.mrf.mxu1 }
 0x3b5   : > { %2537 = vmatprep.subr.mxu0 %v2423_v56 }
 0x3b6   : > { %2538 = vmatpush1.msra.mxu0 %v2422_v46  ;;  %v2502_v31 = vpop.f32.mrf.mxu1 }
 0x3b7   : > { %2539 = vmatprep.subr.mxu0 %v2421_v1 }
 0x3b8   : > { %2540 = vmatpush1.msra.mxu0 %v2420_v49  ;;  %v2504_v16 = vpop.f32.mrf.mxu1 }
 0x3b9   : > { %2541 = vmatprep.subr.mxu0 %v2419_v17 }
 0x3ba   : > { %2542 = vmatpush1.msra.mxu0 %v2418_v48  ;;  %v2508_v40 = vpop.f32.mrf.mxu1 }
 0x3bb   : > { %2543 = vmatprep.subr.mxu0 %v2417_v25 }
 0x3bc   : > { %2544 = vmatpush1.msra.mxu0 %v2416_v32  ;;  %v2510_v3 = vpop.f32.mrf.mxu1 }
 0x3bd   : > { %2870 = vmatmul.mubr.msk.f32.vlgmr.msra.gmra.mxu0 %vm2141_vm9, %v4235_v19 }
 0x3be   : > { %2583 = vmatprep.mubr.f32.mxu0 %v4237_v4 }
 0x3c1   : > { %2871 = vmatmul.mubr.msk.f32.gmra.mxu0 %vm2141_vm9, %v4238_v54 }
 0x3c2   : > { %2589 = vmatprep.mubr.f32.mxu0 %v4237_v4 }
 0x3c5   : > { %2872 = vmatmul.mubr.msk.f32.gmra.mxu0 %vm2141_vm9, %v4240_v22 }
 0x3c6   : > { %2595 = vmatprep.mubr.f32.mxu0 %v4237_v4 }
 0x3c9   : > { %2873 = vmatmul.mubr.msk.f32.gmra.mxu0 %vm2141_vm9, %v4242_v0 }
 0x47d   : > { %v2579_v19 = vpop.f32.mrf.mxu0 }
 0x47e   : > { %v2580_v29 = vadd.f32 %v2579_v19, %v2490_v37 }
 0x47f   : > { %v2581_v10 = vpop.f32.mrf.mxu0 }
 0x480   : > { %v2602_v54 = vmul.f32 %v2580_v29, %v4068_v51  ;;  %v2582_v27 = vadd.f32 %v2581_v10, %v2492_v34 }
 0x481   : > { %v2585_v26 = vpop.f32.mrf.mxu0 }
 0x482   : > { %v2610_v22 = vadd.f32 %v2602_v54, %v4084_v11  ;;  %v2603_v4 = vmul.f32 %v2582_v27, %v4068_v51  ;;  %v2586_v58 = vadd.f32 %v2585_v26, %v2496_v33 }
 0x483   : > { %v2587_v0 = vpop.f32.mrf.mxu0 }
 0x484   : > { %vm2618_vm2 = vcmp.gt.f32.partialorder %v2610_v22, 0.0  ;;  %v2626_v18 = vmul.f32 0.01, %v2610_v22  ;;  %v2611_v39 = vadd.f32 %v2603_v4, %v4084_v11  ;;  %v2604_v63 = vmul.f32 %v2586_v58, %v4064_v24 }
 0x485   : > { %v2588_v8 = vadd.f32 %v2587_v0, %v2498_v35  ;;  %v2591_v21 = vpop.f32.mrf.mxu0 }
 0x486   : > { %v2634_v2 = vsel %vm2618_vm2, %v2610_v22, %v2626_v18  ;;  %vm2619_vm3 = vcmp.gt.f32.partialorder %v2611_v39, 0.0  ;;  %v2627_v51 = vmul.f32 0.01, %v2611_v39  ;;  %v2612_v59 = vadd.f32 %v2604_v63, %v4077_v20 }
 0x487   : > { %v2642_v41 = vadd.f32 %v2634_v2, %v4027_v57  ;;  %v2605_v11 = vmul.f32 %v2588_v8, %v4064_v24  ;;  %v2592_v42 = vadd.f32 %v2591_v21, %v2502_v31  ;;  %v2593_v61 = vpop.f32.mrf.mxu0 }
 0x488   : > { %v2635_v44 = vsel %vm2619_vm3, %v2611_v39, %v2627_v51  ;;  %vm2620_vm4 = vcmp.gt.f32.partialorder %v2612_v59, 0.0  ;;  %v2628_v56 = vmul.f32 0.01, %v2612_v59  ;;  %v2594_v14 = vadd.f32 %v2593_v61, %v2504_v16 }
 0x489   : > { %2650 = vst [vmem:[%s4119_s18] sm:$0xff] %v2642_v41  ;;  %v2643_v45 = vadd.f32 %v2635_v44, %v4022_v9  ;;  %v2613_v46 = vadd.f32 %v2605_v11, %v4077_v20  ;;  %v2606_v23 = vmul.f32 %v2592_v42, %v4060_v12  ;;  %v2597_v15 = vpop.f32.mrf.mxu0 }
 0x48a   : > { %v2636_v1 = vsel %vm2620_vm4, %v2612_v59, %v2628_v56  ;;  %v2607_v57 = vmul.f32 %v2594_v14, %v4060_v12  ;;  %v2598_v24 = vadd.f32 %v2597_v15, %v2508_v40 }
 0x48b   : > { %2651 = vst [vmem:[%s4119_s18 + $0x8] sm:$0xff] %v2643_v45  ;;  %v2644_v5 = vadd.f32 %v2636_v1, %v4017_v7  ;;  %vm2621_vm5 = vcmp.gt.f32.partialorder %v2613_v46, 0.0  ;;  %v2629_v49 = vmul.f32 0.01, %v2613_v46  ;;  %v2614_v50 = vadd.f32 %v2606_v23, %v4066_v47  ;;  %v2599_v9 = vpop.f32.mrf.mxu0 }
 0x48c   : > { %v2615_v20 = vadd.f32 %v2607_v57, %v4066_v47  ;;  %v2608_v6 = vmul.f32 %v2598_v24, %v4058_v13  ;;  %v2600_v17 = vadd.f32 %v2599_v9, %v2510_v3 }
 0x48d   : > { %2652 = vst [vmem:[%s4119_s18 + $0x10] sm:$0xff] %v2644_v5  ;;  %v2637_v52 = vsel %vm2621_vm5, %v2613_v46, %v2629_v49  ;;  %vm2622_vm6 = vcmp.gt.f32.partialorder %v2614_v50, 0.0  ;;  %v2630_v12 = vmul.f32 0.01, %v2614_v50 }
 0x48e   : > { %v2645_v53 = vadd.f32 %v2637_v52, %v4012_v28  ;;  %vm2623_vm7 = vcmp.gt.f32.partialorder %v2615_v20, 0.0  ;;  %v2631_v7 = vmul.f32 0.01, %v2615_v20  ;;  %v2616_v48 = vadd.f32 %v2608_v6, %v4062_v43 }
 0x48f   : > { %v2638_v62 = vsel %vm2622_vm6, %v2614_v50, %v2630_v12  ;;  %v2609_v25 = vmul.f32 %v2600_v17, %v4058_v13 }
 0x490   : > { %2653 = vst [vmem:[%s4119_s18 + $0x18] sm:$0xff] %v2645_v53  ;;  %v2646_v47 = vadd.f32 %v2638_v62, %v4007_v60  ;;  %v2639_v36 = vsel %vm2623_vm7, %v2615_v20, %v2631_v7  ;;  %vm2624_vm8 = vcmp.gt.f32.partialorder %v2616_v48, 0.0  ;;  %v2632_v32 = vmul.f32 0.01, %v2616_v48 }
 0x491   : > { %v2647_v37 = vadd.f32 %v2639_v36, %v4002_v38  ;;  %v2617_v34 = vadd.f32 %v2609_v25, %v4062_v43 }
 0x492   : > { %2654 = vst [vmem:[%s4119_s18 + $0x20] sm:$0xff] %v2646_v47  ;;  %v2640_v28 = vsel %vm2624_vm8, %v2616_v48, %v2632_v32 }
 0x493   : > { %2655 = vst [vmem:[%s4119_s18 + $0x28] sm:$0xff] %v2647_v37  ;;  %v2648_v33 = vadd.f32 %v2640_v28, %v3999_v55  ;;  %vm2625_vm9 = vcmp.gt.f32.partialorder %v2617_v34, 0.0  ;;  %v2633_v35 = vmul.f32 0.01, %v2617_v34 }
 0x495   : > { %2656 = vst [vmem:[%s4119_s18 + $0x30] sm:$0xff] %v2648_v33  ;;  %v2641_v13 = vsel %vm2625_vm9, %v2617_v34, %v2633_v35 }
 0x496   : > { %v2649_v19 = vadd.f32 %v2641_v13, %v3995_v30 }
 0x498   : > { %2657 = vst [vmem:[%s4119_s18 + $0x38] sm:$0xff] %v2649_v19 }
 0x499 PF: > { %s17_s28 = sadd.s32 1, %s3009_s28   ;;  %s4252_s24 = smov %s3001_s26 }
 0x49a   : > { %p14_p7 = scmp.ge.s32.totalorder %s17_s28, 6   ;;  %s4253_s25 = smov %s3005_s27 }
 0x49b   : > { %s4254_s26 = smov %s4257_s29  ;;  %s4255_s27 = smov %s4261_s30 }
 0x49c   :  { %16 = sbr.rel (!%p14_p7) target bundleno = 3 (0x3), region = 92 }

// kernel: decoder_block_forward.4
= control target key start
LH: loop header
LB: loop body
LE: loop exit
PB: predicated region body
PF: predicated region fallthrough
CT: control target
= control target key end

     0   :  { %s3641_s24 = smov 0   ;;  %s3643_s25 = smov 0   ;;  %s4549_s0 = inlined_call_operand.vmem [shape: f32[2,32,512], index: 0, kind: input, shape index: {}]   ;;  %s4550_s1 = inlined_call_operand.vmem [shape: f32[2,2,16,384], index: 1, kind: input, shape index: {}]   ;;  %s4551_s2 = inlined_call_operand.vmem [shape: f32[2,9,16,32], index: 2, kind: input, shape index: {}]   ;;  %s4552_s3 = inlined_call_operand.vmem [shape: f32[16,1], index: 3, kind: input, shape index: {}]   ;;  %s4553_s4 = inlined_call_operand.vmem [shape: f32[16,32], index: 4, kind: input, shape index: {}]   ;;  %s4554_s5 = inlined_call_operand.vmem [shape: f32[16,1], index: 5, kind: input, shape index: {}]   ;;  %s4555_s6 = inlined_call_operand.vmem [shape: f32[16,1], index: 6, kind: input, shape index: {}]   ;;  %s4556_s7 = inlined_call_operand.vmem [shape: f32[2,2,16,384], index: 7, kind: output, shape index: {}]  }
   0x1   :  { %s3645_s26 = smov 0   ;;  %s3647_s27 = smov 0  }
   0x2   :  { %s3649_s28 = smov 0  }
   0x3 LB: > { %s26_s29 = sadd.s32 1, %s3580_s26  ;;  %s29_s30 = sadd.s32 1, %s3584_s27  ;;  %s3588_s28 = sphi %s3649_s28, %s17_s28   ;;  %s3584_s27 = sphi %s3647_s27, %s4566_s27   ;;  %s3580_s26 = sphi %s3645_s26, %s4565_s26   ;;  %s3576_s25 = sphi %s3643_s25, %s4564_s25   ;;  %s3572_s24 = sphi %s3641_s24, %s4563_s24  }
   0x4   : > { %p27_p0 = scmp.ge.s32.totalorder %s26_s29, 2  ;;  %p3220_p1 = scmp.ge.s32.totalorder %s3588_s28, 1 }
   0x5   : > { %p277_p2 = scmp.lt.s32.totalorder %s3588_s28, 5 }
   0x6   : > { %s4568_s29 = smov (%p27_p0, %s26_s29), 0  ;;  %s4570_s30 = smov (!%p27_p0, %s29_s30), %s3584_s27 }
   0x7   : > { %p278_p3 = pnand %p3220_p1, %p277_p2  ;;  %p31_p4 = scmp.ge.s32.totalorder %s4570_s30, 2 }
   0x9   : > { %s4572_s30 = smov (%p31_p4, %s4570_s30), 0  ;;  %281 = sbr.rel (%p278_p3) target bundleno = 1008 (0x3f0), region = 48 }
   0xe   : > { %p327_p5 = scmp.lt.s32.totalorder %s3576_s25, 1  ;;  %s3590_s12 = smov 127   ;;  %v4557_v8 = vmov 0.0   ;;  %vm461_vm0 = vcmask 261120   ;;  %vm436_vm1 = vcmask 1039360   ;;  %vm813_vm2 = vcmask 1031168  }
   0xf   : > { %p334_p6 = scmp.lt.s32.totalorder %s3572_s24, 1  ;;  %532 = vmatprep.mubr.f32.mxu0 %v4557_v8  ;;  %s3592_s17 = smov 126   ;;  %vm1037_vm3 = vcmask 777216   ;;  %vm1261_vm4 = vcmask 769024   ;;  %vm1485_vm5 = vcmask 760832   ;;  %vm1709_vm6 = vcmask 506880  }
  0x10   : > { %s4574_s25 = smov (!%p327_p5, %s3576_s25), 1  ;;  %s3593_s18 = smov 95   ;;  %vm1933_vm7 = vcmask 498688   ;;  %vm2157_vm8 = vcmask 490496   ;;  %vm2382_vm9 = vcmask 130048  }
  0x11   : > { %s3296_s8 = sshll.u32 %s4574_s25, 7  ;;  %s4576_s24 = smov (!%p334_p6, %s3572_s24), 1 }
  0x12   : > { %s3679_s11 = scalar_lea.vmem %s4549_s0, %s3296_s8  ;;  %s3496_s13 = smul.u32 144, %s4576_s24 }
  0x13   : > { %v3682_v0 = vld [vmem:[%s3679_s11 + $0x68] sm:$0xff]  ;;  %v3685_v1 = vld [vmem:[%s3679_s11 + $0x60] sm:$0xff]  ;;  %v3692_v2 = vld [vmem:[%s3679_s11 + $0x70] sm:$0xff]  ;;  %s3594_s19 = smov 94   ;;  %s3595_s20 = smov 93  }
  0x14   : > { %430 = vrot.lane.b32.xlu0 %v3682_v0, %s3590_s12  ;;  %428 = vrot.lane.b32.xlu1 %v3685_v1, %s3590_s12  ;;  %v3695_v3 = vld [vmem:[%s3679_s11 + $0x48] sm:$0xff]  ;;  %v3703_v4 = vld [vmem:[%s3679_s11 + $0x50] sm:$0xff]  ;;  %s3726_s16 = scalar_lea.vmem %s4551_s2, %s3496_s13  ;;  %s3596_s21 = smov 62  }
  0x15   : > { %v3706_v5 = vld [vmem:[%s3679_s11 + $0x40] sm:$0xff]  ;;  %v3717_v6 = vld [vmem:[%s3679_s11 + $0x30] sm:$0xff]  ;;  %v3720_v7 = vld [vmem:[%s3679_s11 + $0x28] sm:$0xff]  ;;  %s3597_s22 = smov 61   ;;  %s3598_s23 = smov 60  }
  0x16   : > { %v3733_v9 = vld [vmem:[%s3726_s16 + $0x10] sm:$0xff]  ;;  %v3736_v10 = vld [vmem:[%s3679_s11 + $0x20] sm:$0xff]  ;;  %v3739_v11 = vld [vmem:[%s3679_s11 + $0x8] sm:$0xff]  ;;  %s3495_s10 = smul.u32 12, %s4574_s25 }
  0x17   : > { %3375 = vmatprep.mubr.msk.f32.mxu1 %vm461_vm0, %v3733_v9  ;;  %v3748_v12 = vld [vmem:[%s3679_s11 + $0x10] sm:$0xff]  ;;  %v3751_v13 = vld [vmem:[%s3679_s11] sm:$0xff]  ;;  %v3758_v14 = vld [vmem:[%s3679_s11 + $0x78] sm:$0xff] }
  0x18   : > { %432 = vrot.lane.b32.xlu0 %v3692_v2, %s3590_s12  ;;  %422 = vrot.lane.b32.xlu1 %v3695_v3, %s3590_s12  ;;  %v3769_v15 = vld [vmem:[%s3679_s11 + $0x58] sm:$0xff]  ;;  %v355_v44 = vld [vmem:[%s3726_s16] sm:$0xff] }
  0x19   : > { %v3780_v16 = vld [vmem:[%s3679_s11 + $0x38] sm:$0xff]  ;;  %v3936_v50 = vld [vmem:[%s3726_s16 + $0x8] sm:$0xff] }
  0x1a   : > { %v3791_v17 = vld [vmem:[%s3679_s11 + $0x18] sm:$0xff] }
  0x1b   : > { %v3908_v41 = vld [vmem:[%s3726_s16 + $0x18] sm:$0xff] }
  0x1c   : > { %424 = vrot.lane.b32.xlu0 %v3703_v4, %s3590_s12  ;;  %420 = vrot.lane.b32.xlu1 %v3706_v5, %s3590_s12 }
  0x20   : > { %416 = vrot.lane.b32.xlu1 %v3717_v6, %s3590_s12  ;;  %414 = vrot.lane.b32.xlu0 %v3720_v7, %s3590_s12 }
  0x24   : > { %412 = vrot.lane.b32.xlu0 %v3736_v10, %s3590_s12  ;;  %406 = vrot.lane.b32.xlu1 %v3739_v11, %s3590_s12 }
  0x28   : > { %408 = vrot.lane.b32.xlu0 %v3748_v12, %s3590_s12  ;;  %404 = vrot.lane.b32.xlu1 %v3751_v13, %s3590_s12 }
  0x2c   : > { %434 = vrot.lane.b32.xlu0 %v3758_v14, %s3590_s12  ;;  %807 = vrot.lane.b32.xlu1 %v3682_v0, %s3592_s17 }
  0x30   : > { %809 = vrot.lane.b32.xlu0 %v3692_v2, %s3592_s17  ;;  %805 = vrot.lane.b32.xlu1 %v3685_v1, %s3592_s17 }
  0x34   : > { %426 = vrot.lane.b32.xlu0 %v3769_v15, %s3590_s12  ;;  %799 = vrot.lane.b32.xlu1 %v3695_v3, %s3592_s17 }
  0x38   : > { %801 = vrot.lane.b32.xlu0 %v3703_v4, %s3592_s17  ;;  %797 = vrot.lane.b32.xlu1 %v3706_v5, %s3592_s17 }
  0x3c   : > { %418 = vrot.lane.b32.xlu0 %v3780_v16, %s3590_s12  ;;  %791 = vrot.lane.b32.xlu1 %v3720_v7, %s3592_s17 }
  0x40   : > { %793 = vrot.lane.b32.xlu0 %v3717_v6, %s3592_s17  ;;  %789 = vrot.lane.b32.xlu1 %v3736_v10, %s3592_s17 }
  0x44   : > { %410 = vrot.lane.b32.xlu0 %v3791_v17, %s3590_s12  ;;  %783 = vrot.lane.b32.xlu1 %v3739_v11, %s3592_s17 }
  0x48   : > { %785 = vrot.lane.b32.xlu0 %v3748_v12, %s3592_s17  ;;  %781 = vrot.lane.b32.xlu1 %v3751_v13, %s3592_s17 }
  0x4c   : > { %1031 = vrot.lane.b32.xlu0 %v3682_v0, %s3593_s18  ;;  %1033 = vrot.lane.b32.xlu1 %v3692_v2, %s3593_s18 }
  0x50   : > { %1029 = vrot.lane.b32.xlu0 %v3685_v1, %s3593_s18  ;;  %1023 = vrot.lane.b32.xlu1 %v3695_v3, %s3593_s18 }
  0x54   : > { %1025 = vrot.lane.b32.xlu0 %v3703_v4, %s3593_s18  ;;  %1021 = vrot.lane.b32.xlu1 %v3706_v5, %s3593_s18 }
  0x58   : > { %1015 = vrot.lane.b32.xlu0 %v3720_v7, %s3593_s18  ;;  %1017 = vrot.lane.b32.xlu1 %v3717_v6, %s3593_s18 }
  0x5c   : > { %1013 = vrot.lane.b32.xlu0 %v3736_v10, %s3593_s18  ;;  %1007 = vrot.lane.b32.xlu1 %v3739_v11, %s3593_s18 }
  0x60   : > { %1009 = vrot.lane.b32.xlu0 %v3748_v12, %s3593_s18  ;;  %1005 = vrot.lane.b32.xlu1 %v3751_v13, %s3593_s18 }
  0x64   : > { %811 = vrot.lane.b32.xlu0 %v3758_v14, %s3592_s17  ;;  %1255 = vrot.lane.b32.xlu1 %v3682_v0, %s3594_s19 }
  0x68   : > { %1257 = vrot.lane.b32.xlu0 %v3692_v2, %s3594_s19  ;;  %1253 = vrot.lane.b32.xlu1 %v3685_v1, %s3594_s19 }
  0x6c   : > { %803 = vrot.lane.b32.xlu0 %v3769_v15, %s3592_s17  ;;  %1247 = vrot.lane.b32.xlu1 %v3695_v3, %s3594_s19 }
  0x70   : > { %1249 = vrot.lane.b32.xlu0 %v3703_v4, %s3594_s19  ;;  %1245 = vrot.lane.b32.xlu1 %v3706_v5, %s3594_s19 }
  0x74   : > { %795 = vrot.lane.b32.xlu0 %v3780_v16, %s3592_s17  ;;  %1239 = vrot.lane.b32.xlu1 %v3720_v7, %s3594_s19 }
  0x78   : > { %1241 = vrot.lane.b32.xlu0 %v3717_v6, %s3594_s19  ;;  %1237 = vrot.lane.b32.xlu1 %v3736_v10, %s3594_s19 }
  0x7c   : > { %787 = vrot.lane.b32.xlu0 %v3791_v17, %s3592_s17  ;;  %1231 = vrot.lane.b32.xlu1 %v3739_v11, %s3594_s19  ;;  %s3600_s17 = smov 112  }
  0x80   : > { %1233 = vrot.lane.b32.xlu0 %v3748_v12, %s3594_s19  ;;  %1229 = vrot.lane.b32.xlu1 %v3751_v13, %s3594_s19 }
  0x84   : > { %1035 = vrot.lane.b32.xlu0 %v3758_v14, %s3593_s18  ;;  %1479 = vrot.lane.b32.xlu1 %v3682_v0, %s3595_s20 }
  0x86   : > { %v431_v18 = vpop.permute.xlu0 %430  ;;  %v429_v19 = vpop.permute.xlu1 %428 }
  0x87   : > { %v446_v23 = vsel %vm436_vm1, %v429_v19, %v431_v18 }
  0x88   : > { %1481 = vrot.lane.b32.xlu0 %v3692_v2, %s3595_s20  ;;  %1477 = vrot.lane.b32.xlu1 %v3685_v1, %s3595_s20 }
  0x8a   : > { %v433_v20 = vpop.permute.xlu0 %432  ;;  %v423_v21 = vpop.permute.xlu1 %422 }
  0x8b   : > { %v447_v22 = vsel %vm436_vm1, %v431_v18, %v433_v20 }
  0x8c   : > { %492 = vmatprep.subr.mxu0 %v447_v22  ;;  %1027 = vrot.lane.b32.xlu0 %v3769_v15, %s3593_s18  ;;  %v3236_v22 = vld [vmem:[%s3726_s16 + $0x20] sm:$0xff] }
  0x8d   : > { %1471 = vrot.lane.b32.xlu1 %v3695_v3, %s3595_s20  ;;  %493 = vmatpush1.msra.mxu0 %v446_v23 }
  0x8e   : > { %v425_v24 = vpop.permute.xlu0 %424  ;;  %v421_v25 = vpop.permute.xlu1 %420 }
  0x8f   : > { %v444_v26 = vsel %vm436_vm1, %v423_v21, %v425_v24  ;;  %v443_v27 = vsel %vm436_vm1, %v421_v25, %v423_v21 }
  0x90   : > { %494 = vmatprep.subr.mxu0 %v444_v26  ;;  %1473 = vrot.lane.b32.xlu0 %v3703_v4, %s3595_s20  ;;  %v3998_v26 = vld [vmem:[%s3726_s16 + $0x28] sm:$0xff] }
  0x91   : > { %1469 = vrot.lane.b32.xlu1 %v3706_v5, %s3595_s20  ;;  %495 = vmatpush1.msra.mxu0 %v443_v27 }
  0x92   : > { %v3877_v28 = vpop.permute.xlu1 %416  ;;  %v415_v29 = vpop.permute.xlu0 %414 }
  0x93   : > { %v441_v30 = vsel %vm436_vm1, %v415_v29, %v3877_v28 }
  0x94   : > { %496 = vmatprep.subr.mxu0 %v441_v30  ;;  %1019 = vrot.lane.b32.xlu0 %v3780_v16, %s3593_s18 }
  0x95   : > { %1463 = vrot.lane.b32.xlu1 %v3720_v7, %s3595_s20 }
  0x96   : > { %v413_v31 = vpop.permute.xlu0 %412  ;;  %v407_v32 = vpop.permute.xlu1 %406 }
  0x97   : > { %v440_v33 = vsel %vm436_vm1, %v413_v31, %v415_v29 }
  0x98   : > { %497 = vmatpush1.msra.mxu0 %v440_v33  ;;  %1465 = vrot.lane.b32.xlu0 %v3717_v6, %s3595_s20 }
  0x99   : > { %1461 = vrot.lane.b32.xlu1 %v3736_v10, %s3595_s20 }
  0x9a   : > { %v3890_v34 = vpop.permute.xlu0 %408  ;;  %v405_v35 = vpop.permute.xlu1 %404 }
  0x9b   : > { %v438_v36 = vsel %vm436_vm1, %v407_v32, %v3890_v34  ;;  %v437_v37 = vsel %vm436_vm1, %v405_v35, %v407_v32 }
  0x9c   : > { %1011 = vrot.lane.b32.xlu0 %v3791_v17, %s3593_s18  ;;  %498 = vmatprep.subr.mxu0 %v438_v36 }
  0x9d   : > { %1455 = vrot.lane.b32.xlu1 %v3739_v11, %s3595_s20  ;;  %499 = vmatpush1.msra.mxu0 %v437_v37 }
  0x9e   : > { %v435_v38 = vpop.permute.xlu0 %434  ;;  %v808_v39 = vpop.permute.xlu1 %807  ;;  %650 = vmatprep.subr.mxu0 %v3682_v0  ;;  %3228 = vmatmul.mubr.msk.f32.vlgmr.msra.gmra.mxu0 %vm461_vm0, %v3733_v9 }
  0x9f   : > { %651 = vmatpush1.msra.mxu0 %v3685_v1  ;;  %v448_v40 = vsel %vm436_vm1, %v433_v20, %v435_v38  ;;  %538 = vmatprep.mubr.f32.mxu0 %v4557_v8 }
  0xa0   : > { %1457 = vrot.lane.b32.xlu0 %v3748_v12, %s3595_s20  ;;  %3367 = vmatprep.subr.mxu1 %v448_v40 }
  0xa1   : > { %1453 = vrot.lane.b32.xlu1 %v3751_v13, %s3595_s20  ;;  %652 = vmatprep.subr.mxu0 %v3695_v3 }
  0xa2   : > { %3368 = vmatpush3.msra.mxu1 %v448_v40  ;;  %653 = vmatpush1.msra.mxu0 %v3706_v5  ;;  %v3914_v42 = vpop.permute.xlu0 %809  ;;  %v806_v43 = vpop.permute.xlu1 %805 }
  0xa3   : > { %654 = vmatprep.subr.mxu0 %v3720_v7  ;;  %3229 = vmatmul.mubr.msk.f32.gmra.mxu0 %vm461_vm0, %v3908_v41  ;;  %v824_v47 = vsel %vm813_vm2, %v808_v39, %v3914_v42  ;;  %v823_v48 = vsel %vm813_vm2, %v806_v43, %v808_v39 }
  0xa4   : > { %655 = vmatpush1.msra.mxu0 %v3736_v10  ;;  %1259 = vrot.lane.b32.xlu0 %v3758_v14, %s3594_s19 }
  0xa5   : > { %1703 = vrot.lane.b32.xlu1 %v3682_v0, %s3596_s21  ;;  %656 = vmatprep.subr.mxu0 %v3739_v11 }
  0xa6   : > { %657 = vmatpush1.msra.mxu0 %v3751_v13  ;;  %v427_v45 = vpop.permute.xlu0 %426  ;;  %690 = vmatprep.mubr.f32.mxu0 %v4557_v8  ;;  %v800_v46 = vpop.permute.xlu1 %799 }
  0xa7   : > { %868 = vmatprep.subr.mxu0 %v824_v47  ;;  %3232 = vmatmul.mubr.msk.f32.vlgmr.msra.gmra.mxu0 %vm461_vm0, %v355_v44  ;;  %v445_v49 = vsel %vm436_vm1, %v425_v24, %v427_v45  ;;  %v4047_v45 = vld [vmem:[%s3726_s16 + $0x30] sm:$0xff] }
  0xa8   : > { %869 = vmatpush1.msra.mxu0 %v823_v48  ;;  %1705 = vrot.lane.b32.xlu0 %v3692_v2, %s3596_s21 }
  0xa9   : > { %3369 = vmatprep.subr.mxu1 %v445_v49  ;;  %1701 = vrot.lane.b32.xlu1 %v3685_v1, %s3596_s21 }
  0xaa   : > { %3370 = vmatpush3.msra.mxu1 %v445_v49  ;;  %v3940_v51 = vpop.permute.xlu0 %801  ;;  %v798_v52 = vpop.permute.xlu1 %797  ;;  %696 = vmatprep.mubr.f32.mxu0 %v4557_v8  ;;  %v4059_v49 = vld [vmem:[%s3726_s16 + $0x38] sm:$0xff] }
  0xab   : > { %v820_v53 = vsel %vm813_vm2, %v798_v52, %v800_v46  ;;  %v821_v54 = vsel %vm813_vm2, %v800_v46, %v3940_v51  ;;  %3233 = vmatmul.mubr.msk.f32.gmra.mxu0 %vm461_vm0, %v3936_v50 }
  0xac   : > { %1251 = vrot.lane.b32.xlu0 %v3769_v15, %s3594_s19  ;;  %870 = vmatprep.subr.mxu0 %v821_v54 }
  0xad   : > { %1695 = vrot.lane.b32.xlu1 %v3695_v3, %s3596_s21  ;;  %871 = vmatpush1.msra.mxu0 %v820_v53 }
  0xae   : > { %v419_v55 = vpop.permute.xlu0 %418  ;;  %v792_v56 = vpop.permute.xlu1 %791  ;;  %908 = vmatprep.mubr.f32.mxu0 %v4557_v8 }
  0xaf   : > { %v442_v57 = vsel %vm436_vm1, %v3877_v28, %v419_v55 }
  0xb0   : > { %1697 = vrot.lane.b32.xlu0 %v3703_v4, %s3596_s21  ;;  %3371 = vmatprep.subr.mxu1 %v442_v57 }
  0xb1   : > { %1693 = vrot.lane.b32.xlu1 %v3706_v5, %s3596_s21  ;;  %3372 = vmatpush3.msra.mxu1 %v442_v57 }
  0xb2   : > { %v3959_v58 = vpop.permute.xlu0 %793  ;;  %v790_v59 = vpop.permute.xlu1 %789 }
  0xb3   : > { %v817_v60 = vsel %vm813_vm2, %v790_v59, %v792_v56  ;;  %v818_v61 = vsel %vm813_vm2, %v792_v56, %v3959_v58 }
  0xb4   : > { %1243 = vrot.lane.b32.xlu0 %v3780_v16, %s3594_s19  ;;  %872 = vmatprep.subr.mxu0 %v818_v61 }
  0xb5   : > { %1687 = vrot.lane.b32.xlu1 %v3720_v7, %s3596_s21  ;;  %873 = vmatpush1.msra.mxu0 %v817_v60 }
  0xb6   : > { %v411_v62 = vpop.permute.xlu0 %410  ;;  %v784_v63 = vpop.permute.xlu1 %783 }
  0xb7   : > { %v439_v9 = vsel %vm436_vm1, %v3890_v34, %v411_v62 }
  0xb8   : > { %1689 = vrot.lane.b32.xlu0 %v3717_v6, %s3596_s21  ;;  %3373 = vmatprep.subr.mxu1 %v439_v9 }
  0xb9   : > { %1685 = vrot.lane.b32.xlu1 %v3736_v10, %s3596_s21  ;;  %3374 = vmatpush3.msra.mxu1 %v439_v9 }
  0xba   : > { %v3974_v18 = vpop.permute.xlu0 %785  ;;  %v782_v19 = vpop.permute.xlu1 %781  ;;  %3378 = vmatprep.subr.mxu1 %v3692_v2  ;;  %3376 = vmatmul.mubr.msk.f32.vlgmr.msra.gmra.mxu1 %vm461_vm0, %v3908_v41 }
  0xbb   : > { %v814_v20 = vsel %vm813_vm2, %v782_v19, %v784_v63  ;;  %v815_v21 = vsel %vm813_vm2, %v784_v63, %v3974_v18  ;;  %3379 = vmatpush3.msra.mxu1 %v3692_v2  ;;  %3386 = vmatprep.mubr.msk.f32.mxu1 %vm461_vm0, %v355_v44 }
  0xbc   : > { %1235 = vrot.lane.b32.xlu0 %v3791_v17, %s3594_s19  ;;  %874 = vmatprep.subr.mxu0 %v815_v21 }
  0xbd   : > { %1679 = vrot.lane.b32.xlu1 %v3739_v11, %s3596_s21  ;;  %875 = vmatpush1.msra.mxu0 %v814_v20 }
  0xbe   : > { %v1032_v23 = vpop.permute.xlu0 %1031  ;;  %v3989_v24 = vpop.permute.xlu1 %1033  ;;  %3238 = vmatmul.mubr.msk.f32.vlgmr.msra.gmra.mxu0 %vm461_vm0, %v3236_v22  ;;  %3380 = vmatprep.subr.mxu1 %v3703_v4 }
  0xbf   : > { %v1048_v25 = vsel %vm1037_vm3, %v1032_v23, %v3989_v24  ;;  %3381 = vmatpush3.msra.mxu1 %v3703_v4  ;;  %914 = vmatprep.mubr.f32.mxu0 %v4557_v8 }
  0xc0   : > { %1681 = vrot.lane.b32.xlu0 %v3748_v12, %s3596_s21  ;;  %1092 = vmatprep.subr.mxu0 %v1048_v25 }
  0xc1   : > { %1677 = vrot.lane.b32.xlu1 %v3751_v13, %s3596_s21  ;;  %3382 = vmatprep.subr.mxu1 %v3717_v6 }
  0xc2   : > { %v1030_v27 = vpop.permute.xlu0 %1029  ;;  %v1024_v28 = vpop.permute.xlu1 %1023  ;;  %3383 = vmatpush3.msra.mxu1 %v3717_v6  ;;  %3239 = vmatmul.mubr.msk.f32.gmra.mxu0 %vm461_vm0, %v3998_v26 }
  0xc3   : > { %v1047_v29 = vsel %vm1037_vm3, %v1030_v27, %v1032_v23  ;;  %3384 = vmatprep.subr.mxu1 %v3748_v12  ;;  %1132 = vmatprep.mubr.f32.mxu0 %v4557_v8  ;;  %v4121_v23 = vld [vmem:[%s3726_s16 + $0x40] sm:$0xff] }
  0xc4   : > { %1483 = vrot.lane.b32.xlu0 %v3758_v14, %s3595_s20  ;;  %1093 = vmatpush1.msra.mxu0 %v1047_v29 }
  0xc5   : > { %1927 = vrot.lane.b32.xlu1 %v3682_v0, %s3597_s22  ;;  %3385 = vmatpush3.msra.mxu1 %v3748_v12 }
  0xc6   : > { %v4016_v30 = vpop.permute.xlu0 %1025  ;;  %v1022_v31 = vpop.permute.xlu1 %1021  ;;  %3387 = vmatmul.mubr.msk.f32.vlgmr.msra.gmra.mxu1 %vm461_vm0, %v3936_v50 }
  0xc7   : > { %v1044_v32 = vsel %vm1037_vm3, %v1022_v31, %v1024_v28  ;;  %v1045_v33 = vsel %vm1037_vm3, %v1024_v28, %v4016_v30  ;;  %3397 = vmatprep.mubr.msk.f32.mxu1 %vm461_vm0, %v3236_v22 }
  0xc8   : > { %1929 = vrot.lane.b32.xlu0 %v3692_v2, %s3597_s22  ;;  %1094 = vmatprep.subr.mxu0 %v1045_v33 }
  0xc9   : > { %1925 = vrot.lane.b32.xlu1 %v3685_v1, %s3597_s22  ;;  %1095 = vmatpush1.msra.mxu0 %v1044_v32 }
  0xca   : > { %v1016_v34 = vpop.permute.xlu0 %1015  ;;  %v4028_v35 = vpop.permute.xlu1 %1017 }
  0xcb   : > { %v1042_v36 = vsel %vm1037_vm3, %v1016_v34, %v4028_v35 }
  0xcc   : > { %1475 = vrot.lane.b32.xlu0 %v3769_v15, %s3595_s20  ;;  %1096 = vmatprep.subr.mxu0 %v1042_v36  ;;  %v3599_v36 = vmov 0  }
  0xcd   : > { %1919 = vrot.lane.b32.xlu1 %v3695_v3, %s3597_s22  ;;  %3548 = vset.pattern.permute.xlu0 %v3599_v36 }
  0xce   : > { %v1014_v37 = vpop.permute.xlu0 %1013  ;;  %v1008_v38 = vpop.permute.xlu1 %1007  ;;  %3549 = vset.pattern.permute.xlu1 %v3599_v36 }
  0xcf   : > { %v1041_v39 = vsel %vm1037_vm3, %v1014_v37, %v1016_v34 }
  0xd0   : > { %1921 = vrot.lane.b32.xlu0 %v3703_v4, %s3597_s22  ;;  %1097 = vmatpush1.msra.mxu0 %v1041_v39 }
  0xd1   : > { %1917 = vrot.lane.b32.xlu1 %v3706_v5, %s3597_s22 }
  0xd2   : > { %v4041_v40 = vpop.permute.xlu0 %1009  ;;  %v1006_v41 = vpop.permute.xlu1 %1005 }
  0xd3   : > { %v1038_v43 = vsel %vm1037_vm3, %v1006_v41, %v1008_v38  ;;  %v1039_v44 = vsel %vm1037_vm3, %v1008_v38, %v4041_v40 }
  0xd4   : > { %1467 = vrot.lane.b32.xlu0 %v3780_v16, %s3595_s20  ;;  %1098 = vmatprep.subr.mxu0 %v1039_v44 }
  0xd5   : > { %1911 = vrot.lane.b32.xlu1 %v3720_v7, %s3597_s22  ;;  %1099 = vmatpush1.msra.mxu0 %v1038_v43 }
  0xd6   : > { %v812_v46 = vpop.permute.xlu0 %811  ;;  %v1256_v47 = vpop.permute.xlu1 %1255  ;;  %3244 = vmatmul.mubr.msk.f32.vlgmr.msra.gmra.mxu0 %vm461_vm0, %v4047_v45 }
  0xd7   : > { %v825_v48 = vsel %vm813_vm2, %v3914_v42, %v812_v46  ;;  %1138 = vmatprep.mubr.f32.mxu0 %v4557_v8  ;;  %v4210_v46 = vld [vmem:[%s4553_s4 + $0x8] sm:$0xff] }
  0xd8   : > { %1913 = vrot.lane.b32.xlu0 %v3717_v6, %s3597_s22  ;;  %3389 = vmatprep.subr.mxu1 %v825_v48 }
  0xd9   : > { %1909 = vrot.lane.b32.xlu1 %v3736_v10, %s3597_s22  ;;  %3390 = vmatpush3.msra.mxu1 %v825_v48  ;;  %v4217_v48 = vld [vmem:[%s4553_s4] sm:$0xff] }
  0xda   : > { %v4065_v50 = vpop.permute.xlu0 %1257  ;;  %v1254_v52 = vpop.permute.xlu1 %1253  ;;  %3245 = vmatmul.mubr.msk.f32.gmra.mxu0 %vm461_vm0, %v4059_v49 }
  0xdb   : > { %v1271_v42 = vsel %vm1261_vm4, %v1254_v52, %v1256_v47  ;;  %v1272_v53 = vsel %vm1261_vm4, %v1256_v47, %v4065_v50  ;;  %1356 = vmatprep.mubr.f32.mxu0 %v4557_v8 }
  0xdc   : > { %1459 = vrot.lane.b32.xlu0 %v3791_v17, %s3595_s20  ;;  %1316 = vmatprep.subr.mxu0 %v1272_v53  ;;  %v2370_v53 = vld [vmem:[%s4554_s5] sm:$0xff] }
  0xdd   : > { %1903 = vrot.lane.b32.xlu1 %v3739_v11, %s3597_s22  ;;  %1317 = vmatpush1.msra.mxu0 %v1271_v42  ;;  %v4223_v42 = vld [vmem:[%s3726_s16 + $0x58] sm:$0xff] }
  0xde   : > { %v804_v54 = vpop.permute.xlu0 %803  ;;  %v1248_v55 = vpop.permute.xlu1 %1247 }
  0xdf   : > { %v822_v56 = vsel %vm813_vm2, %v3940_v51, %v804_v54 }
  0xe0   : > { %1905 = vrot.lane.b32.xlu0 %v3748_v12, %s3597_s22  ;;  %3391 = vmatprep.subr.mxu1 %v822_v56 }
  0xe1   : > { %1901 = vrot.lane.b32.xlu1 %v3751_v13, %s3597_s22  ;;  %3392 = vmatpush3.msra.mxu1 %v822_v56 }
  0xe2   : > { %v4083_v57 = vpop.permute.xlu0 %1249  ;;  %v1246_v59 = vpop.permute.xlu1 %1245 }
  0xe3   : > { %v1268_v60 = vsel %vm1261_vm4, %v1246_v59, %v1248_v55  ;;  %v1269_v61 = vsel %vm1261_vm4, %v1248_v55, %v4083_v57 }
  0xe4   : > { %1707 = vrot.lane.b32.xlu0 %v3758_v14, %s3596_s21  ;;  %1318 = vmatprep.subr.mxu0 %v1269_v61 }
  0xe5   : > { %2151 = vrot.lane.b32.xlu1 %v3682_v0, %s3598_s23  ;;  %1319 = vmatpush1.msra.mxu0 %v1268_v60  ;;  %v2372_v60 = vld [vmem:[%s4555_s6] sm:$0xff] }
  0xe6   : > { %v796_v51 = vpop.permute.xlu0 %795  ;;  %v1240_v62 = vpop.permute.xlu1 %1239 }
  0xe7   : > { %v819_v63 = vsel %vm813_vm2, %v3959_v58, %v796_v51  ;;  %v2373_v51 = vld [vmem:[%s4555_s6 + $0x8] sm:$0xff] }
  0xe8   : > { %2153 = vrot.lane.b32.xlu0 %v3692_v2, %s3598_s23  ;;  %3393 = vmatprep.subr.mxu1 %v819_v63 }
  0xe9   : > { %2149 = vrot.lane.b32.xlu1 %v3685_v1, %s3598_s23  ;;  %3394 = vmatpush3.msra.mxu1 %v819_v63 }
  0xea   : > { %v4098_v9 = vpop.permute.xlu0 %1241  ;;  %v1238_v19 = vpop.permute.xlu1 %1237 }
  0xeb   : > { %v1265_v20 = vsel %vm1261_vm4, %v1238_v19, %v1240_v62  ;;  %v1266_v0 = vsel %vm1261_vm4, %v1240_v62, %v4098_v9 }
  0xec   : > { %1699 = vrot.lane.b32.xlu0 %v3769_v15, %s3596_s21  ;;  %1320 = vmatprep.subr.mxu0 %v1266_v0 }
  0xed   : > { %2143 = vrot.lane.b32.xlu1 %v3695_v3, %s3598_s23  ;;  %1321 = vmatpush1.msra.mxu0 %v1265_v20 }
  0xee   : > { %v788_v2 = vpop.permute.xlu0 %787  ;;  %v1232_v1 = vpop.permute.xlu1 %1231 }
  0xef   : > { %v816_v58 = vsel %vm813_vm2, %v3974_v18, %v788_v2 }
  0xf0   : > { %2145 = vrot.lane.b32.xlu0 %v3703_v4, %s3598_s23  ;;  %3395 = vmatprep.subr.mxu1 %v816_v58 }
  0xf1   : > { %2141 = vrot.lane.b32.xlu1 %v3706_v5, %s3598_s23  ;;  %3396 = vmatpush3.msra.mxu1 %v816_v58 }
  0xf2   : > { %v4113_v21 = vpop.permute.xlu0 %1233  ;;  %v1230_v22 = vpop.permute.xlu1 %1229  ;;  %3398 = vmatmul.mubr.msk.f32.vlgmr.msra.gmra.mxu1 %vm461_vm0, %v3998_v26  ;;  %v4135_v26 = vld [vmem:[%s3726_s16 + $0x48] sm:$0xff] }
  0xf3   : > { %v1262_v3 = vsel %vm1261_vm4, %v1230_v22, %v1232_v1  ;;  %v1263_v18 = vsel %vm1261_vm4, %v1232_v1, %v4113_v21  ;;  %3408 = vmatprep.mubr.msk.f32.mxu1 %vm461_vm0, %v4047_v45 }
  0xf4   : > { %1691 = vrot.lane.b32.xlu0 %v3780_v16, %s3596_s21  ;;  %1322 = vmatprep.subr.mxu0 %v1263_v18 }
  0xf5   : > { %2135 = vrot.lane.b32.xlu1 %v3720_v7, %s3598_s23  ;;  %1323 = vmatpush1.msra.mxu0 %v1262_v3 }
  0xf6   : > { %v1036_v4 = vpop.permute.xlu0 %1035  ;;  %v1480_v5 = vpop.permute.xlu1 %1479  ;;  %3250 = vmatmul.mubr.msk.f32.vlgmr.msra.gmra.mxu0 %vm461_vm0, %v4121_v23 }
  0xf7   : > { %v1049_v25 = vsel %vm1037_vm3, %v3989_v24, %v1036_v4  ;;  %1362 = vmatprep.mubr.f32.mxu0 %v4557_v8 }
  0xf8   : > { %2137 = vrot.lane.b32.xlu0 %v3717_v6, %s3598_s23  ;;  %3400 = vmatprep.subr.mxu1 %v1049_v25 }
  0xf9   : > { %2133 = vrot.lane.b32.xlu1 %v3736_v10, %s3598_s23  ;;  %3401 = vmatpush3.msra.mxu1 %v1049_v25 }
  0xfa   : > { %v4141_v7 = vpop.permute.xlu0 %1481  ;;  %v1478_v27 = vpop.permute.xlu1 %1477  ;;  %3251 = vmatmul.mubr.msk.f32.gmra.mxu0 %vm461_vm0, %v4135_v26 }
  0xfb   : > { %v1495_v24 = vsel %vm1485_vm5, %v1478_v27, %v1480_v5  ;;  %v1496_v28 = vsel %vm1485_vm5, %v1480_v5, %v4141_v7  ;;  %1580 = vmatprep.mubr.f32.mxu0 %v4557_v8 }
  0xfc   : > { %1683 = vrot.lane.b32.xlu0 %v3791_v17, %s3596_s21  ;;  %1540 = vmatprep.subr.mxu0 %v1496_v28  ;;  %v3260_v28 = vld [vmem:[%s3726_s16 + $0x60] sm:$0xff] }
  0xfd   : > { %2127 = vrot.lane.b32.xlu1 %v3739_v11, %s3598_s23  ;;  %1541 = vmatpush1.msra.mxu0 %v1495_v24 }
  0xfe   : > { %v1028_v6 = vpop.permute.xlu0 %1027 }
  0xff   : > { %v1472_v10 = vpop.permute.xlu1 %1471  ;;  %v1046_v29 = vsel %vm1037_vm3, %v4016_v30, %v1028_v6 }
 0x100   : > { %2129 = vrot.lane.b32.xlu0 %v3748_v12, %s3598_s23  ;;  %3402 = vmatprep.subr.mxu1 %v1046_v29 }
 0x101   : > { %2125 = vrot.lane.b32.xlu1 %v3751_v13, %s3598_s23  ;;  %3403 = vmatpush3.msra.mxu1 %v1046_v29 }
 0x102   : > { %v4159_v31 = vpop.permute.xlu0 %1473 }
 0x103   : > { %v1470_v32 = vpop.permute.xlu1 %1469  ;;  %v1493_v11 = vsel %vm1485_vm5, %v1472_v10, %v4159_v31 }
 0x104   : > { %v1492_v33 = vsel %vm1485_vm5, %v1470_v32, %v1472_v10  ;;  %1931 = vrot.lane.b32.xlu0 %v3758_v14, %s3597_s22  ;;  %1542 = vmatprep.subr.mxu0 %v1493_v11 }
 0x105   : > { %1923 = vrot.lane.b32.xlu1 %v3769_v15, %s3597_s22  ;;  %1543 = vmatpush1.msra.mxu0 %v1492_v33 }
 0x106   : > { %v1020_v12 = vpop.permute.xlu0 %1019 }
 0x107   : > { %v1464_v30 = vpop.permute.xlu1 %1463  ;;  %v1043_v13 = vsel %vm1037_vm3, %v4028_v35, %v1020_v12 }
 0x108   : > { %1915 = vrot.lane.b32.xlu0 %v3780_v16, %s3597_s22  ;;  %3404 = vmatprep.subr.mxu1 %v1043_v13 }
 0x109   : > { %1907 = vrot.lane.b32.xlu1 %v3791_v17, %s3597_s22  ;;  %3405 = vmatpush3.msra.mxu1 %v1043_v13 }
 0x10a   : > { %v4174_v34 = vpop.permute.xlu0 %1465 }
 0x10b   : > { %v1462_v37 = vpop.permute.xlu1 %1461  ;;  %v1490_v38 = vsel %vm1485_vm5, %v1464_v30, %v4174_v34 }
 0x10c   : > { %v1489_v39 = vsel %vm1485_vm5, %v1462_v37, %v1464_v30  ;;  %2155 = vrot.lane.b32.xlu0 %v3758_v14, %s3598_s23  ;;  %1544 = vmatprep.subr.mxu0 %v1490_v38  ;;  %v2347_v14 = vld [vmem:[%s4552_s3 + $0x8] sm:$0xff] }
 0x10d   : > { %2147 = vrot.lane.b32.xlu1 %v3769_v15, %s3598_s23  ;;  %1545 = vmatpush1.msra.mxu0 %v1489_v39  ;;  %v2346_v15 = vld [vmem:[%s4552_s3] sm:$0xff] }
 0x10e   : > { %v1012_v35 = vpop.permute.xlu0 %1011 }
 0x10f   : > { %v1456_v41 = vpop.permute.xlu1 %1455  ;;  %v1040_v43 = vsel %vm1037_vm3, %v4041_v40, %v1012_v35 }
 0x110   : > { %2139 = vrot.lane.b32.xlu0 %v3780_v16, %s3598_s23  ;;  %3406 = vmatprep.subr.mxu1 %v1040_v43 }
 0x111   : > { %2131 = vrot.lane.b32.xlu1 %v3791_v17, %s3598_s23  ;;  %3407 = vmatpush3.msra.mxu1 %v1040_v43  ;;  %v4202_v17 = vld [vmem:[%s3726_s16 + $0x50] sm:$0xff] }
 0x112   : > { %v4192_v44 = vpop.permute.xlu0 %1457  ;;  %3409 = vmatmul.mubr.msk.f32.vlgmr.msra.gmra.mxu1 %vm461_vm0, %v4059_v49 }
 0x113   : > { %v1454_v40 = vpop.permute.xlu1 %1453  ;;  %v1487_v16 = vsel %vm1485_vm5, %v1456_v41, %v4192_v44  ;;  %3419 = vmatprep.mubr.msk.f32.mxu1 %vm461_vm0, %v4121_v23 }
 0x114   : > { %v1486_v45 = vsel %vm1485_vm5, %v1454_v40, %v1456_v41  ;;  %1546 = vmatprep.subr.mxu0 %v1487_v16  ;;  %2355 = vperm.xlu0 %3548, %v2347_v14  }
 0x115   : > { %1547 = vmatpush1.msra.mxu0 %v1486_v45  ;;  %2350 = vperm.xlu1 %3549, %v2346_v15  }
 0x116   : > { %v1260_v47 = vpop.permute.xlu0 %1259  ;;  %3256 = vmatmul.mubr.msk.f32.vlgmr.msra.gmra.mxu0 %vm461_vm0, %v4202_v17 }
 0x117   : > { %v1704_v49 = vpop.permute.xlu1 %1703  ;;  %v1273_v52 = vsel %vm1261_vm4, %v4065_v50, %v1260_v47  ;;  %1586 = vmatprep.mubr.f32.mxu0 %v4557_v8  ;;  %v2371_v50 = vld [vmem:[%s4554_s5 + $0x8] sm:$0xff] }
 0x118   : > { %3411 = vmatprep.subr.mxu1 %v1273_v52  ;;  %2380 = vrot.lane.b32.xlu0 %v4210_v46, %s3600_s17 }
 0x119   : > { %3412 = vmatpush3.msra.mxu1 %v1273_v52  ;;  %2378 = vrot.lane.b32.xlu1 %v4217_v48, %s3600_s17  ;;  %v3266_v52 = vld [vmem:[%s3726_s16 + $0x70] sm:$0xff] }
 0x11a   : > { %v4230_v54 = vpop.permute.xlu0 %1705  ;;  %3257 = vmatmul.mubr.msk.f32.gmra.mxu0 %vm461_vm0, %v4223_v42 }
 0x11b   : > { %v1702_v55 = vpop.permute.xlu1 %1701  ;;  %v1720_v56 = vsel %vm1709_vm6, %v1704_v49, %v4230_v54  ;;  %1804 = vmatprep.mubr.f32.mxu0 %v4557_v8 }
 0x11c   : > { %v1719_v59 = vsel %vm1709_vm6, %v1702_v55, %v1704_v49  ;;  %1764 = vmatprep.subr.mxu0 %v1720_v56  ;;  %2697 = vperm.xlu0 %3548, %v2370_v53  }
 0x11d   : > { %1765 = vmatpush1.msra.mxu0 %v1719_v59  ;;  %2702 = vperm.xlu1 %3549, %v2371_v50  }
 0x11e   : > { %v1252_v61 = vpop.permute.xlu0 %1251 }
 0x11f   : > { %v1696_v62 = vpop.permute.xlu1 %1695  ;;  %v1270_v63 = vsel %vm1261_vm4, %v4083_v57, %v1252_v61 }
 0x120   : > { %3413 = vmatprep.subr.mxu1 %v1270_v63  ;;  %2713 = vperm.xlu0 %3548, %v2372_v60  }
 0x121   : > { %3414 = vmatpush3.msra.mxu1 %v1270_v63  ;;  %2718 = vperm.xlu1 %3549, %v2373_v51  }
 0x122   : > { %v4249_v19 = vpop.permute.xlu0 %1697 }
 0x123   : > { %v1694_v20 = vpop.permute.xlu1 %1693  ;;  %v1717_v0 = vsel %vm1709_vm6, %v1696_v62, %v4249_v19 }
 0x124   : > { %v1716_v2 = vsel %vm1709_vm6, %v1694_v20, %v1696_v62  ;;  %1766 = vmatprep.subr.mxu0 %v1717_v0 }
 0x125   : > { %1767 = vmatpush1.msra.mxu0 %v1716_v2 }
 0x126   : > { %v1244_v1 = vpop.permute.xlu0 %1243 }
 0x127   : > { %v1688_v58 = vpop.permute.xlu1 %1687  ;;  %v1267_v22 = vsel %vm1261_vm4, %v4098_v9, %v1244_v1 }
 0x128   : > { %3415 = vmatprep.subr.mxu1 %v1267_v22 }
 0x129   : > { %3416 = vmatpush3.msra.mxu1 %v1267_v22 }
 0x12a   : > { %v4256_v57 = vpop.permute.xlu0 %1689 }
 0x12b   : > { %v1686_v3 = vpop.permute.xlu1 %1685  ;;  %v1714_v18 = vsel %vm1709_vm6, %v1688_v58, %v4256_v57 }
 0x12c   : > { %v1713_v23 = vsel %vm1709_vm6, %v1686_v3, %v1688_v58  ;;  %1768 = vmatprep.subr.mxu0 %v1714_v18 }
 0x12d   : > { %1769 = vmatpush1.msra.mxu0 %v1713_v23 }
 0x12e   : > { %v1236_v4 = vpop.permute.xlu0 %1235 }
 0x12f   : > { %v1680_v5 = vpop.permute.xlu1 %1679  ;;  %v1264_v25 = vsel %vm1261_vm4, %v4113_v21, %v1236_v4 }
 0x130   : > { %3417 = vmatprep.subr.mxu1 %v1264_v25 }
 0x131   : > { %3418 = vmatpush3.msra.mxu1 %v1264_v25 }
 0x132   : > { %v4263_v9 = vpop.permute.xlu0 %1681  ;;  %3420 = vmatmul.mubr.msk.f32.vlgmr.msra.gmra.mxu1 %vm461_vm0, %v4135_v26  ;;  %v4278_v26 = vld [vmem:[%s3726_s16 + $0x68] sm:$0xff] }
 0x133   : > { %v1678_v27 = vpop.permute.xlu1 %1677  ;;  %v1711_v24 = vsel %vm1709_vm6, %v1680_v5, %v4263_v9  ;;  %3430 = vmatprep.mubr.msk.f32.mxu1 %vm461_vm0, %v4202_v17 }
 0x134   : > { %v1710_v6 = vsel %vm1709_vm6, %v1678_v27, %v1680_v5  ;;  %1770 = vmatprep.subr.mxu0 %v1711_v24 }
 0x135   : > { %1771 = vmatpush1.msra.mxu0 %v1710_v6 }
 0x136   : > { %v1484_v21 = vpop.permute.xlu0 %1483  ;;  %3262 = vmatmul.mubr.msk.f32.vlgmr.msra.gmra.mxu0 %vm461_vm0, %v3260_v28 }
 0x137   : > { %v1928_v10 = vpop.permute.xlu1 %1927  ;;  %v1497_v29 = vsel %vm1485_vm5, %v4141_v7, %v1484_v21  ;;  %1810 = vmatprep.mubr.f32.mxu0 %v4557_v8 }
 0x138   : > { %3422 = vmatprep.subr.mxu1 %v1497_v29 }
 0x139   : > { %3423 = vmatpush3.msra.mxu1 %v1497_v29  ;;  %v3273_v29 = vld [vmem:[%s3726_s16 + $0x88] sm:$0xff] }
 0x13a   : > { %v4280_v32 = vpop.permute.xlu0 %1929  ;;  %3263 = vmatmul.mubr.msk.f32.gmra.mxu0 %vm461_vm0, %v4278_v26 }
 0x13b   : > { %v1926_v11 = vpop.permute.xlu1 %1925  ;;  %v1944_v33 = vsel %vm1933_vm7, %v1928_v10, %v4280_v32  ;;  %2028 = vmatprep.mubr.f32.mxu0 %v4557_v8 }
 0x13c   : > { %v1943_v7 = vsel %vm1933_vm7, %v1926_v11, %v1928_v10  ;;  %1988 = vmatprep.subr.mxu0 %v1944_v33 }
 0x13d   : > { %1989 = vmatpush1.msra.mxu0 %v1943_v7 }
 0x13e   : > { %v1476_v12 = vpop.permute.xlu0 %1475 }
 0x13f   : > { %v1920_v30 = vpop.permute.xlu1 %1919  ;;  %v1494_v13 = vsel %vm1485_vm5, %v4159_v31, %v1476_v12 }
 0x140   : > { %3424 = vmatprep.subr.mxu1 %v1494_v13 }
 0x141   : > { %3425 = vmatpush3.msra.mxu1 %v1494_v13 }
 0x142   : > { %v4290_v36 = vpop.permute.xlu0 %1921 }
 0x143   : > { %v1918_v37 = vpop.permute.xlu1 %1917  ;;  %v1941_v38 = vsel %vm1933_vm7, %v1920_v30, %v4290_v36 }
 0x144   : > { %v1940_v39 = vsel %vm1933_vm7, %v1918_v37, %v1920_v30  ;;  %1990 = vmatprep.subr.mxu0 %v1941_v38 }
 0x145   : > { %1991 = vmatpush1.msra.mxu0 %v1940_v39 }
 0x146   : > { %v1468_v35 = vpop.permute.xlu0 %1467 }
 0x147   : > { %v1912_v41 = vpop.permute.xlu1 %1911  ;;  %v1491_v43 = vsel %vm1485_vm5, %v4174_v34, %v1468_v35 }
 0x148   : > { %3426 = vmatprep.subr.mxu1 %v1491_v43 }
 0x149   : > { %3427 = vmatpush3.msra.mxu1 %v1491_v43 }
 0x14a   : > { %v4297_v31 = vpop.permute.xlu0 %1913 }
 0x14b   : > { %v1910_v14 = vpop.permute.xlu1 %1909  ;;  %v1938_v15 = vsel %vm1933_vm7, %v1912_v41, %v4297_v31 }
 0x14c   : > { %v1937_v40 = vsel %vm1933_vm7, %v1910_v14, %v1912_v41  ;;  %1992 = vmatprep.subr.mxu0 %v1938_v15 }
 0x14d   : > { %1993 = vmatpush1.msra.mxu0 %v1937_v40 }
 0x14e   : > { %v1460_v16 = vpop.permute.xlu0 %1459 }
 0x14f   : > { %v1904_v17 = vpop.permute.xlu1 %1903  ;;  %v1488_v45 = vsel %vm1485_vm5, %v4192_v44, %v1460_v16 }
 0x150   : > { %3428 = vmatprep.subr.mxu1 %v1488_v45 }
 0x151   : > { %3429 = vmatpush3.msra.mxu1 %v1488_v45 }
 0x152   : > { %v4304_v34 = vpop.permute.xlu0 %1905  ;;  %3431 = vmatmul.mubr.msk.f32.vlgmr.msra.gmra.mxu1 %vm461_vm0, %v4223_v42  ;;  %v4318_v42 = vld [vmem:[%s3726_s16 + $0x78] sm:$0xff] }
 0x153   : > { %v1902_v47 = vpop.permute.xlu1 %1901  ;;  %v1935_v49 = vsel %vm1933_vm7, %v1904_v17, %v4304_v34  ;;  %3441 = vmatprep.mubr.msk.f32.mxu1 %vm461_vm0, %v3260_v28  ;;  %v3272_v28 = vld [vmem:[%s3726_s16 + $0x80] sm:$0xff]  ;;  %s3494_s16 = smul.u32 6, %s4576_s24 }
 0x154   : > { %v1934_v53 = vsel %vm1933_vm7, %v1902_v47, %v1904_v17  ;;  %1994 = vmatprep.subr.mxu0 %v1935_v49 }
 0x155   : > { %1995 = vmatpush1.msra.mxu0 %v1934_v53  ;;  %s4368_s11 = sadd.s32 %s3495_s10, %s3494_s16 }
 0x156   : > { %v1708_v44 = vpop.permute.xlu0 %1707  ;;  %3268 = vmatmul.mubr.msk.f32.vlgmr.msra.gmra.mxu0 %vm461_vm0, %v3266_v52  ;;  %s3223_s12 = sshll.u32 %s4368_s11, 3 }
 0x157   : > { %v2152_v50 = vpop.permute.xlu1 %2151  ;;  %v1721_v55 = vsel %vm1709_vm6, %v4230_v54, %v1708_v44  ;;  %2034 = vmatprep.mubr.f32.mxu0 %v4557_v8  ;;  %s340_s15 = scalar_lea.vmem %s4550_s1, %s3223_s12  ;;  %s4514_s17 = scalar_lea.vmem %s4556_s7, %s3223_s12 }
 0x158   : > { %3433 = vmatprep.subr.mxu1 %v1721_v55  ;;  %v4380_v14 = vld [vmem:[%s340_s15 + $0x18] sm:$0xff]  ;;  %v4385_v40 = vld [vmem:[%s340_s15 + $0x8] sm:$0xff]  ;;  %v4388_v16 = vld [vmem:[%s340_s15] sm:$0xff] }
 0x159   : > { %3434 = vmatpush3.msra.mxu1 %v1721_v55  ;;  %v4390_v17 = vld [vmem:[%s340_s15 + $0x28] sm:$0xff]  ;;  %v4398_v47 = vld [vmem:[%s340_s15 + $0x10] sm:$0xff] }
 0x15a   : > { %v4320_v56 = vpop.permute.xlu0 %2153  ;;  %3269 = vmatmul.mubr.msk.f32.gmra.mxu0 %vm461_vm0, %v4318_v42  ;;  %4560 = vst [vmem:[#allocation2_spill] sm:$0xff] %v4398_v47 }
 0x15b   : > { %v2150_v59 = vpop.permute.xlu1 %2149  ;;  %v2168_v60 = vsel %vm2157_vm8, %v2152_v50, %v4320_v56  ;;  %2252 = vmatprep.mubr.f32.mxu0 %v4557_v8 }
 0x15c   : > { %v2167_v54 = vsel %vm2157_vm8, %v2150_v59, %v2152_v50  ;;  %2212 = vmatprep.subr.mxu0 %v2168_v60 }
 0x15d   : > { %2213 = vmatpush1.msra.mxu0 %v2167_v54 }
 0x15e   : > { %v1700_v61 = vpop.permute.xlu0 %1699  ;;  %v534_v43 = vpop.f32.mrf.mxu0 }
 0x15f   : > { %v2144_v51 = vpop.permute.xlu1 %2143  ;;  %v1718_v62 = vsel %vm1709_vm6, %v4249_v19, %v1700_v61 }
 0x160   : > { %3435 = vmatprep.subr.mxu1 %v1718_v62  ;;  %v536_v45 = vpop.f32.mrf.mxu0 }
 0x161   : > { %3436 = vmatpush3.msra.mxu1 %v1718_v62 }
 0x162   : > { %v2146_v63 = vpop.permute.xlu0 %2145 }
 0x163   : > { %v2142_v20 = vpop.permute.xlu1 %2141  ;;  %v2165_v0 = vsel %vm2157_vm8, %v2144_v51, %v2146_v63 }
 0x164   : > { %v2164_v2 = vsel %vm2157_vm8, %v2142_v20, %v2144_v51  ;;  %2214 = vmatprep.subr.mxu0 %v2165_v0 }
 0x165   : > { %2215 = vmatpush1.msra.mxu0 %v2164_v2 }
 0x166   : > { %v1692_v1 = vpop.permute.xlu0 %1691 }
 0x167   : > { %v2136_v58 = vpop.permute.xlu1 %2135  ;;  %v1715_v22 = vsel %vm1709_vm6, %v4256_v57, %v1692_v1 }
 0x168   : > { %3437 = vmatprep.subr.mxu1 %v1715_v22 }
 0x169   : > { %3438 = vmatpush3.msra.mxu1 %v1715_v22 }
 0x16a   : > { %v2138_v3 = vpop.permute.xlu0 %2137 }
 0x16b   : > { %v2134_v19 = vpop.permute.xlu1 %2133  ;;  %v2162_v18 = vsel %vm2157_vm8, %v2136_v58, %v2138_v3 }
 0x16c   : > { %v2161_v23 = vsel %vm2157_vm8, %v2134_v19, %v2136_v58  ;;  %2216 = vmatprep.subr.mxu0 %v2162_v18 }
 0x16d   : > { %2217 = vmatpush1.msra.mxu0 %v2161_v23 }
 0x16e   : > { %v1684_v4 = vpop.permute.xlu0 %1683 }
 0x16f   : > { %v2128_v5 = vpop.permute.xlu1 %2127  ;;  %v1712_v25 = vsel %vm1709_vm6, %v4263_v9, %v1684_v4 }
 0x170   : > { %3439 = vmatprep.subr.mxu1 %v1712_v25 }
 0x171   : > { %3440 = vmatpush3.msra.mxu1 %v1712_v25 }
 0x172   : > { %v2130_v57 = vpop.permute.xlu0 %2129  ;;  %3442 = vmatmul.mubr.msk.f32.vlgmr.msra.gmra.mxu1 %vm461_vm0, %v4278_v26 }
 0x173   : > { %v2126_v27 = vpop.permute.xlu1 %2125  ;;  %v2159_v24 = vsel %vm2157_vm8, %v2128_v5, %v2130_v57  ;;  %3452 = vmatprep.mubr.msk.f32.mxu1 %vm461_vm0, %v3266_v52  ;;  %v540_v52 = vpop.f32.mrf.mxu0 }
 0x174   : > { %v2158_v6 = vsel %vm2157_vm8, %v2126_v27, %v2128_v5  ;;  %2218 = vmatprep.subr.mxu0 %v2159_v24 }
 0x175   : > { %2219 = vmatpush1.msra.mxu0 %v2158_v6  ;;  %v542_v53 = vpop.f32.mrf.mxu0 }
 0x176   : > { %v1932_v21 = vpop.permute.xlu0 %1931  ;;  %3274 = vmatmul.mubr.msk.f32.vlgmr.msra.gmra.mxu0 %vm461_vm0, %v3272_v28  ;;  %3466 = vmatprep.subr.mxu0 %v4390_v17 }
 0x177   : > { %v1924_v9 = vpop.permute.xlu1 %1923  ;;  %v1945_v10 = vsel %vm1933_vm7, %v4280_v32, %v1932_v21  ;;  %2258 = vmatprep.mubr.f32.mxu0 %v4557_v8  ;;  %3467 = vmatpush3.msra.mxu0 %v4390_v17  ;;  %v692_v44 = vpop.f32.mrf.mxu0 }
 0x178   : > { %3444 = vmatprep.subr.mxu1 %v1945_v10  ;;  %v1942_v26 = vsel %vm1933_vm7, %v4290_v36, %v1924_v9  ;;  %3468 = vmatprep.subr.mxu0 %v4398_v47 }
 0x179   : > { %3445 = vmatpush3.msra.mxu1 %v1945_v10  ;;  %3469 = vmatpush3.msra.mxu0 %v4398_v47  ;;  %v694_v50 = vpop.f32.mrf.mxu0  ;;  %v693_v10 = vadd.f32 %v692_v44, %v534_v43 }
 0x17a   : > { %v1916_v11 = vpop.permute.xlu0 %1915  ;;  %3446 = vmatprep.subr.mxu1 %v1942_v26  ;;  %3275 = vmatmul.mubr.msk.f32.gmra.mxu0 %vm461_vm0, %v3273_v29  ;;  %v3377_v22 = vpop.f32.mrf.mxu1  ;;  %v695_v21 = vadd.f32 %v694_v50, %v536_v45 }
 0x17b   : > { %v1908_v33 = vpop.permute.xlu1 %1907  ;;  %3447 = vmatpush3.msra.mxu1 %v1942_v26  ;;  %v1939_v7 = vsel %vm1933_vm7, %v4297_v31, %v1916_v11  ;;  %v4378_v31 = vld [vmem:[%s340_s15 + $0x20] sm:$0xff]  ;;  %v698_v55 = vpop.f32.mrf.mxu0 }
 0x17c   : > { %3448 = vmatprep.subr.mxu1 %v1939_v7  ;;  %v1936_v32 = vsel %vm1933_vm7, %v4304_v34, %v1908_v33  ;;  %v611_v19 = vpop.f32.mrf.mxu1  ;;  %v699_v6 = vadd.f32 %v698_v55, %v540_v52 }
 0x17d   : > { %3449 = vmatpush3.msra.mxu1 %v1939_v7 }
 0x17e   : > { %v2156_v12 = vpop.permute.xlu0 %2155  ;;  %3450 = vmatprep.subr.mxu1 %v1936_v32 }
 0x17f   : > { %v2148_v30 = vpop.permute.xlu1 %2147  ;;  %3451 = vmatpush3.msra.mxu1 %v1936_v32  ;;  %v2169_v13 = vsel %vm2157_vm8, %v4320_v56, %v2156_v12 }
 0x180   : > { %3453 = vmatmul.mubr.msk.f32.vlgmr.msra.gmra.mxu1 %vm461_vm0, %v4318_v42  ;;  %3455 = vmatprep.subr.mxu1 %v2169_v13  ;;  %v2166_v36 = vsel %vm2157_vm8, %v2146_v63, %v2148_v30  ;;  %v700_v42 = vpop.f32.mrf.mxu0 }
 0x181   : > { %3456 = vmatpush3.msra.mxu1 %v2169_v13  ;;  %3463 = vmatprep.mubr.msk.f32.mxu1 %vm461_vm0, %v3272_v28  ;;  %v701_v9 = vadd.f32 %v700_v42, %v542_v53 }
 0x182   : > { %v2140_v37 = vpop.permute.xlu0 %2139  ;;  %3457 = vmatprep.subr.mxu1 %v2166_v36  ;;  %v910_v56 = vpop.f32.mrf.mxu0 }
 0x183   : > { %v2132_v38 = vpop.permute.xlu1 %2131  ;;  %3458 = vmatpush3.msra.mxu1 %v2166_v36  ;;  %v2163_v39 = vsel %vm2157_vm8, %v2138_v3, %v2140_v37  ;;  %v996_v12 = vadd.f32 %v910_v56, %v693_v10 }
 0x184   : > { %3459 = vmatprep.subr.mxu1 %v2163_v39  ;;  %v2160_v35 = vsel %vm2157_vm8, %v2130_v57, %v2132_v38  ;;  %v912_v59 = vpop.f32.mrf.mxu0 }
 0x185   : > { %3460 = vmatpush3.msra.mxu1 %v2163_v39  ;;  %v997_v7 = vadd.f32 %v912_v59, %v695_v21 }
 0x186   : > { %3461 = vmatprep.subr.mxu1 %v2160_v35  ;;  %v916_v60 = vpop.f32.mrf.mxu0  ;;  %v3388_v23 = vpop.f32.mrf.mxu1 }
 0x187   : > { %3462 = vmatpush3.msra.mxu1 %v2160_v35  ;;  %v999_v11 = vadd.f32 %v916_v60, %v699_v6  ;;  %v775_v44 = vadd.f32 %v3388_v23, %v3377_v22 }
 0x188   : > { %3464 = vmatmul.mubr.msk.f32.vlgmr.msra.gmra.mxu1 %vm461_vm0, %v3273_v29  ;;  %2415 = vmatprep.subr.mxu1 %v4378_v31  ;;  %v918_v54 = vpop.f32.mrf.mxu0  ;;  %v769_v5 = vpop.f32.mrf.mxu1 }
 0x189   : > { %2451 = vmatprep.mubr.f32.mxu1 %v4557_v8  ;;  %2416 = vmatpush1.msra.mxu1 %v4380_v14  ;;  %v1000_v32 = vadd.f32 %v918_v54, %v701_v9 }
 0x18a   : > { %2417 = vmatprep.subr.mxu1 %v4385_v40 }
 0x18b   : > { %2418 = vmatpush1.msra.mxu1 %v4388_v16 }
 0x18f   : > { %v4382_v15 = vpop.permute.xlu0 %2355 }
 0x190   : > { %v4370_v41 = vpop.permute.xlu1 %2350 }
 0x193   : > { %v4405_v49 = vpop.permute.xlu0 %2380 }
 0x194   : > { %v4393_v34 = vpop.permute.xlu1 %2378 }
 0x195   : > { %3470 = vmatprep.mubr.msk.f32.mxu0 %vm2382_vm9, %v4393_v34  ;;  %3278 = vmatmul.mubr.msk.f32.vlgmr.msra.gmra.mxu1 %vm2382_vm9, %v4393_v34 }
 0x196   : > { %2457 = vmatprep.mubr.f32.mxu1 %v4557_v8  ;;  %3471 = vmatmul.mubr.msk.f32.vlgmr.msra.gmra.mxu0 %vm2382_vm9, %v4405_v49  ;;  %v1134_v61 = vpop.f32.mrf.mxu0 }
 0x197   : > { %2607 = vmatprep.mubr.f32.mxu0 %v4557_v8  ;;  %v1220_v39 = vadd.f32 %v1134_v61, %v996_v12 }
 0x198   : > { %v1136_v51 = vpop.f32.mrf.mxu0 }
 0x199   : > { %3279 = vmatmul.mubr.msk.f32.gmra.mxu1 %vm2382_vm9, %v4405_v49  ;;  %v1221_v37 = vadd.f32 %v1136_v51, %v997_v7 }
 0x19a   : > { %3477 = vmatprep.mubr.msk.f32.mxu1 %vm2382_vm9, %v4217_v48  ;;  %v1140_v62 = vpop.f32.mrf.mxu0 }
 0x19b   : > { %v1223_v13 = vadd.f32 %v1140_v62, %v999_v11  ;;  %v770_v62 = vadd.f32 %v769_v5, %v611_v19 }
 0x19c   : > { %v1142_v63 = vpop.f32.mrf.mxu0 }
 0x19d   : > { %v1224_v38 = vadd.f32 %v1142_v63, %v1000_v32 }
 0x1b2   : > { %v3399_v57 = vpop.f32.mrf.mxu1 }
 0x1b3   : > { %v1001_v6 = vadd.f32 %v3399_v57, %v775_v44 }
 0x1b4   : > { %v987_v24 = vpop.f32.mrf.mxu1 }
 0x1b6   : > { %v1358_v20 = vpop.f32.mrf.mxu0 }
 0x1b7   : > { %v1444_v53 = vadd.f32 %v1358_v20, %v1220_v39  ;;  %v998_v20 = vadd.f32 %v987_v24, %v770_v62 }
 0x1b8   : > { %v1360_v0 = vpop.f32.mrf.mxu0 }
 0x1b9   : > { %v1445_v52 = vadd.f32 %v1360_v0, %v1221_v37 }
 0x1ba   : > { %v1364_v2 = vpop.f32.mrf.mxu0 }
 0x1bb   : > { %v1447_v8 = vadd.f32 %v1364_v2, %v1223_v13 }
 0x1bc   : > { %v1366_v1 = vpop.f32.mrf.mxu0 }
 0x1bd   : > { %v1448_v45 = vadd.f32 %v1366_v1, %v1224_v38 }
 0x1d2   : > { %v3410_v29 = vpop.f32.mrf.mxu1 }
 0x1d3   : > { %v1225_v10 = vadd.f32 %v3410_v29, %v1001_v6 }
 0x1d4   : > { %v1211_v30 = vpop.f32.mrf.mxu1 }
 0x1d5   : > { %v1222_v5 = vadd.f32 %v1211_v30, %v998_v20  ;;  %v4561_v30 = vmov 0.0  }
 0x1d6   : > { %v1582_v58 = vpop.f32.mrf.mxu0 }
 0x1d7   : > { %v1668_v60 = vadd.f32 %v1582_v58, %v1444_v53 }
 0x1d8   : > { %v1584_v3 = vpop.f32.mrf.mxu0 }
 0x1d9   : > { %v1669_v42 = vadd.f32 %v1584_v3, %v1445_v52 }
 0x1da   : > { %v1588_v18 = vpop.f32.mrf.mxu0 }
 0x1db   : > { %v1671_v50 = vadd.f32 %v1588_v18, %v1447_v8 }
 0x1dc   : > { %v1590_v4 = vpop.f32.mrf.mxu0 }
 0x1dd   : > { %v1672_v59 = vadd.f32 %v1590_v4, %v1448_v45 }
 0x1f2   : > { %v3421_v35 = vpop.f32.mrf.mxu1 }
 0x1f3   : > { %v1449_v57 = vadd.f32 %v3421_v35, %v1225_v10 }
 0x1f4   : > { %v1435_v43 = vpop.f32.mrf.mxu1 }
 0x1f6   : > { %v1806_v25 = vpop.f32.mrf.mxu0 }
 0x1f7   : > { %v1892_v2 = vadd.f32 %v1806_v25, %v1668_v60 }
 0x1f8   : > { %v1808_v27 = vpop.f32.mrf.mxu0 }
 0x1f9   : > { %v1893_v61 = vadd.f32 %v1808_v27, %v1669_v42 }
 0x1fa   : > { %v1812_v28 = vpop.f32.mrf.mxu0 }
 0x1fb   : > { %v1895_v51 = vadd.f32 %v1812_v28, %v1671_v50 }
 0x1fc   : > { %v1814_v26 = vpop.f32.mrf.mxu0 }
 0x1fd   : > { %v1896_v21 = vadd.f32 %v1814_v26, %v1672_v59  ;;  %v1446_v26 = vadd.f32 %v1435_v43, %v1222_v5  ;;  %v4472_v59 = vpop.permute.xlu1 %2702 }
 0x212   : > { %v3432_v56 = vpop.f32.mrf.mxu1 }
 0x214   : > { %v1659_v9 = vpop.f32.mrf.mxu1 }
 0x215   : > { %v1670_v7 = vadd.f32 %v1659_v9, %v1446_v26 }
 0x216   : > { %v2030_v33 = vpop.f32.mrf.mxu0 }
 0x217   : > { %v2116_v18 = vadd.f32 %v2030_v33, %v1892_v2  ;;  %v1673_v33 = vadd.f32 %v3432_v56, %v1449_v57  ;;  %v4479_v2 = vpop.permute.xlu1 %2718 }
 0x218   : > { %v2032_v36 = vpop.f32.mrf.mxu0 }
 0x219   : > { %v2117_v22 = vadd.f32 %v2032_v36, %v1893_v61 }
 0x21a   : > { %v2036_v47 = vpop.f32.mrf.mxu0 }
 0x21b   : > { %v2119_v0 = vadd.f32 %v2036_v47, %v1895_v51 }
 0x21c   : > { %v2038_v55 = vpop.f32.mrf.mxu0 }
 0x21d   : > { %v2120_v8 = vadd.f32 %v2038_v55, %v1896_v21  ;;  %v4470_v55 = vpop.permute.xlu0 %2697 }
 0x232   : > { %v3443_v3 = vpop.f32.mrf.mxu1 }
 0x233   : > { %v1897_v32 = vadd.f32 %v3443_v3, %v1673_v33 }
 0x234   : > { %v1883_v25 = vpop.f32.mrf.mxu1 }
 0x235   : > { %v1894_v13 = vadd.f32 %v1883_v25, %v1670_v7 }
 0x236   : > { %v2254_v54 = vpop.f32.mrf.mxu0 }
 0x237   : > { %v2340_v19 = vadd.f32 %v2254_v54, %v2116_v18 }
 0x238   : > { %v2256_v63 = vpop.f32.mrf.mxu0 }
 0x239   : > { %v2341_v4 = vadd.f32 %v2256_v63, %v2117_v22  ;;  %v4427_v28 = vadd.f32 %v4370_v41, %v2340_v19  ;;  %v4476_v63 = vpop.permute.xlu0 %2713 }
 0x23a   : > { %v2260_v1 = vpop.f32.mrf.mxu0 }
 0x23b   : > { %v2343_v23 = vadd.f32 %v2260_v1, %v2119_v0  ;;  %v4423_v24 = vadd.f32 %v4370_v41, %v2341_v4 }
 0x23c   : > { %v2262_v58 = vpop.f32.mrf.mxu0 }
 0x23d   : > { %v2344_v11 = vadd.f32 %v2262_v58, %v2120_v8  ;;  %v4420_v47 = vadd.f32 %v4382_v15, %v2343_v23 }
 0x23f   : > { %v4417_v27 = vadd.f32 %v4382_v15, %v2344_v11 }
 0x240   : > { %v3454_v29 = vpop.f32.mrf.mxu1 }
 0x241   : > { %2571 = vmatprep.subr.mxu0 %v4417_v27  ;;  %v2121_v36 = vadd.f32 %v3454_v29, %v1897_v32 }
 0x242   : > { %2572 = vmatpush1.msra.mxu0 %v4420_v47  ;;  %v2107_v12 = vpop.f32.mrf.mxu1 }
 0x243   : > { %2573 = vmatprep.subr.mxu0 %v4423_v24  ;;  %v2118_v38 = vadd.f32 %v2107_v12, %v1894_v13 }
 0x244   : > { %2574 = vmatpush1.msra.mxu0 %v4427_v28 }
 0x245   : > { %3282 = vmatmul.mubr.msk.f32.vlgmr.msra.gmra.mxu0 %vm2382_vm9, %v4217_v48 }
 0x246   : > { %2613 = vmatprep.mubr.f32.mxu0 %v4561_v30 }
 0x248   : > { %v3465_v37 = vpop.f32.mrf.mxu1 }
 0x249   : > { %v2345_v39 = vadd.f32 %v3465_v37, %v2121_v36  ;;  %3283 = vmatmul.mubr.msk.f32.gmra.mxu0 %vm2382_vm9, %v4210_v46 }
 0x24a   : > { %v2331_v35 = vpop.f32.mrf.mxu1  ;;  %3484 = vmatprep.mubr.msk.f32.mxu0 %vm2382_vm9, %v4393_v34 }
 0x24b   : > { %v4440_v52 = vadd.f32 %v4382_v15, %v2345_v39  ;;  %v2342_v45 = vadd.f32 %v2331_v35, %v2118_v38 }
 0x24d   : > { %v4443_v53 = vadd.f32 %v4370_v41, %v2342_v45  ;;  %3473 = vmatprep.subr.mxu1 %v4440_v52  ;;  %3480 = vmatprep.subr.mxu0 %v4440_v52  ;;  %v4562_v45 = vld [vmem:[#allocation2_spill] sm:$0xff] }
 0x24e   : > { %3474 = vmatpush3.msra.mxu1 %v4440_v52  ;;  %3481 = vmatpush3.msra.mxu0 %v4440_v52 }
 0x24f   : > { %3475 = vmatprep.subr.mxu1 %v4443_v53  ;;  %3482 = vmatprep.subr.mxu0 %v4443_v53 }
 0x250   : > { %3476 = vmatpush3.msra.mxu1 %v4443_v53  ;;  %3483 = vmatpush3.msra.mxu0 %v4443_v53 }
 0x251   : > { %3478 = vmatmul.mubr.msk.f32.vlgmr.msra.gmra.mxu1 %vm2382_vm9, %v4210_v46  ;;  %2779 = vmatprep.subr.mxu1 %v4417_v27 }
 0x252   : > { %3485 = vmatmul.mubr.msk.f32.vlgmr.msra.gmra.mxu0 %vm2382_vm9, %v4405_v49  ;;  %2780 = vmatpush1.msra.mxu1 %v4420_v47 }
 0x253   : > { %2781 = vmatprep.subr.mxu1 %v4423_v24  ;;  %2815 = vmatprep.mubr.f32.mxu1 %v4561_v30 }
 0x254   : > { %2782 = vmatpush1.msra.mxu1 %v4427_v28  ;;  %2967 = vmatprep.mubr.f32.mxu0 %v4561_v30 }
 0x255   : > { %3286 = vmatmul.mubr.msk.f32.vlgmr.msra.gmra.mxu1 %vm2382_vm9, %v4393_v34  ;;  %v2453_v15 = vpop.f32.mrf.mxu1 }
 0x256   : > { %2821 = vmatprep.mubr.f32.mxu1 %v4561_v30  ;;  %v3472_v41 = vpop.f32.mrf.mxu0 }
 0x257   : > { %v2455_v44 = vpop.f32.mrf.mxu1 }
 0x258   : > { %v2530_v43 = vpop.f32.mrf.mxu0 }
 0x259   : > { %3287 = vmatmul.mubr.msk.f32.gmra.mxu1 %vm2382_vm9, %v4405_v49  ;;  %v2459_v34 = vpop.f32.mrf.mxu1 }
 0x25a   : > { %3491 = vmatprep.mubr.msk.f32.mxu1 %vm2382_vm9, %v4217_v48 }
 0x25b   : > { %v2461_v61 = vpop.f32.mrf.mxu1 }
 0x305   : > { %v2609_v50 = vpop.f32.mrf.mxu0 }
 0x306   : > { %v2610_v42 = vadd.f32 %v2609_v50, %v2453_v15 }
 0x307   : > { %v2611_v60 = vpop.f32.mrf.mxu0 }
 0x308   : > { %v2612_v56 = vadd.f32 %v2611_v60, %v2455_v44  ;;  %v2705_v62 = vmul.f32 %v4470_v55, %v2610_v42 }
 0x309   : > { %v2615_v54 = vpop.f32.mrf.mxu0 }
 0x30a   : > { %v2706_v49 = vmul.f32 %v4470_v55, %v2612_v56  ;;  %v2616_v6 = vadd.f32 %v2615_v54, %v2459_v34  ;;  %v2721_v1 = vadd.f32 %v4476_v63, %v2705_v62 }
 0x30b   : > { %v2617_v51 = vpop.f32.mrf.mxu0 }
 0x30c   : > { %v2708_v21 = vmul.f32 %v4472_v59, %v2616_v6  ;;  %v2722_v9 = vadd.f32 %v4476_v63, %v2706_v49  ;;  %v2618_v0 = vadd.f32 %v2617_v51, %v2461_v61  ;;  %v2733_v23 = vmul.f32 0.01, %v2721_v1 }
 0x30d   : > { %vm2727_vm12 = vcmp.gt.f32.partialorder %v2721_v1, 0.0 }
 0x30e   : > { %v2724_v20 = vadd.f32 %v4479_v2, %v2708_v21  ;;  %v2709_v10 = vmul.f32 %v4472_v59, %v2618_v0  ;;  %v2734_v8 = vmul.f32 0.01, %v2722_v9  ;;  %vm2728_vm11 = vcmp.gt.f32.partialorder %v2722_v9, 0.0 }
 0x30f   : > { %v2739_v32 = vsel %vm2727_vm12, %v2721_v1, %v2733_v23 }
 0x310   : > { %v2736_v22 = vmul.f32 0.01, %v2724_v20  ;;  %vm2730_vm10 = vcmp.gt.f32.partialorder %v2724_v20, 0.0  ;;  %v2725_v18 = vadd.f32 %v4479_v2, %v2709_v10  ;;  %v2740_v29 = vsel %vm2728_vm11, %v2722_v9, %v2734_v8 }
 0x311   : > { %v3479_v3 = vpop.f32.mrf.mxu1  ;;  %v2746_v37 = vmul.f32 %v2740_v29, %v4385_v40  ;;  %v2745_v38 = vmul.f32 %v2739_v32, %v4388_v16 }
 0x312   : > { %v2692_v58 = vadd.f32 %v3479_v3, %v3472_v41  ;;  %v2737_v4 = vmul.f32 0.01, %v2725_v18  ;;  %vm2731_vm13 = vcmp.gt.f32.partialorder %v2725_v18, 0.0  ;;  %v2742_v57 = vsel %vm2730_vm10, %v2724_v20, %v2736_v22 }
 0x313   : > { %v2686_v11 = vpop.f32.mrf.mxu1  ;;  %v2748_v12 = vmul.f32 %v2742_v57, %v4380_v14 }
 0x314   : > { %v2710_v19 = vmul.f32 %v4472_v59, %v2692_v58  ;;  %v2687_v5 = vadd.f32 %v2686_v11, %v2530_v43  ;;  %v2743_v25 = vsel %vm2731_vm13, %v2725_v18, %v2737_v4 }
 0x315   : > { %v2749_v7 = vmul.f32 %v2743_v25, %v4378_v31  ;;  %v2817_v16 = vpop.f32.mrf.mxu1 }
 0x316   : > { %v2726_v26 = vadd.f32 %v4479_v2, %v2710_v19  ;;  %v2707_v33 = vmul.f32 %v4470_v55, %v2687_v5 }
 0x317   : > { %2931 = vmatprep.subr.mxu0 %v2749_v7  ;;  %v2819_v41 = vpop.f32.mrf.mxu1 }
 0x318   : > { %v2738_v13 = vmul.f32 0.01, %v2726_v26  ;;  %v2723_v36 = vadd.f32 %v4476_v63, %v2707_v33  ;;  %vm2732_vm14 = vcmp.gt.f32.partialorder %v2726_v26, 0.0  ;;  %2932 = vmatpush1.msra.mxu0 %v2748_v12 }
 0x319   : > { %2933 = vmatprep.subr.mxu0 %v2746_v37 }
 0x31a   : > { %v2735_v39 = vmul.f32 0.01, %v2723_v36  ;;  %v2744_v35 = vsel %vm2732_vm14, %v2726_v26, %v2738_v13  ;;  %vm2729_vm15 = vcmp.gt.f32.partialorder %v2723_v36, 0.0  ;;  %2934 = vmatpush1.msra.mxu0 %v2745_v38 }
 0x31b   : > { %v2750_v31 = vmul.f32 %v2744_v35, %v4390_v17  ;;  %3290 = vmatmul.mubr.msk.f32.vlgmr.msra.gmra.mxu0 %vm2382_vm9, %v4217_v48  ;;  %v3486_v17 = vpop.f32.mrf.mxu0  ;;  %v2823_v48 = vpop.f32.mrf.mxu1 }
 0x31c   : > { %v2741_v14 = vsel %vm2729_vm15, %v2723_v36, %v2735_v39  ;;  %2973 = vmatprep.mubr.f32.mxu0 %v4561_v30 }
 0x31d   : > { %3487 = vmatprep.subr.mxu1 %v2750_v31  ;;  %v2747_v40 = vmul.f32 %v2741_v14, %v4562_v45  ;;  %v2894_v15 = vpop.f32.mrf.mxu0  ;;  %v2825_v30 = vpop.f32.mrf.mxu1 }
 0x31e   : > { %3488 = vmatpush3.msra.mxu1 %v2750_v31 }
 0x31f   : > { %3489 = vmatprep.subr.mxu1 %v2747_v40  ;;  %3291 = vmatmul.mubr.msk.f32.gmra.mxu0 %vm2382_vm9, %v4210_v46 }
 0x320   : > { %3490 = vmatpush3.msra.mxu1 %v2747_v40 }
 0x321   : > { %3492 = vmatmul.mubr.msk.f32.vlgmr.msra.gmra.mxu1 %vm2382_vm9, %v4210_v46 }
 0x3db   : > { %v2969_v43 = vpop.f32.mrf.mxu0 }
 0x3dc   : > { %v2970_v44 = vadd.f32 %v2969_v43, %v2817_v16 }
 0x3dd   : > { %v2971_v50 = vpop.f32.mrf.mxu0 }
 0x3de   : > { %v3055_v42 = vmul.f32 %v2970_v44, %v4470_v55  ;;  %v2972_v60 = vadd.f32 %v2971_v50, %v2819_v41 }
 0x3df   : > { %v2975_v34 = vpop.f32.mrf.mxu0 }
 0x3e0   : > { %v3061_v56 = vadd.f32 %v3055_v42, %v4476_v63  ;;  %v3056_v54 = vmul.f32 %v2972_v60, %v4470_v55  ;;  %v2976_v62 = vadd.f32 %v2975_v34, %v2823_v48 }
 0x3e1   : > { %v3493_v46 = vpop.f32.mrf.mxu1  ;;  %v2977_v49 = vpop.f32.mrf.mxu0 }
 0x3e2   : > { %v3052_v6 = vadd.f32 %v3493_v46, %v3486_v17  ;;  %vm3067_vm0 = vcmp.gt.f32.partialorder %v3061_v56, 0.0  ;;  %v3073_v51 = vmul.f32 0.01, %v3061_v56  ;;  %v3062_v61 = vadd.f32 %v3056_v54, %v4476_v63 }
 0x3e3   : > { %v3058_v21 = vmul.f32 %v2976_v62, %v4472_v59  ;;  %v3046_v9 = vpop.f32.mrf.mxu1  ;;  %v2978_v0 = vadd.f32 %v2977_v49, %v2825_v30 }
 0x3e4   : > { %v3060_v1 = vmul.f32 %v3052_v6, %v4472_v59  ;;  %v3047_v20 = vadd.f32 %v3046_v9, %v2894_v15  ;;  %v3079_v10 = vsel %vm3067_vm0, %v3061_v56, %v3073_v51  ;;  %vm3068_vm1 = vcmp.gt.f32.partialorder %v3062_v61, 0.0 }
 0x3e5   : > { %v3074_v22 = vmul.f32 0.01, %v3062_v61  ;;  %v3064_v8 = vadd.f32 %v3058_v21, %v4479_v2  ;;  %v3085_v18 = vadd.f32 %v3079_v10, %v4427_v28  ;;  %v3059_v3 = vmul.f32 %v2978_v0, %v4472_v59 }
 0x3e6   : > { %v3066_v23 = vadd.f32 %v3060_v1, %v4479_v2  ;;  %v3057_v58 = vmul.f32 %v3047_v20, %v4470_v55 }
 0x3e7   : > { %v3080_v4 = vsel %vm3068_vm1, %v3062_v61, %v3074_v22  ;;  %vm3070_vm2 = vcmp.gt.f32.partialorder %v3064_v8, 0.0  ;;  %v3076_v11 = vmul.f32 0.01, %v3064_v8  ;;  %3091 = vst [vmem:[%s4514_s17] sm:$0xff] %v3085_v18  ;;  %v3065_v5 = vadd.f32 %v3059_v3, %v4479_v2 }
 0x3e8   : > { %v3086_v19 = vadd.f32 %v3080_v4, %v4423_v24  ;;  %vm3072_vm3 = vcmp.gt.f32.partialorder %v3066_v23, 0.0  ;;  %v3078_v57 = vmul.f32 0.01, %v3066_v23  ;;  %v3063_v28 = vadd.f32 %v3057_v58, %v4476_v63 }
 0x3e9   : > { %v3082_v25 = vsel %vm3070_vm2, %v3064_v8, %v3076_v11  ;;  %vm3071_vm4 = vcmp.gt.f32.partialorder %v3065_v5, 0.0  ;;  %v3077_v59 = vmul.f32 0.01, %v3065_v5 }
 0x3ea   : > { %3092 = vst [vmem:[%s4514_s17 + $0x8] sm:$0xff] %v3086_v19  ;;  %v3088_v55 = vadd.f32 %v3082_v25, %v4420_v47  ;;  %v3084_v29 = vsel %vm3072_vm3, %v3066_v23, %v3078_v57  ;;  %vm3069_vm5 = vcmp.gt.f32.partialorder %v3063_v28, 0.0  ;;  %v3075_v24 = vmul.f32 0.01, %v3063_v28 }
 0x3eb   : > { %v3090_v26 = vadd.f32 %v3084_v29, %v4440_v52  ;;  %v3083_v2 = vsel %vm3071_vm4, %v3065_v5, %v3077_v59 }
 0x3ec   : > { %3094 = vst [vmem:[%s4514_s17 + $0x18] sm:$0xff] %v3088_v55  ;;  %v3089_v33 = vadd.f32 %v3083_v2, %v4417_v27  ;;  %v3081_v7 = vsel %vm3069_vm5, %v3063_v28, %v3075_v24 }
 0x3ed   : > { %3096 = vst [vmem:[%s4514_s17 + $0x28] sm:$0xff] %v3090_v26  ;;  %v3087_v32 = vadd.f32 %v3081_v7, %v4443_v53 }
 0x3ee   : > { %3095 = vst [vmem:[%s4514_s17 + $0x20] sm:$0xff] %v3089_v33 }
 0x3ef   : > { %3093 = vst [vmem:[%s4514_s17 + $0x10] sm:$0xff] %v3087_v32 }
 0x3f0 PF: > { %s17_s28 = sadd.s32 1, %s3588_s28   ;;  %s4563_s24 = smov %s3580_s26 }
 0x3f1   : > { %p14_p7 = scmp.ge.s32.totalorder %s17_s28, 6   ;;  %s4564_s25 = smov %s3584_s27 }
 0x3f2   : > { %s4565_s26 = smov %s4568_s29  ;;  %s4566_s27 = smov %s4572_s30 }
 0x3f3   :  { %16 = sbr.rel (!%p14_p7) target bundleno = 3 (0x3), region = 92 }

// kernel: decoder_block_forward.5
= control target key start
LH: loop header
LB: loop body
LE: loop exit
PB: predicated region body
PF: predicated region fallthrough
CT: control target
= control target key end

     0   :  { %s5091_s30 = smov 0   ;;  %s5093_s8 = smov 0   ;;  %s5906_s0 = inlined_call_operand.vmem [shape: f32[2,16,896], index: 0, kind: input, shape index: {}]   ;;  %s5907_s1 = inlined_call_operand.vmem [shape: f32[2,1,1,640], index: 1, kind: input, shape index: {}]   ;;  %s5908_s2 = inlined_call_operand.vmem [shape: f32[1,15,1,16], index: 2, kind: input, shape index: {}]   ;;  %s5909_s3 = inlined_call_operand.<no memory space> [shape: f32[1,1], index: 3, kind: input, shape index: {}]   ;;  %s5910_s4 = inlined_call_operand.vmem [shape: f32[1,2], index: 4, kind: input, shape index: {}]   ;;  %s5911_s7 = inlined_call_operand.vmem [shape: f32[2,1,1,640], index: 7, kind: output, shape index: {}]   ;;  %s5912_s5 = inlined_call_operand.<no memory space> [shape: f32[1,1], index: 5, kind: input, shape index: {}]   ;;  %s5913_s6 = inlined_call_operand.<no memory space> [shape: f32[1,1], index: 6, kind: input, shape index: {}]  }
   0x1   :  { %v12_v0 = vstv %s5909_s3  ;;  %v14_v1 = vstv %s5912_s5  ;;  %v16_v2 = vstv %s5913_s6  ;;  %s5095_s9 = smov 0  }
   0x2   :  { %13 = vst [vmem:[#allocation2] sm:$0x1] %v12_v0  ;;  %15 = vst [vmem:[#allocation3] sm:$0x1] %v14_v1 }
   0x3   :  { %17 = vst [vmem:[#allocation4] sm:$0x1] %v16_v2 }
   0x4 LB: > { %s35_s3 = sadd.s32 1, %s5020_s8  ;;  %p4734_p0 = scmp.ge.s32.totalorder %s5024_s9, 1  ;;  %s5024_s9 = sphi %s5095_s9, %s23_s9   ;;  %s5020_s8 = sphi %s5093_s8, %s5915_s8   ;;  %s5016_s30 = sphi %s5091_s30, %s5914_s30  }
   0x5   : > { %p37_p1 = scmp.ge.s32.totalorder %s35_s3, 2  ;;  %p281_p2 = scmp.lt.s32.totalorder %s5024_s9, 3 }
   0x7   : > { %s5917_s3 = smov (%p37_p1, %s35_s3), 0  ;;  %p282_p3 = pnand %p4734_p0, %p281_p2 }
   0x8   : > { %p328_p4 = scmp.lt.s32.totalorder (!%p282_p3), %s5016_s30, 1  ;;  %s5026_s12 = smov (!%p282_p3), 127  }
   0x9   : > { %285 = sbr.rel (%p282_p3) target bundleno = 708 (0x2c4), region = 48  ;;  %s5028_s13 = smov (!%p282_p3), 126  }
   0xa   : > { %s5029_s14 = smov (!%p282_p3), 125   ;;  %s5030_s15 = smov (!%p282_p3), 124  }
   0xb   : > { %s5031_s16 = smov (!%p282_p3), 63   ;;  %s5032_s17 = smov (!%p282_p3), 62  }
   0xc   : > { %s5034_s20 = smov (!%p282_p3), 61   ;;  %s5035_s25 = smov (!%p282_p3), 60  }
   0xd   : > { %s5036_s28 = smov (!%p282_p3), 59  }
   0xe   : > { %s5919_s30 = smov (!%p328_p4, %s5016_s30), 1  ;;  %v5027_v11 = vmov 0.0   ;;  %vm404_vm0 = vcmask 1039360   ;;  %v4736_v33 = vld [vmem:[%s5908_s2 + $0x1] sm:$0x1]  ;;  %vm425_vm1 = vcmask 130048  }
   0xf   : > { %s4947_s5 = smul.u32 112, %s5919_s30  ;;  %493 = vmatprep.mubr.f32.mxu0 %v5027_v11  ;;  %564 = vmatprep.mubr.f32.mxu1 %v5027_v11  ;;  %vm5033_vm2 = vmmov 0   ;;  %v353_v41 = vld [vmem:[%s5908_s2] sm:$0x1]  ;;  %vm882_vm3 = vcmask 1031168   ;;  %vm1149_vm4 = vcmask 1022976  }
  0x10   : > { %v4743_v57 = vld [vmem:[%s5908_s2 + $0x2] sm:$0x1]  ;;  %vm1416_vm5 = vcmask 1014784   ;;  %vm1683_vm6 = vcmask 515072   ;;  %vm1950_vm7 = vcmask 506880   ;;  %vm2217_vm8 = vcmask 498688  }
  0x11   : > { %s5115_s11 = scalar_lea.vmem %s5906_s0, %s4947_s5  ;;  %vm2484_vm9 = vcmask 490496   ;;  %vm2751_vm10 = vcmask 482304   ;;  %vm3840_vm11 = vcmask 1006592   ;;  %vm4107_vm12 = vcmask 998400  }
  0x12   : > { %v5118_v3 = vld [vmem:[%s5115_s11 + $0x50] sm:$0xff]  ;;  %v5121_v4 = vld [vmem:[%s5115_s11 + $0x40] sm:$0xff]  ;;  %v5126_v5 = vld [vmem:[%s5115_s11 + $0x58] sm:$0xff] }
  0x13   : > { %398 = vrot.lane.b32.xlu1 %v5118_v3, %s5026_s12  ;;  %394 = vrot.lane.b32.xlu0 %v5121_v4, %s5026_s12  ;;  %v5129_v6 = vld [vmem:[%s5115_s11 + $0x48] sm:$0xff]  ;;  %v5134_v7 = vld [vmem:[%s5115_s11 + $0x38] sm:$0xff] }
  0x14   : > { %v5137_v8 = vld [vmem:[%s5115_s11 + $0x8] sm:$0xff]  ;;  %v5142_v9 = vld [vmem:[%s5115_s11 + $0x10] sm:$0xff]  ;;  %v5145_v10 = vld [vmem:[%s5115_s11 + $0x18] sm:$0xff] }
  0x15   : > { %v5152_v12 = vld [vmem:[%s5115_s11 + $0x20] sm:$0xff]  ;;  %v5163_v15 = vld [vmem:[%s5115_s11 + $0x28] sm:$0xff] }
  0x16   : > { %v5155_v13 = vld [vmem:[%s5115_s11] sm:$0xff] }
  0x17   : > { %400 = vrot.lane.b32.xlu1 %v5126_v5, %s5026_s12  ;;  %396 = vrot.lane.b32.xlu0 %v5129_v6, %s5026_s12  ;;  %v5160_v14 = vld [vmem:[%s5115_s11 + $0x60] sm:$0xff] }
  0x1b   : > { %392 = vrot.lane.b32.xlu0 %v5134_v7, %s5026_s12  ;;  %382 = vrot.lane.b32.xlu1 %v5137_v8, %s5026_s12 }
  0x1f   : > { %384 = vrot.lane.b32.xlu0 %v5142_v9, %s5026_s12  ;;  %386 = vrot.lane.b32.xlu1 %v5145_v10, %s5026_s12 }
  0x23   : > { %388 = vrot.lane.b32.xlu0 %v5152_v12, %s5026_s12  ;;  %380 = vrot.lane.b32.xlu1 %v5155_v13, %s5026_s12 }
  0x27   : > { %402 = vrot.lane.b32.xlu0 %v5160_v14, %s5026_s12  ;;  %390 = vrot.lane.b32.xlu1 %v5163_v15, %s5026_s12  ;;  %s4948_s12 = smul.u32 5, %s5919_s30 }
  0x29   : > { %s352_s19 = scalar_lea.vmem %s5911_s7, %s4948_s12 }
  0x2b   : > { %872 = vrot.lane.b32.xlu0 %v5121_v4, %s5028_s13  ;;  %874 = vrot.lane.b32.xlu1 %v5129_v6, %s5028_s13 }
  0x2f   : > { %876 = vrot.lane.b32.xlu0 %v5118_v3, %s5028_s13  ;;  %878 = vrot.lane.b32.xlu1 %v5126_v5, %s5028_s13 }
  0x33   : > { %870 = vrot.lane.b32.xlu0 %v5134_v7, %s5028_s13  ;;  %860 = vrot.lane.b32.xlu1 %v5137_v8, %s5028_s13 }
  0x37   : > { %862 = vrot.lane.b32.xlu0 %v5142_v9, %s5028_s13  ;;  %864 = vrot.lane.b32.xlu1 %v5145_v10, %s5028_s13 }
  0x3b   : > { %866 = vrot.lane.b32.xlu0 %v5152_v12, %s5028_s13  ;;  %858 = vrot.lane.b32.xlu1 %v5155_v13, %s5028_s13 }
  0x3f   : > { %1139 = vrot.lane.b32.xlu0 %v5121_v4, %s5029_s14  ;;  %1141 = vrot.lane.b32.xlu1 %v5129_v6, %s5029_s14 }
  0x43   : > { %880 = vrot.lane.b32.xlu0 %v5160_v14, %s5028_s13  ;;  %1137 = vrot.lane.b32.xlu1 %v5134_v7, %s5029_s14 }
  0x47   : > { %1127 = vrot.lane.b32.xlu0 %v5137_v8, %s5029_s14  ;;  %1129 = vrot.lane.b32.xlu1 %v5142_v9, %s5029_s14 }
  0x4b   : > { %868 = vrot.lane.b32.xlu0 %v5163_v15, %s5028_s13  ;;  %1125 = vrot.lane.b32.xlu1 %v5155_v13, %s5029_s14 }
  0x4f   : > { %1143 = vrot.lane.b32.xlu0 %v5118_v3, %s5029_s14  ;;  %1145 = vrot.lane.b32.xlu1 %v5126_v5, %s5029_s14 }
  0x53   : > { %1147 = vrot.lane.b32.xlu0 %v5160_v14, %s5029_s14  ;;  %1131 = vrot.lane.b32.xlu1 %v5145_v10, %s5029_s14 }
  0x57   : > { %1133 = vrot.lane.b32.xlu0 %v5152_v12, %s5029_s14  ;;  %1135 = vrot.lane.b32.xlu1 %v5163_v15, %s5029_s14 }
  0x5b   : > { %1406 = vrot.lane.b32.xlu0 %v5121_v4, %s5030_s15  ;;  %1408 = vrot.lane.b32.xlu1 %v5129_v6, %s5030_s15 }
  0x5f   : > { %1410 = vrot.lane.b32.xlu0 %v5118_v3, %s5030_s15  ;;  %1412 = vrot.lane.b32.xlu1 %v5126_v5, %s5030_s15 }
  0x63   : > { %1404 = vrot.lane.b32.xlu0 %v5134_v7, %s5030_s15  ;;  %1394 = vrot.lane.b32.xlu1 %v5137_v8, %s5030_s15 }
  0x67   : > { %1396 = vrot.lane.b32.xlu0 %v5142_v9, %s5030_s15  ;;  %1398 = vrot.lane.b32.xlu1 %v5145_v10, %s5030_s15 }
  0x6b   : > { %1400 = vrot.lane.b32.xlu0 %v5152_v12, %s5030_s15  ;;  %1392 = vrot.lane.b32.xlu1 %v5155_v13, %s5030_s15 }
  0x6f   : > { %1673 = vrot.lane.b32.xlu0 %v5121_v4, %s5031_s16  ;;  %1675 = vrot.lane.b32.xlu1 %v5129_v6, %s5031_s16 }
  0x73   : > { %1414 = vrot.lane.b32.xlu0 %v5160_v14, %s5030_s15  ;;  %1671 = vrot.lane.b32.xlu1 %v5134_v7, %s5031_s16 }
  0x77   : > { %1661 = vrot.lane.b32.xlu0 %v5137_v8, %s5031_s16  ;;  %1663 = vrot.lane.b32.xlu1 %v5142_v9, %s5031_s16 }
  0x7b   : > { %1402 = vrot.lane.b32.xlu0 %v5163_v15, %s5030_s15  ;;  %1659 = vrot.lane.b32.xlu1 %v5155_v13, %s5031_s16 }
  0x7f   : > { %1677 = vrot.lane.b32.xlu0 %v5118_v3, %s5031_s16  ;;  %1679 = vrot.lane.b32.xlu1 %v5126_v5, %s5031_s16 }
  0x83   : > { %1681 = vrot.lane.b32.xlu0 %v5160_v14, %s5031_s16  ;;  %1665 = vrot.lane.b32.xlu1 %v5145_v10, %s5031_s16 }
  0x85   : > { %v399_v16 = vpop.permute.xlu1 %398  ;;  %v395_v17 = vpop.permute.xlu0 %394 }
  0x87   : > { %1667 = vrot.lane.b32.xlu0 %v5152_v12, %s5031_s16  ;;  %1669 = vrot.lane.b32.xlu1 %v5163_v15, %s5031_s16 }
  0x89   : > { %v401_v18 = vpop.permute.xlu1 %400  ;;  %v397_v19 = vpop.permute.xlu0 %396 }
  0x8a   : > { %v411_v20 = vsel %vm404_vm0, %v395_v17, %v397_v19  ;;  %v413_v21 = vsel %vm404_vm0, %v399_v16, %v401_v18  ;;  %v412_v22 = vsel %vm404_vm0, %v397_v19, %v399_v16 }
  0x8b   : > { %457 = vmatprep.subr.mxu0 %v411_v20  ;;  %528 = vmatprep.subr.mxu1 %v413_v21 }
  0x8c   : > { %1940 = vrot.lane.b32.xlu0 %v5121_v4, %s5032_s17  ;;  %1942 = vrot.lane.b32.xlu1 %v5129_v6, %s5032_s17 }
  0x8d   : > { %529 = vmatpush1.msra.mxu1 %v412_v22  ;;  %v393_v23 = vpop.permute.xlu0 %392  ;;  %v383_v24 = vpop.permute.xlu1 %382  ;;  %v4747_v22 = vld [vmem:[%s5908_s2 + $0x3] sm:$0x1] }
  0x8e   : > { %v410_v25 = vsel %vm404_vm0, %v393_v23, %v395_v17 }
  0x8f   : > { %458 = vmatpush1.msra.mxu0 %v410_v25 }
  0x90   : > { %1944 = vrot.lane.b32.xlu0 %v5118_v3, %s5032_s17  ;;  %1946 = vrot.lane.b32.xlu1 %v5126_v5, %s5032_s17 }
  0x91   : > { %v385_v26 = vpop.permute.xlu0 %384  ;;  %v387_v27 = vpop.permute.xlu1 %386 }
  0x92   : > { %v406_v28 = vsel %vm404_vm0, %v383_v24, %v385_v26  ;;  %v407_v34 = vsel %vm404_vm0, %v385_v26, %v387_v27 }
  0x93   : > { %459 = vmatprep.subr.mxu0 %v406_v28 }
  0x94   : > { %1938 = vrot.lane.b32.xlu0 %v5134_v7, %s5032_s17  ;;  %1928 = vrot.lane.b32.xlu1 %v5137_v8, %s5032_s17 }
  0x95   : > { %v389_v29 = vpop.permute.xlu0 %388  ;;  %v381_v30 = vpop.permute.xlu1 %380 }
  0x96   : > { %v408_v31 = vsel %vm404_vm0, %v387_v27, %v389_v29  ;;  %v405_v32 = vsel %vm404_vm0, %v381_v30, %v383_v24 }
  0x97   : > { %530 = vmatprep.subr.mxu1 %v408_v31  ;;  %460 = vmatpush1.msra.mxu0 %v405_v32 }
  0x98   : > { %1930 = vrot.lane.b32.xlu0 %v5142_v9, %s5032_s17  ;;  %1932 = vrot.lane.b32.xlu1 %v5145_v10, %s5032_s17 }
  0x99   : > { %531 = vmatpush1.msra.mxu1 %v407_v34  ;;  %v403_v35 = vpop.permute.xlu0 %402  ;;  %v391_v36 = vpop.permute.xlu1 %390  ;;  %4842 = vmatprep.subr.mxu0 %v5027_v11 }
  0x9a   : > { %v414_v37 = vsel %vm404_vm0, %v401_v18, %v403_v35  ;;  %672 = vmatprep.subr.mxu1 %v5121_v4  ;;  %4737 = vmatmul.mubr.msk.f32.vlgmr.msra.gmra.mxu0 %vm425_vm1, %v4736_v33  ;;  %v409_v38 = vsel %vm404_vm0, %v389_v29, %v391_v36 }
  0x9b   : > { %4843 = vmatpush3.msra.mxu0 %v414_v37  ;;  %4738 = vmatmul.mubr.msk.f32.vlgmr.msra.gmra.mxu1 %vm425_vm1, %v4736_v33 }
  0x9c   : > { %1934 = vrot.lane.b32.xlu0 %v5152_v12, %s5032_s17  ;;  %1926 = vrot.lane.b32.xlu1 %v5155_v13, %s5032_s17 }
  0x9d   : > { %4844 = vmatprep.subr.mxu0 %v5027_v11  ;;  %673 = vmatpush1.msra.mxu1 %v5134_v7  ;;  %v873_v39 = vpop.permute.xlu0 %872  ;;  %v875_v40 = vpop.permute.xlu1 %874 }
  0x9e   : > { %4845 = vmatpush3.msra.mxu0 %v409_v38  ;;  %674 = vmatprep.subr.mxu1 %v5137_v8  ;;  %v889_v44 = vsel %vm882_vm3, %v873_v39, %v875_v40 }
  0x9f   : > { %4846 = vmatprep.mubr.msk.f32.mxu0 %vm5033_vm2, %v5027_v11  ;;  %675 = vmatpush1.msra.mxu1 %v5155_v13 }
  0xa0   : > { %743 = vmatprep.subr.mxu0 %v5118_v3  ;;  %2207 = vrot.lane.b32.xlu0 %v5121_v4, %s5034_s20 }
  0xa1   : > { %708 = vmatprep.mubr.f32.mxu1 %v5027_v11  ;;  %2209 = vrot.lane.b32.xlu1 %v5129_v6, %s5034_s20  ;;  %v877_v42 = vpop.permute.xlu0 %876  ;;  %v879_v43 = vpop.permute.xlu1 %878 }
  0xa2   : > { %4847 = vmatmul.mubr.msk.f32.vlgmr.msra.gmra.mxu0 %vm425_vm1, %v4736_v33  ;;  %4849 = vmatprep.subr.mxu1 %v5027_v11  ;;  %v891_v45 = vsel %vm882_vm3, %v877_v42, %v879_v43  ;;  %v890_v48 = vsel %vm882_vm3, %v875_v40, %v877_v42 }
  0xa3   : > { %744 = vmatpush1.msra.mxu0 %v5129_v6  ;;  %4740 = vmatmul.mubr.msk.f32.vlgmr.msra.gmra.mxu1 %vm425_vm1, %v353_v41 }
  0xa4   : > { %745 = vmatprep.subr.mxu0 %v5145_v10  ;;  %4850 = vmatpush3.msra.mxu1 %v5126_v5 }
  0xa5   : > { %746 = vmatpush1.msra.mxu0 %v5142_v9  ;;  %4851 = vmatprep.subr.mxu1 %v5027_v11  ;;  %v871_v46 = vpop.permute.xlu0 %870  ;;  %v861_v47 = vpop.permute.xlu1 %860 }
  0xa6   : > { %4852 = vmatpush3.msra.mxu1 %v5152_v12  ;;  %934 = vmatprep.subr.mxu0 %v889_v44  ;;  %v888_v49 = vsel %vm882_vm3, %v871_v46, %v873_v39 }
  0xa7   : > { %1948 = vrot.lane.b32.xlu0 %v5160_v14, %s5032_s17  ;;  %2205 = vrot.lane.b32.xlu1 %v5134_v7, %s5034_s20 }
  0xa8   : > { %4853 = vmatprep.mubr.msk.f32.mxu1 %vm5033_vm2, %v5027_v11  ;;  %1005 = vmatprep.subr.mxu1 %v891_v45 }
  0xa9   : > { %4854 = vmatmul.mubr.msk.f32.vlgmr.msra.gmra.mxu1 %vm425_vm1, %v353_v41  ;;  %779 = vmatprep.mubr.f32.mxu0 %v5027_v11  ;;  %v863_v50 = vpop.permute.xlu0 %862  ;;  %v865_v51 = vpop.permute.xlu1 %864 }
  0xaa   : > { %1006 = vmatpush1.msra.mxu1 %v890_v48  ;;  %4741 = vmatmul.mubr.msk.f32.vlgmr.msra.gmra.mxu0 %vm425_vm1, %v353_v41  ;;  %v884_v52 = vsel %vm882_vm3, %v861_v47, %v863_v50  ;;  %v885_v58 = vsel %vm882_vm3, %v863_v50, %v865_v51 }
  0xab   : > { %2195 = vrot.lane.b32.xlu0 %v5137_v8, %s5034_s20  ;;  %2197 = vrot.lane.b32.xlu1 %v5142_v9, %s5034_s20 }
  0xac   : > { %935 = vmatpush1.msra.mxu0 %v888_v49  ;;  %970 = vmatprep.mubr.f32.mxu0 %v5027_v11 }
  0xad   : > { %936 = vmatprep.subr.mxu0 %v884_v52  ;;  %v867_v53 = vpop.permute.xlu0 %866  ;;  %v859_v54 = vpop.permute.xlu1 %858  ;;  %1041 = vmatprep.mubr.f32.mxu1 %v5027_v11 }
  0xae   : > { %v883_v55 = vsel %vm882_vm3, %v859_v54, %v861_v47  ;;  %v886_v56 = vsel %vm882_vm3, %v865_v51, %v867_v53 }
  0xaf   : > { %1936 = vrot.lane.b32.xlu0 %v5163_v15, %s5032_s17  ;;  %2193 = vrot.lane.b32.xlu1 %v5155_v13, %s5034_s20  ;;  %s5037_s17 = smov 123  }
  0xb0   : > { %937 = vmatpush1.msra.mxu0 %v883_v55  ;;  %1007 = vmatprep.subr.mxu1 %v886_v56 }
  0xb1   : > { %1008 = vmatpush1.msra.mxu1 %v885_v58  ;;  %v1140_v59 = vpop.permute.xlu0 %1139  ;;  %v1142_v60 = vpop.permute.xlu1 %1141  ;;  %4856 = vmatprep.subr.mxu0 %v5027_v11 }
  0xb2   : > { %v1156_v61 = vsel %vm1149_vm4, %v1140_v59, %v1142_v60  ;;  %4744 = vmatmul.mubr.msk.f32.vlgmr.msra.gmra.mxu0 %vm425_vm1, %v4743_v57  ;;  %4745 = vmatmul.mubr.msk.f32.vlgmr.msra.gmra.mxu1 %vm425_vm1, %v4743_v57 }
  0xb3   : > { %2211 = vrot.lane.b32.xlu0 %v5118_v3, %s5034_s20  ;;  %2213 = vrot.lane.b32.xlu1 %v5126_v5, %s5034_s20 }
  0xb4   : > { %1201 = vmatprep.subr.mxu1 %v1156_v61  ;;  %4860 = vmatprep.mubr.msk.f32.mxu0 %vm5033_vm2, %v5027_v11 }
  0xb5   : > { %v881_v62 = vpop.permute.xlu0 %880  ;;  %v1138_v63 = vpop.permute.xlu1 %1137  ;;  %1237 = vmatprep.mubr.f32.mxu1 %v5027_v11 }
  0xb6   : > { %v892_v0 = vsel %vm882_vm3, %v879_v43, %v881_v62  ;;  %v1155_v1 = vsel %vm1149_vm4, %v1138_v63, %v1140_v59 }
  0xb7   : > { %2215 = vrot.lane.b32.xlu0 %v5160_v14, %s5034_s20  ;;  %2199 = vrot.lane.b32.xlu1 %v5145_v10, %s5034_s20 }
  0xb8   : > { %4857 = vmatpush3.msra.mxu0 %v892_v0  ;;  %1202 = vmatpush1.msra.mxu1 %v1155_v1 }
  0xb9   : > { %v1128_v2 = vpop.permute.xlu0 %1127  ;;  %v1130_v16 = vpop.permute.xlu1 %1129  ;;  %4858 = vmatprep.subr.mxu0 %v5027_v11 }
  0xba   : > { %v1151_v17 = vsel %vm1149_vm4, %v1128_v2, %v1130_v16 }
  0xbb   : > { %2201 = vrot.lane.b32.xlu0 %v5152_v12, %s5034_s20  ;;  %2203 = vrot.lane.b32.xlu1 %v5163_v15, %s5034_s20 }
  0xbc   : > { %1203 = vmatprep.subr.mxu1 %v1151_v17 }
  0xbd   : > { %v869_v18 = vpop.permute.xlu0 %868  ;;  %v1126_v19 = vpop.permute.xlu1 %1125 }
  0xbe   : > { %v887_v20 = vsel %vm882_vm3, %v867_v53, %v869_v18  ;;  %v1150_v21 = vsel %vm1149_vm4, %v1126_v19, %v1128_v2  ;;  %v4755_v2 = vld [vmem:[%s5908_s2 + $0x5] sm:$0x1] }
  0xbf   : > { %2474 = vrot.lane.b32.xlu0 %v5121_v4, %s5035_s25  ;;  %2476 = vrot.lane.b32.xlu1 %v5129_v6, %s5035_s25 }
  0xc0   : > { %4859 = vmatpush3.msra.mxu0 %v887_v20  ;;  %1204 = vmatpush1.msra.mxu1 %v1150_v21 }
  0xc1   : > { %v1144_v23 = vpop.permute.xlu0 %1143  ;;  %v1146_v24 = vpop.permute.xlu1 %1145  ;;  %4861 = vmatmul.mubr.msk.f32.vlgmr.msra.gmra.mxu0 %vm425_vm1, %v4743_v57  ;;  %4863 = vmatprep.subr.mxu1 %v5027_v11 }
  0xc2   : > { %v1158_v25 = vsel %vm1149_vm4, %v1144_v23, %v1146_v24  ;;  %v1157_v26 = vsel %vm1149_vm4, %v1142_v60, %v1144_v23  ;;  %4748 = vmatmul.mubr.msk.f32.vlgmr.msra.gmra.mxu1 %vm425_vm1, %v4747_v22  ;;  %1308 = vmatprep.mubr.f32.mxu0 %v5027_v11 }
  0xc3   : > { %2478 = vrot.lane.b32.xlu0 %v5118_v3, %s5035_s25  ;;  %2480 = vrot.lane.b32.xlu1 %v5126_v5, %s5035_s25 }
  0xc4   : > { %1272 = vmatprep.subr.mxu0 %v1158_v25  ;;  %4867 = vmatprep.mubr.msk.f32.mxu1 %vm5033_vm2, %v5027_v11 }
  0xc5   : > { %1273 = vmatpush1.msra.mxu0 %v1157_v26  ;;  %v1148_v27 = vpop.permute.xlu0 %1147  ;;  %v1132_v28 = vpop.permute.xlu1 %1131 }
  0xc6   : > { %v1159_v29 = vsel %vm1149_vm4, %v1146_v24, %v1148_v27  ;;  %v1152_v34 = vsel %vm1149_vm4, %v1130_v16, %v1132_v28 }
  0xc7   : > { %2472 = vrot.lane.b32.xlu0 %v5134_v7, %s5035_s25  ;;  %2462 = vrot.lane.b32.xlu1 %v5137_v8, %s5035_s25 }
  0xc8   : > { %4864 = vmatpush3.msra.mxu1 %v1159_v29 }
  0xc9   : > { %v1134_v30 = vpop.permute.xlu0 %1133  ;;  %v1136_v31 = vpop.permute.xlu1 %1135  ;;  %4865 = vmatprep.subr.mxu1 %v5027_v11 }
  0xca   : > { %v1154_v32 = vsel %vm1149_vm4, %v1134_v30, %v1136_v31  ;;  %v1153_v33 = vsel %vm1149_vm4, %v1132_v28, %v1134_v30 }
  0xcb   : > { %2464 = vrot.lane.b32.xlu0 %v5142_v9, %s5035_s25  ;;  %2466 = vrot.lane.b32.xlu1 %v5145_v10, %s5035_s25 }
  0xcc   : > { %1274 = vmatprep.subr.mxu0 %v1153_v33  ;;  %4866 = vmatpush3.msra.mxu1 %v1154_v32 }
  0xcd   : > { %1275 = vmatpush1.msra.mxu0 %v1152_v34  ;;  %v1407_v35 = vpop.permute.xlu0 %1406  ;;  %v1409_v36 = vpop.permute.xlu1 %1408  ;;  %4868 = vmatmul.mubr.msk.f32.vlgmr.msra.gmra.mxu1 %vm425_vm1, %v4747_v22 }
  0xce   : > { %v1423_v37 = vsel %vm1416_vm5, %v1407_v35, %v1409_v36  ;;  %4749 = vmatmul.mubr.msk.f32.vlgmr.msra.gmra.mxu0 %vm425_vm1, %v4747_v22  ;;  %1575 = vmatprep.mubr.f32.mxu1 %v5027_v11 }
  0xcf   : > { %2468 = vrot.lane.b32.xlu0 %v5152_v12, %s5035_s25  ;;  %2460 = vrot.lane.b32.xlu1 %v5155_v13, %s5035_s25 }
  0xd0   : > { %1468 = vmatprep.subr.mxu0 %v1423_v37  ;;  %1504 = vmatprep.mubr.f32.mxu0 %v5027_v11 }
  0xd1   : > { %v1411_v38 = vpop.permute.xlu0 %1410  ;;  %v1413_v39 = vpop.permute.xlu1 %1412 }
  0xd2   : > { %v1425_v40 = vsel %vm1416_vm5, %v1411_v38, %v1413_v39  ;;  %v1424_v41 = vsel %vm1416_vm5, %v1409_v36, %v1411_v38 }
  0xd3   : > { %2741 = vrot.lane.b32.xlu0 %v5121_v4, %s5036_s28  ;;  %2743 = vrot.lane.b32.xlu1 %v5129_v6, %s5036_s28 }
  0xd4   : > { %1539 = vmatprep.subr.mxu1 %v1425_v40 }
  0xd5   : > { %1540 = vmatpush1.msra.mxu1 %v1424_v41  ;;  %v1405_v42 = vpop.permute.xlu0 %1404  ;;  %v1395_v43 = vpop.permute.xlu1 %1394 }
  0xd6   : > { %v1422_v44 = vsel %vm1416_vm5, %v1405_v42, %v1407_v35  ;;  %v5507_v35 = vld [vmem:[%s5115_s11 + $0x68] sm:$0xff]  ;;  %v5520_v42 = vld [vmem:[%s5115_s11 + $0x30] sm:$0xff] }
  0xd7   : > { %2482 = vrot.lane.b32.xlu0 %v5160_v14, %s5035_s25  ;;  %2739 = vrot.lane.b32.xlu1 %v5134_v7, %s5036_s28  ;;  %v4751_v7 = vld [vmem:[%s5908_s2 + $0x4] sm:$0x1] }
  0xd8   : > { %1469 = vmatpush1.msra.mxu0 %v1422_v44 }
  0xd9   : > { %v1397_v45 = vpop.permute.xlu0 %1396  ;;  %v1399_v46 = vpop.permute.xlu1 %1398 }
  0xda   : > { %v1418_v47 = vsel %vm1416_vm5, %v1395_v43, %v1397_v45  ;;  %v1419_v52 = vsel %vm1416_vm5, %v1397_v45, %v1399_v46 }
  0xdb   : > { %2729 = vrot.lane.b32.xlu0 %v5137_v8, %s5036_s28  ;;  %2731 = vrot.lane.b32.xlu1 %v5142_v9, %s5036_s28 }
  0xdc   : > { %1470 = vmatprep.subr.mxu0 %v1418_v47  ;;  %v4759_v47 = vld [vmem:[%s5908_s2 + $0x6] sm:$0x1] }
  0xdd   : > { %v1401_v48 = vpop.permute.xlu0 %1400  ;;  %v1393_v49 = vpop.permute.xlu1 %1392 }
  0xde   : > { %v1417_v50 = vsel %vm1416_vm5, %v1393_v49, %v1395_v43  ;;  %v1420_v51 = vsel %vm1416_vm5, %v1399_v46, %v1401_v48 }
  0xdf   : > { %2470 = vrot.lane.b32.xlu0 %v5163_v15, %s5035_s25  ;;  %2727 = vrot.lane.b32.xlu1 %v5155_v13, %s5036_s28 }
  0xe0   : > { %1471 = vmatpush1.msra.mxu0 %v1417_v50  ;;  %1541 = vmatprep.subr.mxu1 %v1420_v51 }
  0xe1   : > { %1542 = vmatpush1.msra.mxu1 %v1419_v52  ;;  %v1674_v53 = vpop.permute.xlu0 %1673  ;;  %v1676_v54 = vpop.permute.xlu1 %1675  ;;  %4870 = vmatprep.subr.mxu0 %v5027_v11 }
  0xe2   : > { %v1690_v55 = vsel %vm1683_vm6, %v1674_v53, %v1676_v54  ;;  %4752 = vmatmul.mubr.msk.f32.vlgmr.msra.gmra.mxu0 %vm425_vm1, %v4751_v7  ;;  %4753 = vmatmul.mubr.msk.f32.vlgmr.msra.gmra.mxu1 %vm425_vm1, %v4751_v7 }
  0xe3   : > { %2745 = vrot.lane.b32.xlu0 %v5118_v3, %s5036_s28  ;;  %2747 = vrot.lane.b32.xlu1 %v5126_v5, %s5036_s28 }
  0xe4   : > { %1735 = vmatprep.subr.mxu1 %v1690_v55  ;;  %4874 = vmatprep.mubr.msk.f32.mxu0 %vm5033_vm2, %v5027_v11 }
  0xe5   : > { %v1415_v13 = vpop.permute.xlu0 %1414  ;;  %v1672_v56 = vpop.permute.xlu1 %1671  ;;  %1771 = vmatprep.mubr.f32.mxu1 %v5027_v11 }
  0xe6   : > { %v1426_v57 = vsel %vm1416_vm5, %v1413_v39, %v1415_v13  ;;  %v1689_v58 = vsel %vm1683_vm6, %v1672_v56, %v1674_v53 }
  0xe7   : > { %2749 = vrot.lane.b32.xlu0 %v5160_v14, %s5036_s28  ;;  %2733 = vrot.lane.b32.xlu1 %v5145_v10, %s5036_s28 }
  0xe8   : > { %4871 = vmatpush3.msra.mxu0 %v1426_v57  ;;  %1736 = vmatpush1.msra.mxu1 %v1689_v58 }
  0xe9   : > { %v1662_v59 = vpop.permute.xlu0 %1661  ;;  %v1664_v60 = vpop.permute.xlu1 %1663  ;;  %4872 = vmatprep.subr.mxu0 %v5027_v11 }
  0xea   : > { %v1685_v61 = vsel %vm1683_vm6, %v1662_v59, %v1664_v60 }
  0xeb   : > { %2735 = vrot.lane.b32.xlu0 %v5152_v12, %s5036_s28  ;;  %2737 = vrot.lane.b32.xlu1 %v5163_v15, %s5036_s28 }
  0xec   : > { %1737 = vmatprep.subr.mxu1 %v1685_v61  ;;  %v4763_v61 = vld [vmem:[%s5908_s2 + $0x7] sm:$0x1] }
  0xed   : > { %v1403_v62 = vpop.permute.xlu0 %1402  ;;  %v1660_v63 = vpop.permute.xlu1 %1659 }
  0xee   : > { %v1421_v0 = vsel %vm1416_vm5, %v1401_v48, %v1403_v62  ;;  %v1684_v1 = vsel %vm1683_vm6, %v1660_v63, %v1662_v59 }
  0xef   : > { %3032 = vrot.lane.b32.xlu0 %v5129_v6, %s5028_s13  ;;  %3034 = vrot.lane.b32.xlu1 %v5118_v3, %s5028_s13 }
  0xf0   : > { %4873 = vmatpush3.msra.mxu0 %v1421_v0  ;;  %1738 = vmatpush1.msra.mxu1 %v1684_v1 }
  0xf1   : > { %v1678_v16 = vpop.permute.xlu0 %1677  ;;  %v1680_v17 = vpop.permute.xlu1 %1679  ;;  %4875 = vmatmul.mubr.msk.f32.vlgmr.msra.gmra.mxu0 %vm425_vm1, %v4751_v7  ;;  %4877 = vmatprep.subr.mxu1 %v5027_v11 }
  0xf2   : > { %v1692_v18 = vsel %vm1683_vm6, %v1678_v16, %v1680_v17  ;;  %v1691_v19 = vsel %vm1683_vm6, %v1676_v54, %v1678_v16  ;;  %4756 = vmatmul.mubr.msk.f32.vlgmr.msra.gmra.mxu1 %vm425_vm1, %v4755_v2  ;;  %1842 = vmatprep.mubr.f32.mxu0 %v5027_v11 }
  0xf3   : > { %3036 = vrot.lane.b32.xlu0 %v5126_v5, %s5028_s13  ;;  %3038 = vrot.lane.b32.xlu1 %v5160_v14, %s5028_s13 }
  0xf4   : > { %1806 = vmatprep.subr.mxu0 %v1692_v18  ;;  %4881 = vmatprep.mubr.msk.f32.mxu1 %vm5033_vm2, %v5027_v11 }
  0xf5   : > { %1807 = vmatpush1.msra.mxu0 %v1691_v19  ;;  %v1682_v20 = vpop.permute.xlu0 %1681  ;;  %v1666_v21 = vpop.permute.xlu1 %1665 }
  0xf6   : > { %v1693_v22 = vsel %vm1683_vm6, %v1680_v17, %v1682_v20  ;;  %v1686_v27 = vsel %vm1683_vm6, %v1664_v60, %v1666_v21 }
  0xf7   : > { %3030 = vrot.lane.b32.xlu0 %v5121_v4, %s5028_s13  ;;  %3020 = vrot.lane.b32.xlu1 %v5142_v9, %s5028_s13 }
  0xf8   : > { %4878 = vmatpush3.msra.mxu1 %v1693_v22 }
  0xf9   : > { %v1668_v23 = vpop.permute.xlu0 %1667  ;;  %v1670_v24 = vpop.permute.xlu1 %1669  ;;  %4879 = vmatprep.subr.mxu1 %v5027_v11 }
  0xfa   : > { %v1688_v25 = vsel %vm1683_vm6, %v1668_v23, %v1670_v24  ;;  %v1687_v26 = vsel %vm1683_vm6, %v1666_v21, %v1668_v23 }
  0xfb   : > { %3022 = vrot.lane.b32.xlu0 %v5145_v10, %s5028_s13  ;;  %3024 = vrot.lane.b32.xlu1 %v5152_v12, %s5028_s13 }
  0xfc   : > { %1808 = vmatprep.subr.mxu0 %v1687_v26  ;;  %4880 = vmatpush3.msra.mxu1 %v1688_v25 }
  0xfd   : > { %1809 = vmatpush1.msra.mxu0 %v1686_v27  ;;  %4882 = vmatmul.mubr.msk.f32.vlgmr.msra.gmra.mxu1 %vm425_vm1, %v4755_v2 }
  0xfe   : > { %v1941_v28 = vpop.permute.xlu0 %1940  ;;  %v1943_v29 = vpop.permute.xlu1 %1942  ;;  %4757 = vmatmul.mubr.msk.f32.vlgmr.msra.gmra.mxu0 %vm425_vm1, %v4755_v2  ;;  %2109 = vmatprep.mubr.f32.mxu1 %v5027_v11 }
  0xff   : > { %3026 = vrot.lane.b32.xlu0 %v5163_v15, %s5028_s13  ;;  %3018 = vrot.lane.b32.xlu1 %v5137_v8, %s5028_s13  ;;  %v1957_v30 = vsel %vm1950_vm7, %v1941_v28, %v1943_v29 }
 0x100   : > { %2002 = vmatprep.subr.mxu0 %v1957_v30  ;;  %2038 = vmatprep.mubr.f32.mxu0 %v5027_v11 }
 0x102   : > { %v1945_v31 = vpop.permute.xlu0 %1944  ;;  %v1947_v32 = vpop.permute.xlu1 %1946 }
 0x103   : > { %3298 = vrot.lane.b32.xlu0 %v5129_v6, %s5029_s14  ;;  %3300 = vrot.lane.b32.xlu1 %v5118_v3, %s5029_s14  ;;  %v1959_v33 = vsel %vm1950_vm7, %v1945_v31, %v1947_v32  ;;  %v1958_v34 = vsel %vm1950_vm7, %v1943_v29, %v1945_v31 }
 0x104   : > { %2073 = vmatprep.subr.mxu1 %v1959_v33 }
 0x105   : > { %2074 = vmatpush1.msra.mxu1 %v1958_v34 }
 0x106   : > { %v1939_v36 = vpop.permute.xlu0 %1938  ;;  %v1929_v37 = vpop.permute.xlu1 %1928 }
 0x107   : > { %3040 = vrot.lane.b32.xlu0 %v5507_v35, %s5028_s13  ;;  %3296 = vrot.lane.b32.xlu1 %v5121_v4, %s5029_s14  ;;  %v1956_v38 = vsel %vm1950_vm7, %v1939_v36, %v1941_v28 }
 0x108   : > { %2003 = vmatpush1.msra.mxu0 %v1956_v38 }
 0x10a   : > { %v1931_v39 = vpop.permute.xlu0 %1930  ;;  %v1933_v40 = vpop.permute.xlu1 %1932 }
 0x10b   : > { %3286 = vrot.lane.b32.xlu0 %v5142_v9, %s5029_s14  ;;  %3288 = vrot.lane.b32.xlu1 %v5145_v10, %s5029_s14  ;;  %v1952_v41 = vsel %vm1950_vm7, %v1929_v37, %v1931_v39  ;;  %v1953_v48 = vsel %vm1950_vm7, %v1931_v39, %v1933_v40 }
 0x10c   : > { %2004 = vmatprep.subr.mxu0 %v1952_v41  ;;  %v4992_v41 = vld [vmem:[%s5115_s11 + $0x28] sm:$0xff] }
 0x10e   : > { %v1935_v43 = vpop.permute.xlu0 %1934  ;;  %v1927_v44 = vpop.permute.xlu1 %1926 }
 0x10f   : > { %3028 = vrot.lane.b32.xlu0 %v5520_v42, %s5028_s13  ;;  %3284 = vrot.lane.b32.xlu1 %v5137_v8, %s5029_s14  ;;  %v1951_v45 = vsel %vm1950_vm7, %v1927_v44, %v1929_v37  ;;  %v1954_v46 = vsel %vm1950_vm7, %v1933_v40, %v1935_v43 }
 0x110   : > { %2005 = vmatpush1.msra.mxu0 %v1951_v45  ;;  %2075 = vmatprep.subr.mxu1 %v1954_v46  ;;  %v4993_v45 = vld [vmem:[%s5115_s11 + $0x48] sm:$0xff]  ;;  %v4994_v46 = vld [vmem:[%s5115_s11 + $0x50] sm:$0xff] }
 0x111   : > { %2076 = vmatpush1.msra.mxu1 %v1953_v48  ;;  %4884 = vmatprep.subr.mxu0 %v5027_v11 }
 0x112   : > { %v2208_v49 = vpop.permute.xlu0 %2207  ;;  %4760 = vmatmul.mubr.msk.f32.vlgmr.msra.gmra.mxu0 %vm425_vm1, %v4759_v47  ;;  %4761 = vmatmul.mubr.msk.f32.vlgmr.msra.gmra.mxu1 %vm425_vm1, %v4759_v47 }
 0x113   : > { %3302 = vrot.lane.b32.xlu0 %v5126_v5, %s5029_s14  ;;  %3304 = vrot.lane.b32.xlu1 %v5160_v14, %s5029_s14  ;;  %v2210_v50 = vpop.permute.xlu1 %2209 }
 0x114   : > { %v2224_v51 = vsel %vm2217_vm8, %v2208_v49, %v2210_v50  ;;  %4888 = vmatprep.mubr.msk.f32.mxu0 %vm5033_vm2, %v5027_v11  ;;  %2305 = vmatprep.mubr.f32.mxu1 %v5027_v11 }
 0x115   : > { %2269 = vmatprep.subr.mxu1 %v2224_v51  ;;  %v4995_v51 = vld [vmem:[%s5115_s11 + $0x58] sm:$0xff] }
 0x117   : > { %3306 = vrot.lane.b32.xlu0 %v5507_v35, %s5029_s14  ;;  %3290 = vrot.lane.b32.xlu1 %v5152_v12, %s5029_s14 }
 0x119   : > { %v1949_v7 = vpop.permute.xlu0 %1948  ;;  %v2206_v52 = vpop.permute.xlu1 %2205 }
 0x11a   : > { %v1960_v53 = vsel %vm1950_vm7, %v1947_v32, %v1949_v7  ;;  %v2223_v54 = vsel %vm2217_vm8, %v2206_v52, %v2208_v49  ;;  %v4996_v7 = vld [vmem:[%s5115_s11 + $0x60] sm:$0xff]  ;;  %v4771_v52 = vld [vmem:[%s5908_s2 + $0x9] sm:$0x1] }
 0x11b   : > { %3292 = vrot.lane.b32.xlu0 %v5163_v15, %s5029_s14  ;;  %3294 = vrot.lane.b32.xlu1 %v5520_v42, %s5029_s14  ;;  %s340_s14 = scalar_lea.vmem %s5907_s1, %s4948_s12 }
 0x11c   : > { %4885 = vmatpush3.msra.mxu0 %v1960_v53  ;;  %2270 = vmatpush1.msra.mxu1 %v2223_v54 }
 0x11d   : > { %v2196_v55 = vpop.permute.xlu0 %2195  ;;  %v2198_v13 = vpop.permute.xlu1 %2197  ;;  %4886 = vmatprep.subr.mxu0 %v5027_v11 }
 0x11e   : > { %v2219_v56 = vsel %vm2217_vm8, %v2196_v55, %v2198_v13 }
 0x11f   : > { %3564 = vrot.lane.b32.xlu0 %v5129_v6, %s5030_s15  ;;  %3566 = vrot.lane.b32.xlu1 %v5118_v3, %s5030_s15 }
 0x120   : > { %2271 = vmatprep.subr.mxu1 %v2219_v56  ;;  %v4997_v56 = vld [vmem:[%s5115_s11 + $0x40] sm:$0xff] }
 0x121   : > { %v1937_v57 = vpop.permute.xlu0 %1936  ;;  %v2194_v58 = vpop.permute.xlu1 %2193 }
 0x122   : > { %v1955_v59 = vsel %vm1950_vm7, %v1935_v43, %v1937_v57  ;;  %v2218_v60 = vsel %vm2217_vm8, %v2194_v58, %v2196_v55  ;;  %v4998_v57 = vld [vmem:[%s5115_s11 + $0x10] sm:$0xff] }
 0x123   : > { %3568 = vrot.lane.b32.xlu0 %v5126_v5, %s5030_s15  ;;  %3570 = vrot.lane.b32.xlu1 %v5160_v14, %s5030_s15 }
 0x124   : > { %4887 = vmatpush3.msra.mxu0 %v1955_v59  ;;  %2272 = vmatpush1.msra.mxu1 %v2218_v60 }
 0x125   : > { %v2212_v62 = vpop.permute.xlu0 %2211  ;;  %v2214_v63 = vpop.permute.xlu1 %2213  ;;  %4889 = vmatmul.mubr.msk.f32.vlgmr.msra.gmra.mxu0 %vm425_vm1, %v4759_v47  ;;  %4891 = vmatprep.subr.mxu1 %v5027_v11 }
 0x126   : > { %v2225_v0 = vsel %vm2217_vm8, %v2210_v50, %v2212_v62  ;;  %v2226_v1 = vsel %vm2217_vm8, %v2212_v62, %v2214_v63  ;;  %4764 = vmatmul.mubr.msk.f32.vlgmr.msra.gmra.mxu1 %vm425_vm1, %v4763_v61  ;;  %2376 = vmatprep.mubr.f32.mxu0 %v5027_v11  ;;  %v4999_v62 = vld [vmem:[%s5115_s11 + $0x18] sm:$0xff] }
 0x127   : > { %3562 = vrot.lane.b32.xlu0 %v5121_v4, %s5030_s15  ;;  %3552 = vrot.lane.b32.xlu1 %v5142_v9, %s5030_s15 }
 0x128   : > { %2340 = vmatprep.subr.mxu0 %v2226_v1  ;;  %4895 = vmatprep.mubr.msk.f32.mxu1 %vm5033_vm2, %v5027_v11  ;;  %v5039_v1 = vmov 1  }
 0x129   : > { %2341 = vmatpush1.msra.mxu0 %v2225_v0  ;;  %v2216_v2 = vpop.permute.xlu0 %2215  ;;  %v2200_v16 = vpop.permute.xlu1 %2199  ;;  %4990 = vset.pattern.permute.xlu1 %v5039_v1 }
 0x12a   : > { %v2227_v17 = vsel %vm2217_vm8, %v2214_v63, %v2216_v2  ;;  %v2220_v22 = vsel %vm2217_vm8, %v2198_v13, %v2200_v16  ;;  %v5000_v63 = vld [vmem:[%s5115_s11 + $0x20] sm:$0xff] }
 0x12b   : > { %3554 = vrot.lane.b32.xlu0 %v5145_v10, %s5030_s15  ;;  %3556 = vrot.lane.b32.xlu1 %v5152_v12, %s5030_s15 }
 0x12c   : > { %4892 = vmatpush3.msra.mxu1 %v2227_v17  ;;  %v5040_v17 = vmov 0  }
 0x12d   : > { %v2202_v18 = vpop.permute.xlu0 %2201  ;;  %v2204_v19 = vpop.permute.xlu1 %2203  ;;  %4893 = vmatprep.subr.mxu1 %v5027_v11  ;;  %4989 = vset.pattern.permute.xlu0 %v5040_v17 }
 0x12e   : > { %v2222_v20 = vsel %vm2217_vm8, %v2202_v18, %v2204_v19  ;;  %v2221_v21 = vsel %vm2217_vm8, %v2200_v16, %v2202_v18 }
 0x12f   : > { %3558 = vrot.lane.b32.xlu0 %v5163_v15, %s5030_s15  ;;  %3550 = vrot.lane.b32.xlu1 %v5137_v8, %s5030_s15 }
 0x130   : > { %2342 = vmatprep.subr.mxu0 %v2221_v21  ;;  %4894 = vmatpush3.msra.mxu1 %v2222_v20  ;;  %v5001_v21 = vld [vmem:[%s5115_s11 + $0x8] sm:$0xff] }
 0x131   : > { %2343 = vmatpush1.msra.mxu0 %v2220_v22  ;;  %v2475_v23 = vpop.permute.xlu0 %2474  ;;  %v2477_v24 = vpop.permute.xlu1 %2476  ;;  %4896 = vmatmul.mubr.msk.f32.vlgmr.msra.gmra.mxu1 %vm425_vm1, %v4763_v61 }
 0x132   : > { %v2491_v25 = vsel %vm2484_vm9, %v2475_v23, %v2477_v24  ;;  %4765 = vmatmul.mubr.msk.f32.vlgmr.msra.gmra.mxu0 %vm425_vm1, %v4763_v61  ;;  %2643 = vmatprep.mubr.f32.mxu1 %v5027_v11 }
 0x133   : > { %3830 = vrot.lane.b32.xlu0 %v5129_v6, %s5037_s17  ;;  %3832 = vrot.lane.b32.xlu1 %v5118_v3, %s5037_s17 }
 0x134   : > { %2536 = vmatprep.subr.mxu0 %v2491_v25  ;;  %2572 = vmatprep.mubr.f32.mxu0 %v5027_v11 }
 0x135   : > { %v2479_v15 = vpop.permute.xlu0 %2478  ;;  %v2481_v26 = vpop.permute.xlu1 %2480 }
 0x136   : > { %v2492_v27 = vsel %vm2484_vm9, %v2477_v24, %v2479_v15  ;;  %v2493_v28 = vsel %vm2484_vm9, %v2479_v15, %v2481_v26 }
 0x137   : > { %3572 = vrot.lane.b32.xlu0 %v5507_v35, %s5030_s15  ;;  %3828 = vrot.lane.b32.xlu1 %v5121_v4, %s5037_s17 }
 0x138   : > { %2607 = vmatprep.subr.mxu1 %v2493_v28 }
 0x139   : > { %2608 = vmatpush1.msra.mxu1 %v2492_v27  ;;  %v2473_v6 = vpop.permute.xlu0 %2472  ;;  %v2463_v29 = vpop.permute.xlu1 %2462 }
 0x13a   : > { %v2490_v3 = vsel %vm2484_vm9, %v2473_v6, %v2475_v23  ;;  %v4366_v6 = vld [vmem:[%s5910_s4] sm:$0x1] }
 0x13b   : > { %3818 = vrot.lane.b32.xlu0 %v5142_v9, %s5037_s17  ;;  %3820 = vrot.lane.b32.xlu1 %v5145_v10, %s5037_s17  ;;  %v4767_v10 = vld [vmem:[%s5908_s2 + $0x8] sm:$0x1] }
 0x13c   : > { %2537 = vmatpush1.msra.mxu0 %v2490_v3 }
 0x13d   : > { %v2465_v30 = vpop.permute.xlu0 %2464  ;;  %v2467_v31 = vpop.permute.xlu1 %2466 }
 0x13e   : > { %v2486_v32 = vsel %vm2484_vm9, %v2463_v29, %v2465_v30 }
 0x13f   : > { %3560 = vrot.lane.b32.xlu0 %v5520_v42, %s5030_s15  ;;  %3816 = vrot.lane.b32.xlu1 %v5137_v8, %s5037_s17  ;;  %v2487_v8 = vsel %vm2484_vm9, %v2465_v30, %v2467_v31  ;;  %s5038_s15 = smov 122  }
 0x140   : > { %2538 = vmatprep.subr.mxu0 %v2486_v32 }
 0x141   : > { %v2469_v4 = vpop.permute.xlu0 %2468  ;;  %v2461_v33 = vpop.permute.xlu1 %2460 }
 0x142   : > { %v2485_v34 = vsel %vm2484_vm9, %v2461_v33, %v2463_v29  ;;  %v2488_v9 = vsel %vm2484_vm9, %v2467_v31, %v2469_v4  ;;  %v4348_v31 = vld [vmem:[#allocation2] sm:$0x1] }
 0x143   : > { %3834 = vrot.lane.b32.xlu0 %v5126_v5, %s5037_s17  ;;  %3836 = vrot.lane.b32.xlu1 %v5160_v14, %s5037_s17 }
 0x144   : > { %2539 = vmatpush1.msra.mxu0 %v2485_v34  ;;  %2609 = vmatprep.subr.mxu1 %v2488_v9  ;;  %v4364_v9 = vld [vmem:[#allocation3] sm:$0x1] }
 0x145   : > { %2610 = vmatpush1.msra.mxu1 %v2487_v8  ;;  %v2742_v36 = vpop.permute.xlu0 %2741  ;;  %v2744_v37 = vpop.permute.xlu1 %2743  ;;  %4898 = vmatprep.subr.mxu0 %v5027_v11 }
 0x146   : > { %v2758_v5 = vsel %vm2751_vm10, %v2742_v36, %v2744_v37  ;;  %4768 = vmatmul.mubr.msk.f32.vlgmr.msra.gmra.mxu0 %vm425_vm1, %v4767_v10  ;;  %4769 = vmatmul.mubr.msk.f32.vlgmr.msra.gmra.mxu1 %vm425_vm1, %v4767_v10 }
 0x147   : > { %3838 = vrot.lane.b32.xlu0 %v5507_v35, %s5037_s17  ;;  %3822 = vrot.lane.b32.xlu1 %v5152_v12, %s5037_s17 }
 0x148   : > { %2803 = vmatprep.subr.mxu1 %v2758_v5  ;;  %4902 = vmatprep.mubr.msk.f32.mxu0 %vm5033_vm2, %v5027_v11 }
 0x149   : > { %v2483_v14 = vpop.permute.xlu0 %2482  ;;  %v2740_v38 = vpop.permute.xlu1 %2739  ;;  %2839 = vmatprep.mubr.f32.mxu1 %v5027_v11 }
 0x14a   : > { %v2494_v39 = vsel %vm2484_vm9, %v2481_v26, %v2483_v14  ;;  %v2757_v40 = vsel %vm2751_vm10, %v2740_v38, %v2742_v36 }
 0x14b   : > { %3824 = vrot.lane.b32.xlu0 %v4992_v41, %s5037_s17  ;;  %3826 = vrot.lane.b32.xlu1 %v5520_v42, %s5037_s17 }
 0x14c   : > { %4899 = vmatpush3.msra.mxu0 %v2494_v39  ;;  %2804 = vmatpush1.msra.mxu1 %v2757_v40 }
 0x14d   : > { %v2730_v12 = vpop.permute.xlu0 %2729  ;;  %v2732_v43 = vpop.permute.xlu1 %2731  ;;  %4900 = vmatprep.subr.mxu0 %v5027_v11 }
 0x14e   : > { %v2753_v44 = vsel %vm2751_vm10, %v2730_v12, %v2732_v43 }
 0x14f   : > { %4097 = vrot.lane.b32.xlu0 %v4993_v45, %s5038_s15  ;;  %4099 = vrot.lane.b32.xlu1 %v4994_v46, %s5038_s15 }
 0x150   : > { %2805 = vmatprep.subr.mxu1 %v2753_v44 }
 0x151   : > { %v2471_v47 = vpop.permute.xlu0 %2470  ;;  %v2728_v48 = vpop.permute.xlu1 %2727 }
 0x152   : > { %v2489_v49 = vsel %vm2484_vm9, %v2469_v4, %v2471_v47  ;;  %v2752_v50 = vsel %vm2751_vm10, %v2728_v48, %v2730_v12  ;;  %v4365_v12 = vld [vmem:[#allocation4] sm:$0x1]  ;;  %v4775_v48 = vld [vmem:[%s5908_s2 + $0xa] sm:$0x1] }
 0x153   : > { %4101 = vrot.lane.b32.xlu0 %v4995_v51, %s5038_s15  ;;  %4103 = vrot.lane.b32.xlu1 %v4996_v7, %s5038_s15 }
 0x154   : > { %4901 = vmatpush3.msra.mxu0 %v2489_v49  ;;  %2806 = vmatpush1.msra.mxu1 %v2752_v50 }
 0x155   : > { %v2746_v53 = vpop.permute.xlu0 %2745  ;;  %v2748_v54 = vpop.permute.xlu1 %2747  ;;  %4903 = vmatmul.mubr.msk.f32.vlgmr.msra.gmra.mxu0 %vm425_vm1, %v4767_v10  ;;  %4905 = vmatprep.subr.mxu1 %v5027_v11 }
 0x156   : > { %v2759_v55 = vsel %vm2751_vm10, %v2744_v37, %v2746_v53  ;;  %v2760_v13 = vsel %vm2751_vm10, %v2746_v53, %v2748_v54  ;;  %4772 = vmatmul.mubr.msk.f32.vlgmr.msra.gmra.mxu1 %vm425_vm1, %v4771_v52  ;;  %2910 = vmatprep.mubr.f32.mxu0 %v5027_v11 }
 0x157   : > { %4095 = vrot.lane.b32.xlu0 %v4997_v56, %s5038_s15  ;;  %4085 = vrot.lane.b32.xlu1 %v4998_v57, %s5038_s15 }
 0x158   : > { %2874 = vmatprep.subr.mxu0 %v2760_v13  ;;  %4909 = vmatprep.mubr.msk.f32.mxu1 %vm5033_vm2, %v5027_v11 }
 0x159   : > { %2875 = vmatpush1.msra.mxu0 %v2759_v55  ;;  %v2750_v58 = vpop.permute.xlu0 %2749  ;;  %v2734_v59 = vpop.permute.xlu1 %2733 }
 0x15a   : > { %v2761_v60 = vsel %vm2751_vm10, %v2748_v54, %v2750_v58  ;;  %v495_v61 = vpop.f32.mrf.mxu0  ;;  %v2754_v23 = vsel %vm2751_vm10, %v2732_v43, %v2734_v59 }
 0x15b   : > { %4087 = vrot.lane.b32.xlu0 %v4999_v62, %s5038_s15  ;;  %4089 = vrot.lane.b32.xlu1 %v5000_v63, %s5038_s15  ;;  %v566_v0 = vpop.f32.mrf.mxu1 }
 0x15c   : > { %4906 = vmatpush3.msra.mxu1 %v2761_v60  ;;  %v497_v20 = vpop.f32.mrf.mxu0 }
 0x15d   : > { %v2736_v2 = vpop.permute.xlu0 %2735  ;;  %v2738_v16 = vpop.permute.xlu1 %2737  ;;  %4907 = vmatprep.subr.mxu1 %v5027_v11 }
 0x15e   : > { %v2756_v18 = vsel %vm2751_vm10, %v2736_v2, %v2738_v16  ;;  %v2755_v19 = vsel %vm2751_vm10, %v2734_v59, %v2736_v2  ;;  %v568_v22 = vpop.f32.mrf.mxu1 }
 0x15f   : > { %4091 = vrot.lane.b32.xlu0 %v4992_v41, %s5038_s15  ;;  %4083 = vrot.lane.b32.xlu1 %v5001_v21, %s5038_s15 }
 0x160   : > { %2876 = vmatprep.subr.mxu0 %v2755_v19  ;;  %4908 = vmatpush3.msra.mxu1 %v2756_v18  ;;  %v4779_v19 = vld [vmem:[%s5908_s2 + $0xb] sm:$0x1] }
 0x161   : > { %2877 = vmatpush1.msra.mxu0 %v2754_v23  ;;  %v3033_v24 = vpop.permute.xlu0 %3032  ;;  %v3035_v25 = vpop.permute.xlu1 %3034  ;;  %4910 = vmatmul.mubr.msk.f32.vlgmr.msra.gmra.mxu1 %vm425_vm1, %v4771_v52 }
 0x162   : > { %v3048_v15 = vsel %vm882_vm3, %v3033_v24, %v3035_v25  ;;  %4773 = vmatmul.mubr.msk.f32.vlgmr.msra.gmra.mxu0 %vm425_vm1, %v4771_v52  ;;  %3200 = vmatprep.mubr.f32.mxu1 %v5027_v11  ;;  %v637_v26 = vpop.f32.mrf.mxu0 }
 0x163   : > { %4105 = vrot.lane.b32.xlu0 %v5507_v35, %s5038_s15  ;;  %4093 = vrot.lane.b32.xlu1 %v5520_v42, %s5038_s15  ;;  %v710_v27 = vpop.f32.mrf.mxu1 }
 0x164   : > { %3093 = vmatprep.subr.mxu0 %v3048_v15  ;;  %3129 = vmatprep.mubr.f32.mxu0 %v5027_v11  ;;  %v4848_v28 = vpop.f32.mrf.mxu0  ;;  %v711_v29 = vadd.f32 %v710_v27, %v495_v61 }
 0x165   : > { %v3037_v3 = vpop.permute.xlu0 %3036  ;;  %v3039_v30 = vpop.permute.xlu1 %3038 }
 0x166   : > { %v3049_v32 = vsel %vm882_vm3, %v3035_v25, %v3037_v3  ;;  %v3050_v35 = vsel %vm882_vm3, %v3037_v3, %v3039_v30  ;;  %v712_v4 = vpop.f32.mrf.mxu1 }
 0x167   : > { %3164 = vmatprep.subr.mxu1 %v3050_v35  ;;  %4382 = vperm.xlu1 %4990, %v4366_v6   ;;  %v713_v42 = vadd.f32 %v712_v4, %v497_v20 }
 0x168   : > { %3165 = vmatpush1.msra.mxu1 %v3049_v32  ;;  %4351 = vperm.xlu0 %4989, %v4348_v31  }
 0x169   : > { %v3031_v33 = vpop.permute.xlu0 %3030  ;;  %v3021_v34 = vpop.permute.xlu1 %3020 }
 0x16a   : > { %v3047_v10 = vsel %vm882_vm3, %v3031_v33, %v3033_v24  ;;  %v781_v8 = vpop.f32.mrf.mxu0  ;;  %v852_v36 = vpop.f32.mrf.mxu1 }
 0x16b   : > { %3094 = vmatpush1.msra.mxu0 %v3047_v10  ;;  %v782_v37 = vadd.f32 %v781_v8, %v566_v0  ;;  %4991 = vset.pattern.permute.xlu1 %v5040_v17  ;;  %v853_v5 = vadd.f32 %v852_v36, %v637_v26 }
 0x16c   : > { %v783_v14 = vpop.f32.mrf.mxu0  ;;  %4369 = vperm.xlu1 %4991, %v4366_v6   ;;  %4423 = vperm.xlu0 %4989, %v4364_v9   ;;  %v4855_v38 = vpop.f32.mrf.mxu1 }
 0x16d   : > { %v3023_v39 = vpop.permute.xlu0 %3022  ;;  %v3025_v40 = vpop.permute.xlu1 %3024  ;;  %v784_v41 = vadd.f32 %v783_v14, %v568_v22 }
 0x16e   : > { %v3043_v43 = vsel %vm882_vm3, %v3021_v34, %v3023_v39  ;;  %v3044_v51 = vsel %vm882_vm3, %v3023_v39, %v3025_v40 }
 0x16f   : > { %3095 = vmatprep.subr.mxu0 %v3043_v43 }
 0x170   : > { %4437 = vperm.xlu1 %4991, %v4365_v12  }
 0x171   : > { %v3027_v44 = vpop.permute.xlu0 %3026  ;;  %v3019_v45 = vpop.permute.xlu1 %3018 }
 0x172   : > { %v3042_v46 = vsel %vm882_vm3, %v3019_v45, %v3021_v34  ;;  %v3045_v47 = vsel %vm882_vm3, %v3025_v40, %v3027_v44  ;;  %v972_v49 = vpop.f32.mrf.mxu0  ;;  %v1043_v50 = vpop.f32.mrf.mxu1 }
 0x173   : > { %3096 = vmatpush1.msra.mxu0 %v3042_v46  ;;  %3166 = vmatprep.subr.mxu1 %v3045_v47  ;;  %v1118_v7 = vadd.f32 %v972_v49, %v711_v29  ;;  %v5706_v52 = vadd.f32 %v1043_v50, %v782_v37 }
 0x174   : > { %3167 = vmatpush1.msra.mxu1 %v3044_v51  ;;  %4912 = vmatprep.subr.mxu0 %v5027_v11  ;;  %v974_v53 = vpop.f32.mrf.mxu0  ;;  %v1045_v54 = vpop.f32.mrf.mxu1  ;;  %v4783_v51 = vld [vmem:[%s5908_s2 + $0xc] sm:$0x1] }
 0x175   : > { %v3299_v55 = vpop.permute.xlu0 %3298  ;;  %v3301_v13 = vpop.permute.xlu1 %3300  ;;  %4776 = vmatmul.mubr.msk.f32.vlgmr.msra.gmra.mxu0 %vm425_vm1, %v4775_v48  ;;  %4777 = vmatmul.mubr.msk.f32.vlgmr.msra.gmra.mxu1 %vm425_vm1, %v4775_v48  ;;  %v1119_v56 = vadd.f32 %v974_v53, %v713_v42  ;;  %v5711_v57 = vadd.f32 %v1045_v54, %v784_v41 }
 0x176   : > { %v3314_v58 = vsel %vm1149_vm4, %v3299_v55, %v3301_v13  ;;  %4916 = vmatprep.mubr.msk.f32.mxu0 %vm5033_vm2, %v5027_v11  ;;  %3395 = vmatprep.mubr.f32.mxu1 %v5027_v11 }
 0x177   : > { %3359 = vmatprep.subr.mxu1 %v3314_v58 }
 0x179   : > { %v3041_v59 = vpop.permute.xlu0 %3040  ;;  %v3297_v60 = vpop.permute.xlu1 %3296 }
 0x17a   : > { %v3051_v61 = vsel %vm882_vm3, %v3039_v30, %v3041_v59  ;;  %v3313_v62 = vsel %vm1149_vm4, %v3297_v60, %v3299_v55 }
 0x17b   : > { %4913 = vmatpush3.msra.mxu0 %v3051_v61  ;;  %3360 = vmatpush1.msra.mxu1 %v3313_v62 }
 0x17c   : > { %4914 = vmatprep.subr.mxu0 %v5027_v11 }
 0x17d   : > { %v3287_v63 = vpop.permute.xlu0 %3286  ;;  %v3289_v0 = vpop.permute.xlu1 %3288 }
 0x17e   : > { %v3309_v1 = vsel %vm1149_vm4, %v3287_v63, %v3289_v0 }
 0x17f   : > { %3361 = vmatprep.subr.mxu1 %v3309_v1 }
 0x181   : > { %v3029_v2 = vpop.permute.xlu0 %3028  ;;  %v3285_v16 = vpop.permute.xlu1 %3284 }
 0x182   : > { %v3046_v17 = vsel %vm882_vm3, %v3027_v44, %v3029_v2  ;;  %v3308_v18 = vsel %vm1149_vm4, %v3285_v16, %v3287_v63  ;;  %v1114_v20 = vpop.f32.mrf.mxu0  ;;  %v1239_v21 = vpop.f32.mrf.mxu1 }
 0x183   : > { %4915 = vmatpush3.msra.mxu0 %v3046_v17  ;;  %3362 = vmatpush1.msra.mxu1 %v3308_v18  ;;  %v1122_v22 = vadd.f32 %v1114_v20, %v853_v5  ;;  %v5726_v23 = vadd.f32 %v1239_v21, %v1118_v7 }
 0x184   : > { %4917 = vmatmul.mubr.msk.f32.vlgmr.msra.gmra.mxu0 %vm425_vm1, %v4775_v48  ;;  %4919 = vmatprep.subr.mxu1 %v5027_v11  ;;  %v4862_v24 = vpop.f32.mrf.mxu0  ;;  %v1241_v25 = vpop.f32.mrf.mxu1 }
 0x185   : > { %v3303_v15 = vpop.permute.xlu0 %3302  ;;  %v3305_v26 = vpop.permute.xlu1 %3304  ;;  %4780 = vmatmul.mubr.msk.f32.vlgmr.msra.gmra.mxu1 %vm425_vm1, %v4779_v19  ;;  %3466 = vmatprep.mubr.f32.mxu0 %v5027_v11  ;;  %v5732_v27 = vadd.f32 %v1241_v25, %v1119_v56 }
 0x186   : > { %v3315_v28 = vsel %vm1149_vm4, %v3301_v13, %v3303_v15  ;;  %v3316_v6 = vsel %vm1149_vm4, %v3303_v15, %v3305_v26  ;;  %4923 = vmatprep.mubr.msk.f32.mxu1 %vm5033_vm2, %v5027_v11 }
 0x187   : > { %3430 = vmatprep.subr.mxu0 %v3316_v6 }
 0x188   : > { %3431 = vmatpush1.msra.mxu0 %v3315_v28 }
 0x189   : > { %v3307_v29 = vpop.permute.xlu0 %3306  ;;  %v3291_v3 = vpop.permute.xlu1 %3290 }
 0x18a   : > { %v3317_v30 = vsel %vm1149_vm4, %v3305_v26, %v3307_v29  ;;  %v3310_v34 = vsel %vm1149_vm4, %v3289_v0, %v3291_v3 }
 0x18b   : > { %4920 = vmatpush3.msra.mxu1 %v3317_v30 }
 0x18c   : > { %4921 = vmatprep.subr.mxu1 %v5027_v11 }
 0x18d   : > { %v3293_v31 = vpop.permute.xlu0 %3292  ;;  %v3295_v32 = vpop.permute.xlu1 %3294 }
 0x18e   : > { %v3312_v35 = vsel %vm1149_vm4, %v3293_v31, %v3295_v32  ;;  %v3311_v4 = vsel %vm1149_vm4, %v3291_v3, %v3293_v31  ;;  %v1310_v42 = vpop.f32.mrf.mxu0  ;;  %v1381_v33 = vpop.f32.mrf.mxu1 }
 0x18f   : > { %3432 = vmatprep.subr.mxu0 %v3311_v4  ;;  %4922 = vmatpush3.msra.mxu1 %v3312_v35  ;;  %v1387_v9 = vadd.f32 %v1310_v42, %v5706_v52  ;;  %v5744_v10 = vadd.f32 %v1381_v33, %v1122_v22  ;;  %v4787_v22 = vld [vmem:[%s5908_s2 + $0xd] sm:$0x1] }
 0x190   : > { %3433 = vmatpush1.msra.mxu0 %v3310_v34  ;;  %4924 = vmatmul.mubr.msk.f32.vlgmr.msra.gmra.mxu1 %vm425_vm1, %v4779_v19  ;;  %v1312_v8 = vpop.f32.mrf.mxu0  ;;  %v4869_v36 = vpop.f32.mrf.mxu1 }
 0x191   : > { %v3565_v37 = vpop.permute.xlu0 %3564  ;;  %v3567_v5 = vpop.permute.xlu1 %3566  ;;  %4781 = vmatmul.mubr.msk.f32.vlgmr.msra.gmra.mxu0 %vm425_vm1, %v4779_v19  ;;  %3732 = vmatprep.mubr.f32.mxu1 %v5027_v11  ;;  %v1388_v14 = vadd.f32 %v1312_v8, %v5711_v57 }
 0x192   : > { %v3580_v38 = vsel %vm1416_vm5, %v3565_v37, %v3567_v5  ;;  %3661 = vmatprep.mubr.f32.mxu0 %v5027_v11 }
 0x193   : > { %3625 = vmatprep.subr.mxu0 %v3580_v38 }
 0x195   : > { %v3569_v39 = vpop.permute.xlu0 %3568  ;;  %v3571_v40 = vpop.permute.xlu1 %3570 }
 0x196   : > { %v3581_v41 = vsel %vm1416_vm5, %v3567_v5, %v3569_v39  ;;  %v3582_v12 = vsel %vm1416_vm5, %v3569_v39, %v3571_v40 }
 0x197   : > { %3696 = vmatprep.subr.mxu1 %v3582_v12 }
 0x198   : > { %3697 = vmatpush1.msra.mxu1 %v3581_v41 }
 0x199   : > { %v3563_v43 = vpop.permute.xlu0 %3562  ;;  %v3553_v44 = vpop.permute.xlu1 %3552 }
 0x19a   : > { %v3579_v45 = vsel %vm1416_vm5, %v3563_v43, %v3565_v37 }
 0x19b   : > { %3626 = vmatpush1.msra.mxu0 %v3579_v45 }
 0x19d   : > { %v3555_v46 = vpop.permute.xlu0 %3554  ;;  %v3557_v47 = vpop.permute.xlu1 %3556 }
 0x19e   : > { %v3575_v48 = vsel %vm1416_vm5, %v3553_v44, %v3555_v46  ;;  %v3576_v55 = vsel %vm1416_vm5, %v3555_v46, %v3557_v47 }
 0x19f   : > { %3627 = vmatprep.subr.mxu0 %v3575_v48 }
 0x1a1   : > { %v3559_v49 = vpop.permute.xlu0 %3558  ;;  %v3551_v50 = vpop.permute.xlu1 %3550 }
 0x1a2   : > { %v3574_v7 = vsel %vm1416_vm5, %v3551_v50, %v3553_v44  ;;  %v3577_v52 = vsel %vm1416_vm5, %v3557_v47, %v3559_v49  ;;  %v1506_v53 = vpop.f32.mrf.mxu0  ;;  %v1577_v54 = vpop.f32.mrf.mxu1 }
 0x1a3   : > { %3628 = vmatpush1.msra.mxu0 %v3574_v7  ;;  %3698 = vmatprep.subr.mxu1 %v3577_v52  ;;  %v1652_v13 = vadd.f32 %v1506_v53, %v5726_v23  ;;  %v5763_v56 = vadd.f32 %v1577_v54, %v1387_v9 }
 0x1a4   : > { %4784 = vmatmul.mubr.msk.f32.vlgmr.msra.gmra.mxu0 %vm425_vm1, %v4783_v51  ;;  %3699 = vmatpush1.msra.mxu1 %v3576_v55  ;;  %v1508_v57 = vpop.f32.mrf.mxu0  ;;  %v1579_v58 = vpop.f32.mrf.mxu1  ;;  %v4791_v55 = vld [vmem:[%s5908_s2 + $0xe] sm:$0x1] }
 0x1a5   : > { %v3831_v59 = vpop.permute.xlu0 %3830  ;;  %v3833_v60 = vpop.permute.xlu1 %3832  ;;  %4785 = vmatmul.mubr.msk.f32.vlgmr.msra.gmra.mxu1 %vm425_vm1, %v4783_v51  ;;  %4926 = vmatprep.subr.mxu0 %v5027_v11  ;;  %v1653_v61 = vadd.f32 %v1508_v57, %v5732_v27  ;;  %v5769_v62 = vadd.f32 %v1579_v58, %v1388_v14 }
 0x1a6   : > { %v3847_v63 = vsel %vm3840_vm11, %v3831_v59, %v3833_v60  ;;  %4930 = vmatprep.mubr.msk.f32.mxu0 %vm5033_vm2, %v5027_v11  ;;  %3928 = vmatprep.mubr.f32.mxu1 %v5027_v11 }
 0x1a7   : > { %3892 = vmatprep.subr.mxu1 %v3847_v63 }
 0x1a9   : > { %v3573_v0 = vpop.permute.xlu0 %3572  ;;  %v3829_v1 = vpop.permute.xlu1 %3828 }
 0x1aa   : > { %v3583_v2 = vsel %vm1416_vm5, %v3571_v40, %v3573_v0  ;;  %v3846_v16 = vsel %vm3840_vm11, %v3829_v1, %v3831_v59 }
 0x1ab   : > { %4927 = vmatpush3.msra.mxu0 %v3583_v2  ;;  %3893 = vmatpush1.msra.mxu1 %v3846_v16 }
 0x1ac   : > { %4928 = vmatprep.subr.mxu0 %v5027_v11 }
 0x1ad   : > { %v3819_v17 = vpop.permute.xlu0 %3818  ;;  %v3821_v18 = vpop.permute.xlu1 %3820 }
 0x1ae   : > { %v3842_v19 = vsel %vm3840_vm11, %v3819_v17, %v3821_v18 }
 0x1af   : > { %3894 = vmatprep.subr.mxu1 %v3842_v19 }
 0x1b1   : > { %v3561_v20 = vpop.permute.xlu0 %3560  ;;  %v3817_v21 = vpop.permute.xlu1 %3816 }
 0x1b2   : > { %v3578_v23 = vsel %vm1416_vm5, %v3559_v49, %v3561_v20  ;;  %v3841_v24 = vsel %vm3840_vm11, %v3817_v21, %v3819_v17  ;;  %v1648_v25 = vpop.f32.mrf.mxu0  ;;  %v1773_v15 = vpop.f32.mrf.mxu1 }
 0x1b3   : > { %4929 = vmatpush3.msra.mxu0 %v3578_v23  ;;  %3895 = vmatpush1.msra.mxu1 %v3841_v24  ;;  %v1656_v26 = vadd.f32 %v1648_v25, %v5744_v10  ;;  %v5785_v27 = vadd.f32 %v1773_v15, %v1652_v13 }
 0x1b4   : > { %4931 = vmatmul.mubr.msk.f32.vlgmr.msra.gmra.mxu0 %vm425_vm1, %v4783_v51  ;;  %4788 = vmatmul.mubr.msk.f32.vlgmr.msra.gmra.mxu1 %vm425_vm1, %v4787_v22  ;;  %v4876_v28 = vpop.f32.mrf.mxu0  ;;  %v1775_v6 = vpop.f32.mrf.mxu1 }
 0x1b5   : > { %v3835_v29 = vpop.permute.xlu0 %3834  ;;  %v3837_v3 = vpop.permute.xlu1 %3836  ;;  %4933 = vmatprep.subr.mxu1 %v5027_v11  ;;  %4937 = vmatprep.mubr.msk.f32.mxu1 %vm5033_vm2, %v5027_v11  ;;  %v5792_v30 = vadd.f32 %v1775_v6, %v1653_v61 }
 0x1b6   : > { %v3848_v31 = vsel %vm3840_vm11, %v3833_v60, %v3835_v29  ;;  %v3849_v32 = vsel %vm3840_vm11, %v3835_v29, %v3837_v3  ;;  %3999 = vmatprep.mubr.f32.mxu0 %v5027_v11 }
 0x1b7   : > { %3963 = vmatprep.subr.mxu0 %v3849_v32 }
 0x1b8   : > { %3964 = vmatpush1.msra.mxu0 %v3848_v31 }
 0x1b9   : > { %v3839_v35 = vpop.permute.xlu0 %3838  ;;  %v3823_v4 = vpop.permute.xlu1 %3822 }
 0x1ba   : > { %v3850_v42 = vsel %vm3840_vm11, %v3837_v3, %v3839_v35  ;;  %v3843_v37 = vsel %vm3840_vm11, %v3821_v18, %v3823_v4 }
 0x1bb   : > { %4934 = vmatpush3.msra.mxu1 %v3850_v42 }
 0x1bc   : > { %4935 = vmatprep.subr.mxu1 %v5027_v11 }
 0x1bd   : > { %v3825_v33 = vpop.permute.xlu0 %3824  ;;  %v3827_v34 = vpop.permute.xlu1 %3826 }
 0x1be   : > { %v3845_v9 = vsel %vm3840_vm11, %v3825_v33, %v3827_v34  ;;  %v3844_v10 = vsel %vm3840_vm11, %v3823_v4, %v3825_v33  ;;  %v1844_v8 = vpop.f32.mrf.mxu0  ;;  %v1915_v36 = vpop.f32.mrf.mxu1 }
 0x1bf   : > { %3965 = vmatprep.subr.mxu0 %v3844_v10  ;;  %4936 = vmatpush3.msra.mxu1 %v3845_v9  ;;  %v1921_v5 = vadd.f32 %v1844_v8, %v5763_v56  ;;  %v1923_v14 = vadd.f32 %v1915_v36, %v1656_v26 }
 0x1c0   : > { %3966 = vmatpush1.msra.mxu0 %v3843_v37  ;;  %4938 = vmatmul.mubr.msk.f32.vlgmr.msra.gmra.mxu1 %vm425_vm1, %v4787_v22  ;;  %v1846_v38 = vpop.f32.mrf.mxu0  ;;  %v4883_v39 = vpop.f32.mrf.mxu1 }
 0x1c1   : > { %v4098_v40 = vpop.permute.xlu0 %4097  ;;  %4789 = vmatmul.mubr.msk.f32.vlgmr.msra.gmra.mxu0 %vm425_vm1, %v4787_v22  ;;  %v4100_v41 = vpop.permute.xlu1 %4099  ;;  %4266 = vmatprep.mubr.f32.mxu1 %v5027_v11  ;;  %v1922_v12 = vadd.f32 %v1846_v38, %v5769_v62 }
 0x1c2   : > { %v4114_v43 = vsel %vm4107_vm12, %v4098_v40, %v4100_v41  ;;  %4195 = vmatprep.mubr.f32.mxu0 %v5027_v11 }
 0x1c3   : > { %4159 = vmatprep.subr.mxu0 %v4114_v43 }
 0x1c5   : > { %v4102_v44 = vpop.permute.xlu0 %4101  ;;  %v4104_v45 = vpop.permute.xlu1 %4103 }
 0x1c6   : > { %v4115_v46 = vsel %vm4107_vm12, %v4100_v41, %v4102_v44  ;;  %v4116_v47 = vsel %vm4107_vm12, %v4102_v44, %v4104_v45 }
 0x1c7   : > { %4230 = vmatprep.subr.mxu1 %v4116_v47 }
 0x1c8   : > { %4231 = vmatpush1.msra.mxu1 %v4115_v46 }
 0x1c9   : > { %v4096_v48 = vpop.permute.xlu0 %4095  ;;  %v4086_v49 = vpop.permute.xlu1 %4085 }
 0x1ca   : > { %v4113_v50 = vsel %vm4107_vm12, %v4096_v48, %v4098_v40 }
 0x1cb   : > { %4160 = vmatpush1.msra.mxu0 %v4113_v50 }
 0x1cd   : > { %v4088_v51 = vpop.permute.xlu0 %4087  ;;  %v4090_v7 = vpop.permute.xlu1 %4089 }
 0x1ce   : > { %v4109_v52 = vsel %vm4107_vm12, %v4086_v49, %v4088_v51  ;;  %v4110_v59 = vsel %vm4107_vm12, %v4088_v51, %v4090_v7 }
 0x1cf   : > { %4161 = vmatprep.subr.mxu0 %v4109_v52 }
 0x1d1   : > { %v4092_v53 = vpop.permute.xlu0 %4091  ;;  %v4084_v54 = vpop.permute.xlu1 %4083 }
 0x1d2   : > { %v4108_v13 = vsel %vm4107_vm12, %v4084_v54, %v4086_v49  ;;  %v4111_v56 = vsel %vm4107_vm12, %v4090_v7, %v4092_v53  ;;  %v2040_v57 = vpop.f32.mrf.mxu0  ;;  %v2111_v58 = vpop.f32.mrf.mxu1 }
 0x1d3   : > { %4162 = vmatpush1.msra.mxu0 %v4108_v13  ;;  %4232 = vmatprep.subr.mxu1 %v4111_v56  ;;  %v2186_v60 = vadd.f32 %v2040_v57, %v5785_v27  ;;  %v2188_v61 = vadd.f32 %v2111_v58, %v1921_v5 }
 0x1d4   : > { %4792 = vmatmul.mubr.msk.f32.vlgmr.msra.gmra.mxu0 %vm425_vm1, %v4791_v55  ;;  %4233 = vmatpush1.msra.mxu1 %v4110_v59  ;;  %v2042_v62 = vpop.f32.mrf.mxu0  ;;  %v2113_v63 = vpop.f32.mrf.mxu1 }
 0x1d5   : > { %v4106_v0 = vpop.permute.xlu0 %4105  ;;  %v4094_v1 = vpop.permute.xlu1 %4093  ;;  %4793 = vmatmul.mubr.msk.f32.vlgmr.msra.gmra.mxu1 %vm425_vm1, %v4791_v55  ;;  %4940 = vmatprep.subr.mxu0 %v5027_v11  ;;  %v2187_v2 = vadd.f32 %v2042_v62, %v5792_v30  ;;  %v2189_v16 = vadd.f32 %v2113_v63, %v1922_v12 }
 0x1d6   : > { %v4117_v17 = vsel %vm4107_vm12, %v4104_v45, %v4106_v0  ;;  %4944 = vmatprep.mubr.msk.f32.mxu0 %vm5033_vm2, %v5027_v11  ;;  %v4112_v18 = vsel %vm4107_vm12, %v4092_v53, %v4094_v1 }
 0x1d7   : > { %4941 = vmatpush3.msra.mxu0 %v4117_v17 }
 0x1d8   : > { %4942 = vmatprep.subr.mxu0 %v5027_v11 }
 0x1d9   : > { %4943 = vmatpush3.msra.mxu0 %v4112_v18 }
 0x1da   : > { %4945 = vmatmul.mubr.msk.f32.vlgmr.msra.gmra.mxu0 %vm425_vm1, %v4791_v55 }
 0x1e5   : > { %v2182_v19 = vpop.f32.mrf.mxu0 }
 0x1e6   : > { %v2190_v20 = vadd.f32 %v2182_v19, %v1923_v14  ;;  %v2307_v21 = vpop.f32.mrf.mxu1 }
 0x1e7   : > { %v4890_v22 = vpop.f32.mrf.mxu0  ;;  %v2453_v23 = vadd.f32 %v2307_v21, %v2186_v60 }
 0x1e8   : > { %v2309_v24 = vpop.f32.mrf.mxu1 }
 0x1e9   : > { %v2454_v25 = vadd.f32 %v2309_v24, %v2187_v2 }
 0x1f1   : > { %v2449_v15 = vpop.f32.mrf.mxu1 }
 0x1f2   : > { %v2378_v26 = vpop.f32.mrf.mxu0  ;;  %v2457_v27 = vadd.f32 %v2449_v15, %v2190_v20  ;;  %v4354_v20 = vlaneseq  ;;  %v4383_v15 = vpop.permute.xlu1 %4382 }
 0x1f3   : > { %v2455_v28 = vadd.f32 %v2378_v26, %v2188_v61  ;;  %v4897_v6 = vpop.f32.mrf.mxu1  ;;  %v4352_v26 = vpop.permute.xlu0 %4351 }
 0x1f4   : > { %v2380_v29 = vpop.f32.mrf.mxu0  ;;  %v4355_v22 = vshrl.u32 %v4354_v20, 7  ;;  %vm4615_vm3 = vcmp.lt.s32.totalorder %v4354_v20, 640 }
 0x1f5   : > { %v2456_v3 = vadd.f32 %v2380_v29, %v2189_v16  ;;  %v5839_v29 = vld [vmem:[%s340_s14] sm:$0x1f] }
 0x206   : > { %v2574_v30 = vpop.f32.mrf.mxu0  ;;  %v2645_v31 = vpop.f32.mrf.mxu1 }
 0x207   : > { %v2720_v11 = vadd.f32 %v2574_v30, %v2453_v23  ;;  %v2722_v32 = vadd.f32 %v2645_v31, %v2455_v28  ;;  %v5041_v23 = vmov 1966171168   ;;  %v4370_v30 = vpop.permute.xlu1 %4369 }
 0x208   : > { %v2576_v35 = vpop.f32.mrf.mxu0  ;;  %v2647_v4 = vpop.f32.mrf.mxu1  ;;  %v4472_v24 = vunpack.c.l.s4 %v5041_v23 }
 0x209   : > { %v2721_v42 = vadd.f32 %v2576_v35, %v2454_v25  ;;  %v2723_v33 = vadd.f32 %v2647_v4, %v2456_v3  ;;  %v4356_v25 = vsub.s32 0, %v4355_v22 }
 0x20b   : > { %v5837_v6 = vrot.slane %v4383_v15, %v4356_v25 }
 0x215   : > { %v2716_v34 = vpop.f32.mrf.mxu0 }
 0x216   : > { %v2724_v9 = vadd.f32 %v2716_v34, %v2457_v27  ;;  %v2841_v10 = vpop.f32.mrf.mxu1  ;;  %v4473_v27 = vunpack.c.0.s8 %v4472_v24  ;;  %v4424_v34 = vpop.permute.xlu0 %4423 }
 0x217   : > { %v4904_v8 = vpop.f32.mrf.mxu0  ;;  %v2987_v36 = vadd.f32 %v2841_v10, %v2720_v11 }
 0x218   : > { %v2843_v37 = vpop.f32.mrf.mxu1  ;;  %v5841_v11 = vsub.s32 %v4473_v27, %v4355_v22  ;;  %v4357_v8 = vrot.slane %v4352_v26, %v4356_v25 }
 0x219   : > { %v2988_v5 = vadd.f32 %v2843_v37, %v2721_v42  ;;  %v4389_v42 = vmul.f32 %v5837_v6, %v5839_v29 }
 0x221   : > { %v2983_v14 = vpop.f32.mrf.mxu1 }
 0x222   : > { %v2912_v38 = vpop.f32.mrf.mxu0  ;;  %v2991_v39 = vadd.f32 %v2983_v14, %v2724_v9 }
 0x223   : > { %v2989_v40 = vadd.f32 %v2912_v38, %v2722_v32  ;;  %v4911_v41 = vpop.f32.mrf.mxu1  ;;  %v4401_v38 = vsub.s32 2, %v4355_v22 }
 0x224   : > { %v2914_v12 = vpop.f32.mrf.mxu0 }
 0x225   : > { %v2990_v43 = vadd.f32 %v2914_v12, %v2723_v33  ;;  %v4405_v33 = vsub.s32 3, %v4355_v22 }
 0x235   : > { %v3131_v44 = vpop.f32.mrf.mxu0  ;;  %v3202_v45 = vpop.f32.mrf.mxu1 }
 0x236   : > { %v3277_v46 = vadd.f32 %v3131_v44, %v2987_v36  ;;  %v3279_v47 = vadd.f32 %v3202_v45, %v2989_v40  ;;  %v4397_v36 = vsub.s32 1, %v4355_v22  ;;  %v5847_v44 = vrot.slane %v4424_v34, %v4356_v25 }
 0x237   : > { %v3133_v48 = vpop.f32.mrf.mxu0  ;;  %v3204_v49 = vpop.f32.mrf.mxu1 }
 0x238   : > { %v3278_v50 = vadd.f32 %v3133_v48, %v2988_v5  ;;  %v3280_v51 = vadd.f32 %v3204_v49, %v2990_v43  ;;  %v5845_v43 = vrot.slane %v4370_v30, %v4356_v25  ;;  %v4406_v48 = vrot.slane %v4389_v42, %v4405_v33 }
 0x239   : > { %v4394_v49 = vrot.slane %v4389_v42, %v4356_v25 }
 0x244   : > { %v3273_v7 = vpop.f32.mrf.mxu0 }
 0x245   : > { %v3281_v52 = vadd.f32 %v3273_v7, %v2991_v39  ;;  %v3397_v53 = vpop.f32.mrf.mxu1  ;;  %v4409_v39 = vsub.s32 4, %v4355_v22 }
 0x246   : > { %v4918_v54 = vpop.f32.mrf.mxu0  ;;  %v3543_v55 = vadd.f32 %v3397_v53, %v3277_v46 }
 0x247   : > { %v3399_v13 = vpop.f32.mrf.mxu1  ;;  %v4398_v54 = vrot.slane %v4389_v42, %v4397_v36 }
 0x248   : > { %v3544_v56 = vadd.f32 %v3399_v13, %v3278_v50  ;;  %v4438_v50 = vpop.permute.xlu1 %4437 }
 0x250   : > { %v3539_v57 = vpop.f32.mrf.mxu1 }
 0x251   : > { %v3547_v58 = vadd.f32 %v3539_v57, %v3281_v52  ;;  %v3468_v60 = vpop.f32.mrf.mxu0  ;;  %v4410_v57 = vrot.slane %v4389_v42, %v4409_v39 }
 0x252   : > { %v4925_v59 = vpop.f32.mrf.mxu1  ;;  %v3545_v3 = vadd.f32 %v3468_v60, %v3279_v47 }
 0x253   : > { %v3470_v61 = vpop.f32.mrf.mxu0 }
 0x254   : > { %v3546_v32 = vadd.f32 %v3470_v61, %v3280_v51 }
 0x264   : > { %v3663_v62 = vpop.f32.mrf.mxu0 }
 0x265   : > { %v3734_v0 = vpop.f32.mrf.mxu1  ;;  %v3809_v31 = vadd.f32 %v3663_v62, %v3543_v55  ;;  %v5850_v62 = vrot.slane %v4438_v50, %v4356_v25 }
 0x266   : > { %v3665_v63 = vpop.f32.mrf.mxu0  ;;  %v3811_v35 = vadd.f32 %v3734_v0, %v3545_v3 }
 0x267   : > { %v3736_v16 = vpop.f32.mrf.mxu1  ;;  %v3810_v9 = vadd.f32 %v3665_v63, %v3544_v56  ;;  %v4402_v56 = vrot.slane %v4389_v42, %v4401_v38 }
 0x268   : > { %v3812_v37 = vadd.f32 %v3736_v16, %v3546_v32 }
 0x274   : > { %v3805_v1 = vpop.f32.mrf.mxu0  ;;  %v3930_v17 = vpop.f32.mrf.mxu1 }
 0x275   : > { %v4076_v10 = vadd.f32 %v3930_v17, %v3809_v31  ;;  %v3813_v51 = vadd.f32 %v3805_v1, %v3547_v58 }
 0x276   : > { %v4932_v2 = vpop.f32.mrf.mxu0  ;;  %v3932_v18 = vpop.f32.mrf.mxu1 }
 0x277   : > { %v4077_v40 = vadd.f32 %v3932_v18, %v3810_v9 }
 0x280   : > { %v4072_v19 = vpop.f32.mrf.mxu1 }
 0x281   : > { %v4001_v28 = vpop.f32.mrf.mxu0  ;;  %v4080_v59 = vadd.f32 %v4072_v19, %v3813_v51 }
 0x282   : > { %v4939_v21 = vpop.f32.mrf.mxu1  ;;  %v4078_v5 = vadd.f32 %v4001_v28, %v3811_v35 }
 0x283   : > { %v4003_v4 = vpop.f32.mrf.mxu0 }
 0x284   : > { %v4079_v45 = vadd.f32 %v4003_v4, %v3812_v37 }
 0x294   : > { %v4197_v14 = vpop.f32.mrf.mxu0 }
 0x295   : > { %v4343_v41 = vadd.f32 %v4197_v14, %v4076_v10  ;;  %v4268_v12 = vpop.f32.mrf.mxu1 }
 0x296   : > { %v4345_v46 = vadd.f32 %v4268_v12, %v4078_v5  ;;  %v4199_v47 = vpop.f32.mrf.mxu0 }
 0x297   : > { %v4358_v7 = vadd.f32 %v4357_v8, %v4343_v41  ;;  %v4344_v52 = vadd.f32 %v4199_v47, %v4077_v40  ;;  %v4270_v53 = vpop.f32.mrf.mxu1 }
 0x298   : > { %v4360_v55 = vadd.f32 %v4357_v8, %v4345_v46  ;;  %v4346_v13 = vadd.f32 %v4270_v53, %v4079_v45 }
 0x299   : > { %v4359_v60 = vadd.f32 %v4357_v8, %v4344_v52  ;;  %v4376_v61 = vmul.f32 %v5845_v43, %v4358_v7  ;;  %v4511_v63 = vmul.f32 %v5837_v6, %v4358_v7 }
 0x29a   : > { %v4513_v0 = vmul.f32 %v5837_v6, %v4360_v55  ;;  %v4378_v58 = vmul.f32 %v5845_v43, %v4360_v55  ;;  %v4361_v1 = vadd.f32 %v4357_v8, %v4346_v13  ;;  %v4339_v2 = vpop.f32.mrf.mxu0 }
 0x29b   : > { %v4512_v16 = vmul.f32 %v5837_v6, %v4359_v60  ;;  %v4572_v17 = vcombine.low %v4358_v7, %v4359_v60  ;;  %v4377_v18 = vmul.f32 %v5845_v43, %v4359_v60  ;;  %v4416_v21 = vadd.f32 %v4394_v49, %v4376_v61 }
 0x29c   : > { %v4379_v19 = vmul.f32 %v5845_v43, %v4361_v1  ;;  %v4514_v22 = vmul.f32 %v5837_v6, %v4361_v1  ;;  %v4573_v23 = vcombine.low %v4360_v55, %v4361_v1  ;;  %v4418_v24 = vadd.f32 %v4402_v56, %v4378_v58  ;;  %v4946_v25 = vpop.f32.mrf.mxu0 }
 0x29d   : > { %v4521_v15 = vcombine.low %v4511_v63, %v4512_v16  ;;  %v4580_v26 = vrot.slane %v4572_v17, %v5841_v11  ;;  %v4417_v27 = vadd.f32 %v4398_v54, %v4377_v18  ;;  %v4430_v28 = vmul.f32 %v5847_v44, %v4416_v21 }
 0x29e   : > { %v4419_v3 = vadd.f32 %v4406_v48, %v4379_v19  ;;  %v4522_v30 = vcombine.low %v4513_v0, %v4514_v22  ;;  %v4587_v31 = vrot.slane %v4573_v23, %v5841_v11  ;;  %v4432_v32 = vmul.f32 %v5847_v44, %v4418_v24 }
 0x29f   : > { %v4529_v35 = vrot.slane %v4521_v15, %v5841_v11  ;;  %v4431_v4 = vmul.f32 %v5847_v44, %v4417_v27  ;;  %v4347_v42 = vadd.f32 %v4339_v2, %v4080_v59  ;;  %v4444_v33 = vadd.f32 %v5850_v62, %v4430_v28 }
 0x2a0   : > { %v4536_v34 = vrot.slane %v4522_v30, %v5841_v11  ;;  %v4595_v9 = vcombine.low %v4580_v26, %v4587_v31  ;;  %v4433_v10 = vmul.f32 %v5847_v44, %v4419_v3  ;;  %v4446_v36 = vadd.f32 %v5850_v62, %v4432_v32 }
 0x2a1   : > { %v4362_v37 = vadd.f32 %v4357_v8, %v4347_v42  ;;  %v4445_v5 = vadd.f32 %v5850_v62, %v4431_v4  ;;  %vm4449_vm13 = vcmp.gt.f32.partialorder %v4444_v33, 0.0  ;;  %v4454_v14 = vmul.f32 0.01, %v4444_v33 }
 0x2a2   : > { %v4544_v38 = vcombine.low %v4529_v35, %v4536_v34  ;;  %v4602_v39 = vrot.slane %v4595_v9, %v5841_v11  ;;  %v4447_v40 = vadd.f32 %v5850_v62, %v4433_v10  ;;  %vm4451_vm14 = vcmp.gt.f32.partialorder %v4446_v36, 0.0 }
 0x2a3   : > { %v4380_v41 = vmul.f32 %v5845_v43, %v4362_v37  ;;  %v4515_v12 = vmul.f32 %v5837_v6, %v4362_v37  ;;  %v4594_v45 = vrot.slane %v4362_v37, %v5841_v11  ;;  %vm4450_vm15 = vcmp.gt.f32.partialorder %v4445_v5, 0.0 }
 0x2a4   : > { %v4551_v46 = vrot.slane %v4544_v38, %v5841_v11  ;;  %vm4452_vm0 = vcmp.gt.f32.partialorder %v4447_v40, 0.0  ;;  %v4455_v8 = vmul.f32 0.01, %v4445_v5  ;;  %v4456_v47 = vmul.f32 0.01, %v4446_v36 }
 0x2a5   : > { %v4420_v48 = vadd.f32 %v4410_v57, %v4380_v41  ;;  %v4543_v49 = vrot.slane %v4515_v12, %v5841_v11  ;;  %v4609_v50 = vrot.slane %v4594_v45, %v5841_v11  ;;  %v4457_v51 = vmul.f32 0.01, %v4447_v40 }
 0x2a6   : > { %v4459_v7 = vsel %vm4449_vm13, %v4444_v33, %v4454_v14  ;;  %v4460_v52 = vsel %vm4450_vm15, %v4445_v5, %v4455_v8  ;;  %v4461_v53 = vsel %vm4451_vm14, %v4446_v36, %v4456_v47 }
 0x2a7   : > { %v4434_v6 = vmul.f32 %v5847_v44, %v4420_v48  ;;  %v4558_v54 = vrot.slane %v4543_v49, %v5841_v11  ;;  %v4610_v55 = vcombine.low %v4602_v39, %v4609_v50  ;;  %v4462_v13 = vsel %vm4452_vm0, %v4447_v40, %v4457_v51 }
 0x2a8   : > { %v4469_v56 = vcombine.low %v4459_v7, %v4460_v52  ;;  %v4470_v59 = vcombine.low %v4461_v53, %v4462_v13 }
 0x2a9   : > { %v4559_v60 = vcombine.low %v4551_v46, %v4558_v54  ;;  %v4448_v57 = vadd.f32 %v5850_v62, %v4434_v6 }
 0x2aa   : > { %v4477_v61 = vrot.slane %v4469_v56, %v5841_v11  ;;  %v4484_v63 = vrot.slane %v4470_v59, %v5841_v11 }
 0x2ab   : > { %vm4453_vm1 = vcmp.gt.f32.partialorder %v4448_v57, 0.0  ;;  %v4458_v0 = vmul.f32 0.01, %v4448_v57 }
 0x2ac   : > { %v4492_v58 = vcombine.low %v4477_v61, %v4484_v63 }
 0x2ad   : > { %v4463_v1 = vsel %vm4453_vm1, %v4448_v57, %v4458_v0 }
 0x2ae   : > { %v4491_v2 = vrot.slane %v4463_v1, %v5841_v11  ;;  %v4499_v16 = vrot.slane %v4492_v58, %v5841_v11 }
 0x2b0   : > { %v4506_v17 = vrot.slane %v4491_v2, %v5841_v11 }
 0x2b2   : > { %v4507_v18 = vcombine.low %v4499_v16, %v4506_v17 }
 0x2b4   : > { %v4509_v21 = vmul.f32 %v4507_v18, %v5839_v29 }
 0x2b6   : > { %v4510_v19 = vmul.f32 %v4509_v21, %v5845_v43 }
 0x2b8   : > { %v4561_v22 = vadd.f32 %v4559_v60, %v4510_v19 }
 0x2ba   : > { %v4562_v23 = vmul.f32 %v4561_v22, %v5847_v44 }
 0x2bc   : > { %v4563_v24 = vadd.f32 %v4562_v23, %v5850_v62 }
 0x2be   : > { %vm4564_vm2 = vcmp.gt.f32.partialorder %v4563_v24, 0.0  ;;  %v4565_v25 = vmul.f32 0.01, %v4563_v24 }
 0x2c0   : > { %v4566_v11 = vsel %vm4564_vm2, %v4563_v24, %v4565_v25 }
 0x2c1   : > { %v4612_v15 = vadd.f32 %v4610_v55, %v4566_v11 }
 0x2c3   : > { %4617 = vst.msk [vmem:[%s352_s19] sm:$0x1f] %vm4615_vm3, %v4612_v15 }
 0x2c4 PF: > { %s23_s9 = sadd.s32 1, %s5024_s9   ;;  %s5914_s30 = smov %s5020_s8 }
 0x2c5   : > { %p20_p5 = scmp.ge.s32.totalorder %s23_s9, 4   ;;  %s5915_s8 = smov %s5917_s3 }
 0x2c7   :  { %22 = sbr.rel (!%p20_p5) target bundleno = 4 (0x4), region = 98 }

</bundles_post_ra>
